<compile_context>
chip_gen: v7x
topology: tpu7x:2x2x1
jax: 0.10.0
libtpu: 0.0.40
codegen_flags: <defaults>
</compile_context>

<pallas_src>
import math
import functools

import jax
import jax.numpy as jnp
from jax.experimental import pallas as pl
from jax.experimental.pallas import tpu as pltpu

# ----------------------------- config ---------------------------------------
N_MEL = 16          # n_mel_channels
D_MODEL = 32        # encoder_hidden == decoder_hidden == style dim
N_HEADS = 2
D_FF = 64           # FFT conv filter size
ENC_LAYERS = 2
STYLE_DIM = 32
VP_FILTER = 32      # variance predictor filter
VP_KERNEL = 3
N_BINS = 16         # pitch / energy quantization bins
VOCAB = 20
N_LANG = 4
DIFF_STEPS = 4      # diffusion timesteps
RC = 32             # diffusion residual channels
DIFF_LAYERS = 2
B = 2
MAX_SRC = 8
MAX_MEL = 16

relu = jax.nn.relu


# ----------------------- in-kernel helper functions --------------------------
def _mish(x):
    return x * jnp.tanh(jax.nn.softplus(x))


def _swish(x):
    return x * jax.nn.sigmoid(x)


def _linear(x2d, w, b2d, act=None):
    """x2d: [M, K], w: [K, N], b2d: [1, N]."""
    y = jnp.dot(x2d, w, preferred_element_type=jnp.float32) + b2d
    return act(y) if act is not None else y


def _ln(x, gamma, beta, eps=1e-5):
    mu = jnp.mean(x, axis=-1, keepdims=True)
    var = jnp.mean(jnp.square(x - mu), axis=-1, keepdims=True)
    return (x - mu) * jax.lax.rsqrt(var + eps) * gamma + beta


def _saln(x3, style, aff_w, aff_b2d):
    """Style-Adaptive LayerNorm; gamma/beta computed in-kernel from style [B, D]."""
    bb, t, d = x3.shape
    gb = _linear(style, aff_w, aff_b2d)          # [B, 2D]
    gamma = gb[:, :d][:, None, :]                # [B, 1, D]
    beta = gb[:, d:][:, None, :]
    return _ln(x3, gamma, beta)


def _conv1d(x3, pad_ref, w, b2d, k, dil=1, act=None):
    """'same' Conv1d, channels-last.  Zero-padding + im2col are done on a VMEM
    scratch ref (pad_ref, shape [B, T + 2*pad, C]); the conv is K accumulated
    matmuls with the [k*Cin, Cout] weight sliced per tap (PyTorch tap order)."""
    bb, t, c = x3.shape
    pad = (k // 2) * dil
    pad_ref[...] = jnp.zeros(pad_ref.shape, jnp.float32)
    pad_ref[:, pad:pad + t, :] = x3
    cout = w.shape[1]
    acc = b2d                                    # (1, Cout), broadcast on first add
    for i in range(k):
        sl = pad_ref[:, i * dil:i * dil + t, :].reshape(bb * t, c)
        acc = acc + jnp.dot(sl, w[i * c:(i + 1) * c, :],
                            preferred_element_type=jnp.float32)
    y = acc.reshape(bb, t, cout)
    return act(y) if act is not None else y


def _self_attention(x3, valid, wqkv, bqkv2d, wo, bo2d, n_heads):
    """Fused-QKV multi-head self-attention.  valid: [B, T] (1 = real, 0 = pad).
    The output projection is accumulated per head (no lane concat)."""
    bb, t, d = x3.shape
    dk = d // n_heads
    scale = 1.0 / math.sqrt(dk)
    qkv = _linear(x3.reshape(bb * t, d), wqkv, bqkv2d).reshape(bb, t, 3 * d)
    bias = (valid[:, None, :] - 1.0) * 1e9       # 0 for valid keys, -1e9 for padded
    out = bo2d                                   # (1, D), broadcast on first add
    for h in range(n_heads):
        lo = h * dk
        qh = qkv[:, :, lo:lo + dk]
        kh = qkv[:, :, d + lo:d + lo + dk]
        vh = qkv[:, :, 2 * d + lo:2 * d + lo + dk]
        s = jnp.einsum('bqd,bkd->bqk', qh, kh,
                       preferred_element_type=jnp.float32) * scale + bias
        s = s - jnp.max(s, axis=-1, keepdims=True)
        p = jnp.exp(s)
        p = p / jnp.sum(p, axis=-1, keepdims=True)
        oh = jnp.einsum('bqk,bkd->bqd', p, vh, preferred_element_type=jnp.float32)
        out = out + jnp.dot(oh.reshape(bb * t, dk), wo[lo:lo + dk, :],
                            preferred_element_type=jnp.float32)
    return out.reshape(bb, t, d)


def _b2(b):
    return b.reshape(1, -1)


# ---------------------------- MelStyleEncoder --------------------------------
def mel_style_encoder(p, mels, mel_mask):
    bb, t, nm = mels.shape
    valid = (~mel_mask).astype(jnp.float32)                        # [B, T]
    weights = [p["spec1"]["w"], _b2(p["spec1"]["b"]),
               p["spec2"]["w"], _b2(p["spec2"]["b"])]
    for cp in p["temporal"]:
        weights += [cp["w"], _b2(cp["b"])]
    ap = p["attn"]
    weights += [ap["wqkv"]["w"], _b2(ap["wqkv"]["b"]),
                ap["wo"]["w"], _b2(ap["wo"]["b"]),
                p["fc"]["w"], _b2(p["fc"]["b"])]
    n_w = len(weights)
    n_temporal = len(p["temporal"])

    def kernel(*refs):
        mels_ref, valid_ref = refs[0], refs[1]
        w_refs = refs[2:2 + n_w]
        out_ref = refs[2 + n_w]
        pad_ref = refs[2 + n_w + 1]
        it = iter(w_refs)
        nxt = lambda: next(it)[...]

        v = valid_ref[...]
        x2 = _linear(mels_ref[...].reshape(bb * t, nm), nxt(), nxt(), _mish)
        x2 = _linear(x2, nxt(), nxt(), _mish)
        x3 = x2.reshape(bb, t, D_MODEL)
        for _ in range(n_temporal):                                # Conv1dGLU residual
            h = _conv1d(x3, pad_ref, nxt(), nxt(), 5)
            a = h[:, :, :D_MODEL]
            g = h[:, :, D_MODEL:]
            x3 = x3 + a * jax.nn.sigmoid(g)
        x3 = x3 * v[:, :, None]
        wqkv, bqkv, wo, bo = nxt(), nxt(), nxt(), nxt()
        x3 = x3 + _self_attention(x3, v, wqkv, bqkv, wo, bo, N_HEADS)
        x2 = _linear(x3.reshape(bb * t, D_MODEL), nxt(), nxt())
        x3 = x2.reshape(bb, t, STYLE_DIM)
        s = jnp.sum(x3 * v[:, :, None], axis=1)                    # [B, STYLE]
        cnt = jnp.maximum(jnp.sum(v, axis=1, keepdims=True), 1.0)  # NaN-safe
        out_ref[...] = s / cnt

    return pl.pallas_call(
        kernel,
        out_shape=jax.ShapeDtypeStruct((bb, STYLE_DIM), jnp.float32),
        scratch_shapes=[pltpu.VMEM((bb, t + 4, D_MODEL), jnp.float32)],
    )(mels, valid, *weights)


# ------------------------- Encoder_StyleSpeech --------------------------------
def encoder(p, x0, style, src_mask):
    bb, t, d = x0.shape
    valid = (~src_mask).astype(jnp.float32)
    weights = []
    for lp in p["layers"]:
        weights += [lp["attn"]["wqkv"]["w"], _b2(lp["attn"]["wqkv"]["b"]),
                    lp["attn"]["wo"]["w"], _b2(lp["attn"]["wo"]["b"]),
                    lp["saln1"]["affine"]["w"], _b2(lp["saln1"]["affine"]["b"]),
                    lp["ff1"]["w"], _b2(lp["ff1"]["b"]),
                    lp["ff2"]["w"], _b2(lp["ff2"]["b"]),
                    lp["saln2"]["affine"]["w"], _b2(lp["saln2"]["affine"]["b"])]
    n_w = len(weights)
    n_layers = len(p["layers"])

    def kernel(*refs):
        x_ref, style_ref, valid_ref = refs[0], refs[1], refs[2]
        w_refs = refs[3:3 + n_w]
        out_ref = refs[3 + n_w]
        pad1_ref = refs[3 + n_w + 1]
        pad2_ref = refs[3 + n_w + 2]
        it = iter(w_refs)
        nxt = lambda: next(it)[...]

        x3 = x_ref[...]
        style = style_ref[...]
        v = valid_ref[...]
        vmask = v[:, :, None]
        for _ in range(n_layers):
            wqkv, bqkv, wo, bo = nxt(), nxt(), nxt(), nxt()
            aw1, ab1 = nxt(), nxt()
            fw1, fb1 = nxt(), nxt()
            fw2, fb2 = nxt(), nxt()
            aw2, ab2 = nxt(), nxt()
            res = x3
            h = _self_attention(x3, v, wqkv, bqkv, wo, bo, N_HEADS)
            x3 = _saln(res + h, style, aw1, ab1) * vmask
            res = x3
            h = _conv1d(x3, pad1_ref, fw1, fb1, 3, act=relu)
            h = _conv1d(h, pad2_ref, fw2, fb2, 3)
            x3 = _saln(res + h, style, aw2, ab2) * vmask
        out_ref[...] = x3

    return pl.pallas_call(
        kernel,
        out_shape=jax.ShapeDtypeStruct((bb, t, d), jnp.float32),
        scratch_shapes=[pltpu.VMEM((bb, t + 2, D_MODEL), jnp.float32),
                        pltpu.VMEM((bb, t + 2, D_FF), jnp.float32)],
    )(x0, style, valid, *weights)


# ---------------------------- VarianceAdaptor --------------------------------
def variance_adaptor_kernel(p, x, src_mask, pitch_add, energy_add):
    """One fused kernel: duration / pitch / energy predictors + emb adds."""
    bb, t, d = x.shape
    valid_col = (~src_mask).astype(jnp.float32).reshape(bb * t, 1)

    def vp_weights(vp):
        return [vp["conv1"]["w"], _b2(vp["conv1"]["b"]),
                _b2(vp["ln1"]["g"]), _b2(vp["ln1"]["b"]),
                vp["conv2"]["w"], _b2(vp["conv2"]["b"]),
                _b2(vp["ln2"]["g"]), _b2(vp["ln2"]["b"]),
                vp["out"]["w"], _b2(vp["out"]["b"])]

    weights = (vp_weights(p["duration"]) + vp_weights(p["pitch"])
               + vp_weights(p["energy"]))
    n_w = len(weights)

    def kernel(*refs):
        x_ref, vcol_ref, padd_ref, eadd_ref = refs[0], refs[1], refs[2], refs[3]
        w_refs = refs[4:4 + n_w]
        xo_ref, d_ref, p_ref, e_ref = refs[4 + n_w:4 + n_w + 4]
        pad1_ref = refs[4 + n_w + 4]
        pad2_ref = refs[4 + n_w + 5]
        it = iter(w_refs)
        nxt = lambda: next(it)[...]

        x3 = x_ref[...]
        vcol = vcol_ref[...]

        def run_vp(x3_in):
            w1, b1, g1, be1 = nxt(), nxt(), nxt(), nxt()
            w2, b2, g2, be2 = nxt(), nxt(), nxt(), nxt()
            wo, bo = nxt(), nxt()
            h = _conv1d(x3_in, pad1_ref, w1, b1, VP_KERNEL, act=relu)
            h = _ln(h, g1[None], be1[None])
            h = _conv1d(h, pad2_ref, w2, b2, VP_KERNEL, act=relu)
            h = _ln(h, g2[None], be2[None])
            out = _linear(h.reshape(bb * t, VP_FILTER), wo, bo)     # [B*T, 1]
            return out * vcol

        d_ref[...] = run_vp(x3)                 # log-duration prediction
        p_ref[...] = run_vp(x3)                 # pitch prediction
        x3 = x3 + padd_ref[...]                 # pitch embedding (teacher forced)
        e_ref[...] = run_vp(x3)                 # energy prediction
        x3 = x3 + eadd_ref[...]                 # energy embedding
        xo_ref[...] = x3

    pad = VP_KERNEL // 2
    outs = pl.pallas_call(
        kernel,
        out_shape=(jax.ShapeDtypeStruct((bb, t, d), jnp.float32),
                   jax.ShapeDtypeStruct((bb * t, 1), jnp.float32),
                   jax.ShapeDtypeStruct((bb * t, 1), jnp.float32),
                   jax.ShapeDtypeStruct((bb * t, 1), jnp.float32)),
        scratch_shapes=[pltpu.VMEM((bb, t + 2 * pad, D_MODEL), jnp.float32),
                        pltpu.VMEM((bb, t + 2 * pad, VP_FILTER), jnp.float32)],
    )(x, valid_col, pitch_add, energy_add, *weights)
    x_out, d_pred, p_pred, e_pred = outs
    return (x_out, d_pred.reshape(bb, t), p_pred.reshape(bb, t),
            e_pred.reshape(bb, t))


def get_mask_from_lengths(lengths, max_len):
    ids = jnp.arange(max_len)
    return ids[None, :] >= lengths[:, None]          # True = padded


def length_regulator(x, durations, max_mel_len):
    # data-dependent expansion kept in JAX glue (gather via cumsum indexing)
    bb, ts, d = x.shape
    cum = jnp.cumsum(durations, axis=1)
    mel_len = cum[:, -1]
    frame = jnp.arange(max_mel_len)
    src_idx = jnp.sum(frame[None, :, None] >= cum[:, None, :], axis=-1)
    src_idx = jnp.clip(src_idx, 0, ts - 1)
    idx = jnp.broadcast_to(src_idx[..., None], (bb, max_mel_len, d))
    expanded = jnp.take_along_axis(x, idx, axis=1)
    valid = frame[None, :] < mel_len[:, None]
    expanded = jnp.where(valid[..., None], expanded, 0.0)
    return expanded, mel_len


def variance_adaptor(p, x, src_mask, max_mel_len, p_targets, e_targets, d_targets,
                     p_control=1.0, e_control=1.0, d_control=1.0):
    pitch_idx = jnp.searchsorted(p["pitch_bins"], p_targets)
    energy_idx = jnp.searchsorted(p["energy_bins"], e_targets)
    pitch_add = p["pitch_emb"][pitch_idx]
    energy_add = p["energy_emb"][energy_idx]
    x_out, log_d_pred, p_pred, e_pred = variance_adaptor_kernel(
        p, x, src_mask, pitch_add, energy_add)
    x_reg, mel_len = length_regulator(x_out, d_targets, max_mel_len)
    d_rounded = d_targets
    mel_mask = get_mask_from_lengths(mel_len, max_mel_len)
    return x_reg, p_pred, e_pred, log_d_pred, d_rounded, mel_len, mel_mask


# --------------------------- GaussianDiffusion -------------------------------
def diffusion_step_embedding(t, dim):
    half = dim // 2
    freqs = jnp.exp(jnp.arange(half) * -(math.log(10000.0) / (half - 1)))
    args = t.astype(jnp.float32)[:, None] * freqs[None, :]
    return jnp.concatenate([jnp.sin(args), jnp.cos(args)], axis=-1)


def denoiser(p, x_noisy, demb, cond):
    """DiffNet denoiser: all residual layers fused into one kernel."""
    bb, t, nm = x_noisy.shape
    weights = [p["in_proj"]["w"], _b2(p["in_proj"]["b"]),
               p["mlp1"]["w"], _b2(p["mlp1"]["b"]),
               p["mlp2"]["w"], _b2(p["mlp2"]["b"])]
    dils = []
    for li, lp in enumerate(p["layers"]):
        weights += [lp["step"]["w"], _b2(lp["step"]["b"]),
                    lp["dil_conv"]["w"], _b2(lp["dil_conv"]["b"]),
                    lp["cond"]["w"], _b2(lp["cond"]["b"]),
                    lp["out"]["w"], _b2(lp["out"]["b"])]
        dils.append(2 ** li)
    weights += [p["skip_proj"]["w"], _b2(p["skip_proj"]["b"]),
                p["out_proj"]["w"], _b2(p["out_proj"]["b"])]
    n_w = len(weights)
    n_layers = len(p["layers"])

    def kernel(*refs):
        x_ref, demb_ref, cond_ref = refs[0], refs[1], refs[2]
        w_refs = refs[3:3 + n_w]
        out_ref = refs[3 + n_w]
        pad_refs = refs[3 + n_w + 1:3 + n_w + 1 + n_layers]
        it = iter(w_refs)
        nxt = lambda: next(it)[...]

        x2 = x_ref[...].reshape(bb * t, nm)
        cond2 = cond_ref[...].reshape(bb * t, D_MODEL)
        de = demb_ref[...]
        h = _linear(x2, nxt(), nxt(), relu)                 # [B*T, RC]
        de = _linear(de, nxt(), nxt(), _swish)
        de = _linear(de, nxt(), nxt(), _swish)              # [B, RC]
        skip = jnp.zeros((bb * t, RC), jnp.float32)
        for li in range(n_layers):
            w_s, b_s = nxt(), nxt()
            w_d, b_d = nxt(), nxt()
            w_c, b_c = nxt(), nxt()
            w_o, b_o = nxt(), nxt()
            step = _linear(de, w_s, b_s)                    # [B, RC]
            y3 = h.reshape(bb, t, RC) + step[:, None, :]
            y3 = _conv1d(y3, pad_refs[li], w_d, b_d, 3, dil=dils[li])   # [B, T, 2RC]
            y3 = y3 + _linear(cond2, w_c, b_c).reshape(bb, t, 2 * RC)
            a = y3[:, :, :RC]
            g = y3[:, :, RC:]
            y2 = (jnp.tanh(a) * jax.nn.sigmoid(g)).reshape(bb * t, RC)
            y2 = _linear(y2, w_o, b_o)                      # [B*T, 2RC]
            h = (h + y2[:, :RC]) / math.sqrt(2.0)
            skip = skip + y2[:, RC:]
        skip = skip / math.sqrt(float(n_layers))
        skip = _linear(skip, nxt(), nxt(), relu)
        out_ref[...] = _linear(skip, nxt(), nxt())

    eps2 = pl.pallas_call(
        kernel,
        out_shape=jax.ShapeDtypeStruct((bb * t, nm), jnp.float32),
        scratch_shapes=[pltpu.VMEM((bb, t + 2 * dd, RC), jnp.float32) for dd in dils],
    )(x_noisy, demb, cond, *weights)
    return eps2.reshape(bb, t, nm)


def gaussian_diffusion(p, mels, cond, mel_mask, key):
    bb, tm, nm = mels.shape
    kt, kn = jax.random.split(key)
    t = jax.random.randint(kt, (bb,), 0, DIFF_STEPS)
    x0 = (mels - p["spec_min"]) / (p["spec_max"] - p["spec_min"]) * 2.0 - 1.0
    noise = jax.random.normal(kn, x0.shape, dtype=jnp.float32)
    acp = p["alphas_cumprod"][t]
    sa = jnp.sqrt(acp)[:, None, None]
    so = jnp.sqrt(1.0 - acp)[:, None, None]
    x_noisy = sa * x0 + so * noise
    demb = diffusion_step_embedding(t, RC)
    eps_pred = denoiser(p["denoiser"], x_noisy, demb, cond)
    valid = (~mel_mask)[..., None].astype(jnp.float32)
    loss = jnp.sum(jnp.abs(eps_pred - noise) * valid) / (jnp.sum(valid) * nm)
    x0_pred = jnp.clip((x_noisy - so * eps_pred) / sa, -1.0, 1.0)
    out = (x0_pred + 1.0) / 2.0 * (p["spec_max"] - p["spec_min"]) + p["spec_min"]
    return out, eps_pred, loss, t


# ------------------------------ full forward ---------------------------------
def fastspeech2_forward(params, languages, speakers, texts, src_lens, max_src_len,
                        mels, mel_lens, max_mel_len, p_targets, e_targets, d_targets,
                        key, p_control=1.0, e_control=1.0, d_control=1.0):
    del speakers  # speaker_emb is None in this configuration
    src_masks = get_mask_from_lengths(src_lens, max_src_len)
    mel_masks = get_mask_from_lengths(mel_lens, max_mel_len)
    style_vector = mel_style_encoder(params["mse"], mels, mel_masks)
    t = texts.shape[1]
    x0 = params["enc"]["src_emb"][texts] + params["enc"]["pos_enc"][None, :t, :]
    output = encoder(params["enc"], x0, style_vector, src_masks)
    output = output + params["language_emb"][languages][:, None, :]
    (output, p_pred, e_pred, log_d_pred, d_rounded, mel_lens2,
     mel_masks2) = variance_adaptor(params["va"], output, src_masks, max_mel_len,
                                    p_targets, e_targets, d_targets,
                                    p_control, e_control, d_control)
    out_diff, eps_pred, loss, t_step = gaussian_diffusion(
        params["diff"], mels, output, mel_masks2, key)
    return (output, out_diff, eps_pred, loss, t_step, p_pred, e_pred, log_d_pred,
            d_rounded, src_masks, mel_masks2, src_lens, mel_lens2)


# ------------------------------ parameter init --------------------------------
class KeyGen:
    def __init__(self, seed):
        self._key = jax.random.PRNGKey(seed)

    def __call__(self):
        self._key, sub = jax.random.split(self._key)
        return sub


def lin_init(kg, k_in, k_out, scale=0.1, bias=None):
    w = scale * jax.random.normal(kg(), (k_in, k_out), dtype=jnp.float32)
    b = jnp.zeros((k_out,), jnp.float32) if bias is None else bias
    return {"w": w, "b": b}


def sinusoid_table(n_pos, d):
    pos = jnp.arange(n_pos, dtype=jnp.float32)[:, None]
    i = jnp.arange(d, dtype=jnp.float32)[None, :]
    angle = pos / jnp.power(10000.0, 2.0 * jnp.floor(i / 2.0) / d)
    return jnp.where(jnp.arange(d)[None, :] % 2 == 0, jnp.sin(angle), jnp.cos(angle))


def init_params(seed=0):
    kg = KeyGen(seed)

    def attn_init():
        # Q/K/V fused into one [D, 3D] projection (same math as 3 separate linears).
        return {"wqkv": lin_init(kg, D_MODEL, 3 * D_MODEL),
                "wo": lin_init(kg, D_MODEL, D_MODEL)}

    saln_bias = jnp.concatenate(
        [jnp.ones((D_MODEL,), jnp.float32), jnp.zeros((D_MODEL,), jnp.float32)])

    mse = {
        "spec1": lin_init(kg, N_MEL, D_MODEL),
        "spec2": lin_init(kg, D_MODEL, D_MODEL),
        "temporal": [lin_init(kg, 5 * D_MODEL, 2 * D_MODEL) for _ in range(2)],
        "attn": attn_init(),
        "fc": lin_init(kg, D_MODEL, STYLE_DIM),
    }

    enc_layers = []
    for _ in range(ENC_LAYERS):
        enc_layers.append({
            "attn": attn_init(),
            "saln1": {"affine": lin_init(kg, STYLE_DIM, 2 * D_MODEL, bias=saln_bias)},
            "ff1": lin_init(kg, 3 * D_MODEL, D_FF),
            "ff2": lin_init(kg, 3 * D_FF, D_MODEL),
            "saln2": {"affine": lin_init(kg, STYLE_DIM, 2 * D_MODEL, bias=saln_bias)},
        })
    enc = {
        "src_emb": 0.1 * jax.random.normal(kg(), (VOCAB, D_MODEL), jnp.float32),
        "pos_enc": sinusoid_table(MAX_SRC, D_MODEL),
        "layers": enc_layers,
    }

    def vp_init(d_in):
        return {"conv1": lin_init(kg, VP_KERNEL * d_in, VP_FILTER),
                "ln1": {"g": jnp.ones((VP_FILTER,)), "b": jnp.zeros((VP_FILTER,))},
                "conv2": lin_init(kg, VP_KERNEL * VP_FILTER, VP_FILTER),
                "ln2": {"g": jnp.ones((VP_FILTER,)), "b": jnp.zeros((VP_FILTER,))},
                "out": lin_init(kg, VP_FILTER, 1)}

    va = {
        "duration": vp_init(D_MODEL),
        "pitch": vp_init(D_MODEL),
        "energy": vp_init(D_MODEL),
        "pitch_bins": jnp.linspace(-1.0, 1.0, N_BINS - 1),
        "pitch_emb": 0.1 * jax.random.normal(kg(), (N_BINS, D_MODEL), jnp.float32),
        "energy_bins": jnp.linspace(-1.0, 1.0, N_BINS - 1),
        "energy_emb": 0.1 * jax.random.normal(kg(), (N_BINS, D_MODEL), jnp.float32),
    }

    diff_layers = []
    for _ in range(DIFF_LAYERS):
        diff_layers.append({
            "step": lin_init(kg, RC, RC),
            "dil_conv": lin_init(kg, 3 * RC, 2 * RC),
            "cond": lin_init(kg, D_MODEL, 2 * RC),
            "out": lin_init(kg, RC, 2 * RC),
        })
    betas = jnp.linspace(1e-4, 0.06, DIFF_STEPS)
    diff = {
        "alphas_cumprod": jnp.cumprod(1.0 - betas),
        "spec_min": -4.0,
        "spec_max": 4.0,
        "denoiser": {
            "in_proj": lin_init(kg, N_MEL, RC),
            "mlp1": lin_init(kg, RC, 4 * RC),
            "mlp2": lin_init(kg, 4 * RC, RC),
            "layers": diff_layers,
            "skip_proj": lin_init(kg, RC, RC),
            "out_proj": lin_init(kg, RC, N_MEL),
        },
    }

    return {
        "mse": mse,
        "enc": enc,
        "va": va,
        "diff": diff,
        "language_emb": 0.1 * jax.random.normal(kg(), (N_LANG, D_MODEL), jnp.float32),
    }


# ----------------------------------- main -------------------------------------
if __name__ == "__main__":
    params = init_params(0)

    key = jax.random.PRNGKey(0)
    k1, k2, k3, k4 = jax.random.split(key, 4)

    languages = jnp.array([0, 2], jnp.int32)
    speakers = jnp.array([0, 1], jnp.int32)
    src_lens = jnp.array([8, 6], jnp.int32)
    texts = jax.random.randint(k1, (B, MAX_SRC), 1, VOCAB)
    texts = jnp.where(jnp.arange(MAX_SRC)[None, :] < src_lens[:, None], texts, 0)
    mels = jax.random.normal(k2, (B, MAX_MEL, N_MEL), jnp.float32)
    mel_lens = jnp.array([16, 12], jnp.int32)
    p_targets = jax.random.uniform(k3, (B, MAX_SRC), minval=-1.0, maxval=1.0)
    e_targets = jax.random.uniform(k4, (B, MAX_SRC), minval=-1.0, maxval=1.0)
    d_targets = jnp.array([[2, 2, 2, 2, 2, 2, 2, 2],
                           [2, 2, 2, 2, 2, 2, 0, 0]], jnp.int32)

    fwd = jax.jit(fastspeech2_forward, static_argnums=(5, 8))
    outs = fwd(params, languages, speakers, texts, src_lens, MAX_SRC,
               mels, mel_lens, MAX_MEL, p_targets, e_targets, d_targets,
               jax.random.PRNGKey(1))

    jax.block_until_ready(outs)
    print("KERNEL_OK")
</pallas_src>

<mosaic_0001>
module attributes {stable_mosaic.version = 11 : i64} {
  func.func @kernel(%arg0: memref<2x16x16xf32, #tpu.memory_space<vmem>>, %arg1: memref<2x16xf32, #tpu.memory_space<vmem>>, %arg2: memref<16x32xf32, #tpu.memory_space<vmem>>, %arg3: memref<1x32xf32, #tpu.memory_space<vmem>>, %arg4: memref<32x32xf32, #tpu.memory_space<vmem>>, %arg5: memref<1x32xf32, #tpu.memory_space<vmem>>, %arg6: memref<160x64xf32, #tpu.memory_space<vmem>>, %arg7: memref<1x64xf32, #tpu.memory_space<vmem>>, %arg8: memref<160x64xf32, #tpu.memory_space<vmem>>, %arg9: memref<1x64xf32, #tpu.memory_space<vmem>>, %arg10: memref<32x96xf32, #tpu.memory_space<vmem>>, %arg11: memref<1x96xf32, #tpu.memory_space<vmem>>, %arg12: memref<32x32xf32, #tpu.memory_space<vmem>>, %arg13: memref<1x32xf32, #tpu.memory_space<vmem>>, %arg14: memref<32x32xf32, #tpu.memory_space<vmem>>, %arg15: memref<1x32xf32, #tpu.memory_space<vmem>>, %arg16: memref<2x32xf32, #tpu.memory_space<vmem>>, %arg17: memref<2x20x32xf32, #tpu.memory_space<vmem>>) attributes {dimension_semantics = [], scalar_prefetch = 0 : i64, scratch_operands = 1 : i64, tpu.core_type = #tpu.core_type<tc>} {
    %c0 = arith.constant 0 : index
    %c0_0 = arith.constant 0 : index
    %0 = vector.load %arg1[%c0, %c0_0] : memref<2x16xf32, #tpu.memory_space<vmem>>, vector<2x16xf32>
    %c0_1 = arith.constant 0 : index
    %c0_2 = arith.constant 0 : index
    %c0_3 = arith.constant 0 : index
    %1 = vector.load %arg0[%c0_1, %c0_2, %c0_3] : memref<2x16x16xf32, #tpu.memory_space<vmem>>, vector<2x16x16xf32>
    %2 = vector.shape_cast %1 : vector<2x16x16xf32> to vector<32x16xf32>
    %c0_4 = arith.constant 0 : index
    %c0_5 = arith.constant 0 : index
    %3 = vector.load %arg2[%c0_4, %c0_5] : memref<16x32xf32, #tpu.memory_space<vmem>>, vector<16x32xf32>
    %c0_6 = arith.constant 0 : index
    %c0_7 = arith.constant 0 : index
    %4 = vector.load %arg3[%c0_6, %c0_7] : memref<1x32xf32, #tpu.memory_space<vmem>>, vector<1x32xf32>
    %cst = arith.constant dense<0.000000e+00> : vector<32x32xf32>
    %5 = tpu.matmul %2, %3, %cst {dimension_numbers = #tpu.dot_dimension_numbers<[1], [0], [0], [1], [0, 0, 1, 1], [], []>} : vector<32x16xf32>, vector<16x32xf32>, vector<32x32xf32> -> vector<32x32xf32>
    %6 = vector.broadcast %4 : vector<1x32xf32> to vector<32x32xf32>
    %7 = arith.addf %5, %6 : vector<32x32xf32>
    %cst_8 = arith.constant 0.000000e+00 : f32
    %8 = vector.broadcast %cst_8 : f32 to vector<32x32xf32>
    %9 = arith.maximumf %7, %8 : vector<32x32xf32>
    %10 = vector.broadcast %cst_8 : f32 to vector<32x32xf32>
    %11 = arith.subf %7, %10 : vector<32x32xf32>
    %12 = arith.cmpf one, %11, %11 : vector<32x32xf32>
    %13 = vector.broadcast %cst_8 : f32 to vector<32x32xf32>
    %14 = arith.addf %7, %13 : vector<32x32xf32>
    %15 = math.absf %11 : vector<32x32xf32>
    %cst_9 = arith.constant 0.000000e+00 : f32
    %16 = vector.broadcast %cst_9 : f32 to vector<32x32xf32>
    %17 = arith.subf %16, %15 : vector<32x32xf32>
    %18 = math.exp %17 : vector<32x32xf32>
    %19 = math.log1p %18 : vector<32x32xf32>
    %20 = arith.addf %9, %19 : vector<32x32xf32>
    %21 = arith.select %12, %14, %20 : vector<32x32xi1>, vector<32x32xf32>
    %22 = math.tanh %21 : vector<32x32xf32>
    %23 = arith.mulf %7, %22 : vector<32x32xf32>
    %c0_10 = arith.constant 0 : index
    %c0_11 = arith.constant 0 : index
    %24 = vector.load %arg4[%c0_10, %c0_11] : memref<32x32xf32, #tpu.memory_space<vmem>>, vector<32x32xf32>
    %c0_12 = arith.constant 0 : index
    %c0_13 = arith.constant 0 : index
    %25 = vector.load %arg5[%c0_12, %c0_13] : memref<1x32xf32, #tpu.memory_space<vmem>>, vector<1x32xf32>
    %cst_14 = arith.constant dense<0.000000e+00> : vector<32x32xf32>
    %26 = tpu.matmul %23, %24, %cst_14 {dimension_numbers = #tpu.dot_dimension_numbers<[1], [0], [0], [1], [0, 0, 1, 1], [], []>} : vector<32x32xf32>, vector<32x32xf32>, vector<32x32xf32> -> vector<32x32xf32>
    %27 = vector.broadcast %25 : vector<1x32xf32> to vector<32x32xf32>
    %28 = arith.addf %26, %27 : vector<32x32xf32>
    %cst_15 = arith.constant 0.000000e+00 : f32
    %29 = vector.broadcast %cst_15 : f32 to vector<32x32xf32>
    %30 = arith.maximumf %28, %29 : vector<32x32xf32>
    %31 = vector.broadcast %cst_15 : f32 to vector<32x32xf32>
    %32 = arith.subf %28, %31 : vector<32x32xf32>
    %33 = arith.cmpf one, %32, %32 : vector<32x32xf32>
    %34 = vector.broadcast %cst_15 : f32 to vector<32x32xf32>
    %35 = arith.addf %28, %34 : vector<32x32xf32>
    %36 = math.absf %32 : vector<32x32xf32>
    %cst_16 = arith.constant 0.000000e+00 : f32
    %37 = vector.broadcast %cst_16 : f32 to vector<32x32xf32>
    %38 = arith.subf %37, %36 : vector<32x32xf32>
    %39 = math.exp %38 : vector<32x32xf32>
    %40 = math.log1p %39 : vector<32x32xf32>
    %41 = arith.addf %30, %40 : vector<32x32xf32>
    %42 = arith.select %33, %35, %41 : vector<32x32xi1>, vector<32x32xf32>
    %43 = math.tanh %42 : vector<32x32xf32>
    %44 = arith.mulf %28, %43 : vector<32x32xf32>
    %45 = vector.shape_cast %44 : vector<32x32xf32> to vector<2x16x32xf32>
    %c0_17 = arith.constant 0 : index
    %c0_18 = arith.constant 0 : index
    %46 = vector.load %arg6[%c0_17, %c0_18] : memref<160x64xf32, #tpu.memory_space<vmem>>, vector<160x64xf32>
    %c0_19 = arith.constant 0 : index
    %c0_20 = arith.constant 0 : index
    %47 = vector.load %arg7[%c0_19, %c0_20] : memref<1x64xf32, #tpu.memory_space<vmem>>, vector<1x64xf32>
    %cst_21 = arith.constant 0.000000e+00 : f32
    %48 = vector.broadcast %cst_21 : f32 to vector<2x20x32xf32>
    %c0_22 = arith.constant 0 : index
    %c0_23 = arith.constant 0 : index
    %c0_24 = arith.constant 0 : index
    %49 = vector.load %arg17[%c0_22, %c0_23, %c0_24] : memref<2x20x32xf32, #tpu.memory_space<vmem>>, vector<2x20x32xf32>
    tpu.vector_store %arg17[%c0_22, %c0_23, %c0_24], %48 {strides = array<i32>} : memref<2x20x32xf32, #tpu.memory_space<vmem>>, vector<2x20x32xf32>,
    %c0_25 = arith.constant 0 : index
    %c2 = arith.constant 2 : index
    %c0_26 = arith.constant 0 : index
    %50 = vector.load %arg17[%c0_25, %c2, %c0_26] : memref<2x20x32xf32, #tpu.memory_space<vmem>>, vector<2x16x32xf32>
    tpu.vector_store %arg17[%c0_25, %c2, %c0_26], %45 {strides = array<i32>} : memref<2x20x32xf32, #tpu.memory_space<vmem>>, vector<2x16x32xf32>,
    %c0_27 = arith.constant 0 : index
    %c0_28 = arith.constant 0 : index
    %c0_29 = arith.constant 0 : index
    %51 = vector.load %arg17[%c0_27, %c0_28, %c0_29] : memref<2x20x32xf32, #tpu.memory_space<vmem>>, vector<2x16x32xf32>
    %52 = vector.shape_cast %51 : vector<2x16x32xf32> to vector<32x32xf32>
    %53 = vector.extract_strided_slice %46 {offsets = [0, 0], sizes = [32, 64], strides = [1, 1]} : vector<160x64xf32> to vector<32x64xf32>
    %cst_30 = arith.constant dense<0.000000e+00> : vector<32x64xf32>
    %54 = tpu.matmul %52, %53, %cst_30 {dimension_numbers = #tpu.dot_dimension_numbers<[1], [0], [0], [1], [0, 0, 1, 1], [], []>} : vector<32x32xf32>, vector<32x64xf32>, vector<32x64xf32> -> vector<32x64xf32>
    %55 = vector.broadcast %47 : vector<1x64xf32> to vector<32x64xf32>
    %56 = arith.addf %55, %54 : vector<32x64xf32>
    %c0_31 = arith.constant 0 : index
    %c1 = arith.constant 1 : index
    %c0_32 = arith.constant 0 : index
    %57 = vector.load %arg17[%c0_31, %c1, %c0_32] : memref<2x20x32xf32, #tpu.memory_space<vmem>>, vector<2x16x32xf32>
    %58 = vector.shape_cast %57 : vector<2x16x32xf32> to vector<32x32xf32>
    %59 = vector.extract_strided_slice %46 {offsets = [32, 0], sizes = [32, 64], strides = [1, 1]} : vector<160x64xf32> to vector<32x64xf32>
    %cst_33 = arith.constant dense<0.000000e+00> : vector<32x64xf32>
    %60 = tpu.matmul %58, %59, %cst_33 {dimension_numbers = #tpu.dot_dimension_numbers<[1], [0], [0], [1], [0, 0, 1, 1], [], []>} : vector<32x32xf32>, vector<32x64xf32>, vector<32x64xf32> -> vector<32x64xf32>
    %61 = arith.addf %56, %60 : vector<32x64xf32>
    %c0_34 = arith.constant 0 : index
    %c2_35 = arith.constant 2 : index
    %c0_36 = arith.constant 0 : index
    %62 = vector.load %arg17[%c0_34, %c2_35, %c0_36] : memref<2x20x32xf32, #tpu.memory_space<vmem>>, vector<2x16x32xf32>
    %63 = vector.shape_cast %62 : vector<2x16x32xf32> to vector<32x32xf32>
    %64 = vector.extract_strided_slice %46 {offsets = [64, 0], sizes = [32, 64], strides = [1, 1]} : vector<160x64xf32> to vector<32x64xf32>
    %cst_37 = arith.constant dense<0.000000e+00> : vector<32x64xf32>
    %65 = tpu.matmul %63, %64, %cst_37 {dimension_numbers = #tpu.dot_dimension_numbers<[1], [0], [0], [1], [0, 0, 1, 1], [], []>} : vector<32x32xf32>, vector<32x64xf32>, vector<32x64xf32> -> vector<32x64xf32>
    %66 = arith.addf %61, %65 : vector<32x64xf32>
    %c0_38 = arith.constant 0 : index
    %c3 = arith.constant 3 : index
    %c0_39 = arith.constant 0 : index
    %67 = vector.load %arg17[%c0_38, %c3, %c0_39] : memref<2x20x32xf32, #tpu.memory_space<vmem>>, vector<2x16x32xf32>
    %68 = vector.shape_cast %67 : vector<2x16x32xf32> to vector<32x32xf32>
    %69 = vector.extract_strided_slice %46 {offsets = [96, 0], sizes = [32, 64], strides = [1, 1]} : vector<160x64xf32> to vector<32x64xf32>
    %cst_40 = arith.constant dense<0.000000e+00> : vector<32x64xf32>
    %70 = tpu.matmul %68, %69, %cst_40 {dimension_numbers = #tpu.dot_dimension_numbers<[1], [0], [0], [1], [0, 0, 1, 1], [], []>} : vector<32x32xf32>, vector<32x64xf32>, vector<32x64xf32> -> vector<32x64xf32>
    %71 = arith.addf %66, %70 : vector<32x64xf32>
    %c0_41 = arith.constant 0 : index
    %c4 = arith.constant 4 : index
    %c0_42 = arith.constant 0 : index
    %72 = vector.load %arg17[%c0_41, %c4, %c0_42] : memref<2x20x32xf32, #tpu.memory_space<vmem>>, vector<2x16x32xf32>
    %73 = vector.shape_cast %72 : vector<2x16x32xf32> to vector<32x32xf32>
    %74 = vector.extract_strided_slice %46 {offsets = [128, 0], sizes = [32, 64], strides = [1, 1]} : vector<160x64xf32> to vector<32x64xf32>
    %cst_43 = arith.constant dense<0.000000e+00> : vector<32x64xf32>
    %75 = tpu.matmul %73, %74, %cst_43 {dimension_numbers = #tpu.dot_dimension_numbers<[1], [0], [0], [1], [0, 0, 1, 1], [], []>} : vector<32x32xf32>, vector<32x64xf32>, vector<32x64xf32> -> vector<32x64xf32>
    %76 = arith.addf %71, %75 : vector<32x64xf32>
    %77 = vector.shape_cast %76 : vector<32x64xf32> to vector<2x16x64xf32>
    %78 = vector.extract_strided_slice %77 {offsets = [0, 0, 0], sizes = [2, 16, 32], strides = [1, 1, 1]} : vector<2x16x64xf32> to vector<2x16x32xf32>
    %79 = vector.extract_strided_slice %77 {offsets = [0, 0, 32], sizes = [2, 16, 32], strides = [1, 1, 1]} : vector<2x16x64xf32> to vector<2x16x32xf32>
    %80 = arith.negf %79 : vector<2x16x32xf32>
    %81 = math.exp %80 : vector<2x16x32xf32>
    %cst_44 = arith.constant 1.000000e+00 : f32
    %82 = vector.broadcast %cst_44 : f32 to vector<2x16x32xf32>
    %83 = arith.addf %82, %81 : vector<2x16x32xf32>
    %84 = arith.divf %82, %83 : vector<2x16x32xf32>
    %85 = arith.mulf %78, %84 : vector<2x16x32xf32>
    %86 = arith.addf %45, %85 : vector<2x16x32xf32>
    %c0_45 = arith.constant 0 : index
    %c0_46 = arith.constant 0 : index
    %87 = vector.load %arg8[%c0_45, %c0_46] : memref<160x64xf32, #tpu.memory_space<vmem>>, vector<160x64xf32>
    %c0_47 = arith.constant 0 : index
    %c0_48 = arith.constant 0 : index
    %88 = vector.load %arg9[%c0_47, %c0_48] : memref<1x64xf32, #tpu.memory_space<vmem>>, vector<1x64xf32>
    %cst_49 = arith.constant 0.000000e+00 : f32
    %89 = vector.broadcast %cst_49 : f32 to vector<2x20x32xf32>
    %c0_50 = arith.constant 0 : index
    %c0_51 = arith.constant 0 : index
    %c0_52 = arith.constant 0 : index
    %90 = vector.load %arg17[%c0_50, %c0_51, %c0_52] : memref<2x20x32xf32, #tpu.memory_space<vmem>>, vector<2x20x32xf32>
    tpu.vector_store %arg17[%c0_50, %c0_51, %c0_52], %89 {strides = array<i32>} : memref<2x20x32xf32, #tpu.memory_space<vmem>>, vector<2x20x32xf32>,
    %c0_53 = arith.constant 0 : index
    %c2_54 = arith.constant 2 : index
    %c0_55 = arith.constant 0 : index
    %91 = vector.load %arg17[%c0_53, %c2_54, %c0_55] : memref<2x20x32xf32, #tpu.memory_space<vmem>>, vector<2x16x32xf32>
    tpu.vector_store %arg17[%c0_53, %c2_54, %c0_55], %86 {strides = array<i32>} : memref<2x20x32xf32, #tpu.memory_space<vmem>>, vector<2x16x32xf32>,
    %c0_56 = arith.constant 0 : index
    %c0_57 = arith.constant 0 : index
    %c0_58 = arith.constant 0 : index
    %92 = vector.load %arg17[%c0_56, %c0_57, %c0_58] : memref<2x20x32xf32, #tpu.memory_space<vmem>>, vector<2x16x32xf32>
    %93 = vector.shape_cast %92 : vector<2x16x32xf32> to vector<32x32xf32>
    %94 = vector.extract_strided_slice %87 {offsets = [0, 0], sizes = [32, 64], strides = [1, 1]} : vector<160x64xf32> to vector<32x64xf32>
    %cst_59 = arith.constant dense<0.000000e+00> : vector<32x64xf32>
    %95 = tpu.matmul %93, %94, %cst_59 {dimension_numbers = #tpu.dot_dimension_numbers<[1], [0], [0], [1], [0, 0, 1, 1], [], []>} : vector<32x32xf32>, vector<32x64xf32>, vector<32x64xf32> -> vector<32x64xf32>
    %96 = vector.broadcast %88 : vector<1x64xf32> to vector<32x64xf32>
    %97 = arith.addf %96, %95 : vector<32x64xf32>
    %c0_60 = arith.constant 0 : index
    %c1_61 = arith.constant 1 : index
    %c0_62 = arith.constant 0 : index
    %98 = vector.load %arg17[%c0_60, %c1_61, %c0_62] : memref<2x20x32xf32, #tpu.memory_space<vmem>>, vector<2x16x32xf32>
    %99 = vector.shape_cast %98 : vector<2x16x32xf32> to vector<32x32xf32>
    %100 = vector.extract_strided_slice %87 {offsets = [32, 0], sizes = [32, 64], strides = [1, 1]} : vector<160x64xf32> to vector<32x64xf32>
    %cst_63 = arith.constant dense<0.000000e+00> : vector<32x64xf32>
    %101 = tpu.matmul %99, %100, %cst_63 {dimension_numbers = #tpu.dot_dimension_numbers<[1], [0], [0], [1], [0, 0, 1, 1], [], []>} : vector<32x32xf32>, vector<32x64xf32>, vector<32x64xf32> -> vector<32x64xf32>
    %102 = arith.addf %97, %101 : vector<32x64xf32>
    %c0_64 = arith.constant 0 : index
    %c2_65 = arith.constant 2 : index
    %c0_66 = arith.constant 0 : index
    %103 = vector.load %arg17[%c0_64, %c2_65, %c0_66] : memref<2x20x32xf32, #tpu.memory_space<vmem>>, vector<2x16x32xf32>
    %104 = vector.shape_cast %103 : vector<2x16x32xf32> to vector<32x32xf32>
    %105 = vector.extract_strided_slice %87 {offsets = [64, 0], sizes = [32, 64], strides = [1, 1]} : vector<160x64xf32> to vector<32x64xf32>
    %cst_67 = arith.constant dense<0.000000e+00> : vector<32x64xf32>
    %106 = tpu.matmul %104, %105, %cst_67 {dimension_numbers = #tpu.dot_dimension_numbers<[1], [0], [0], [1], [0, 0, 1, 1], [], []>} : vector<32x32xf32>, vector<32x64xf32>, vector<32x64xf32> -> vector<32x64xf32>
    %107 = arith.addf %102, %106 : vector<32x64xf32>
    %c0_68 = arith.constant 0 : index
    %c3_69 = arith.constant 3 : index
    %c0_70 = arith.constant 0 : index
    %108 = vector.load %arg17[%c0_68, %c3_69, %c0_70] : memref<2x20x32xf32, #tpu.memory_space<vmem>>, vector<2x16x32xf32>
    %109 = vector.shape_cast %108 : vector<2x16x32xf32> to vector<32x32xf32>
    %110 = vector.extract_strided_slice %87 {offsets = [96, 0], sizes = [32, 64], strides = [1, 1]} : vector<160x64xf32> to vector<32x64xf32>
    %cst_71 = arith.constant dense<0.000000e+00> : vector<32x64xf32>
    %111 = tpu.matmul %109, %110, %cst_71 {dimension_numbers = #tpu.dot_dimension_numbers<[1], [0], [0], [1], [0, 0, 1, 1], [], []>} : vector<32x32xf32>, vector<32x64xf32>, vector<32x64xf32> -> vector<32x64xf32>
    %112 = arith.addf %107, %111 : vector<32x64xf32>
    %c0_72 = arith.constant 0 : index
    %c4_73 = arith.constant 4 : index
    %c0_74 = arith.constant 0 : index
    %113 = vector.load %arg17[%c0_72, %c4_73, %c0_74] : memref<2x20x32xf32, #tpu.memory_space<vmem>>, vector<2x16x32xf32>
    %114 = vector.shape_cast %113 : vector<2x16x32xf32> to vector<32x32xf32>
    %115 = vector.extract_strided_slice %87 {offsets = [128, 0], sizes = [32, 64], strides = [1, 1]} : vector<160x64xf32> to vector<32x64xf32>
    %cst_75 = arith.constant dense<0.000000e+00> : vector<32x64xf32>
    %116 = tpu.matmul %114, %115, %cst_75 {dimension_numbers = #tpu.dot_dimension_numbers<[1], [0], [0], [1], [0, 0, 1, 1], [], []>} : vector<32x32xf32>, vector<32x64xf32>, vector<32x64xf32> -> vector<32x64xf32>
    %117 = arith.addf %112, %116 : vector<32x64xf32>
    %118 = vector.shape_cast %117 : vector<32x64xf32> to vector<2x16x64xf32>
    %119 = vector.extract_strided_slice %118 {offsets = [0, 0, 0], sizes = [2, 16, 32], strides = [1, 1, 1]} : vector<2x16x64xf32> to vector<2x16x32xf32>
    %120 = vector.extract_strided_slice %118 {offsets = [0, 0, 32], sizes = [2, 16, 32], strides = [1, 1, 1]} : vector<2x16x64xf32> to vector<2x16x32xf32>
    %121 = arith.negf %120 : vector<2x16x32xf32>
    %122 = math.exp %121 : vector<2x16x32xf32>
    %cst_76 = arith.constant 1.000000e+00 : f32
    %123 = vector.broadcast %cst_76 : f32 to vector<2x16x32xf32>
    %124 = arith.addf %123, %122 : vector<2x16x32xf32>
    %125 = arith.divf %123, %124 : vector<2x16x32xf32>
    %126 = arith.mulf %119, %125 : vector<2x16x32xf32>
    %127 = arith.addf %86, %126 : vector<2x16x32xf32>
    %128 = vector.shape_cast %0 : vector<2x16xf32> to vector<2x16x1xf32>
    %129 = vector.broadcast %128 : vector<2x16x1xf32> to vector<2x16x32xf32>
    %130 = arith.mulf %127, %129 : vector<2x16x32xf32>
    %c0_77 = arith.constant 0 : index
    %c0_78 = arith.constant 0 : index
    %131 = vector.load %arg10[%c0_77, %c0_78] : memref<32x96xf32, #tpu.memory_space<vmem>>, vector<32x96xf32>
    %c0_79 = arith.constant 0 : index
    %c0_80 = arith.constant 0 : index
    %132 = vector.load %arg11[%c0_79, %c0_80] : memref<1x96xf32, #tpu.memory_space<vmem>>, vector<1x96xf32>
    %c0_81 = arith.constant 0 : index
    %c0_82 = arith.constant 0 : index
    %133 = vector.load %arg12[%c0_81, %c0_82] : memref<32x32xf32, #tpu.memory_space<vmem>>, vector<32x32xf32>
    %c0_83 = arith.constant 0 : index
    %c0_84 = arith.constant 0 : index
    %134 = vector.load %arg13[%c0_83, %c0_84] : memref<1x32xf32, #tpu.memory_space<vmem>>, vector<1x32xf32>
    %135 = vector.shape_cast %130 : vector<2x16x32xf32> to vector<32x32xf32>
    %cst_85 = arith.constant dense<0.000000e+00> : vector<32x96xf32>
    %136 = tpu.matmul %135, %131, %cst_85 {dimension_numbers = #tpu.dot_dimension_numbers<[1], [0], [0], [1], [0, 0, 1, 1], [], []>} : vector<32x32xf32>, vector<32x96xf32>, vector<32x96xf32> -> vector<32x96xf32>
    %137 = vector.broadcast %132 : vector<1x96xf32> to vector<32x96xf32>
    %138 = arith.addf %136, %137 : vector<32x96xf32>
    %139 = vector.shape_cast %138 : vector<32x96xf32> to vector<2x16x96xf32>
    %140 = vector.shape_cast %0 : vector<2x16xf32> to vector<2x1x16xf32>
    %cst_86 = arith.constant 1.000000e+00 : f32
    %141 = vector.broadcast %cst_86 : f32 to vector<2x1x16xf32>
    %142 = arith.subf %140, %141 : vector<2x1x16xf32>
    %cst_87 = arith.constant 1.000000e+09 : f32
    %143 = vector.broadcast %cst_87 : f32 to vector<2x1x16xf32>
    %144 = arith.mulf %142, %143 : vector<2x1x16xf32>
    %145 = vector.extract_strided_slice %139 {offsets = [0, 0, 0], sizes = [2, 16, 16], strides = [1, 1, 1]} : vector<2x16x96xf32> to vector<2x16x16xf32>
    %146 = vector.extract_strided_slice %139 {offsets = [0, 0, 32], sizes = [2, 16, 16], strides = [1, 1, 1]} : vector<2x16x96xf32> to vector<2x16x16xf32>
    %147 = vector.extract_strided_slice %139 {offsets = [0, 0, 64], sizes = [2, 16, 16], strides = [1, 1, 1]} : vector<2x16x96xf32> to vector<2x16x16xf32>
    "tpu.trace_start"() <{level = 10 : i32, message = "bqd,bkd->bqk"}> : () -> ()
    %cst_88 = arith.constant dense<0.000000e+00> : vector<2x16x16xf32>
    %148 = tpu.matmul %145, %146, %cst_88 {dimension_numbers = #tpu.dot_dimension_numbers<[2], [2], [1], [1], [0, 0, 0, 1, 1, 1], [0], [0]>} : vector<2x16x16xf32>, vector<2x16x16xf32>, vector<2x16x16xf32> -> vector<2x16x16xf32>
    "tpu.trace_stop"() : () -> ()
    %cst_89 = arith.constant 2.500000e-01 : f32
    %149 = vector.broadcast %cst_89 : f32 to vector<2x16x16xf32>
    %150 = arith.mulf %148, %149 : vector<2x16x16xf32>
    %151 = vector.broadcast %144 : vector<2x1x16xf32> to vector<2x16x16xf32>
    %152 = arith.addf %150, %151 : vector<2x16x16xf32>
    %cst_90 = arith.constant dense<0xFF800000> : vector<2x16xf32>
    %153 = vector.multi_reduction <maximumf>, %152, %cst_90 [2] : vector<2x16x16xf32> to vector<2x16xf32>
    %154 = vector.shape_cast %153 : vector<2x16xf32> to vector<2x16x1xf32>
    %155 = vector.broadcast %154 : vector<2x16x1xf32> to vector<2x16x16xf32>
    %156 = arith.subf %152, %155 : vector<2x16x16xf32>
    %157 = math.exp %156 : vector<2x16x16xf32>
    %cst_91 = arith.constant dense<0.000000e+00> : vector<2x16xf32>
    %158 = vector.multi_reduction <add>, %157, %cst_91 [2] : vector<2x16x16xf32> to vector<2x16xf32>
    %159 = vector.shape_cast %158 : vector<2x16xf32> to vector<2x16x1xf32>
    %160 = vector.broadcast %159 : vector<2x16x1xf32> to vector<2x16x16xf32>
    %161 = arith.divf %157, %160 : vector<2x16x16xf32>
    "tpu.trace_start"() <{level = 10 : i32, message = "bqk,bkd->bqd"}> : () -> ()
    %cst_92 = arith.constant dense<0.000000e+00> : vector<2x16x16xf32>
    %162 = tpu.matmul %161, %147, %cst_92 {dimension_numbers = #tpu.dot_dimension_numbers<[2], [1], [1], [2], [0, 0, 0, 1, 1, 2], [0], [0]>} : vector<2x16x16xf32>, vector<2x16x16xf32>, vector<2x16x16xf32> -> vector<2x16x16xf32>
    "tpu.trace_stop"() : () -> ()
    %163 = vector.shape_cast %162 : vector<2x16x16xf32> to vector<32x16xf32>
    %164 = vector.extract_strided_slice %133 {offsets = [0, 0], sizes = [16, 32], strides = [1, 1]} : vector<32x32xf32> to vector<16x32xf32>
    %cst_93 = arith.constant dense<0.000000e+00> : vector<32x32xf32>
    %165 = tpu.matmul %163, %164, %cst_93 {dimension_numbers = #tpu.dot_dimension_numbers<[1], [0], [0], [1], [0, 0, 1, 1], [], []>} : vector<32x16xf32>, vector<16x32xf32>, vector<32x32xf32> -> vector<32x32xf32>
    %166 = vector.broadcast %134 : vector<1x32xf32> to vector<32x32xf32>
    %167 = arith.addf %166, %165 : vector<32x32xf32>
    %168 = vector.extract_strided_slice %139 {offsets = [0, 0, 16], sizes = [2, 16, 16], strides = [1, 1, 1]} : vector<2x16x96xf32> to vector<2x16x16xf32>
    %169 = vector.extract_strided_slice %139 {offsets = [0, 0, 48], sizes = [2, 16, 16], strides = [1, 1, 1]} : vector<2x16x96xf32> to vector<2x16x16xf32>
    %170 = vector.extract_strided_slice %139 {offsets = [0, 0, 80], sizes = [2, 16, 16], strides = [1, 1, 1]} : vector<2x16x96xf32> to vector<2x16x16xf32>
    "tpu.trace_start"() <{level = 10 : i32, message = "bqd,bkd->bqk"}> : () -> ()
    %cst_94 = arith.constant dense<0.000000e+00> : vector<2x16x16xf32>
    %171 = tpu.matmul %168, %169, %cst_94 {dimension_numbers = #tpu.dot_dimension_numbers<[2], [2], [1], [1], [0, 0, 0, 1, 1, 1], [0], [0]>} : vector<2x16x16xf32>, vector<2x16x16xf32>, vector<2x16x16xf32> -> vector<2x16x16xf32>
    "tpu.trace_stop"() : () -> ()
    %cst_95 = arith.constant 2.500000e-01 : f32
    %172 = vector.broadcast %cst_95 : f32 to vector<2x16x16xf32>
    %173 = arith.mulf %171, %172 : vector<2x16x16xf32>
    %174 = vector.broadcast %144 : vector<2x1x16xf32> to vector<2x16x16xf32>
    %175 = arith.addf %173, %174 : vector<2x16x16xf32>
    %cst_96 = arith.constant dense<0xFF800000> : vector<2x16xf32>
    %176 = vector.multi_reduction <maximumf>, %175, %cst_96 [2] : vector<2x16x16xf32> to vector<2x16xf32>
    %177 = vector.shape_cast %176 : vector<2x16xf32> to vector<2x16x1xf32>
    %178 = vector.broadcast %177 : vector<2x16x1xf32> to vector<2x16x16xf32>
    %179 = arith.subf %175, %178 : vector<2x16x16xf32>
    %180 = math.exp %179 : vector<2x16x16xf32>
    %cst_97 = arith.constant dense<0.000000e+00> : vector<2x16xf32>
    %181 = vector.multi_reduction <add>, %180, %cst_97 [2] : vector<2x16x16xf32> to vector<2x16xf32>
    %182 = vector.shape_cast %181 : vector<2x16xf32> to vector<2x16x1xf32>
    %183 = vector.broadcast %182 : vector<2x16x1xf32> to vector<2x16x16xf32>
    %184 = arith.divf %180, %183 : vector<2x16x16xf32>
    "tpu.trace_start"() <{level = 10 : i32, message = "bqk,bkd->bqd"}> : () -> ()
    %cst_98 = arith.constant dense<0.000000e+00> : vector<2x16x16xf32>
    %185 = tpu.matmul %184, %170, %cst_98 {dimension_numbers = #tpu.dot_dimension_numbers<[2], [1], [1], [2], [0, 0, 0, 1, 1, 2], [0], [0]>} : vector<2x16x16xf32>, vector<2x16x16xf32>, vector<2x16x16xf32> -> vector<2x16x16xf32>
    "tpu.trace_stop"() : () -> ()
    %186 = vector.shape_cast %185 : vector<2x16x16xf32> to vector<32x16xf32>
    %187 = vector.extract_strided_slice %133 {offsets = [16, 0], sizes = [16, 32], strides = [1, 1]} : vector<32x32xf32> to vector<16x32xf32>
    %cst_99 = arith.constant dense<0.000000e+00> : vector<32x32xf32>
    %188 = tpu.matmul %186, %187, %cst_99 {dimension_numbers = #tpu.dot_dimension_numbers<[1], [0], [0], [1], [0, 0, 1, 1], [], []>} : vector<32x16xf32>, vector<16x32xf32>, vector<32x32xf32> -> vector<32x32xf32>
    %189 = arith.addf %167, %188 : vector<32x32xf32>
    %190 = vector.shape_cast %189 : vector<32x32xf32> to vector<2x16x32xf32>
    %191 = arith.addf %130, %190 : vector<2x16x32xf32>
    %192 = vector.shape_cast %191 : vector<2x16x32xf32> to vector<32x32xf32>
    %c0_100 = arith.constant 0 : index
    %c0_101 = arith.constant 0 : index
    %193 = vector.load %arg14[%c0_100, %c0_101] : memref<32x32xf32, #tpu.memory_space<vmem>>, vector<32x32xf32>
    %c0_102 = arith.constant 0 : index
    %c0_103 = arith.constant 0 : index
    %194 = vector.load %arg15[%c0_102, %c0_103] : memref<1x32xf32, #tpu.memory_space<vmem>>, vector<1x32xf32>
    %cst_104 = arith.constant dense<0.000000e+00> : vector<32x32xf32>
    %195 = tpu.matmul %192, %193, %cst_104 {dimension_numbers = #tpu.dot_dimension_numbers<[1], [0], [0], [1], [0, 0, 1, 1], [], []>} : vector<32x32xf32>, vector<32x32xf32>, vector<32x32xf32> -> vector<32x32xf32>
    %196 = vector.broadcast %194 : vector<1x32xf32> to vector<32x32xf32>
    %197 = arith.addf %195, %196 : vector<32x32xf32>
    %198 = vector.shape_cast %197 : vector<32x32xf32> to vector<2x16x32xf32>
    %199 = vector.shape_cast %0 : vector<2x16xf32> to vector<2x16x1xf32>
    %200 = vector.broadcast %199 : vector<2x16x1xf32> to vector<2x16x32xf32>
    %201 = arith.mulf %198, %200 : vector<2x16x32xf32>
    %cst_105 = arith.constant dense<0.000000e+00> : vector<2x32xf32>
    %202 = vector.multi_reduction <add>, %201, %cst_105 [1] : vector<2x16x32xf32> to vector<2x32xf32>
    %cst_106 = arith.constant dense<0.000000e+00> : vector<2xf32>
    %203 = vector.multi_reduction <add>, %0, %cst_106 [1] : vector<2x16xf32> to vector<2xf32>
    %204 = vector.shape_cast %203 : vector<2xf32> to vector<2x1xf32>
    %cst_107 = arith.constant 1.000000e+00 : f32
    %205 = vector.broadcast %cst_107 : f32 to vector<2x1xf32>
    %206 = arith.maximumf %204, %205 : vector<2x1xf32>
    %207 = vector.broadcast %206 : vector<2x1xf32> to vector<2x32xf32>
    %208 = arith.divf %202, %207 : vector<2x32xf32>
    %c0_108 = arith.constant 0 : index
    %c0_109 = arith.constant 0 : index
    %209 = vector.load %arg16[%c0_108, %c0_109] : memref<2x32xf32, #tpu.memory_space<vmem>>, vector<2x32xf32>
    tpu.vector_store %arg16[%c0_108, %c0_109], %208 {strides = array<i32>} : memref<2x32xf32, #tpu.memory_space<vmem>>, vector<2x32xf32>,
    return
  }
}

module attributes {stable_mosaic.version = 11 : i64} {
  func.func @kernel(%arg0: memref<2x8x32xf32, #tpu.memory_space<vmem>>, %arg1: memref<2x32xf32, #tpu.memory_space<vmem>>, %arg2: memref<2x8xf32, #tpu.memory_space<vmem>>, %arg3: memref<32x96xf32, #tpu.memory_space<vmem>>, %arg4: memref<1x96xf32, #tpu.memory_space<vmem>>, %arg5: memref<32x32xf32, #tpu.memory_space<vmem>>, %arg6: memref<1x32xf32, #tpu.memory_space<vmem>>, %arg7: memref<32x64xf32, #tpu.memory_space<vmem>>, %arg8: memref<1x64xf32, #tpu.memory_space<vmem>>, %arg9: memref<96x64xf32, #tpu.memory_space<vmem>>, %arg10: memref<1x64xf32, #tpu.memory_space<vmem>>, %arg11: memref<192x32xf32, #tpu.memory_space<vmem>>, %arg12: memref<1x32xf32, #tpu.memory_space<vmem>>, %arg13: memref<32x64xf32, #tpu.memory_space<vmem>>, %arg14: memref<1x64xf32, #tpu.memory_space<vmem>>, %arg15: memref<32x96xf32, #tpu.memory_space<vmem>>, %arg16: memref<1x96xf32, #tpu.memory_space<vmem>>, %arg17: memref<32x32xf32, #tpu.memory_space<vmem>>, %arg18: memref<1x32xf32, #tpu.memory_space<vmem>>, %arg19: memref<32x64xf32, #tpu.memory_space<vmem>>, %arg20: memref<1x64xf32, #tpu.memory_space<vmem>>, %arg21: memref<96x64xf32, #tpu.memory_space<vmem>>, %arg22: memref<1x64xf32, #tpu.memory_space<vmem>>, %arg23: memref<192x32xf32, #tpu.memory_space<vmem>>, %arg24: memref<1x32xf32, #tpu.memory_space<vmem>>, %arg25: memref<32x64xf32, #tpu.memory_space<vmem>>, %arg26: memref<1x64xf32, #tpu.memory_space<vmem>>, %arg27: memref<2x8x32xf32, #tpu.memory_space<vmem>>, %arg28: memref<2x10x32xf32, #tpu.memory_space<vmem>>, %arg29: memref<2x10x64xf32, #tpu.memory_space<vmem>>) attributes {dimension_semantics = [], scalar_prefetch = 0 : i64, scratch_operands = 2 : i64, tpu.core_type = #tpu.core_type<tc>} {
    %c0 = arith.constant 0 : index
    %c0_0 = arith.constant 0 : index
    %c0_1 = arith.constant 0 : index
    %0 = vector.load %arg0[%c0, %c0_0, %c0_1] : memref<2x8x32xf32, #tpu.memory_space<vmem>>, vector<2x8x32xf32>
    %c0_2 = arith.constant 0 : index
    %c0_3 = arith.constant 0 : index
    %1 = vector.load %arg1[%c0_2, %c0_3] : memref<2x32xf32, #tpu.memory_space<vmem>>, vector<2x32xf32>
    %c0_4 = arith.constant 0 : index
    %c0_5 = arith.constant 0 : index
    %2 = vector.load %arg2[%c0_4, %c0_5] : memref<2x8xf32, #tpu.memory_space<vmem>>, vector<2x8xf32>
    %3 = vector.shape_cast %2 : vector<2x8xf32> to vector<2x8x1xf32>
    %c0_6 = arith.constant 0 : index
    %c0_7 = arith.constant 0 : index
    %4 = vector.load %arg3[%c0_6, %c0_7] : memref<32x96xf32, #tpu.memory_space<vmem>>, vector<32x96xf32>
    %c0_8 = arith.constant 0 : index
    %c0_9 = arith.constant 0 : index
    %5 = vector.load %arg4[%c0_8, %c0_9] : memref<1x96xf32, #tpu.memory_space<vmem>>, vector<1x96xf32>
    %c0_10 = arith.constant 0 : index
    %c0_11 = arith.constant 0 : index
    %6 = vector.load %arg5[%c0_10, %c0_11] : memref<32x32xf32, #tpu.memory_space<vmem>>, vector<32x32xf32>
    %c0_12 = arith.constant 0 : index
    %c0_13 = arith.constant 0 : index
    %7 = vector.load %arg6[%c0_12, %c0_13] : memref<1x32xf32, #tpu.memory_space<vmem>>, vector<1x32xf32>
    %c0_14 = arith.constant 0 : index
    %c0_15 = arith.constant 0 : index
    %8 = vector.load %arg7[%c0_14, %c0_15] : memref<32x64xf32, #tpu.memory_space<vmem>>, vector<32x64xf32>
    %c0_16 = arith.constant 0 : index
    %c0_17 = arith.constant 0 : index
    %9 = vector.load %arg8[%c0_16, %c0_17] : memref<1x64xf32, #tpu.memory_space<vmem>>, vector<1x64xf32>
    %c0_18 = arith.constant 0 : index
    %c0_19 = arith.constant 0 : index
    %10 = vector.load %arg9[%c0_18, %c0_19] : memref<96x64xf32, #tpu.memory_space<vmem>>, vector<96x64xf32>
    %c0_20 = arith.constant 0 : index
    %c0_21 = arith.constant 0 : index
    %11 = vector.load %arg10[%c0_20, %c0_21] : memref<1x64xf32, #tpu.memory_space<vmem>>, vector<1x64xf32>
    %c0_22 = arith.constant 0 : index
    %c0_23 = arith.constant 0 : index
    %12 = vector.load %arg11[%c0_22, %c0_23] : memref<192x32xf32, #tpu.memory_space<vmem>>, vector<192x32xf32>
    %c0_24 = arith.constant 0 : index
    %c0_25 = arith.constant 0 : index
    %13 = vector.load %arg12[%c0_24, %c0_25] : memref<1x32xf32, #tpu.memory_space<vmem>>, vector<1x32xf32>
    %c0_26 = arith.constant 0 : index
    %c0_27 = arith.constant 0 : index
    %14 = vector.load %arg13[%c0_26, %c0_27] : memref<32x64xf32, #tpu.memory_space<vmem>>, vector<32x64xf32>
    %c0_28 = arith.constant 0 : index
    %c0_29 = arith.constant 0 : index
    %15 = vector.load %arg14[%c0_28, %c0_29] : memref<1x64xf32, #tpu.memory_space<vmem>>, vector<1x64xf32>
    %16 = vector.shape_cast %0 : vector<2x8x32xf32> to vector<16x32xf32>
    %cst = arith.constant dense<0.000000e+00> : vector<16x96xf32>
    %17 = tpu.matmul %16, %4, %cst {dimension_numbers = #tpu.dot_dimension_numbers<[1], [0], [0], [1], [0, 0, 1, 1], [], []>} : vector<16x32xf32>, vector<32x96xf32>, vector<16x96xf32> -> vector<16x96xf32>
    %18 = vector.broadcast %5 : vector<1x96xf32> to vector<16x96xf32>
    %19 = arith.addf %17, %18 : vector<16x96xf32>
    %20 = vector.shape_cast %19 : vector<16x96xf32> to vector<2x8x96xf32>
    %21 = vector.shape_cast %2 : vector<2x8xf32> to vector<2x1x8xf32>
    %cst_30 = arith.constant 1.000000e+00 : f32
    %22 = vector.broadcast %cst_30 : f32 to vector<2x1x8xf32>
    %23 = arith.subf %21, %22 : vector<2x1x8xf32>
    %cst_31 = arith.constant 1.000000e+09 : f32
    %24 = vector.broadcast %cst_31 : f32 to vector<2x1x8xf32>
    %25 = arith.mulf %23, %24 : vector<2x1x8xf32>
    %26 = vector.extract_strided_slice %20 {offsets = [0, 0, 0], sizes = [2, 8, 16], strides = [1, 1, 1]} : vector<2x8x96xf32> to vector<2x8x16xf32>
    %27 = vector.extract_strided_slice %20 {offsets = [0, 0, 32], sizes = [2, 8, 16], strides = [1, 1, 1]} : vector<2x8x96xf32> to vector<2x8x16xf32>
    %28 = vector.extract_strided_slice %20 {offsets = [0, 0, 64], sizes = [2, 8, 16], strides = [1, 1, 1]} : vector<2x8x96xf32> to vector<2x8x16xf32>
    "tpu.trace_start"() <{level = 10 : i32, message = "bqd,bkd->bqk"}> : () -> ()
    %cst_32 = arith.constant dense<0.000000e+00> : vector<2x8x8xf32>
    %29 = tpu.matmul %26, %27, %cst_32 {dimension_numbers = #tpu.dot_dimension_numbers<[2], [2], [1], [1], [0, 0, 0, 1, 1, 1], [0], [0]>} : vector<2x8x16xf32>, vector<2x8x16xf32>, vector<2x8x8xf32> -> vector<2x8x8xf32>
    "tpu.trace_stop"() : () -> ()
    %cst_33 = arith.constant 2.500000e-01 : f32
    %30 = vector.broadcast %cst_33 : f32 to vector<2x8x8xf32>
    %31 = arith.mulf %29, %30 : vector<2x8x8xf32>
    %32 = vector.broadcast %25 : vector<2x1x8xf32> to vector<2x8x8xf32>
    %33 = arith.addf %31, %32 : vector<2x8x8xf32>
    %cst_34 = arith.constant dense<0xFF800000> : vector<2x8xf32>
    %34 = vector.multi_reduction <maximumf>, %33, %cst_34 [2] : vector<2x8x8xf32> to vector<2x8xf32>
    %35 = vector.shape_cast %34 : vector<2x8xf32> to vector<2x8x1xf32>
    %36 = vector.broadcast %35 : vector<2x8x1xf32> to vector<2x8x8xf32>
    %37 = arith.subf %33, %36 : vector<2x8x8xf32>
    %38 = math.exp %37 : vector<2x8x8xf32>
    %cst_35 = arith.constant dense<0.000000e+00> : vector<2x8xf32>
    %39 = vector.multi_reduction <add>, %38, %cst_35 [2] : vector<2x8x8xf32> to vector<2x8xf32>
    %40 = vector.shape_cast %39 : vector<2x8xf32> to vector<2x8x1xf32>
    %41 = vector.broadcast %40 : vector<2x8x1xf32> to vector<2x8x8xf32>
    %42 = arith.divf %38, %41 : vector<2x8x8xf32>
    "tpu.trace_start"() <{level = 10 : i32, message = "bqk,bkd->bqd"}> : () -> ()
    %cst_36 = arith.constant dense<0.000000e+00> : vector<2x8x16xf32>
    %43 = tpu.matmul %42, %28, %cst_36 {dimension_numbers = #tpu.dot_dimension_numbers<[2], [1], [1], [2], [0, 0, 0, 1, 1, 2], [0], [0]>} : vector<2x8x8xf32>, vector<2x8x16xf32>, vector<2x8x16xf32> -> vector<2x8x16xf32>
    "tpu.trace_stop"() : () -> ()
    %44 = vector.shape_cast %43 : vector<2x8x16xf32> to vector<16x16xf32>
    %45 = vector.extract_strided_slice %6 {offsets = [0, 0], sizes = [16, 32], strides = [1, 1]} : vector<32x32xf32> to vector<16x32xf32>
    %cst_37 = arith.constant dense<0.000000e+00> : vector<16x32xf32>
    %46 = tpu.matmul %44, %45, %cst_37 {dimension_numbers = #tpu.dot_dimension_numbers<[1], [0], [0], [1], [0, 0, 1, 1], [], []>} : vector<16x16xf32>, vector<16x32xf32>, vector<16x32xf32> -> vector<16x32xf32>
    %47 = vector.broadcast %7 : vector<1x32xf32> to vector<16x32xf32>
    %48 = arith.addf %47, %46 : vector<16x32xf32>
    %49 = vector.extract_strided_slice %20 {offsets = [0, 0, 16], sizes = [2, 8, 16], strides = [1, 1, 1]} : vector<2x8x96xf32> to vector<2x8x16xf32>
    %50 = vector.extract_strided_slice %20 {offsets = [0, 0, 48], sizes = [2, 8, 16], strides = [1, 1, 1]} : vector<2x8x96xf32> to vector<2x8x16xf32>
    %51 = vector.extract_strided_slice %20 {offsets = [0, 0, 80], sizes = [2, 8, 16], strides = [1, 1, 1]} : vector<2x8x96xf32> to vector<2x8x16xf32>
    "tpu.trace_start"() <{level = 10 : i32, message = "bqd,bkd->bqk"}> : () -> ()
    %cst_38 = arith.constant dense<0.000000e+00> : vector<2x8x8xf32>
    %52 = tpu.matmul %49, %50, %cst_38 {dimension_numbers = #tpu.dot_dimension_numbers<[2], [2], [1], [1], [0, 0, 0, 1, 1, 1], [0], [0]>} : vector<2x8x16xf32>, vector<2x8x16xf32>, vector<2x8x8xf32> -> vector<2x8x8xf32>
    "tpu.trace_stop"() : () -> ()
    %cst_39 = arith.constant 2.500000e-01 : f32
    %53 = vector.broadcast %cst_39 : f32 to vector<2x8x8xf32>
    %54 = arith.mulf %52, %53 : vector<2x8x8xf32>
    %55 = vector.broadcast %25 : vector<2x1x8xf32> to vector<2x8x8xf32>
    %56 = arith.addf %54, %55 : vector<2x8x8xf32>
    %cst_40 = arith.constant dense<0xFF800000> : vector<2x8xf32>
    %57 = vector.multi_reduction <maximumf>, %56, %cst_40 [2] : vector<2x8x8xf32> to vector<2x8xf32>
    %58 = vector.shape_cast %57 : vector<2x8xf32> to vector<2x8x1xf32>
    %59 = vector.broadcast %58 : vector<2x8x1xf32> to vector<2x8x8xf32>
    %60 = arith.subf %56, %59 : vector<2x8x8xf32>
    %61 = math.exp %60 : vector<2x8x8xf32>
    %cst_41 = arith.constant dense<0.000000e+00> : vector<2x8xf32>
    %62 = vector.multi_reduction <add>, %61, %cst_41 [2] : vector<2x8x8xf32> to vector<2x8xf32>
    %63 = vector.shape_cast %62 : vector<2x8xf32> to vector<2x8x1xf32>
    %64 = vector.broadcast %63 : vector<2x8x1xf32> to vector<2x8x8xf32>
    %65 = arith.divf %61, %64 : vector<2x8x8xf32>
    "tpu.trace_start"() <{level = 10 : i32, message = "bqk,bkd->bqd"}> : () -> ()
    %cst_42 = arith.constant dense<0.000000e+00> : vector<2x8x16xf32>
    %66 = tpu.matmul %65, %51, %cst_42 {dimension_numbers = #tpu.dot_dimension_numbers<[2], [1], [1], [2], [0, 0, 0, 1, 1, 2], [0], [0]>} : vector<2x8x8xf32>, vector<2x8x16xf32>, vector<2x8x16xf32> -> vector<2x8x16xf32>
    "tpu.trace_stop"() : () -> ()
    %67 = vector.shape_cast %66 : vector<2x8x16xf32> to vector<16x16xf32>
    %68 = vector.extract_strided_slice %6 {offsets = [16, 0], sizes = [16, 32], strides = [1, 1]} : vector<32x32xf32> to vector<16x32xf32>
    %cst_43 = arith.constant dense<0.000000e+00> : vector<16x32xf32>
    %69 = tpu.matmul %67, %68, %cst_43 {dimension_numbers = #tpu.dot_dimension_numbers<[1], [0], [0], [1], [0, 0, 1, 1], [], []>} : vector<16x16xf32>, vector<16x32xf32>, vector<16x32xf32> -> vector<16x32xf32>
    %70 = arith.addf %48, %69 : vector<16x32xf32>
    %71 = vector.shape_cast %70 : vector<16x32xf32> to vector<2x8x32xf32>
    %72 = arith.addf %0, %71 : vector<2x8x32xf32>
    %cst_44 = arith.constant dense<0.000000e+00> : vector<2x64xf32>
    %73 = tpu.matmul %1, %8, %cst_44 {dimension_numbers = #tpu.dot_dimension_numbers<[1], [0], [0], [1], [0, 0, 1, 1], [], []>} : vector<2x32xf32>, vector<32x64xf32>, vector<2x64xf32> -> vector<2x64xf32>
    %74 = vector.broadcast %9 : vector<1x64xf32> to vector<2x64xf32>
    %75 = arith.addf %73, %74 : vector<2x64xf32>
    %76 = vector.extract_strided_slice %75 {offsets = [0, 0], sizes = [2, 32], strides = [1, 1]} : vector<2x64xf32> to vector<2x32xf32>
    %77 = vector.shape_cast %76 : vector<2x32xf32> to vector<2x1x32xf32>
    %78 = vector.extract_strided_slice %75 {offsets = [0, 32], sizes = [2, 32], strides = [1, 1]} : vector<2x64xf32> to vector<2x32xf32>
    %79 = vector.shape_cast %78 : vector<2x32xf32> to vector<2x1x32xf32>
    %cst_45 = arith.constant dense<0.000000e+00> : vector<2x8xf32>
    %80 = vector.multi_reduction <add>, %72, %cst_45 [2] : vector<2x8x32xf32> to vector<2x8xf32>
    %81 = vector.shape_cast %80 : vector<2x8xf32> to vector<2x8x1xf32>
    %cst_46 = arith.constant 3.200000e+01 : f32
    %82 = vector.broadcast %cst_46 : f32 to vector<2x8x1xf32>
    %83 = arith.divf %81, %82 : vector<2x8x1xf32>
    %84 = vector.broadcast %83 : vector<2x8x1xf32> to vector<2x8x32xf32>
    %85 = arith.subf %72, %84 : vector<2x8x32xf32>
    %86 = arith.mulf %85, %85 : vector<2x8x32xf32>
    %cst_47 = arith.constant dense<0.000000e+00> : vector<2x8xf32>
    %87 = vector.multi_reduction <add>, %86, %cst_47 [2] : vector<2x8x32xf32> to vector<2x8xf32>
    %88 = vector.shape_cast %87 : vector<2x8xf32> to vector<2x8x1xf32>
    %cst_48 = arith.constant 3.200000e+01 : f32
    %89 = vector.broadcast %cst_48 : f32 to vector<2x8x1xf32>
    %90 = arith.divf %88, %89 : vector<2x8x1xf32>
    %91 = vector.broadcast %83 : vector<2x8x1xf32> to vector<2x8x32xf32>
    %92 = arith.subf %72, %91 : vector<2x8x32xf32>
    %cst_49 = arith.constant 9.99999974E-6 : f32
    %93 = vector.broadcast %cst_49 : f32 to vector<2x8x1xf32>
    %94 = arith.addf %90, %93 : vector<2x8x1xf32>
    %95 = math.rsqrt %94 : vector<2x8x1xf32>
    %96 = vector.broadcast %95 : vector<2x8x1xf32> to vector<2x8x32xf32>
    %97 = arith.mulf %92, %96 : vector<2x8x32xf32>
    %98 = vector.broadcast %77 : vector<2x1x32xf32> to vector<2x8x32xf32>
    %99 = arith.mulf %97, %98 : vector<2x8x32xf32>
    %100 = vector.broadcast %79 : vector<2x1x32xf32> to vector<2x8x32xf32>
    %101 = arith.addf %99, %100 : vector<2x8x32xf32>
    %102 = vector.broadcast %3 : vector<2x8x1xf32> to vector<2x8x32xf32>
    %103 = arith.mulf %101, %102 : vector<2x8x32xf32>
    %cst_50 = arith.constant 0.000000e+00 : f32
    %104 = vector.broadcast %cst_50 : f32 to vector<2x10x32xf32>
    %c0_51 = arith.constant 0 : index
    %c0_52 = arith.constant 0 : index
    %c0_53 = arith.constant 0 : index
    %105 = vector.load %arg28[%c0_51, %c0_52, %c0_53] : memref<2x10x32xf32, #tpu.memory_space<vmem>>, vector<2x10x32xf32>
    tpu.vector_store %arg28[%c0_51, %c0_52, %c0_53], %104 {strides = array<i32>} : memref<2x10x32xf32, #tpu.memory_space<vmem>>, vector<2x10x32xf32>,
    %c0_54 = arith.constant 0 : index
    %c1 = arith.constant 1 : index
    %c0_55 = arith.constant 0 : index
    %106 = vector.load %arg28[%c0_54, %c1, %c0_55] : memref<2x10x32xf32, #tpu.memory_space<vmem>>, vector<2x8x32xf32>
    tpu.vector_store %arg28[%c0_54, %c1, %c0_55], %103 {strides = array<i32>} : memref<2x10x32xf32, #tpu.memory_space<vmem>>, vector<2x8x32xf32>,
    %c0_56 = arith.constant 0 : index
    %c0_57 = arith.constant 0 : index
    %c0_58 = arith.constant 0 : index
    %107 = vector.load %arg28[%c0_56, %c0_57, %c0_58] : memref<2x10x32xf32, #tpu.memory_space<vmem>>, vector<2x8x32xf32>
    %108 = vector.shape_cast %107 : vector<2x8x32xf32> to vector<16x32xf32>
    %109 = vector.extract_strided_slice %10 {offsets = [0, 0], sizes = [32, 64], strides = [1, 1]} : vector<96x64xf32> to vector<32x64xf32>
    %cst_59 = arith.constant dense<0.000000e+00> : vector<16x64xf32>
    %110 = tpu.matmul %108, %109, %cst_59 {dimension_numbers = #tpu.dot_dimension_numbers<[1], [0], [0], [1], [0, 0, 1, 1], [], []>} : vector<16x32xf32>, vector<32x64xf32>, vector<16x64xf32> -> vector<16x64xf32>
    %111 = vector.broadcast %11 : vector<1x64xf32> to vector<16x64xf32>
    %112 = arith.addf %111, %110 : vector<16x64xf32>
    %c0_60 = arith.constant 0 : index
    %c1_61 = arith.constant 1 : index
    %c0_62 = arith.constant 0 : index
    %113 = vector.load %arg28[%c0_60, %c1_61, %c0_62] : memref<2x10x32xf32, #tpu.memory_space<vmem>>, vector<2x8x32xf32>
    %114 = vector.shape_cast %113 : vector<2x8x32xf32> to vector<16x32xf32>
    %115 = vector.extract_strided_slice %10 {offsets = [32, 0], sizes = [32, 64], strides = [1, 1]} : vector<96x64xf32> to vector<32x64xf32>
    %cst_63 = arith.constant dense<0.000000e+00> : vector<16x64xf32>
    %116 = tpu.matmul %114, %115, %cst_63 {dimension_numbers = #tpu.dot_dimension_numbers<[1], [0], [0], [1], [0, 0, 1, 1], [], []>} : vector<16x32xf32>, vector<32x64xf32>, vector<16x64xf32> -> vector<16x64xf32>
    %117 = arith.addf %112, %116 : vector<16x64xf32>
    %c0_64 = arith.constant 0 : index
    %c2 = arith.constant 2 : index
    %c0_65 = arith.constant 0 : index
    %118 = vector.load %arg28[%c0_64, %c2, %c0_65] : memref<2x10x32xf32, #tpu.memory_space<vmem>>, vector<2x8x32xf32>
    %119 = vector.shape_cast %118 : vector<2x8x32xf32> to vector<16x32xf32>
    %120 = vector.extract_strided_slice %10 {offsets = [64, 0], sizes = [32, 64], strides = [1, 1]} : vector<96x64xf32> to vector<32x64xf32>
    %cst_66 = arith.constant dense<0.000000e+00> : vector<16x64xf32>
    %121 = tpu.matmul %119, %120, %cst_66 {dimension_numbers = #tpu.dot_dimension_numbers<[1], [0], [0], [1], [0, 0, 1, 1], [], []>} : vector<16x32xf32>, vector<32x64xf32>, vector<16x64xf32> -> vector<16x64xf32>
    %122 = arith.addf %117, %121 : vector<16x64xf32>
    %123 = vector.shape_cast %122 : vector<16x64xf32> to vector<2x8x64xf32>
    %cst_67 = arith.constant 0.000000e+00 : f32
    %124 = vector.broadcast %cst_67 : f32 to vector<2x8x64xf32>
    %125 = arith.maximumf %123, %124 : vector<2x8x64xf32>
    %cst_68 = arith.constant 0.000000e+00 : f32
    %126 = vector.broadcast %cst_68 : f32 to vector<2x10x64xf32>
    %c0_69 = arith.constant 0 : index
    %c0_70 = arith.constant 0 : index
    %c0_71 = arith.constant 0 : index
    %127 = vector.load %arg29[%c0_69, %c0_70, %c0_71] : memref<2x10x64xf32, #tpu.memory_space<vmem>>, vector<2x10x64xf32>
    tpu.vector_store %arg29[%c0_69, %c0_70, %c0_71], %126 {strides = array<i32>} : memref<2x10x64xf32, #tpu.memory_space<vmem>>, vector<2x10x64xf32>,
    %c0_72 = arith.constant 0 : index
    %c1_73 = arith.constant 1 : index
    %c0_74 = arith.constant 0 : index
    %128 = vector.load %arg29[%c0_72, %c1_73, %c0_74] : memref<2x10x64xf32, #tpu.memory_space<vmem>>, vector<2x8x64xf32>
    tpu.vector_store %arg29[%c0_72, %c1_73, %c0_74], %125 {strides = array<i32>} : memref<2x10x64xf32, #tpu.memory_space<vmem>>, vector<2x8x64xf32>,
    %c0_75 = arith.constant 0 : index
    %c0_76 = arith.constant 0 : index
    %c0_77 = arith.constant 0 : index
    %129 = vector.load %arg29[%c0_75, %c0_76, %c0_77] : memref<2x10x64xf32, #tpu.memory_space<vmem>>, vector<2x8x64xf32>
    %130 = vector.shape_cast %129 : vector<2x8x64xf32> to vector<16x64xf32>
    %131 = vector.extract_strided_slice %12 {offsets = [0, 0], sizes = [64, 32], strides = [1, 1]} : vector<192x32xf32> to vector<64x32xf32>
    %cst_78 = arith.constant dense<0.000000e+00> : vector<16x32xf32>
    %132 = tpu.matmul %130, %131, %cst_78 {dimension_numbers = #tpu.dot_dimension_numbers<[1], [0], [0], [1], [0, 0, 1, 1], [], []>} : vector<16x64xf32>, vector<64x32xf32>, vector<16x32xf32> -> vector<16x32xf32>
    %133 = vector.broadcast %13 : vector<1x32xf32> to vector<16x32xf32>
    %134 = arith.addf %133, %132 : vector<16x32xf32>
    %c0_79 = arith.constant 0 : index
    %c1_80 = arith.constant 1 : index
    %c0_81 = arith.constant 0 : index
    %135 = vector.load %arg29[%c0_79, %c1_80, %c0_81] : memref<2x10x64xf32, #tpu.memory_space<vmem>>, vector<2x8x64xf32>
    %136 = vector.shape_cast %135 : vector<2x8x64xf32> to vector<16x64xf32>
    %137 = vector.extract_strided_slice %12 {offsets = [64, 0], sizes = [64, 32], strides = [1, 1]} : vector<192x32xf32> to vector<64x32xf32>
    %cst_82 = arith.constant dense<0.000000e+00> : vector<16x32xf32>
    %138 = tpu.matmul %136, %137, %cst_82 {dimension_numbers = #tpu.dot_dimension_numbers<[1], [0], [0], [1], [0, 0, 1, 1], [], []>} : vector<16x64xf32>, vector<64x32xf32>, vector<16x32xf32> -> vector<16x32xf32>
    %139 = arith.addf %134, %138 : vector<16x32xf32>
    %c0_83 = arith.constant 0 : index
    %c2_84 = arith.constant 2 : index
    %c0_85 = arith.constant 0 : index
    %140 = vector.load %arg29[%c0_83, %c2_84, %c0_85] : memref<2x10x64xf32, #tpu.memory_space<vmem>>, vector<2x8x64xf32>
    %141 = vector.shape_cast %140 : vector<2x8x64xf32> to vector<16x64xf32>
    %142 = vector.extract_strided_slice %12 {offsets = [128, 0], sizes = [64, 32], strides = [1, 1]} : vector<192x32xf32> to vector<64x32xf32>
    %cst_86 = arith.constant dense<0.000000e+00> : vector<16x32xf32>
    %143 = tpu.matmul %141, %142, %cst_86 {dimension_numbers = #tpu.dot_dimension_numbers<[1], [0], [0], [1], [0, 0, 1, 1], [], []>} : vector<16x64xf32>, vector<64x32xf32>, vector<16x32xf32> -> vector<16x32xf32>
    %144 = arith.addf %139, %143 : vector<16x32xf32>
    %145 = vector.shape_cast %144 : vector<16x32xf32> to vector<2x8x32xf32>
    %146 = arith.addf %103, %145 : vector<2x8x32xf32>
    %cst_87 = arith.constant dense<0.000000e+00> : vector<2x64xf32>
    %147 = tpu.matmul %1, %14, %cst_87 {dimension_numbers = #tpu.dot_dimension_numbers<[1], [0], [0], [1], [0, 0, 1, 1], [], []>} : vector<2x32xf32>, vector<32x64xf32>, vector<2x64xf32> -> vector<2x64xf32>
    %148 = vector.broadcast %15 : vector<1x64xf32> to vector<2x64xf32>
    %149 = arith.addf %147, %148 : vector<2x64xf32>
    %150 = vector.extract_strided_slice %149 {offsets = [0, 0], sizes = [2, 32], strides = [1, 1]} : vector<2x64xf32> to vector<2x32xf32>
    %151 = vector.shape_cast %150 : vector<2x32xf32> to vector<2x1x32xf32>
    %152 = vector.extract_strided_slice %149 {offsets = [0, 32], sizes = [2, 32], strides = [1, 1]} : vector<2x64xf32> to vector<2x32xf32>
    %153 = vector.shape_cast %152 : vector<2x32xf32> to vector<2x1x32xf32>
    %cst_88 = arith.constant dense<0.000000e+00> : vector<2x8xf32>
    %154 = vector.multi_reduction <add>, %146, %cst_88 [2] : vector<2x8x32xf32> to vector<2x8xf32>
    %155 = vector.shape_cast %154 : vector<2x8xf32> to vector<2x8x1xf32>
    %cst_89 = arith.constant 3.200000e+01 : f32
    %156 = vector.broadcast %cst_89 : f32 to vector<2x8x1xf32>
    %157 = arith.divf %155, %156 : vector<2x8x1xf32>
    %158 = vector.broadcast %157 : vector<2x8x1xf32> to vector<2x8x32xf32>
    %159 = arith.subf %146, %158 : vector<2x8x32xf32>
    %160 = arith.mulf %159, %159 : vector<2x8x32xf32>
    %cst_90 = arith.constant dense<0.000000e+00> : vector<2x8xf32>
    %161 = vector.multi_reduction <add>, %160, %cst_90 [2] : vector<2x8x32xf32> to vector<2x8xf32>
    %162 = vector.shape_cast %161 : vector<2x8xf32> to vector<2x8x1xf32>
    %cst_91 = arith.constant 3.200000e+01 : f32
    %163 = vector.broadcast %cst_91 : f32 to vector<2x8x1xf32>
    %164 = arith.divf %162, %163 : vector<2x8x1xf32>
    %165 = vector.broadcast %157 : vector<2x8x1xf32> to vector<2x8x32xf32>
    %166 = arith.subf %146, %165 : vector<2x8x32xf32>
    %cst_92 = arith.constant 9.99999974E-6 : f32
    %167 = vector.broadcast %cst_92 : f32 to vector<2x8x1xf32>
    %168 = arith.addf %164, %167 : vector<2x8x1xf32>
    %169 = math.rsqrt %168 : vector<2x8x1xf32>
    %170 = vector.broadcast %169 : vector<2x8x1xf32> to vector<2x8x32xf32>
    %171 = arith.mulf %166, %170 : vector<2x8x32xf32>
    %172 = vector.broadcast %151 : vector<2x1x32xf32> to vector<2x8x32xf32>
    %173 = arith.mulf %171, %172 : vector<2x8x32xf32>
    %174 = vector.broadcast %153 : vector<2x1x32xf32> to vector<2x8x32xf32>
    %175 = arith.addf %173, %174 : vector<2x8x32xf32>
    %176 = vector.broadcast %3 : vector<2x8x1xf32> to vector<2x8x32xf32>
    %177 = arith.mulf %175, %176 : vector<2x8x32xf32>
    %c0_93 = arith.constant 0 : index
    %c0_94 = arith.constant 0 : index
    %178 = vector.load %arg15[%c0_93, %c0_94] : memref<32x96xf32, #tpu.memory_space<vmem>>, vector<32x96xf32>
    %c0_95 = arith.constant 0 : index
    %c0_96 = arith.constant 0 : index
    %179 = vector.load %arg16[%c0_95, %c0_96] : memref<1x96xf32, #tpu.memory_space<vmem>>, vector<1x96xf32>
    %c0_97 = arith.constant 0 : index
    %c0_98 = arith.constant 0 : index
    %180 = vector.load %arg17[%c0_97, %c0_98] : memref<32x32xf32, #tpu.memory_space<vmem>>, vector<32x32xf32>
    %c0_99 = arith.constant 0 : index
    %c0_100 = arith.constant 0 : index
    %181 = vector.load %arg18[%c0_99, %c0_100] : memref<1x32xf32, #tpu.memory_space<vmem>>, vector<1x32xf32>
    %c0_101 = arith.constant 0 : index
    %c0_102 = arith.constant 0 : index
    %182 = vector.load %arg19[%c0_101, %c0_102] : memref<32x64xf32, #tpu.memory_space<vmem>>, vector<32x64xf32>
    %c0_103 = arith.constant 0 : index
    %c0_104 = arith.constant 0 : index
    %183 = vector.load %arg20[%c0_103, %c0_104] : memref<1x64xf32, #tpu.memory_space<vmem>>, vector<1x64xf32>
    %c0_105 = arith.constant 0 : index
    %c0_106 = arith.constant 0 : index
    %184 = vector.load %arg21[%c0_105, %c0_106] : memref<96x64xf32, #tpu.memory_space<vmem>>, vector<96x64xf32>
    %c0_107 = arith.constant 0 : index
    %c0_108 = arith.constant 0 : index
    %185 = vector.load %arg22[%c0_107, %c0_108] : memref<1x64xf32, #tpu.memory_space<vmem>>, vector<1x64xf32>
    %c0_109 = arith.constant 0 : index
    %c0_110 = arith.constant 0 : index
    %186 = vector.load %arg23[%c0_109, %c0_110] : memref<192x32xf32, #tpu.memory_space<vmem>>, vector<192x32xf32>
    %c0_111 = arith.constant 0 : index
    %c0_112 = arith.constant 0 : index
    %187 = vector.load %arg24[%c0_111, %c0_112] : memref<1x32xf32, #tpu.memory_space<vmem>>, vector<1x32xf32>
    %c0_113 = arith.constant 0 : index
    %c0_114 = arith.constant 0 : index
    %188 = vector.load %arg25[%c0_113, %c0_114] : memref<32x64xf32, #tpu.memory_space<vmem>>, vector<32x64xf32>
    %c0_115 = arith.constant 0 : index
    %c0_116 = arith.constant 0 : index
    %189 = vector.load %arg26[%c0_115, %c0_116] : memref<1x64xf32, #tpu.memory_space<vmem>>, vector<1x64xf32>
    %190 = vector.shape_cast %177 : vector<2x8x32xf32> to vector<16x32xf32>
    %cst_117 = arith.constant dense<0.000000e+00> : vector<16x96xf32>
    %191 = tpu.matmul %190, %178, %cst_117 {dimension_numbers = #tpu.dot_dimension_numbers<[1], [0], [0], [1], [0, 0, 1, 1], [], []>} : vector<16x32xf32>, vector<32x96xf32>, vector<16x96xf32> -> vector<16x96xf32>
    %192 = vector.broadcast %179 : vector<1x96xf32> to vector<16x96xf32>
    %193 = arith.addf %191, %192 : vector<16x96xf32>
    %194 = vector.shape_cast %193 : vector<16x96xf32> to vector<2x8x96xf32>
    %195 = vector.shape_cast %2 : vector<2x8xf32> to vector<2x1x8xf32>
    %cst_118 = arith.constant 1.000000e+00 : f32
    %196 = vector.broadcast %cst_118 : f32 to vector<2x1x8xf32>
    %197 = arith.subf %195, %196 : vector<2x1x8xf32>
    %cst_119 = arith.constant 1.000000e+09 : f32
    %198 = vector.broadcast %cst_119 : f32 to vector<2x1x8xf32>
    %199 = arith.mulf %197, %198 : vector<2x1x8xf32>
    %200 = vector.extract_strided_slice %194 {offsets = [0, 0, 0], sizes = [2, 8, 16], strides = [1, 1, 1]} : vector<2x8x96xf32> to vector<2x8x16xf32>
    %201 = vector.extract_strided_slice %194 {offsets = [0, 0, 32], sizes = [2, 8, 16], strides = [1, 1, 1]} : vector<2x8x96xf32> to vector<2x8x16xf32>
    %202 = vector.extract_strided_slice %194 {offsets = [0, 0, 64], sizes = [2, 8, 16], strides = [1, 1, 1]} : vector<2x8x96xf32> to vector<2x8x16xf32>
    "tpu.trace_start"() <{level = 10 : i32, message = "bqd,bkd->bqk"}> : () -> ()
    %cst_120 = arith.constant dense<0.000000e+00> : vector<2x8x8xf32>
    %203 = tpu.matmul %200, %201, %cst_120 {dimension_numbers = #tpu.dot_dimension_numbers<[2], [2], [1], [1], [0, 0, 0, 1, 1, 1], [0], [0]>} : vector<2x8x16xf32>, vector<2x8x16xf32>, vector<2x8x8xf32> -> vector<2x8x8xf32>
    "tpu.trace_stop"() : () -> ()
    %cst_121 = arith.constant 2.500000e-01 : f32
    %204 = vector.broadcast %cst_121 : f32 to vector<2x8x8xf32>
    %205 = arith.mulf %203, %204 : vector<2x8x8xf32>
    %206 = vector.broadcast %199 : vector<2x1x8xf32> to vector<2x8x8xf32>
    %207 = arith.addf %205, %206 : vector<2x8x8xf32>
    %cst_122 = arith.constant dense<0xFF800000> : vector<2x8xf32>
    %208 = vector.multi_reduction <maximumf>, %207, %cst_122 [2] : vector<2x8x8xf32> to vector<2x8xf32>
    %209 = vector.shape_cast %208 : vector<2x8xf32> to vector<2x8x1xf32>
    %210 = vector.broadcast %209 : vector<2x8x1xf32> to vector<2x8x8xf32>
    %211 = arith.subf %207, %210 : vector<2x8x8xf32>
    %212 = math.exp %211 : vector<2x8x8xf32>
    %cst_123 = arith.constant dense<0.000000e+00> : vector<2x8xf32>
    %213 = vector.multi_reduction <add>, %212, %cst_123 [2] : vector<2x8x8xf32> to vector<2x8xf32>
    %214 = vector.shape_cast %213 : vector<2x8xf32> to vector<2x8x1xf32>
    %215 = vector.broadcast %214 : vector<2x8x1xf32> to vector<2x8x8xf32>
    %216 = arith.divf %212, %215 : vector<2x8x8xf32>
    "tpu.trace_start"() <{level = 10 : i32, message = "bqk,bkd->bqd"}> : () -> ()
    %cst_124 = arith.constant dense<0.000000e+00> : vector<2x8x16xf32>
    %217 = tpu.matmul %216, %202, %cst_124 {dimension_numbers = #tpu.dot_dimension_numbers<[2], [1], [1], [2], [0, 0, 0, 1, 1, 2], [0], [0]>} : vector<2x8x8xf32>, vector<2x8x16xf32>, vector<2x8x16xf32> -> vector<2x8x16xf32>
    "tpu.trace_stop"() : () -> ()
    %218 = vector.shape_cast %217 : vector<2x8x16xf32> to vector<16x16xf32>
    %219 = vector.extract_strided_slice %180 {offsets = [0, 0], sizes = [16, 32], strides = [1, 1]} : vector<32x32xf32> to vector<16x32xf32>
    %cst_125 = arith.constant dense<0.000000e+00> : vector<16x32xf32>
    %220 = tpu.matmul %218, %219, %cst_125 {dimension_numbers = #tpu.dot_dimension_numbers<[1], [0], [0], [1], [0, 0, 1, 1], [], []>} : vector<16x16xf32>, vector<16x32xf32>, vector<16x32xf32> -> vector<16x32xf32>
    %221 = vector.broadcast %181 : vector<1x32xf32> to vector<16x32xf32>
    %222 = arith.addf %221, %220 : vector<16x32xf32>
    %223 = vector.extract_strided_slice %194 {offsets = [0, 0, 16], sizes = [2, 8, 16], strides = [1, 1, 1]} : vector<2x8x96xf32> to vector<2x8x16xf32>
    %224 = vector.extract_strided_slice %194 {offsets = [0, 0, 48], sizes = [2, 8, 16], strides = [1, 1, 1]} : vector<2x8x96xf32> to vector<2x8x16xf32>
    %225 = vector.extract_strided_slice %194 {offsets = [0, 0, 80], sizes = [2, 8, 16], strides = [1, 1, 1]} : vector<2x8x96xf32> to vector<2x8x16xf32>
    "tpu.trace_start"() <{level = 10 : i32, message = "bqd,bkd->bqk"}> : () -> ()
    %cst_126 = arith.constant dense<0.000000e+00> : vector<2x8x8xf32>
    %226 = tpu.matmul %223, %224, %cst_126 {dimension_numbers = #tpu.dot_dimension_numbers<[2], [2], [1], [1], [0, 0, 0, 1, 1, 1], [0], [0]>} : vector<2x8x16xf32>, vector<2x8x16xf32>, vector<2x8x8xf32> -> vector<2x8x8xf32>
    "tpu.trace_stop"() : () -> ()
    %cst_127 = arith.constant 2.500000e-01 : f32
    %227 = vector.broadcast %cst_127 : f32 to vector<2x8x8xf32>
    %228 = arith.mulf %226, %227 : vector<2x8x8xf32>
    %229 = vector.broadcast %199 : vector<2x1x8xf32> to vector<2x8x8xf32>
    %230 = arith.addf %228, %229 : vector<2x8x8xf32>
    %cst_128 = arith.constant dense<0xFF800000> : vector<2x8xf32>
    %231 = vector.multi_reduction <maximumf>, %230, %cst_128 [2] : vector<2x8x8xf32> to vector<2x8xf32>
    %232 = vector.shape_cast %231 : vector<2x8xf32> to vector<2x8x1xf32>
    %233 = vector.broadcast %232 : vector<2x8x1xf32> to vector<2x8x8xf32>
    %234 = arith.subf %230, %233 : vector<2x8x8xf32>
    %235 = math.exp %234 : vector<2x8x8xf32>
    %cst_129 = arith.constant dense<0.000000e+00> : vector<2x8xf32>
    %236 = vector.multi_reduction <add>, %235, %cst_129 [2] : vector<2x8x8xf32> to vector<2x8xf32>
    %237 = vector.shape_cast %236 : vector<2x8xf32> to vector<2x8x1xf32>
    %238 = vector.broadcast %237 : vector<2x8x1xf32> to vector<2x8x8xf32>
    %239 = arith.divf %235, %238 : vector<2x8x8xf32>
    "tpu.trace_start"() <{level = 10 : i32, message = "bqk,bkd->bqd"}> : () -> ()
    %cst_130 = arith.constant dense<0.000000e+00> : vector<2x8x16xf32>
    %240 = tpu.matmul %239, %225, %cst_130 {dimension_numbers = #tpu.dot_dimension_numbers<[2], [1], [1], [2], [0, 0, 0, 1, 1, 2], [0], [0]>} : vector<2x8x8xf32>, vector<2x8x16xf32>, vector<2x8x16xf32> -> vector<2x8x16xf32>
    "tpu.trace_stop"() : () -> ()
    %241 = vector.shape_cast %240 : vector<2x8x16xf32> to vector<16x16xf32>
    %242 = vector.extract_strided_slice %180 {offsets = [16, 0], sizes = [16, 32], strides = [1, 1]} : vector<32x32xf32> to vector<16x32xf32>
    %cst_131 = arith.constant dense<0.000000e+00> : vector<16x32xf32>
    %243 = tpu.matmul %241, %242, %cst_131 {dimension_numbers = #tpu.dot_dimension_numbers<[1], [0], [0], [1], [0, 0, 1, 1], [], []>} : vector<16x16xf32>, vector<16x32xf32>, vector<16x32xf32> -> vector<16x32xf32>
    %244 = arith.addf %222, %243 : vector<16x32xf32>
    %245 = vector.shape_cast %244 : vector<16x32xf32> to vector<2x8x32xf32>
    %246 = arith.addf %177, %245 : vector<2x8x32xf32>
    %cst_132 = arith.constant dense<0.000000e+00> : vector<2x64xf32>
    %247 = tpu.matmul %1, %182, %cst_132 {dimension_numbers = #tpu.dot_dimension_numbers<[1], [0], [0], [1], [0, 0, 1, 1], [], []>} : vector<2x32xf32>, vector<32x64xf32>, vector<2x64xf32> -> vector<2x64xf32>
    %248 = vector.broadcast %183 : vector<1x64xf32> to vector<2x64xf32>
    %249 = arith.addf %247, %248 : vector<2x64xf32>
    %250 = vector.extract_strided_slice %249 {offsets = [0, 0], sizes = [2, 32], strides = [1, 1]} : vector<2x64xf32> to vector<2x32xf32>
    %251 = vector.shape_cast %250 : vector<2x32xf32> to vector<2x1x32xf32>
    %252 = vector.extract_strided_slice %249 {offsets = [0, 32], sizes = [2, 32], strides = [1, 1]} : vector<2x64xf32> to vector<2x32xf32>
    %253 = vector.shape_cast %252 : vector<2x32xf32> to vector<2x1x32xf32>
    %cst_133 = arith.constant dense<0.000000e+00> : vector<2x8xf32>
    %254 = vector.multi_reduction <add>, %246, %cst_133 [2] : vector<2x8x32xf32> to vector<2x8xf32>
    %255 = vector.shape_cast %254 : vector<2x8xf32> to vector<2x8x1xf32>
    %cst_134 = arith.constant 3.200000e+01 : f32
    %256 = vector.broadcast %cst_134 : f32 to vector<2x8x1xf32>
    %257 = arith.divf %255, %256 : vector<2x8x1xf32>
    %258 = vector.broadcast %257 : vector<2x8x1xf32> to vector<2x8x32xf32>
    %259 = arith.subf %246, %258 : vector<2x8x32xf32>
    %260 = arith.mulf %259, %259 : vector<2x8x32xf32>
    %cst_135 = arith.constant dense<0.000000e+00> : vector<2x8xf32>
    %261 = vector.multi_reduction <add>, %260, %cst_135 [2] : vector<2x8x32xf32> to vector<2x8xf32>
    %262 = vector.shape_cast %261 : vector<2x8xf32> to vector<2x8x1xf32>
    %cst_136 = arith.constant 3.200000e+01 : f32
    %263 = vector.broadcast %cst_136 : f32 to vector<2x8x1xf32>
    %264 = arith.divf %262, %263 : vector<2x8x1xf32>
    %265 = vector.broadcast %257 : vector<2x8x1xf32> to vector<2x8x32xf32>
    %266 = arith.subf %246, %265 : vector<2x8x32xf32>
    %cst_137 = arith.constant 9.99999974E-6 : f32
    %267 = vector.broadcast %cst_137 : f32 to vector<2x8x1xf32>
    %268 = arith.addf %264, %267 : vector<2x8x1xf32>
    %269 = math.rsqrt %268 : vector<2x8x1xf32>
    %270 = vector.broadcast %269 : vector<2x8x1xf32> to vector<2x8x32xf32>
    %271 = arith.mulf %266, %270 : vector<2x8x32xf32>
    %272 = vector.broadcast %251 : vector<2x1x32xf32> to vector<2x8x32xf32>
    %273 = arith.mulf %271, %272 : vector<2x8x32xf32>
    %274 = vector.broadcast %253 : vector<2x1x32xf32> to vector<2x8x32xf32>
    %275 = arith.addf %273, %274 : vector<2x8x32xf32>
    %276 = vector.broadcast %3 : vector<2x8x1xf32> to vector<2x8x32xf32>
    %277 = arith.mulf %275, %276 : vector<2x8x32xf32>
    %cst_138 = arith.constant 0.000000e+00 : f32
    %278 = vector.broadcast %cst_138 : f32 to vector<2x10x32xf32>
    %c0_139 = arith.constant 0 : index
    %c0_140 = arith.constant 0 : index
    %c0_141 = arith.constant 0 : index
    %279 = vector.load %arg28[%c0_139, %c0_140, %c0_141] : memref<2x10x32xf32, #tpu.memory_space<vmem>>, vector<2x10x32xf32>
    tpu.vector_store %arg28[%c0_139, %c0_140, %c0_141], %278 {strides = array<i32>} : memref<2x10x32xf32, #tpu.memory_space<vmem>>, vector<2x10x32xf32>,
    %c0_142 = arith.constant 0 : index
    %c1_143 = arith.constant 1 : index
    %c0_144 = arith.constant 0 : index
    %280 = vector.load %arg28[%c0_142, %c1_143, %c0_144] : memref<2x10x32xf32, #tpu.memory_space<vmem>>, vector<2x8x32xf32>
    tpu.vector_store %arg28[%c0_142, %c1_143, %c0_144], %277 {strides = array<i32>} : memref<2x10x32xf32, #tpu.memory_space<vmem>>, vector<2x8x32xf32>,
    %c0_145 = arith.constant 0 : index
    %c0_146 = arith.constant 0 : index
    %c0_147 = arith.constant 0 : index
    %281 = vector.load %arg28[%c0_145, %c0_146, %c0_147] : memref<2x10x32xf32, #tpu.memory_space<vmem>>, vector<2x8x32xf32>
    %282 = vector.shape_cast %281 : vector<2x8x32xf32> to vector<16x32xf32>
    %283 = vector.extract_strided_slice %184 {offsets = [0, 0], sizes = [32, 64], strides = [1, 1]} : vector<96x64xf32> to vector<32x64xf32>
    %cst_148 = arith.constant dense<0.000000e+00> : vector<16x64xf32>
    %284 = tpu.matmul %282, %283, %cst_148 {dimension_numbers = #tpu.dot_dimension_numbers<[1], [0], [0], [1], [0, 0, 1, 1], [], []>} : vector<16x32xf32>, vector<32x64xf32>, vector<16x64xf32> -> vector<16x64xf32>
    %285 = vector.broadcast %185 : vector<1x64xf32> to vector<16x64xf32>
    %286 = arith.addf %285, %284 : vector<16x64xf32>
    %c0_149 = arith.constant 0 : index
    %c1_150 = arith.constant 1 : index
    %c0_151 = arith.constant 0 : index
    %287 = vector.load %arg28[%c0_149, %c1_150, %c0_151] : memref<2x10x32xf32, #tpu.memory_space<vmem>>, vector<2x8x32xf32>
    %288 = vector.shape_cast %287 : vector<2x8x32xf32> to vector<16x32xf32>
    %289 = vector.extract_strided_slice %184 {offsets = [32, 0], sizes = [32, 64], strides = [1, 1]} : vector<96x64xf32> to vector<32x64xf32>
    %cst_152 = arith.constant dense<0.000000e+00> : vector<16x64xf32>
    %290 = tpu.matmul %288, %289, %cst_152 {dimension_numbers = #tpu.dot_dimension_numbers<[1], [0], [0], [1], [0, 0, 1, 1], [], []>} : vector<16x32xf32>, vector<32x64xf32>, vector<16x64xf32> -> vector<16x64xf32>
    %291 = arith.addf %286, %290 : vector<16x64xf32>
    %c0_153 = arith.constant 0 : index
    %c2_154 = arith.constant 2 : index
    %c0_155 = arith.constant 0 : index
    %292 = vector.load %arg28[%c0_153, %c2_154, %c0_155] : memref<2x10x32xf32, #tpu.memory_space<vmem>>, vector<2x8x32xf32>
    %293 = vector.shape_cast %292 : vector<2x8x32xf32> to vector<16x32xf32>
    %294 = vector.extract_strided_slice %184 {offsets = [64, 0], sizes = [32, 64], strides = [1, 1]} : vector<96x64xf32> to vector<32x64xf32>
    %cst_156 = arith.constant dense<0.000000e+00> : vector<16x64xf32>
    %295 = tpu.matmul %293, %294, %cst_156 {dimension_numbers = #tpu.dot_dimension_numbers<[1], [0], [0], [1], [0, 0, 1, 1], [], []>} : vector<16x32xf32>, vector<32x64xf32>, vector<16x64xf32> -> vector<16x64xf32>
    %296 = arith.addf %291, %295 : vector<16x64xf32>
    %297 = vector.shape_cast %296 : vector<16x64xf32> to vector<2x8x64xf32>
    %cst_157 = arith.constant 0.000000e+00 : f32
    %298 = vector.broadcast %cst_157 : f32 to vector<2x8x64xf32>
    %299 = arith.maximumf %297, %298 : vector<2x8x64xf32>
    %cst_158 = arith.constant 0.000000e+00 : f32
    %300 = vector.broadcast %cst_158 : f32 to vector<2x10x64xf32>
    %c0_159 = arith.constant 0 : index
    %c0_160 = arith.constant 0 : index
    %c0_161 = arith.constant 0 : index
    %301 = vector.load %arg29[%c0_159, %c0_160, %c0_161] : memref<2x10x64xf32, #tpu.memory_space<vmem>>, vector<2x10x64xf32>
    tpu.vector_store %arg29[%c0_159, %c0_160, %c0_161], %300 {strides = array<i32>} : memref<2x10x64xf32, #tpu.memory_space<vmem>>, vector<2x10x64xf32>,
    %c0_162 = arith.constant 0 : index
    %c1_163 = arith.constant 1 : index
    %c0_164 = arith.constant 0 : index
    %302 = vector.load %arg29[%c0_162, %c1_163, %c0_164] : memref<2x10x64xf32, #tpu.memory_space<vmem>>, vector<2x8x64xf32>
    tpu.vector_store %arg29[%c0_162, %c1_163, %c0_164], %299 {strides = array<i32>} : memref<2x10x64xf32, #tpu.memory_space<vmem>>, vector<2x8x64xf32>,
    %c0_165 = arith.constant 0 : index
    %c0_166 = arith.constant 0 : index
    %c0_167 = arith.constant 0 : index
    %303 = vector.load %arg29[%c0_165, %c0_166, %c0_167] : memref<2x10x64xf32, #tpu.memory_space<vmem>>, vector<2x8x64xf32>
    %304 = vector.shape_cast %303 : vector<2x8x64xf32> to vector<16x64xf32>
    %305 = vector.extract_strided_slice %186 {offsets = [0, 0], sizes = [64, 32], strides = [1, 1]} : vector<192x32xf32> to vector<64x32xf32>
    %cst_168 = arith.constant dense<0.000000e+00> : vector<16x32xf32>
    %306 = tpu.matmul %304, %305, %cst_168 {dimension_numbers = #tpu.dot_dimension_numbers<[1], [0], [0], [1], [0, 0, 1, 1], [], []>} : vector<16x64xf32>, vector<64x32xf32>, vector<16x32xf32> -> vector<16x32xf32>
    %307 = vector.broadcast %187 : vector<1x32xf32> to vector<16x32xf32>
    %308 = arith.addf %307, %306 : vector<16x32xf32>
    %c0_169 = arith.constant 0 : index
    %c1_170 = arith.constant 1 : index
    %c0_171 = arith.constant 0 : index
    %309 = vector.load %arg29[%c0_169, %c1_170, %c0_171] : memref<2x10x64xf32, #tpu.memory_space<vmem>>, vector<2x8x64xf32>
    %310 = vector.shape_cast %309 : vector<2x8x64xf32> to vector<16x64xf32>
    %311 = vector.extract_strided_slice %186 {offsets = [64, 0], sizes = [64, 32], strides = [1, 1]} : vector<192x32xf32> to vector<64x32xf32>
    %cst_172 = arith.constant dense<0.000000e+00> : vector<16x32xf32>
    %312 = tpu.matmul %310, %311, %cst_172 {dimension_numbers = #tpu.dot_dimension_numbers<[1], [0], [0], [1], [0, 0, 1, 1], [], []>} : vector<16x64xf32>, vector<64x32xf32>, vector<16x32xf32> -> vector<16x32xf32>
    %313 = arith.addf %308, %312 : vector<16x32xf32>
    %c0_173 = arith.constant 0 : index
    %c2_174 = arith.constant 2 : index
    %c0_175 = arith.constant 0 : index
    %314 = vector.load %arg29[%c0_173, %c2_174, %c0_175] : memref<2x10x64xf32, #tpu.memory_space<vmem>>, vector<2x8x64xf32>
    %315 = vector.shape_cast %314 : vector<2x8x64xf32> to vector<16x64xf32>
    %316 = vector.extract_strided_slice %186 {offsets = [128, 0], sizes = [64, 32], strides = [1, 1]} : vector<192x32xf32> to vector<64x32xf32>
    %cst_176 = arith.constant dense<0.000000e+00> : vector<16x32xf32>
    %317 = tpu.matmul %315, %316, %cst_176 {dimension_numbers = #tpu.dot_dimension_numbers<[1], [0], [0], [1], [0, 0, 1, 1], [], []>} : vector<16x64xf32>, vector<64x32xf32>, vector<16x32xf32> -> vector<16x32xf32>
    %318 = arith.addf %313, %317 : vector<16x32xf32>
    %319 = vector.shape_cast %318 : vector<16x32xf32> to vector<2x8x32xf32>
    %320 = arith.addf %277, %319 : vector<2x8x32xf32>
    %cst_177 = arith.constant dense<0.000000e+00> : vector<2x64xf32>
    %321 = tpu.matmul %1, %188, %cst_177 {dimension_numbers = #tpu.dot_dimension_numbers<[1], [0], [0], [1], [0, 0, 1, 1], [], []>} : vector<2x32xf32>, vector<32x64xf32>, vector<2x64xf32> -> vector<2x64xf32>
    %322 = vector.broadcast %189 : vector<1x64xf32> to vector<2x64xf32>
    %323 = arith.addf %321, %322 : vector<2x64xf32>
    %324 = vector.extract_strided_slice %323 {offsets = [0, 0], sizes = [2, 32], strides = [1, 1]} : vector<2x64xf32> to vector<2x32xf32>
    %325 = vector.shape_cast %324 : vector<2x32xf32> to vector<2x1x32xf32>
    %326 = vector.extract_strided_slice %323 {offsets = [0, 32], sizes = [2, 32], strides = [1, 1]} : vector<2x64xf32> to vector<2x32xf32>
    %327 = vector.shape_cast %326 : vector<2x32xf32> to vector<2x1x32xf32>
    %cst_178 = arith.constant dense<0.000000e+00> : vector<2x8xf32>
    %328 = vector.multi_reduction <add>, %320, %cst_178 [2] : vector<2x8x32xf32> to vector<2x8xf32>
    %329 = vector.shape_cast %328 : vector<2x8xf32> to vector<2x8x1xf32>
    %cst_179 = arith.constant 3.200000e+01 : f32
    %330 = vector.broadcast %cst_179 : f32 to vector<2x8x1xf32>
    %331 = arith.divf %329, %330 : vector<2x8x1xf32>
    %332 = vector.broadcast %331 : vector<2x8x1xf32> to vector<2x8x32xf32>
    %333 = arith.subf %320, %332 : vector<2x8x32xf32>
    %334 = arith.mulf %333, %333 : vector<2x8x32xf32>
    %cst_180 = arith.constant dense<0.000000e+00> : vector<2x8xf32>
    %335 = vector.multi_reduction <add>, %334, %cst_180 [2] : vector<2x8x32xf32> to vector<2x8xf32>
    %336 = vector.shape_cast %335 : vector<2x8xf32> to vector<2x8x1xf32>
    %cst_181 = arith.constant 3.200000e+01 : f32
    %337 = vector.broadcast %cst_181 : f32 to vector<2x8x1xf32>
    %338 = arith.divf %336, %337 : vector<2x8x1xf32>
    %339 = vector.broadcast %331 : vector<2x8x1xf32> to vector<2x8x32xf32>
    %340 = arith.subf %320, %339 : vector<2x8x32xf32>
    %cst_182 = arith.constant 9.99999974E-6 : f32
    %341 = vector.broadcast %cst_182 : f32 to vector<2x8x1xf32>
    %342 = arith.addf %338, %341 : vector<2x8x1xf32>
    %343 = math.rsqrt %342 : vector<2x8x1xf32>
    %344 = vector.broadcast %343 : vector<2x8x1xf32> to vector<2x8x32xf32>
    %345 = arith.mulf %340, %344 : vector<2x8x32xf32>
    %346 = vector.broadcast %325 : vector<2x1x32xf32> to vector<2x8x32xf32>
    %347 = arith.mulf %345, %346 : vector<2x8x32xf32>
    %348 = vector.broadcast %327 : vector<2x1x32xf32> to vector<2x8x32xf32>
    %349 = arith.addf %347, %348 : vector<2x8x32xf32>
    %350 = vector.broadcast %3 : vector<2x8x1xf32> to vector<2x8x32xf32>
    %351 = arith.mulf %349, %350 : vector<2x8x32xf32>
    %c0_183 = arith.constant 0 : index
    %c0_184 = arith.constant 0 : index
    %c0_185 = arith.constant 0 : index
    %352 = vector.load %arg27[%c0_183, %c0_184, %c0_185] : memref<2x8x32xf32, #tpu.memory_space<vmem>>, vector<2x8x32xf32>
    tpu.vector_store %arg27[%c0_183, %c0_184, %c0_185], %351 {strides = array<i32>} : memref<2x8x32xf32, #tpu.memory_space<vmem>>, vector<2x8x32xf32>,
    return
  }
}

module attributes {stable_mosaic.version = 11 : i64} {
  func.func @kernel(%arg0: memref<2x8x32xf32, #tpu.memory_space<vmem>>, %arg1: memref<16x1xf32, #tpu.memory_space<vmem>>, %arg2: memref<2x8x32xf32, #tpu.memory_space<vmem>>, %arg3: memref<2x8x32xf32, #tpu.memory_space<vmem>>, %arg4: memref<96x32xf32, #tpu.memory_space<vmem>>, %arg5: memref<1x32xf32, #tpu.memory_space<vmem>>, %arg6: memref<1x32xf32, #tpu.memory_space<vmem>>, %arg7: memref<1x32xf32, #tpu.memory_space<vmem>>, %arg8: memref<96x32xf32, #tpu.memory_space<vmem>>, %arg9: memref<1x32xf32, #tpu.memory_space<vmem>>, %arg10: memref<1x32xf32, #tpu.memory_space<vmem>>, %arg11: memref<1x32xf32, #tpu.memory_space<vmem>>, %arg12: memref<32x1xf32, #tpu.memory_space<vmem>>, %arg13: memref<1x1xf32, #tpu.memory_space<vmem>>, %arg14: memref<96x32xf32, #tpu.memory_space<vmem>>, %arg15: memref<1x32xf32, #tpu.memory_space<vmem>>, %arg16: memref<1x32xf32, #tpu.memory_space<vmem>>, %arg17: memref<1x32xf32, #tpu.memory_space<vmem>>, %arg18: memref<96x32xf32, #tpu.memory_space<vmem>>, %arg19: memref<1x32xf32, #tpu.memory_space<vmem>>, %arg20: memref<1x32xf32, #tpu.memory_space<vmem>>, %arg21: memref<1x32xf32, #tpu.memory_space<vmem>>, %arg22: memref<32x1xf32, #tpu.memory_space<vmem>>, %arg23: memref<1x1xf32, #tpu.memory_space<vmem>>, %arg24: memref<96x32xf32, #tpu.memory_space<vmem>>, %arg25: memref<1x32xf32, #tpu.memory_space<vmem>>, %arg26: memref<1x32xf32, #tpu.memory_space<vmem>>, %arg27: memref<1x32xf32, #tpu.memory_space<vmem>>, %arg28: memref<96x32xf32, #tpu.memory_space<vmem>>, %arg29: memref<1x32xf32, #tpu.memory_space<vmem>>, %arg30: memref<1x32xf32, #tpu.memory_space<vmem>>, %arg31: memref<1x32xf32, #tpu.memory_space<vmem>>, %arg32: memref<32x1xf32, #tpu.memory_space<vmem>>, %arg33: memref<1x1xf32, #tpu.memory_space<vmem>>, %arg34: memref<2x8x32xf32, #tpu.memory_space<vmem>>, %arg35: memref<16x1xf32, #tpu.memory_space<vmem>>, %arg36: memref<16x1xf32, #tpu.memory_space<vmem>>, %arg37: memref<16x1xf32, #tpu.memory_space<vmem>>, %arg38: memref<2x10x32xf32, #tpu.memory_space<vmem>>, %arg39: memref<2x10x32xf32, #tpu.memory_space<vmem>>) attributes {dimension_semantics = [], scalar_prefetch = 0 : i64, scratch_operands = 2 : i64, tpu.core_type = #tpu.core_type<tc>} {
    %c0 = arith.constant 0 : index
    %c0_0 = arith.constant 0 : index
    %c0_1 = arith.constant 0 : index
    %0 = vector.load %arg0[%c0, %c0_0, %c0_1] : memref<2x8x32xf32, #tpu.memory_space<vmem>>, vector<2x8x32xf32>
    %c0_2 = arith.constant 0 : index
    %c0_3 = arith.constant 0 : index
    %1 = vector.load %arg1[%c0_2, %c0_3] : memref<16x1xf32, #tpu.memory_space<vmem>>, vector<16x1xf32>
    %c0_4 = arith.constant 0 : index
    %c0_5 = arith.constant 0 : index
    %2 = vector.load %arg4[%c0_4, %c0_5] : memref<96x32xf32, #tpu.memory_space<vmem>>, vector<96x32xf32>
    %c0_6 = arith.constant 0 : index
    %c0_7 = arith.constant 0 : index
    %3 = vector.load %arg5[%c0_6, %c0_7] : memref<1x32xf32, #tpu.memory_space<vmem>>, vector<1x32xf32>
    %c0_8 = arith.constant 0 : index
    %c0_9 = arith.constant 0 : index
    %4 = vector.load %arg6[%c0_8, %c0_9] : memref<1x32xf32, #tpu.memory_space<vmem>>, vector<1x32xf32>
    %c0_10 = arith.constant 0 : index
    %c0_11 = arith.constant 0 : index
    %5 = vector.load %arg7[%c0_10, %c0_11] : memref<1x32xf32, #tpu.memory_space<vmem>>, vector<1x32xf32>
    %c0_12 = arith.constant 0 : index
    %c0_13 = arith.constant 0 : index
    %6 = vector.load %arg8[%c0_12, %c0_13] : memref<96x32xf32, #tpu.memory_space<vmem>>, vector<96x32xf32>
    %c0_14 = arith.constant 0 : index
    %c0_15 = arith.constant 0 : index
    %7 = vector.load %arg9[%c0_14, %c0_15] : memref<1x32xf32, #tpu.memory_space<vmem>>, vector<1x32xf32>
    %c0_16 = arith.constant 0 : index
    %c0_17 = arith.constant 0 : index
    %8 = vector.load %arg10[%c0_16, %c0_17] : memref<1x32xf32, #tpu.memory_space<vmem>>, vector<1x32xf32>
    %c0_18 = arith.constant 0 : index
    %c0_19 = arith.constant 0 : index
    %9 = vector.load %arg11[%c0_18, %c0_19] : memref<1x32xf32, #tpu.memory_space<vmem>>, vector<1x32xf32>
    %c0_20 = arith.constant 0 : index
    %c0_21 = arith.constant 0 : index
    %10 = vector.load %arg12[%c0_20, %c0_21] : memref<32x1xf32, #tpu.memory_space<vmem>>, vector<32x1xf32>
    %c0_22 = arith.constant 0 : index
    %c0_23 = arith.constant 0 : index
    %11 = vector.load %arg13[%c0_22, %c0_23] : memref<1x1xf32, #tpu.memory_space<vmem>>, vector<1x1xf32>
    %cst = arith.constant 0.000000e+00 : f32
    %12 = vector.broadcast %cst : f32 to vector<2x10x32xf32>
    %c0_24 = arith.constant 0 : index
    %c0_25 = arith.constant 0 : index
    %c0_26 = arith.constant 0 : index
    %13 = vector.load %arg38[%c0_24, %c0_25, %c0_26] : memref<2x10x32xf32, #tpu.memory_space<vmem>>, vector<2x10x32xf32>
    tpu.vector_store %arg38[%c0_24, %c0_25, %c0_26], %12 {strides = array<i32>} : memref<2x10x32xf32, #tpu.memory_space<vmem>>, vector<2x10x32xf32>,
    %c0_27 = arith.constant 0 : index
    %c1 = arith.constant 1 : index
    %c0_28 = arith.constant 0 : index
    %14 = vector.load %arg38[%c0_27, %c1, %c0_28] : memref<2x10x32xf32, #tpu.memory_space<vmem>>, vector<2x8x32xf32>
    tpu.vector_store %arg38[%c0_27, %c1, %c0_28], %0 {strides = array<i32>} : memref<2x10x32xf32, #tpu.memory_space<vmem>>, vector<2x8x32xf32>,
    %c0_29 = arith.constant 0 : index
    %c0_30 = arith.constant 0 : index
    %c0_31 = arith.constant 0 : index
    %15 = vector.load %arg38[%c0_29, %c0_30, %c0_31] : memref<2x10x32xf32, #tpu.memory_space<vmem>>, vector<2x8x32xf32>
    %16 = vector.shape_cast %15 : vector<2x8x32xf32> to vector<16x32xf32>
    %17 = vector.extract_strided_slice %2 {offsets = [0, 0], sizes = [32, 32], strides = [1, 1]} : vector<96x32xf32> to vector<32x32xf32>
    %cst_32 = arith.constant dense<0.000000e+00> : vector<16x32xf32>
    %18 = tpu.matmul %16, %17, %cst_32 {dimension_numbers = #tpu.dot_dimension_numbers<[1], [0], [0], [1], [0, 0, 1, 1], [], []>} : vector<16x32xf32>, vector<32x32xf32>, vector<16x32xf32> -> vector<16x32xf32>
    %19 = vector.broadcast %3 : vector<1x32xf32> to vector<16x32xf32>
    %20 = arith.addf %19, %18 : vector<16x32xf32>
    %c0_33 = arith.constant 0 : index
    %c1_34 = arith.constant 1 : index
    %c0_35 = arith.constant 0 : index
    %21 = vector.load %arg38[%c0_33, %c1_34, %c0_35] : memref<2x10x32xf32, #tpu.memory_space<vmem>>, vector<2x8x32xf32>
    %22 = vector.shape_cast %21 : vector<2x8x32xf32> to vector<16x32xf32>
    %23 = vector.extract_strided_slice %2 {offsets = [32, 0], sizes = [32, 32], strides = [1, 1]} : vector<96x32xf32> to vector<32x32xf32>
    %cst_36 = arith.constant dense<0.000000e+00> : vector<16x32xf32>
    %24 = tpu.matmul %22, %23, %cst_36 {dimension_numbers = #tpu.dot_dimension_numbers<[1], [0], [0], [1], [0, 0, 1, 1], [], []>} : vector<16x32xf32>, vector<32x32xf32>, vector<16x32xf32> -> vector<16x32xf32>
    %25 = arith.addf %20, %24 : vector<16x32xf32>
    %c0_37 = arith.constant 0 : index
    %c2 = arith.constant 2 : index
    %c0_38 = arith.constant 0 : index
    %26 = vector.load %arg38[%c0_37, %c2, %c0_38] : memref<2x10x32xf32, #tpu.memory_space<vmem>>, vector<2x8x32xf32>
    %27 = vector.shape_cast %26 : vector<2x8x32xf32> to vector<16x32xf32>
    %28 = vector.extract_strided_slice %2 {offsets = [64, 0], sizes = [32, 32], strides = [1, 1]} : vector<96x32xf32> to vector<32x32xf32>
    %cst_39 = arith.constant dense<0.000000e+00> : vector<16x32xf32>
    %29 = tpu.matmul %27, %28, %cst_39 {dimension_numbers = #tpu.dot_dimension_numbers<[1], [0], [0], [1], [0, 0, 1, 1], [], []>} : vector<16x32xf32>, vector<32x32xf32>, vector<16x32xf32> -> vector<16x32xf32>
    %30 = arith.addf %25, %29 : vector<16x32xf32>
    %31 = vector.shape_cast %30 : vector<16x32xf32> to vector<2x8x32xf32>
    %cst_40 = arith.constant 0.000000e+00 : f32
    %32 = vector.broadcast %cst_40 : f32 to vector<2x8x32xf32>
    %33 = arith.maximumf %31, %32 : vector<2x8x32xf32>
    %34 = vector.shape_cast %4 : vector<1x32xf32> to vector<1x1x32xf32>
    %35 = vector.shape_cast %5 : vector<1x32xf32> to vector<1x1x32xf32>
    %cst_41 = arith.constant dense<0.000000e+00> : vector<2x8xf32>
    %36 = vector.multi_reduction <add>, %33, %cst_41 [2] : vector<2x8x32xf32> to vector<2x8xf32>
    %37 = vector.shape_cast %36 : vector<2x8xf32> to vector<2x8x1xf32>
    %cst_42 = arith.constant 3.200000e+01 : f32
    %38 = vector.broadcast %cst_42 : f32 to vector<2x8x1xf32>
    %39 = arith.divf %37, %38 : vector<2x8x1xf32>
    %40 = vector.broadcast %39 : vector<2x8x1xf32> to vector<2x8x32xf32>
    %41 = arith.subf %33, %40 : vector<2x8x32xf32>
    %42 = arith.mulf %41, %41 : vector<2x8x32xf32>
    %cst_43 = arith.constant dense<0.000000e+00> : vector<2x8xf32>
    %43 = vector.multi_reduction <add>, %42, %cst_43 [2] : vector<2x8x32xf32> to vector<2x8xf32>
    %44 = vector.shape_cast %43 : vector<2x8xf32> to vector<2x8x1xf32>
    %cst_44 = arith.constant 3.200000e+01 : f32
    %45 = vector.broadcast %cst_44 : f32 to vector<2x8x1xf32>
    %46 = arith.divf %44, %45 : vector<2x8x1xf32>
    %47 = vector.broadcast %39 : vector<2x8x1xf32> to vector<2x8x32xf32>
    %48 = arith.subf %33, %47 : vector<2x8x32xf32>
    %cst_45 = arith.constant 9.99999974E-6 : f32
    %49 = vector.broadcast %cst_45 : f32 to vector<2x8x1xf32>
    %50 = arith.addf %46, %49 : vector<2x8x1xf32>
    %51 = math.rsqrt %50 : vector<2x8x1xf32>
    %52 = vector.broadcast %51 : vector<2x8x1xf32> to vector<2x8x32xf32>
    %53 = arith.mulf %48, %52 : vector<2x8x32xf32>
    %54 = vector.broadcast %34 : vector<1x1x32xf32> to vector<2x8x32xf32>
    %55 = arith.mulf %53, %54 : vector<2x8x32xf32>
    %56 = vector.broadcast %35 : vector<1x1x32xf32> to vector<2x8x32xf32>
    %57 = arith.addf %55, %56 : vector<2x8x32xf32>
    %cst_46 = arith.constant 0.000000e+00 : f32
    %58 = vector.broadcast %cst_46 : f32 to vector<2x10x32xf32>
    %c0_47 = arith.constant 0 : index
    %c0_48 = arith.constant 0 : index
    %c0_49 = arith.constant 0 : index
    %59 = vector.load %arg39[%c0_47, %c0_48, %c0_49] : memref<2x10x32xf32, #tpu.memory_space<vmem>>, vector<2x10x32xf32>
    tpu.vector_store %arg39[%c0_47, %c0_48, %c0_49], %58 {strides = array<i32>} : memref<2x10x32xf32, #tpu.memory_space<vmem>>, vector<2x10x32xf32>,
    %c0_50 = arith.constant 0 : index
    %c1_51 = arith.constant 1 : index
    %c0_52 = arith.constant 0 : index
    %60 = vector.load %arg39[%c0_50, %c1_51, %c0_52] : memref<2x10x32xf32, #tpu.memory_space<vmem>>, vector<2x8x32xf32>
    tpu.vector_store %arg39[%c0_50, %c1_51, %c0_52], %57 {strides = array<i32>} : memref<2x10x32xf32, #tpu.memory_space<vmem>>, vector<2x8x32xf32>,
    %c0_53 = arith.constant 0 : index
    %c0_54 = arith.constant 0 : index
    %c0_55 = arith.constant 0 : index
    %61 = vector.load %arg39[%c0_53, %c0_54, %c0_55] : memref<2x10x32xf32, #tpu.memory_space<vmem>>, vector<2x8x32xf32>
    %62 = vector.shape_cast %61 : vector<2x8x32xf32> to vector<16x32xf32>
    %63 = vector.extract_strided_slice %6 {offsets = [0, 0], sizes = [32, 32], strides = [1, 1]} : vector<96x32xf32> to vector<32x32xf32>
    %cst_56 = arith.constant dense<0.000000e+00> : vector<16x32xf32>
    %64 = tpu.matmul %62, %63, %cst_56 {dimension_numbers = #tpu.dot_dimension_numbers<[1], [0], [0], [1], [0, 0, 1, 1], [], []>} : vector<16x32xf32>, vector<32x32xf32>, vector<16x32xf32> -> vector<16x32xf32>
    %65 = vector.broadcast %7 : vector<1x32xf32> to vector<16x32xf32>
    %66 = arith.addf %65, %64 : vector<16x32xf32>
    %c0_57 = arith.constant 0 : index
    %c1_58 = arith.constant 1 : index
    %c0_59 = arith.constant 0 : index
    %67 = vector.load %arg39[%c0_57, %c1_58, %c0_59] : memref<2x10x32xf32, #tpu.memory_space<vmem>>, vector<2x8x32xf32>
    %68 = vector.shape_cast %67 : vector<2x8x32xf32> to vector<16x32xf32>
    %69 = vector.extract_strided_slice %6 {offsets = [32, 0], sizes = [32, 32], strides = [1, 1]} : vector<96x32xf32> to vector<32x32xf32>
    %cst_60 = arith.constant dense<0.000000e+00> : vector<16x32xf32>
    %70 = tpu.matmul %68, %69, %cst_60 {dimension_numbers = #tpu.dot_dimension_numbers<[1], [0], [0], [1], [0, 0, 1, 1], [], []>} : vector<16x32xf32>, vector<32x32xf32>, vector<16x32xf32> -> vector<16x32xf32>
    %71 = arith.addf %66, %70 : vector<16x32xf32>
    %c0_61 = arith.constant 0 : index
    %c2_62 = arith.constant 2 : index
    %c0_63 = arith.constant 0 : index
    %72 = vector.load %arg39[%c0_61, %c2_62, %c0_63] : memref<2x10x32xf32, #tpu.memory_space<vmem>>, vector<2x8x32xf32>
    %73 = vector.shape_cast %72 : vector<2x8x32xf32> to vector<16x32xf32>
    %74 = vector.extract_strided_slice %6 {offsets = [64, 0], sizes = [32, 32], strides = [1, 1]} : vector<96x32xf32> to vector<32x32xf32>
    %cst_64 = arith.constant dense<0.000000e+00> : vector<16x32xf32>
    %75 = tpu.matmul %73, %74, %cst_64 {dimension_numbers = #tpu.dot_dimension_numbers<[1], [0], [0], [1], [0, 0, 1, 1], [], []>} : vector<16x32xf32>, vector<32x32xf32>, vector<16x32xf32> -> vector<16x32xf32>
    %76 = arith.addf %71, %75 : vector<16x32xf32>
    %77 = vector.shape_cast %76 : vector<16x32xf32> to vector<2x8x32xf32>
    %cst_65 = arith.constant 0.000000e+00 : f32
    %78 = vector.broadcast %cst_65 : f32 to vector<2x8x32xf32>
    %79 = arith.maximumf %77, %78 : vector<2x8x32xf32>
    %80 = vector.shape_cast %8 : vector<1x32xf32> to vector<1x1x32xf32>
    %81 = vector.shape_cast %9 : vector<1x32xf32> to vector<1x1x32xf32>
    %cst_66 = arith.constant dense<0.000000e+00> : vector<2x8xf32>
    %82 = vector.multi_reduction <add>, %79, %cst_66 [2] : vector<2x8x32xf32> to vector<2x8xf32>
    %83 = vector.shape_cast %82 : vector<2x8xf32> to vector<2x8x1xf32>
    %cst_67 = arith.constant 3.200000e+01 : f32
    %84 = vector.broadcast %cst_67 : f32 to vector<2x8x1xf32>
    %85 = arith.divf %83, %84 : vector<2x8x1xf32>
    %86 = vector.broadcast %85 : vector<2x8x1xf32> to vector<2x8x32xf32>
    %87 = arith.subf %79, %86 : vector<2x8x32xf32>
    %88 = arith.mulf %87, %87 : vector<2x8x32xf32>
    %cst_68 = arith.constant dense<0.000000e+00> : vector<2x8xf32>
    %89 = vector.multi_reduction <add>, %88, %cst_68 [2] : vector<2x8x32xf32> to vector<2x8xf32>
    %90 = vector.shape_cast %89 : vector<2x8xf32> to vector<2x8x1xf32>
    %cst_69 = arith.constant 3.200000e+01 : f32
    %91 = vector.broadcast %cst_69 : f32 to vector<2x8x1xf32>
    %92 = arith.divf %90, %91 : vector<2x8x1xf32>
    %93 = vector.broadcast %85 : vector<2x8x1xf32> to vector<2x8x32xf32>
    %94 = arith.subf %79, %93 : vector<2x8x32xf32>
    %cst_70 = arith.constant 9.99999974E-6 : f32
    %95 = vector.broadcast %cst_70 : f32 to vector<2x8x1xf32>
    %96 = arith.addf %92, %95 : vector<2x8x1xf32>
    %97 = math.rsqrt %96 : vector<2x8x1xf32>
    %98 = vector.broadcast %97 : vector<2x8x1xf32> to vector<2x8x32xf32>
    %99 = arith.mulf %94, %98 : vector<2x8x32xf32>
    %100 = vector.broadcast %80 : vector<1x1x32xf32> to vector<2x8x32xf32>
    %101 = arith.mulf %99, %100 : vector<2x8x32xf32>
    %102 = vector.broadcast %81 : vector<1x1x32xf32> to vector<2x8x32xf32>
    %103 = arith.addf %101, %102 : vector<2x8x32xf32>
    %104 = vector.shape_cast %103 : vector<2x8x32xf32> to vector<16x32xf32>
    %cst_71 = arith.constant dense<0.000000e+00> : vector<16x1xf32>
    %105 = tpu.matmul %104, %10, %cst_71 {dimension_numbers = #tpu.dot_dimension_numbers<[1], [0], [0], [1], [0, 0, 1, 1], [], []>} : vector<16x32xf32>, vector<32x1xf32>, vector<16x1xf32> -> vector<16x1xf32>
    %106 = vector.broadcast %11 : vector<1x1xf32> to vector<16x1xf32>
    %107 = arith.addf %105, %106 : vector<16x1xf32>
    %108 = arith.mulf %107, %1 : vector<16x1xf32>
    %c0_72 = arith.constant 0 : index
    %c0_73 = arith.constant 0 : index
    %109 = vector.load %arg35[%c0_72, %c0_73] : memref<16x1xf32, #tpu.memory_space<vmem>>, vector<16x1xf32>
    tpu.vector_store %arg35[%c0_72, %c0_73], %108 {strides = array<i32>} : memref<16x1xf32, #tpu.memory_space<vmem>>, vector<16x1xf32>,
    %c0_74 = arith.constant 0 : index
    %c0_75 = arith.constant 0 : index
    %110 = vector.load %arg14[%c0_74, %c0_75] : memref<96x32xf32, #tpu.memory_space<vmem>>, vector<96x32xf32>
    %c0_76 = arith.constant 0 : index
    %c0_77 = arith.constant 0 : index
    %111 = vector.load %arg15[%c0_76, %c0_77] : memref<1x32xf32, #tpu.memory_space<vmem>>, vector<1x32xf32>
    %c0_78 = arith.constant 0 : index
    %c0_79 = arith.constant 0 : index
    %112 = vector.load %arg16[%c0_78, %c0_79] : memref<1x32xf32, #tpu.memory_space<vmem>>, vector<1x32xf32>
    %c0_80 = arith.constant 0 : index
    %c0_81 = arith.constant 0 : index
    %113 = vector.load %arg17[%c0_80, %c0_81] : memref<1x32xf32, #tpu.memory_space<vmem>>, vector<1x32xf32>
    %c0_82 = arith.constant 0 : index
    %c0_83 = arith.constant 0 : index
    %114 = vector.load %arg18[%c0_82, %c0_83] : memref<96x32xf32, #tpu.memory_space<vmem>>, vector<96x32xf32>
    %c0_84 = arith.constant 0 : index
    %c0_85 = arith.constant 0 : index
    %115 = vector.load %arg19[%c0_84, %c0_85] : memref<1x32xf32, #tpu.memory_space<vmem>>, vector<1x32xf32>
    %c0_86 = arith.constant 0 : index
    %c0_87 = arith.constant 0 : index
    %116 = vector.load %arg20[%c0_86, %c0_87] : memref<1x32xf32, #tpu.memory_space<vmem>>, vector<1x32xf32>
    %c0_88 = arith.constant 0 : index
    %c0_89 = arith.constant 0 : index
    %117 = vector.load %arg21[%c0_88, %c0_89] : memref<1x32xf32, #tpu.memory_space<vmem>>, vector<1x32xf32>
    %c0_90 = arith.constant 0 : index
    %c0_91 = arith.constant 0 : index
    %118 = vector.load %arg22[%c0_90, %c0_91] : memref<32x1xf32, #tpu.memory_space<vmem>>, vector<32x1xf32>
    %c0_92 = arith.constant 0 : index
    %c0_93 = arith.constant 0 : index
    %119 = vector.load %arg23[%c0_92, %c0_93] : memref<1x1xf32, #tpu.memory_space<vmem>>, vector<1x1xf32>
    %cst_94 = arith.constant 0.000000e+00 : f32
    %120 = vector.broadcast %cst_94 : f32 to vector<2x10x32xf32>
    %c0_95 = arith.constant 0 : index
    %c0_96 = arith.constant 0 : index
    %c0_97 = arith.constant 0 : index
    %121 = vector.load %arg38[%c0_95, %c0_96, %c0_97] : memref<2x10x32xf32, #tpu.memory_space<vmem>>, vector<2x10x32xf32>
    tpu.vector_store %arg38[%c0_95, %c0_96, %c0_97], %120 {strides = array<i32>} : memref<2x10x32xf32, #tpu.memory_space<vmem>>, vector<2x10x32xf32>,
    %c0_98 = arith.constant 0 : index
    %c1_99 = arith.constant 1 : index
    %c0_100 = arith.constant 0 : index
    %122 = vector.load %arg38[%c0_98, %c1_99, %c0_100] : memref<2x10x32xf32, #tpu.memory_space<vmem>>, vector<2x8x32xf32>
    tpu.vector_store %arg38[%c0_98, %c1_99, %c0_100], %0 {strides = array<i32>} : memref<2x10x32xf32, #tpu.memory_space<vmem>>, vector<2x8x32xf32>,
    %c0_101 = arith.constant 0 : index
    %c0_102 = arith.constant 0 : index
    %c0_103 = arith.constant 0 : index
    %123 = vector.load %arg38[%c0_101, %c0_102, %c0_103] : memref<2x10x32xf32, #tpu.memory_space<vmem>>, vector<2x8x32xf32>
    %124 = vector.shape_cast %123 : vector<2x8x32xf32> to vector<16x32xf32>
    %125 = vector.extract_strided_slice %110 {offsets = [0, 0], sizes = [32, 32], strides = [1, 1]} : vector<96x32xf32> to vector<32x32xf32>
    %cst_104 = arith.constant dense<0.000000e+00> : vector<16x32xf32>
    %126 = tpu.matmul %124, %125, %cst_104 {dimension_numbers = #tpu.dot_dimension_numbers<[1], [0], [0], [1], [0, 0, 1, 1], [], []>} : vector<16x32xf32>, vector<32x32xf32>, vector<16x32xf32> -> vector<16x32xf32>
    %127 = vector.broadcast %111 : vector<1x32xf32> to vector<16x32xf32>
    %128 = arith.addf %127, %126 : vector<16x32xf32>
    %c0_105 = arith.constant 0 : index
    %c1_106 = arith.constant 1 : index
    %c0_107 = arith.constant 0 : index
    %129 = vector.load %arg38[%c0_105, %c1_106, %c0_107] : memref<2x10x32xf32, #tpu.memory_space<vmem>>, vector<2x8x32xf32>
    %130 = vector.shape_cast %129 : vector<2x8x32xf32> to vector<16x32xf32>
    %131 = vector.extract_strided_slice %110 {offsets = [32, 0], sizes = [32, 32], strides = [1, 1]} : vector<96x32xf32> to vector<32x32xf32>
    %cst_108 = arith.constant dense<0.000000e+00> : vector<16x32xf32>
    %132 = tpu.matmul %130, %131, %cst_108 {dimension_numbers = #tpu.dot_dimension_numbers<[1], [0], [0], [1], [0, 0, 1, 1], [], []>} : vector<16x32xf32>, vector<32x32xf32>, vector<16x32xf32> -> vector<16x32xf32>
    %133 = arith.addf %128, %132 : vector<16x32xf32>
    %c0_109 = arith.constant 0 : index
    %c2_110 = arith.constant 2 : index
    %c0_111 = arith.constant 0 : index
    %134 = vector.load %arg38[%c0_109, %c2_110, %c0_111] : memref<2x10x32xf32, #tpu.memory_space<vmem>>, vector<2x8x32xf32>
    %135 = vector.shape_cast %134 : vector<2x8x32xf32> to vector<16x32xf32>
    %136 = vector.extract_strided_slice %110 {offsets = [64, 0], sizes = [32, 32], strides = [1, 1]} : vector<96x32xf32> to vector<32x32xf32>
    %cst_112 = arith.constant dense<0.000000e+00> : vector<16x32xf32>
    %137 = tpu.matmul %135, %136, %cst_112 {dimension_numbers = #tpu.dot_dimension_numbers<[1], [0], [0], [1], [0, 0, 1, 1], [], []>} : vector<16x32xf32>, vector<32x32xf32>, vector<16x32xf32> -> vector<16x32xf32>
    %138 = arith.addf %133, %137 : vector<16x32xf32>
    %139 = vector.shape_cast %138 : vector<16x32xf32> to vector<2x8x32xf32>
    %cst_113 = arith.constant 0.000000e+00 : f32
    %140 = vector.broadcast %cst_113 : f32 to vector<2x8x32xf32>
    %141 = arith.maximumf %139, %140 : vector<2x8x32xf32>
    %142 = vector.shape_cast %112 : vector<1x32xf32> to vector<1x1x32xf32>
    %143 = vector.shape_cast %113 : vector<1x32xf32> to vector<1x1x32xf32>
    %cst_114 = arith.constant dense<0.000000e+00> : vector<2x8xf32>
    %144 = vector.multi_reduction <add>, %141, %cst_114 [2] : vector<2x8x32xf32> to vector<2x8xf32>
    %145 = vector.shape_cast %144 : vector<2x8xf32> to vector<2x8x1xf32>
    %cst_115 = arith.constant 3.200000e+01 : f32
    %146 = vector.broadcast %cst_115 : f32 to vector<2x8x1xf32>
    %147 = arith.divf %145, %146 : vector<2x8x1xf32>
    %148 = vector.broadcast %147 : vector<2x8x1xf32> to vector<2x8x32xf32>
    %149 = arith.subf %141, %148 : vector<2x8x32xf32>
    %150 = arith.mulf %149, %149 : vector<2x8x32xf32>
    %cst_116 = arith.constant dense<0.000000e+00> : vector<2x8xf32>
    %151 = vector.multi_reduction <add>, %150, %cst_116 [2] : vector<2x8x32xf32> to vector<2x8xf32>
    %152 = vector.shape_cast %151 : vector<2x8xf32> to vector<2x8x1xf32>
    %cst_117 = arith.constant 3.200000e+01 : f32
    %153 = vector.broadcast %cst_117 : f32 to vector<2x8x1xf32>
    %154 = arith.divf %152, %153 : vector<2x8x1xf32>
    %155 = vector.broadcast %147 : vector<2x8x1xf32> to vector<2x8x32xf32>
    %156 = arith.subf %141, %155 : vector<2x8x32xf32>
    %cst_118 = arith.constant 9.99999974E-6 : f32
    %157 = vector.broadcast %cst_118 : f32 to vector<2x8x1xf32>
    %158 = arith.addf %154, %157 : vector<2x8x1xf32>
    %159 = math.rsqrt %158 : vector<2x8x1xf32>
    %160 = vector.broadcast %159 : vector<2x8x1xf32> to vector<2x8x32xf32>
    %161 = arith.mulf %156, %160 : vector<2x8x32xf32>
    %162 = vector.broadcast %142 : vector<1x1x32xf32> to vector<2x8x32xf32>
    %163 = arith.mulf %161, %162 : vector<2x8x32xf32>
    %164 = vector.broadcast %143 : vector<1x1x32xf32> to vector<2x8x32xf32>
    %165 = arith.addf %163, %164 : vector<2x8x32xf32>
    %cst_119 = arith.constant 0.000000e+00 : f32
    %166 = vector.broadcast %cst_119 : f32 to vector<2x10x32xf32>
    %c0_120 = arith.constant 0 : index
    %c0_121 = arith.constant 0 : index
    %c0_122 = arith.constant 0 : index
    %167 = vector.load %arg39[%c0_120, %c0_121, %c0_122] : memref<2x10x32xf32, #tpu.memory_space<vmem>>, vector<2x10x32xf32>
    tpu.vector_store %arg39[%c0_120, %c0_121, %c0_122], %166 {strides = array<i32>} : memref<2x10x32xf32, #tpu.memory_space<vmem>>, vector<2x10x32xf32>,
    %c0_123 = arith.constant 0 : index
    %c1_124 = arith.constant 1 : index
    %c0_125 = arith.constant 0 : index
    %168 = vector.load %arg39[%c0_123, %c1_124, %c0_125] : memref<2x10x32xf32, #tpu.memory_space<vmem>>, vector<2x8x32xf32>
    tpu.vector_store %arg39[%c0_123, %c1_124, %c0_125], %165 {strides = array<i32>} : memref<2x10x32xf32, #tpu.memory_space<vmem>>, vector<2x8x32xf32>,
    %c0_126 = arith.constant 0 : index
    %c0_127 = arith.constant 0 : index
    %c0_128 = arith.constant 0 : index
    %169 = vector.load %arg39[%c0_126, %c0_127, %c0_128] : memref<2x10x32xf32, #tpu.memory_space<vmem>>, vector<2x8x32xf32>
    %170 = vector.shape_cast %169 : vector<2x8x32xf32> to vector<16x32xf32>
    %171 = vector.extract_strided_slice %114 {offsets = [0, 0], sizes = [32, 32], strides = [1, 1]} : vector<96x32xf32> to vector<32x32xf32>
    %cst_129 = arith.constant dense<0.000000e+00> : vector<16x32xf32>
    %172 = tpu.matmul %170, %171, %cst_129 {dimension_numbers = #tpu.dot_dimension_numbers<[1], [0], [0], [1], [0, 0, 1, 1], [], []>} : vector<16x32xf32>, vector<32x32xf32>, vector<16x32xf32> -> vector<16x32xf32>
    %173 = vector.broadcast %115 : vector<1x32xf32> to vector<16x32xf32>
    %174 = arith.addf %173, %172 : vector<16x32xf32>
    %c0_130 = arith.constant 0 : index
    %c1_131 = arith.constant 1 : index
    %c0_132 = arith.constant 0 : index
    %175 = vector.load %arg39[%c0_130, %c1_131, %c0_132] : memref<2x10x32xf32, #tpu.memory_space<vmem>>, vector<2x8x32xf32>
    %176 = vector.shape_cast %175 : vector<2x8x32xf32> to vector<16x32xf32>
    %177 = vector.extract_strided_slice %114 {offsets = [32, 0], sizes = [32, 32], strides = [1, 1]} : vector<96x32xf32> to vector<32x32xf32>
    %cst_133 = arith.constant dense<0.000000e+00> : vector<16x32xf32>
    %178 = tpu.matmul %176, %177, %cst_133 {dimension_numbers = #tpu.dot_dimension_numbers<[1], [0], [0], [1], [0, 0, 1, 1], [], []>} : vector<16x32xf32>, vector<32x32xf32>, vector<16x32xf32> -> vector<16x32xf32>
    %179 = arith.addf %174, %178 : vector<16x32xf32>
    %c0_134 = arith.constant 0 : index
    %c2_135 = arith.constant 2 : index
    %c0_136 = arith.constant 0 : index
    %180 = vector.load %arg39[%c0_134, %c2_135, %c0_136] : memref<2x10x32xf32, #tpu.memory_space<vmem>>, vector<2x8x32xf32>
    %181 = vector.shape_cast %180 : vector<2x8x32xf32> to vector<16x32xf32>
    %182 = vector.extract_strided_slice %114 {offsets = [64, 0], sizes = [32, 32], strides = [1, 1]} : vector<96x32xf32> to vector<32x32xf32>
    %cst_137 = arith.constant dense<0.000000e+00> : vector<16x32xf32>
    %183 = tpu.matmul %181, %182, %cst_137 {dimension_numbers = #tpu.dot_dimension_numbers<[1], [0], [0], [1], [0, 0, 1, 1], [], []>} : vector<16x32xf32>, vector<32x32xf32>, vector<16x32xf32> -> vector<16x32xf32>
    %184 = arith.addf %179, %183 : vector<16x32xf32>
    %185 = vector.shape_cast %184 : vector<16x32xf32> to vector<2x8x32xf32>
    %cst_138 = arith.constant 0.000000e+00 : f32
    %186 = vector.broadcast %cst_138 : f32 to vector<2x8x32xf32>
    %187 = arith.maximumf %185, %186 : vector<2x8x32xf32>
    %188 = vector.shape_cast %116 : vector<1x32xf32> to vector<1x1x32xf32>
    %189 = vector.shape_cast %117 : vector<1x32xf32> to vector<1x1x32xf32>
    %cst_139 = arith.constant dense<0.000000e+00> : vector<2x8xf32>
    %190 = vector.multi_reduction <add>, %187, %cst_139 [2] : vector<2x8x32xf32> to vector<2x8xf32>
    %191 = vector.shape_cast %190 : vector<2x8xf32> to vector<2x8x1xf32>
    %cst_140 = arith.constant 3.200000e+01 : f32
    %192 = vector.broadcast %cst_140 : f32 to vector<2x8x1xf32>
    %193 = arith.divf %191, %192 : vector<2x8x1xf32>
    %194 = vector.broadcast %193 : vector<2x8x1xf32> to vector<2x8x32xf32>
    %195 = arith.subf %187, %194 : vector<2x8x32xf32>
    %196 = arith.mulf %195, %195 : vector<2x8x32xf32>
    %cst_141 = arith.constant dense<0.000000e+00> : vector<2x8xf32>
    %197 = vector.multi_reduction <add>, %196, %cst_141 [2] : vector<2x8x32xf32> to vector<2x8xf32>
    %198 = vector.shape_cast %197 : vector<2x8xf32> to vector<2x8x1xf32>
    %cst_142 = arith.constant 3.200000e+01 : f32
    %199 = vector.broadcast %cst_142 : f32 to vector<2x8x1xf32>
    %200 = arith.divf %198, %199 : vector<2x8x1xf32>
    %201 = vector.broadcast %193 : vector<2x8x1xf32> to vector<2x8x32xf32>
    %202 = arith.subf %187, %201 : vector<2x8x32xf32>
    %cst_143 = arith.constant 9.99999974E-6 : f32
    %203 = vector.broadcast %cst_143 : f32 to vector<2x8x1xf32>
    %204 = arith.addf %200, %203 : vector<2x8x1xf32>
    %205 = math.rsqrt %204 : vector<2x8x1xf32>
    %206 = vector.broadcast %205 : vector<2x8x1xf32> to vector<2x8x32xf32>
    %207 = arith.mulf %202, %206 : vector<2x8x32xf32>
    %208 = vector.broadcast %188 : vector<1x1x32xf32> to vector<2x8x32xf32>
    %209 = arith.mulf %207, %208 : vector<2x8x32xf32>
    %210 = vector.broadcast %189 : vector<1x1x32xf32> to vector<2x8x32xf32>
    %211 = arith.addf %209, %210 : vector<2x8x32xf32>
    %212 = vector.shape_cast %211 : vector<2x8x32xf32> to vector<16x32xf32>
    %cst_144 = arith.constant dense<0.000000e+00> : vector<16x1xf32>
    %213 = tpu.matmul %212, %118, %cst_144 {dimension_numbers = #tpu.dot_dimension_numbers<[1], [0], [0], [1], [0, 0, 1, 1], [], []>} : vector<16x32xf32>, vector<32x1xf32>, vector<16x1xf32> -> vector<16x1xf32>
    %214 = vector.broadcast %119 : vector<1x1xf32> to vector<16x1xf32>
    %215 = arith.addf %213, %214 : vector<16x1xf32>
    %216 = arith.mulf %215, %1 : vector<16x1xf32>
    %c0_145 = arith.constant 0 : index
    %c0_146 = arith.constant 0 : index
    %217 = vector.load %arg36[%c0_145, %c0_146] : memref<16x1xf32, #tpu.memory_space<vmem>>, vector<16x1xf32>
    tpu.vector_store %arg36[%c0_145, %c0_146], %216 {strides = array<i32>} : memref<16x1xf32, #tpu.memory_space<vmem>>, vector<16x1xf32>,
    %c0_147 = arith.constant 0 : index
    %c0_148 = arith.constant 0 : index
    %c0_149 = arith.constant 0 : index
    %218 = vector.load %arg2[%c0_147, %c0_148, %c0_149] : memref<2x8x32xf32, #tpu.memory_space<vmem>>, vector<2x8x32xf32>
    %219 = arith.addf %0, %218 : vector<2x8x32xf32>
    %c0_150 = arith.constant 0 : index
    %c0_151 = arith.constant 0 : index
    %220 = vector.load %arg24[%c0_150, %c0_151] : memref<96x32xf32, #tpu.memory_space<vmem>>, vector<96x32xf32>
    %c0_152 = arith.constant 0 : index
    %c0_153 = arith.constant 0 : index
    %221 = vector.load %arg25[%c0_152, %c0_153] : memref<1x32xf32, #tpu.memory_space<vmem>>, vector<1x32xf32>
    %c0_154 = arith.constant 0 : index
    %c0_155 = arith.constant 0 : index
    %222 = vector.load %arg26[%c0_154, %c0_155] : memref<1x32xf32, #tpu.memory_space<vmem>>, vector<1x32xf32>
    %c0_156 = arith.constant 0 : index
    %c0_157 = arith.constant 0 : index
    %223 = vector.load %arg27[%c0_156, %c0_157] : memref<1x32xf32, #tpu.memory_space<vmem>>, vector<1x32xf32>
    %c0_158 = arith.constant 0 : index
    %c0_159 = arith.constant 0 : index
    %224 = vector.load %arg28[%c0_158, %c0_159] : memref<96x32xf32, #tpu.memory_space<vmem>>, vector<96x32xf32>
    %c0_160 = arith.constant 0 : index
    %c0_161 = arith.constant 0 : index
    %225 = vector.load %arg29[%c0_160, %c0_161] : memref<1x32xf32, #tpu.memory_space<vmem>>, vector<1x32xf32>
    %c0_162 = arith.constant 0 : index
    %c0_163 = arith.constant 0 : index
    %226 = vector.load %arg30[%c0_162, %c0_163] : memref<1x32xf32, #tpu.memory_space<vmem>>, vector<1x32xf32>
    %c0_164 = arith.constant 0 : index
    %c0_165 = arith.constant 0 : index
    %227 = vector.load %arg31[%c0_164, %c0_165] : memref<1x32xf32, #tpu.memory_space<vmem>>, vector<1x32xf32>
    %c0_166 = arith.constant 0 : index
    %c0_167 = arith.constant 0 : index
    %228 = vector.load %arg32[%c0_166, %c0_167] : memref<32x1xf32, #tpu.memory_space<vmem>>, vector<32x1xf32>
    %c0_168 = arith.constant 0 : index
    %c0_169 = arith.constant 0 : index
    %229 = vector.load %arg33[%c0_168, %c0_169] : memref<1x1xf32, #tpu.memory_space<vmem>>, vector<1x1xf32>
    %cst_170 = arith.constant 0.000000e+00 : f32
    %230 = vector.broadcast %cst_170 : f32 to vector<2x10x32xf32>
    %c0_171 = arith.constant 0 : index
    %c0_172 = arith.constant 0 : index
    %c0_173 = arith.constant 0 : index
    %231 = vector.load %arg38[%c0_171, %c0_172, %c0_173] : memref<2x10x32xf32, #tpu.memory_space<vmem>>, vector<2x10x32xf32>
    tpu.vector_store %arg38[%c0_171, %c0_172, %c0_173], %230 {strides = array<i32>} : memref<2x10x32xf32, #tpu.memory_space<vmem>>, vector<2x10x32xf32>,
    %c0_174 = arith.constant 0 : index
    %c1_175 = arith.constant 1 : index
    %c0_176 = arith.constant 0 : index
    %232 = vector.load %arg38[%c0_174, %c1_175, %c0_176] : memref<2x10x32xf32, #tpu.memory_space<vmem>>, vector<2x8x32xf32>
    tpu.vector_store %arg38[%c0_174, %c1_175, %c0_176], %219 {strides = array<i32>} : memref<2x10x32xf32, #tpu.memory_space<vmem>>, vector<2x8x32xf32>,
    %c0_177 = arith.constant 0 : index
    %c0_178 = arith.constant 0 : index
    %c0_179 = arith.constant 0 : index
    %233 = vector.load %arg38[%c0_177, %c0_178, %c0_179] : memref<2x10x32xf32, #tpu.memory_space<vmem>>, vector<2x8x32xf32>
    %234 = vector.shape_cast %233 : vector<2x8x32xf32> to vector<16x32xf32>
    %235 = vector.extract_strided_slice %220 {offsets = [0, 0], sizes = [32, 32], strides = [1, 1]} : vector<96x32xf32> to vector<32x32xf32>
    %cst_180 = arith.constant dense<0.000000e+00> : vector<16x32xf32>
    %236 = tpu.matmul %234, %235, %cst_180 {dimension_numbers = #tpu.dot_dimension_numbers<[1], [0], [0], [1], [0, 0, 1, 1], [], []>} : vector<16x32xf32>, vector<32x32xf32>, vector<16x32xf32> -> vector<16x32xf32>
    %237 = vector.broadcast %221 : vector<1x32xf32> to vector<16x32xf32>
    %238 = arith.addf %237, %236 : vector<16x32xf32>
    %c0_181 = arith.constant 0 : index
    %c1_182 = arith.constant 1 : index
    %c0_183 = arith.constant 0 : index
    %239 = vector.load %arg38[%c0_181, %c1_182, %c0_183] : memref<2x10x32xf32, #tpu.memory_space<vmem>>, vector<2x8x32xf32>
    %240 = vector.shape_cast %239 : vector<2x8x32xf32> to vector<16x32xf32>
    %241 = vector.extract_strided_slice %220 {offsets = [32, 0], sizes = [32, 32], strides = [1, 1]} : vector<96x32xf32> to vector<32x32xf32>
    %cst_184 = arith.constant dense<0.000000e+00> : vector<16x32xf32>
    %242 = tpu.matmul %240, %241, %cst_184 {dimension_numbers = #tpu.dot_dimension_numbers<[1], [0], [0], [1], [0, 0, 1, 1], [], []>} : vector<16x32xf32>, vector<32x32xf32>, vector<16x32xf32> -> vector<16x32xf32>
    %243 = arith.addf %238, %242 : vector<16x32xf32>
    %c0_185 = arith.constant 0 : index
    %c2_186 = arith.constant 2 : index
    %c0_187 = arith.constant 0 : index
    %244 = vector.load %arg38[%c0_185, %c2_186, %c0_187] : memref<2x10x32xf32, #tpu.memory_space<vmem>>, vector<2x8x32xf32>
    %245 = vector.shape_cast %244 : vector<2x8x32xf32> to vector<16x32xf32>
    %246 = vector.extract_strided_slice %220 {offsets = [64, 0], sizes = [32, 32], strides = [1, 1]} : vector<96x32xf32> to vector<32x32xf32>
    %cst_188 = arith.constant dense<0.000000e+00> : vector<16x32xf32>
    %247 = tpu.matmul %245, %246, %cst_188 {dimension_numbers = #tpu.dot_dimension_numbers<[1], [0], [0], [1], [0, 0, 1, 1], [], []>} : vector<16x32xf32>, vector<32x32xf32>, vector<16x32xf32> -> vector<16x32xf32>
    %248 = arith.addf %243, %247 : vector<16x32xf32>
    %249 = vector.shape_cast %248 : vector<16x32xf32> to vector<2x8x32xf32>
    %cst_189 = arith.constant 0.000000e+00 : f32
    %250 = vector.broadcast %cst_189 : f32 to vector<2x8x32xf32>
    %251 = arith.maximumf %249, %250 : vector<2x8x32xf32>
    %252 = vector.shape_cast %222 : vector<1x32xf32> to vector<1x1x32xf32>
    %253 = vector.shape_cast %223 : vector<1x32xf32> to vector<1x1x32xf32>
    %cst_190 = arith.constant dense<0.000000e+00> : vector<2x8xf32>
    %254 = vector.multi_reduction <add>, %251, %cst_190 [2] : vector<2x8x32xf32> to vector<2x8xf32>
    %255 = vector.shape_cast %254 : vector<2x8xf32> to vector<2x8x1xf32>
    %cst_191 = arith.constant 3.200000e+01 : f32
    %256 = vector.broadcast %cst_191 : f32 to vector<2x8x1xf32>
    %257 = arith.divf %255, %256 : vector<2x8x1xf32>
    %258 = vector.broadcast %257 : vector<2x8x1xf32> to vector<2x8x32xf32>
    %259 = arith.subf %251, %258 : vector<2x8x32xf32>
    %260 = arith.mulf %259, %259 : vector<2x8x32xf32>
    %cst_192 = arith.constant dense<0.000000e+00> : vector<2x8xf32>
    %261 = vector.multi_reduction <add>, %260, %cst_192 [2] : vector<2x8x32xf32> to vector<2x8xf32>
    %262 = vector.shape_cast %261 : vector<2x8xf32> to vector<2x8x1xf32>
    %cst_193 = arith.constant 3.200000e+01 : f32
    %263 = vector.broadcast %cst_193 : f32 to vector<2x8x1xf32>
    %264 = arith.divf %262, %263 : vector<2x8x1xf32>
    %265 = vector.broadcast %257 : vector<2x8x1xf32> to vector<2x8x32xf32>
    %266 = arith.subf %251, %265 : vector<2x8x32xf32>
    %cst_194 = arith.constant 9.99999974E-6 : f32
    %267 = vector.broadcast %cst_194 : f32 to vector<2x8x1xf32>
    %268 = arith.addf %264, %267 : vector<2x8x1xf32>
    %269 = math.rsqrt %268 : vector<2x8x1xf32>
    %270 = vector.broadcast %269 : vector<2x8x1xf32> to vector<2x8x32xf32>
    %271 = arith.mulf %266, %270 : vector<2x8x32xf32>
    %272 = vector.broadcast %252 : vector<1x1x32xf32> to vector<2x8x32xf32>
    %273 = arith.mulf %271, %272 : vector<2x8x32xf32>
    %274 = vector.broadcast %253 : vector<1x1x32xf32> to vector<2x8x32xf32>
    %275 = arith.addf %273, %274 : vector<2x8x32xf32>
    %cst_195 = arith.constant 0.000000e+00 : f32
    %276 = vector.broadcast %cst_195 : f32 to vector<2x10x32xf32>
    %c0_196 = arith.constant 0 : index
    %c0_197 = arith.constant 0 : index
    %c0_198 = arith.constant 0 : index
    %277 = vector.load %arg39[%c0_196, %c0_197, %c0_198] : memref<2x10x32xf32, #tpu.memory_space<vmem>>, vector<2x10x32xf32>
    tpu.vector_store %arg39[%c0_196, %c0_197, %c0_198], %276 {strides = array<i32>} : memref<2x10x32xf32, #tpu.memory_space<vmem>>, vector<2x10x32xf32>,
    %c0_199 = arith.constant 0 : index
    %c1_200 = arith.constant 1 : index
    %c0_201 = arith.constant 0 : index
    %278 = vector.load %arg39[%c0_199, %c1_200, %c0_201] : memref<2x10x32xf32, #tpu.memory_space<vmem>>, vector<2x8x32xf32>
    tpu.vector_store %arg39[%c0_199, %c1_200, %c0_201], %275 {strides = array<i32>} : memref<2x10x32xf32, #tpu.memory_space<vmem>>, vector<2x8x32xf32>,
    %c0_202 = arith.constant 0 : index
    %c0_203 = arith.constant 0 : index
    %c0_204 = arith.constant 0 : index
    %279 = vector.load %arg39[%c0_202, %c0_203, %c0_204] : memref<2x10x32xf32, #tpu.memory_space<vmem>>, vector<2x8x32xf32>
    %280 = vector.shape_cast %279 : vector<2x8x32xf32> to vector<16x32xf32>
    %281 = vector.extract_strided_slice %224 {offsets = [0, 0], sizes = [32, 32], strides = [1, 1]} : vector<96x32xf32> to vector<32x32xf32>
    %cst_205 = arith.constant dense<0.000000e+00> : vector<16x32xf32>
    %282 = tpu.matmul %280, %281, %cst_205 {dimension_numbers = #tpu.dot_dimension_numbers<[1], [0], [0], [1], [0, 0, 1, 1], [], []>} : vector<16x32xf32>, vector<32x32xf32>, vector<16x32xf32> -> vector<16x32xf32>
    %283 = vector.broadcast %225 : vector<1x32xf32> to vector<16x32xf32>
    %284 = arith.addf %283, %282 : vector<16x32xf32>
    %c0_206 = arith.constant 0 : index
    %c1_207 = arith.constant 1 : index
    %c0_208 = arith.constant 0 : index
    %285 = vector.load %arg39[%c0_206, %c1_207, %c0_208] : memref<2x10x32xf32, #tpu.memory_space<vmem>>, vector<2x8x32xf32>
    %286 = vector.shape_cast %285 : vector<2x8x32xf32> to vector<16x32xf32>
    %287 = vector.extract_strided_slice %224 {offsets = [32, 0], sizes = [32, 32], strides = [1, 1]} : vector<96x32xf32> to vector<32x32xf32>
    %cst_209 = arith.constant dense<0.000000e+00> : vector<16x32xf32>
    %288 = tpu.matmul %286, %287, %cst_209 {dimension_numbers = #tpu.dot_dimension_numbers<[1], [0], [0], [1], [0, 0, 1, 1], [], []>} : vector<16x32xf32>, vector<32x32xf32>, vector<16x32xf32> -> vector<16x32xf32>
    %289 = arith.addf %284, %288 : vector<16x32xf32>
    %c0_210 = arith.constant 0 : index
    %c2_211 = arith.constant 2 : index
    %c0_212 = arith.constant 0 : index
    %290 = vector.load %arg39[%c0_210, %c2_211, %c0_212] : memref<2x10x32xf32, #tpu.memory_space<vmem>>, vector<2x8x32xf32>
    %291 = vector.shape_cast %290 : vector<2x8x32xf32> to vector<16x32xf32>
    %292 = vector.extract_strided_slice %224 {offsets = [64, 0], sizes = [32, 32], strides = [1, 1]} : vector<96x32xf32> to vector<32x32xf32>
    %cst_213 = arith.constant dense<0.000000e+00> : vector<16x32xf32>
    %293 = tpu.matmul %291, %292, %cst_213 {dimension_numbers = #tpu.dot_dimension_numbers<[1], [0], [0], [1], [0, 0, 1, 1], [], []>} : vector<16x32xf32>, vector<32x32xf32>, vector<16x32xf32> -> vector<16x32xf32>
    %294 = arith.addf %289, %293 : vector<16x32xf32>
    %295 = vector.shape_cast %294 : vector<16x32xf32> to vector<2x8x32xf32>
    %cst_214 = arith.constant 0.000000e+00 : f32
    %296 = vector.broadcast %cst_214 : f32 to vector<2x8x32xf32>
    %297 = arith.maximumf %295, %296 : vector<2x8x32xf32>
    %298 = vector.shape_cast %226 : vector<1x32xf32> to vector<1x1x32xf32>
    %299 = vector.shape_cast %227 : vector<1x32xf32> to vector<1x1x32xf32>
    %cst_215 = arith.constant dense<0.000000e+00> : vector<2x8xf32>
    %300 = vector.multi_reduction <add>, %297, %cst_215 [2] : vector<2x8x32xf32> to vector<2x8xf32>
    %301 = vector.shape_cast %300 : vector<2x8xf32> to vector<2x8x1xf32>
    %cst_216 = arith.constant 3.200000e+01 : f32
    %302 = vector.broadcast %cst_216 : f32 to vector<2x8x1xf32>
    %303 = arith.divf %301, %302 : vector<2x8x1xf32>
    %304 = vector.broadcast %303 : vector<2x8x1xf32> to vector<2x8x32xf32>
    %305 = arith.subf %297, %304 : vector<2x8x32xf32>
    %306 = arith.mulf %305, %305 : vector<2x8x32xf32>
    %cst_217 = arith.constant dense<0.000000e+00> : vector<2x8xf32>
    %307 = vector.multi_reduction <add>, %306, %cst_217 [2] : vector<2x8x32xf32> to vector<2x8xf32>
    %308 = vector.shape_cast %307 : vector<2x8xf32> to vector<2x8x1xf32>
    %cst_218 = arith.constant 3.200000e+01 : f32
    %309 = vector.broadcast %cst_218 : f32 to vector<2x8x1xf32>
    %310 = arith.divf %308, %309 : vector<2x8x1xf32>
    %311 = vector.broadcast %303 : vector<2x8x1xf32> to vector<2x8x32xf32>
    %312 = arith.subf %297, %311 : vector<2x8x32xf32>
    %cst_219 = arith.constant 9.99999974E-6 : f32
    %313 = vector.broadcast %cst_219 : f32 to vector<2x8x1xf32>
    %314 = arith.addf %310, %313 : vector<2x8x1xf32>
    %315 = math.rsqrt %314 : vector<2x8x1xf32>
    %316 = vector.broadcast %315 : vector<2x8x1xf32> to vector<2x8x32xf32>
    %317 = arith.mulf %312, %316 : vector<2x8x32xf32>
    %318 = vector.broadcast %298 : vector<1x1x32xf32> to vector<2x8x32xf32>
    %319 = arith.mulf %317, %318 : vector<2x8x32xf32>
    %320 = vector.broadcast %299 : vector<1x1x32xf32> to vector<2x8x32xf32>
    %321 = arith.addf %319, %320 : vector<2x8x32xf32>
    %322 = vector.shape_cast %321 : vector<2x8x32xf32> to vector<16x32xf32>
    %cst_220 = arith.constant dense<0.000000e+00> : vector<16x1xf32>
    %323 = tpu.matmul %322, %228, %cst_220 {dimension_numbers = #tpu.dot_dimension_numbers<[1], [0], [0], [1], [0, 0, 1, 1], [], []>} : vector<16x32xf32>, vector<32x1xf32>, vector<16x1xf32> -> vector<16x1xf32>
    %324 = vector.broadcast %229 : vector<1x1xf32> to vector<16x1xf32>
    %325 = arith.addf %323, %324 : vector<16x1xf32>
    %326 = arith.mulf %325, %1 : vector<16x1xf32>
    %c0_221 = arith.constant 0 : index
    %c0_222 = arith.constant 0 : index
    %327 = vector.load %arg37[%c0_221, %c0_222] : memref<16x1xf32, #tpu.memory_space<vmem>>, vector<16x1xf32>
    tpu.vector_store %arg37[%c0_221, %c0_222], %326 {strides = array<i32>} : memref<16x1xf32, #tpu.memory_space<vmem>>, vector<16x1xf32>,
    %c0_223 = arith.constant 0 : index
    %c0_224 = arith.constant 0 : index
    %c0_225 = arith.constant 0 : index
    %328 = vector.load %arg3[%c0_223, %c0_224, %c0_225] : memref<2x8x32xf32, #tpu.memory_space<vmem>>, vector<2x8x32xf32>
    %329 = arith.addf %219, %328 : vector<2x8x32xf32>
    %c0_226 = arith.constant 0 : index
    %c0_227 = arith.constant 0 : index
    %c0_228 = arith.constant 0 : index
    %330 = vector.load %arg34[%c0_226, %c0_227, %c0_228] : memref<2x8x32xf32, #tpu.memory_space<vmem>>, vector<2x8x32xf32>
    tpu.vector_store %arg34[%c0_226, %c0_227, %c0_228], %329 {strides = array<i32>} : memref<2x8x32xf32, #tpu.memory_space<vmem>>, vector<2x8x32xf32>,
    return
  }
}

module attributes {stable_mosaic.version = 11 : i64} {
  func.func @kernel(%arg0: memref<2x16x16xf32, #tpu.memory_space<vmem>>, %arg1: memref<2x32xf32, #tpu.memory_space<vmem>>, %arg2: memref<2x16x32xf32, #tpu.memory_space<vmem>>, %arg3: memref<16x32xf32, #tpu.memory_space<vmem>>, %arg4: memref<1x32xf32, #tpu.memory_space<vmem>>, %arg5: memref<32x128xf32, #tpu.memory_space<vmem>>, %arg6: memref<1x128xf32, #tpu.memory_space<vmem>>, %arg7: memref<128x32xf32, #tpu.memory_space<vmem>>, %arg8: memref<1x32xf32, #tpu.memory_space<vmem>>, %arg9: memref<32x32xf32, #tpu.memory_space<vmem>>, %arg10: memref<1x32xf32, #tpu.memory_space<vmem>>, %arg11: memref<96x64xf32, #tpu.memory_space<vmem>>, %arg12: memref<1x64xf32, #tpu.memory_space<vmem>>, %arg13: memref<32x64xf32, #tpu.memory_space<vmem>>, %arg14: memref<1x64xf32, #tpu.memory_space<vmem>>, %arg15: memref<32x64xf32, #tpu.memory_space<vmem>>, %arg16: memref<1x64xf32, #tpu.memory_space<vmem>>, %arg17: memref<32x32xf32, #tpu.memory_space<vmem>>, %arg18: memref<1x32xf32, #tpu.memory_space<vmem>>, %arg19: memref<96x64xf32, #tpu.memory_space<vmem>>, %arg20: memref<1x64xf32, #tpu.memory_space<vmem>>, %arg21: memref<32x64xf32, #tpu.memory_space<vmem>>, %arg22: memref<1x64xf32, #tpu.memory_space<vmem>>, %arg23: memref<32x64xf32, #tpu.memory_space<vmem>>, %arg24: memref<1x64xf32, #tpu.memory_space<vmem>>, %arg25: memref<32x32xf32, #tpu.memory_space<vmem>>, %arg26: memref<1x32xf32, #tpu.memory_space<vmem>>, %arg27: memref<32x16xf32, #tpu.memory_space<vmem>>, %arg28: memref<1x16xf32, #tpu.memory_space<vmem>>, %arg29: memref<32x16xf32, #tpu.memory_space<vmem>>, %arg30: memref<2x18x32xf32, #tpu.memory_space<vmem>>, %arg31: memref<2x20x32xf32, #tpu.memory_space<vmem>>) attributes {dimension_semantics = [], scalar_prefetch = 0 : i64, scratch_operands = 2 : i64, tpu.core_type = #tpu.core_type<tc>} {
    %c0 = arith.constant 0 : index
    %c0_0 = arith.constant 0 : index
    %c0_1 = arith.constant 0 : index
    %0 = vector.load %arg0[%c0, %c0_0, %c0_1] : memref<2x16x16xf32, #tpu.memory_space<vmem>>, vector<2x16x16xf32>
    %1 = vector.shape_cast %0 : vector<2x16x16xf32> to vector<32x16xf32>
    %c0_2 = arith.constant 0 : index
    %c0_3 = arith.constant 0 : index
    %c0_4 = arith.constant 0 : index
    %2 = vector.load %arg2[%c0_2, %c0_3, %c0_4] : memref<2x16x32xf32, #tpu.memory_space<vmem>>, vector<2x16x32xf32>
    %3 = vector.shape_cast %2 : vector<2x16x32xf32> to vector<32x32xf32>
    %c0_5 = arith.constant 0 : index
    %c0_6 = arith.constant 0 : index
    %4 = vector.load %arg1[%c0_5, %c0_6] : memref<2x32xf32, #tpu.memory_space<vmem>>, vector<2x32xf32>
    %c0_7 = arith.constant 0 : index
    %c0_8 = arith.constant 0 : index
    %5 = vector.load %arg3[%c0_7, %c0_8] : memref<16x32xf32, #tpu.memory_space<vmem>>, vector<16x32xf32>
    %c0_9 = arith.constant 0 : index
    %c0_10 = arith.constant 0 : index
    %6 = vector.load %arg4[%c0_9, %c0_10] : memref<1x32xf32, #tpu.memory_space<vmem>>, vector<1x32xf32>
    %cst = arith.constant dense<0.000000e+00> : vector<32x32xf32>
    %7 = tpu.matmul %1, %5, %cst {dimension_numbers = #tpu.dot_dimension_numbers<[1], [0], [0], [1], [0, 0, 1, 1], [], []>} : vector<32x16xf32>, vector<16x32xf32>, vector<32x32xf32> -> vector<32x32xf32>
    %8 = vector.broadcast %6 : vector<1x32xf32> to vector<32x32xf32>
    %9 = arith.addf %7, %8 : vector<32x32xf32>
    %cst_11 = arith.constant 0.000000e+00 : f32
    %10 = vector.broadcast %cst_11 : f32 to vector<32x32xf32>
    %11 = arith.maximumf %9, %10 : vector<32x32xf32>
    %c0_12 = arith.constant 0 : index
    %c0_13 = arith.constant 0 : index
    %12 = vector.load %arg5[%c0_12, %c0_13] : memref<32x128xf32, #tpu.memory_space<vmem>>, vector<32x128xf32>
    %c0_14 = arith.constant 0 : index
    %c0_15 = arith.constant 0 : index
    %13 = vector.load %arg6[%c0_14, %c0_15] : memref<1x128xf32, #tpu.memory_space<vmem>>, vector<1x128xf32>
    %cst_16 = arith.constant dense<0.000000e+00> : vector<2x128xf32>
    %14 = tpu.matmul %4, %12, %cst_16 {dimension_numbers = #tpu.dot_dimension_numbers<[1], [0], [0], [1], [0, 0, 1, 1], [], []>} : vector<2x32xf32>, vector<32x128xf32>, vector<2x128xf32> -> vector<2x128xf32>
    %15 = vector.broadcast %13 : vector<1x128xf32> to vector<2x128xf32>
    %16 = arith.addf %14, %15 : vector<2x128xf32>
    %17 = arith.negf %16 : vector<2x128xf32>
    %18 = math.exp %17 : vector<2x128xf32>
    %cst_17 = arith.constant 1.000000e+00 : f32
    %19 = vector.broadcast %cst_17 : f32 to vector<2x128xf32>
    %20 = arith.addf %19, %18 : vector<2x128xf32>
    %21 = arith.divf %19, %20 : vector<2x128xf32>
    %22 = arith.mulf %16, %21 : vector<2x128xf32>
    %c0_18 = arith.constant 0 : index
    %c0_19 = arith.constant 0 : index
    %23 = vector.load %arg7[%c0_18, %c0_19] : memref<128x32xf32, #tpu.memory_space<vmem>>, vector<128x32xf32>
    %c0_20 = arith.constant 0 : index
    %c0_21 = arith.constant 0 : index
    %24 = vector.load %arg8[%c0_20, %c0_21] : memref<1x32xf32, #tpu.memory_space<vmem>>, vector<1x32xf32>
    %cst_22 = arith.constant dense<0.000000e+00> : vector<2x32xf32>
    %25 = tpu.matmul %22, %23, %cst_22 {dimension_numbers = #tpu.dot_dimension_numbers<[1], [0], [0], [1], [0, 0, 1, 1], [], []>} : vector<2x128xf32>, vector<128x32xf32>, vector<2x32xf32> -> vector<2x32xf32>
    %26 = vector.broadcast %24 : vector<1x32xf32> to vector<2x32xf32>
    %27 = arith.addf %25, %26 : vector<2x32xf32>
    %28 = arith.negf %27 : vector<2x32xf32>
    %29 = math.exp %28 : vector<2x32xf32>
    %cst_23 = arith.constant 1.000000e+00 : f32
    %30 = vector.broadcast %cst_23 : f32 to vector<2x32xf32>
    %31 = arith.addf %30, %29 : vector<2x32xf32>
    %32 = arith.divf %30, %31 : vector<2x32xf32>
    %33 = arith.mulf %27, %32 : vector<2x32xf32>
    %cst_24 = arith.constant 0.000000e+00 : f32
    %34 = vector.broadcast %cst_24 : f32 to vector<32x32xf32>
    %c0_25 = arith.constant 0 : index
    %c0_26 = arith.constant 0 : index
    %35 = vector.load %arg9[%c0_25, %c0_26] : memref<32x32xf32, #tpu.memory_space<vmem>>, vector<32x32xf32>
    %c0_27 = arith.constant 0 : index
    %c0_28 = arith.constant 0 : index
    %36 = vector.load %arg10[%c0_27, %c0_28] : memref<1x32xf32, #tpu.memory_space<vmem>>, vector<1x32xf32>
    %c0_29 = arith.constant 0 : index
    %c0_30 = arith.constant 0 : index
    %37 = vector.load %arg11[%c0_29, %c0_30] : memref<96x64xf32, #tpu.memory_space<vmem>>, vector<96x64xf32>
    %c0_31 = arith.constant 0 : index
    %c0_32 = arith.constant 0 : index
    %38 = vector.load %arg12[%c0_31, %c0_32] : memref<1x64xf32, #tpu.memory_space<vmem>>, vector<1x64xf32>
    %c0_33 = arith.constant 0 : index
    %c0_34 = arith.constant 0 : index
    %39 = vector.load %arg13[%c0_33, %c0_34] : memref<32x64xf32, #tpu.memory_space<vmem>>, vector<32x64xf32>
    %c0_35 = arith.constant 0 : index
    %c0_36 = arith.constant 0 : index
    %40 = vector.load %arg14[%c0_35, %c0_36] : memref<1x64xf32, #tpu.memory_space<vmem>>, vector<1x64xf32>
    %c0_37 = arith.constant 0 : index
    %c0_38 = arith.constant 0 : index
    %41 = vector.load %arg15[%c0_37, %c0_38] : memref<32x64xf32, #tpu.memory_space<vmem>>, vector<32x64xf32>
    %c0_39 = arith.constant 0 : index
    %c0_40 = arith.constant 0 : index
    %42 = vector.load %arg16[%c0_39, %c0_40] : memref<1x64xf32, #tpu.memory_space<vmem>>, vector<1x64xf32>
    %cst_41 = arith.constant dense<0.000000e+00> : vector<2x32xf32>
    %43 = tpu.matmul %33, %35, %cst_41 {dimension_numbers = #tpu.dot_dimension_numbers<[1], [0], [0], [1], [0, 0, 1, 1], [], []>} : vector<2x32xf32>, vector<32x32xf32>, vector<2x32xf32> -> vector<2x32xf32>
    %44 = vector.broadcast %36 : vector<1x32xf32> to vector<2x32xf32>
    %45 = arith.addf %43, %44 : vector<2x32xf32>
    %46 = vector.shape_cast %11 : vector<32x32xf32> to vector<2x16x32xf32>
    %47 = vector.shape_cast %45 : vector<2x32xf32> to vector<2x1x32xf32>
    %48 = vector.broadcast %47 : vector<2x1x32xf32> to vector<2x16x32xf32>
    %49 = arith.addf %46, %48 : vector<2x16x32xf32>
    %cst_42 = arith.constant 0.000000e+00 : f32
    %50 = vector.broadcast %cst_42 : f32 to vector<2x18x32xf32>
    %c0_43 = arith.constant 0 : index
    %c0_44 = arith.constant 0 : index
    %c0_45 = arith.constant 0 : index
    %51 = vector.load %arg30[%c0_43, %c0_44, %c0_45] : memref<2x18x32xf32, #tpu.memory_space<vmem>>, vector<2x18x32xf32>
    tpu.vector_store %arg30[%c0_43, %c0_44, %c0_45], %50 {strides = array<i32>} : memref<2x18x32xf32, #tpu.memory_space<vmem>>, vector<2x18x32xf32>,
    %c0_46 = arith.constant 0 : index
    %c1 = arith.constant 1 : index
    %c0_47 = arith.constant 0 : index
    %52 = vector.load %arg30[%c0_46, %c1, %c0_47] : memref<2x18x32xf32, #tpu.memory_space<vmem>>, vector<2x16x32xf32>
    tpu.vector_store %arg30[%c0_46, %c1, %c0_47], %49 {strides = array<i32>} : memref<2x18x32xf32, #tpu.memory_space<vmem>>, vector<2x16x32xf32>,
    %c0_48 = arith.constant 0 : index
    %c0_49 = arith.constant 0 : index
    %c0_50 = arith.constant 0 : index
    %53 = vector.load %arg30[%c0_48, %c0_49, %c0_50] : memref<2x18x32xf32, #tpu.memory_space<vmem>>, vector<2x16x32xf32>
    %54 = vector.shape_cast %53 : vector<2x16x32xf32> to vector<32x32xf32>
    %55 = vector.extract_strided_slice %37 {offsets = [0, 0], sizes = [32, 64], strides = [1, 1]} : vector<96x64xf32> to vector<32x64xf32>
    %cst_51 = arith.constant dense<0.000000e+00> : vector<32x64xf32>
    %56 = tpu.matmul %54, %55, %cst_51 {dimension_numbers = #tpu.dot_dimension_numbers<[1], [0], [0], [1], [0, 0, 1, 1], [], []>} : vector<32x32xf32>, vector<32x64xf32>, vector<32x64xf32> -> vector<32x64xf32>
    %57 = vector.broadcast %38 : vector<1x64xf32> to vector<32x64xf32>
    %58 = arith.addf %57, %56 : vector<32x64xf32>
    %c0_52 = arith.constant 0 : index
    %c1_53 = arith.constant 1 : index
    %c0_54 = arith.constant 0 : index
    %59 = vector.load %arg30[%c0_52, %c1_53, %c0_54] : memref<2x18x32xf32, #tpu.memory_space<vmem>>, vector<2x16x32xf32>
    %60 = vector.shape_cast %59 : vector<2x16x32xf32> to vector<32x32xf32>
    %61 = vector.extract_strided_slice %37 {offsets = [32, 0], sizes = [32, 64], strides = [1, 1]} : vector<96x64xf32> to vector<32x64xf32>
    %cst_55 = arith.constant dense<0.000000e+00> : vector<32x64xf32>
    %62 = tpu.matmul %60, %61, %cst_55 {dimension_numbers = #tpu.dot_dimension_numbers<[1], [0], [0], [1], [0, 0, 1, 1], [], []>} : vector<32x32xf32>, vector<32x64xf32>, vector<32x64xf32> -> vector<32x64xf32>
    %63 = arith.addf %58, %62 : vector<32x64xf32>
    %c0_56 = arith.constant 0 : index
    %c2 = arith.constant 2 : index
    %c0_57 = arith.constant 0 : index
    %64 = vector.load %arg30[%c0_56, %c2, %c0_57] : memref<2x18x32xf32, #tpu.memory_space<vmem>>, vector<2x16x32xf32>
    %65 = vector.shape_cast %64 : vector<2x16x32xf32> to vector<32x32xf32>
    %66 = vector.extract_strided_slice %37 {offsets = [64, 0], sizes = [32, 64], strides = [1, 1]} : vector<96x64xf32> to vector<32x64xf32>
    %cst_58 = arith.constant dense<0.000000e+00> : vector<32x64xf32>
    %67 = tpu.matmul %65, %66, %cst_58 {dimension_numbers = #tpu.dot_dimension_numbers<[1], [0], [0], [1], [0, 0, 1, 1], [], []>} : vector<32x32xf32>, vector<32x64xf32>, vector<32x64xf32> -> vector<32x64xf32>
    %68 = arith.addf %63, %67 : vector<32x64xf32>
    %69 = vector.shape_cast %68 : vector<32x64xf32> to vector<2x16x64xf32>
    %cst_59 = arith.constant dense<0.000000e+00> : vector<32x64xf32>
    %70 = tpu.matmul %3, %39, %cst_59 {dimension_numbers = #tpu.dot_dimension_numbers<[1], [0], [0], [1], [0, 0, 1, 1], [], []>} : vector<32x32xf32>, vector<32x64xf32>, vector<32x64xf32> -> vector<32x64xf32>
    %71 = vector.broadcast %40 : vector<1x64xf32> to vector<32x64xf32>
    %72 = arith.addf %70, %71 : vector<32x64xf32>
    %73 = vector.shape_cast %72 : vector<32x64xf32> to vector<2x16x64xf32>
    %74 = arith.addf %69, %73 : vector<2x16x64xf32>
    %75 = vector.extract_strided_slice %74 {offsets = [0, 0, 0], sizes = [2, 16, 32], strides = [1, 1, 1]} : vector<2x16x64xf32> to vector<2x16x32xf32>
    %76 = vector.extract_strided_slice %74 {offsets = [0, 0, 32], sizes = [2, 16, 32], strides = [1, 1, 1]} : vector<2x16x64xf32> to vector<2x16x32xf32>
    %77 = math.tanh %75 : vector<2x16x32xf32>
    %78 = arith.negf %76 : vector<2x16x32xf32>
    %79 = math.exp %78 : vector<2x16x32xf32>
    %cst_60 = arith.constant 1.000000e+00 : f32
    %80 = vector.broadcast %cst_60 : f32 to vector<2x16x32xf32>
    %81 = arith.addf %80, %79 : vector<2x16x32xf32>
    %82 = arith.divf %80, %81 : vector<2x16x32xf32>
    %83 = arith.mulf %77, %82 : vector<2x16x32xf32>
    %84 = vector.shape_cast %83 : vector<2x16x32xf32> to vector<32x32xf32>
    %cst_61 = arith.constant dense<0.000000e+00> : vector<32x64xf32>
    %85 = tpu.matmul %84, %41, %cst_61 {dimension_numbers = #tpu.dot_dimension_numbers<[1], [0], [0], [1], [0, 0, 1, 1], [], []>} : vector<32x32xf32>, vector<32x64xf32>, vector<32x64xf32> -> vector<32x64xf32>
    %86 = vector.broadcast %42 : vector<1x64xf32> to vector<32x64xf32>
    %87 = arith.addf %85, %86 : vector<32x64xf32>
    %88 = vector.extract_strided_slice %87 {offsets = [0, 0], sizes = [32, 32], strides = [1, 1]} : vector<32x64xf32> to vector<32x32xf32>
    %89 = arith.addf %11, %88 : vector<32x32xf32>
    %cst_62 = arith.constant 1.41421354 : f32
    %90 = vector.broadcast %cst_62 : f32 to vector<32x32xf32>
    %91 = arith.divf %89, %90 : vector<32x32xf32>
    %92 = vector.extract_strided_slice %87 {offsets = [0, 32], sizes = [32, 32], strides = [1, 1]} : vector<32x64xf32> to vector<32x32xf32>
    %93 = arith.addf %34, %92 : vector<32x32xf32>
    %c0_63 = arith.constant 0 : index
    %c0_64 = arith.constant 0 : index
    %94 = vector.load %arg17[%c0_63, %c0_64] : memref<32x32xf32, #tpu.memory_space<vmem>>, vector<32x32xf32>
    %c0_65 = arith.constant 0 : index
    %c0_66 = arith.constant 0 : index
    %95 = vector.load %arg18[%c0_65, %c0_66] : memref<1x32xf32, #tpu.memory_space<vmem>>, vector<1x32xf32>
    %c0_67 = arith.constant 0 : index
    %c0_68 = arith.constant 0 : index
    %96 = vector.load %arg19[%c0_67, %c0_68] : memref<96x64xf32, #tpu.memory_space<vmem>>, vector<96x64xf32>
    %c0_69 = arith.constant 0 : index
    %c0_70 = arith.constant 0 : index
    %97 = vector.load %arg20[%c0_69, %c0_70] : memref<1x64xf32, #tpu.memory_space<vmem>>, vector<1x64xf32>
    %c0_71 = arith.constant 0 : index
    %c0_72 = arith.constant 0 : index
    %98 = vector.load %arg21[%c0_71, %c0_72] : memref<32x64xf32, #tpu.memory_space<vmem>>, vector<32x64xf32>
    %c0_73 = arith.constant 0 : index
    %c0_74 = arith.constant 0 : index
    %99 = vector.load %arg22[%c0_73, %c0_74] : memref<1x64xf32, #tpu.memory_space<vmem>>, vector<1x64xf32>
    %c0_75 = arith.constant 0 : index
    %c0_76 = arith.constant 0 : index
    %100 = vector.load %arg23[%c0_75, %c0_76] : memref<32x64xf32, #tpu.memory_space<vmem>>, vector<32x64xf32>
    %c0_77 = arith.constant 0 : index
    %c0_78 = arith.constant 0 : index
    %101 = vector.load %arg24[%c0_77, %c0_78] : memref<1x64xf32, #tpu.memory_space<vmem>>, vector<1x64xf32>
    %cst_79 = arith.constant dense<0.000000e+00> : vector<2x32xf32>
    %102 = tpu.matmul %33, %94, %cst_79 {dimension_numbers = #tpu.dot_dimension_numbers<[1], [0], [0], [1], [0, 0, 1, 1], [], []>} : vector<2x32xf32>, vector<32x32xf32>, vector<2x32xf32> -> vector<2x32xf32>
    %103 = vector.broadcast %95 : vector<1x32xf32> to vector<2x32xf32>
    %104 = arith.addf %102, %103 : vector<2x32xf32>
    %105 = vector.shape_cast %91 : vector<32x32xf32> to vector<2x16x32xf32>
    %106 = vector.shape_cast %104 : vector<2x32xf32> to vector<2x1x32xf32>
    %107 = vector.broadcast %106 : vector<2x1x32xf32> to vector<2x16x32xf32>
    %108 = arith.addf %105, %107 : vector<2x16x32xf32>
    %cst_80 = arith.constant 0.000000e+00 : f32
    %109 = vector.broadcast %cst_80 : f32 to vector<2x20x32xf32>
    %c0_81 = arith.constant 0 : index
    %c0_82 = arith.constant 0 : index
    %c0_83 = arith.constant 0 : index
    %110 = vector.load %arg31[%c0_81, %c0_82, %c0_83] : memref<2x20x32xf32, #tpu.memory_space<vmem>>, vector<2x20x32xf32>
    tpu.vector_store %arg31[%c0_81, %c0_82, %c0_83], %109 {strides = array<i32>} : memref<2x20x32xf32, #tpu.memory_space<vmem>>, vector<2x20x32xf32>,
    %c0_84 = arith.constant 0 : index
    %c2_85 = arith.constant 2 : index
    %c0_86 = arith.constant 0 : index
    %111 = vector.load %arg31[%c0_84, %c2_85, %c0_86] : memref<2x20x32xf32, #tpu.memory_space<vmem>>, vector<2x16x32xf32>
    tpu.vector_store %arg31[%c0_84, %c2_85, %c0_86], %108 {strides = array<i32>} : memref<2x20x32xf32, #tpu.memory_space<vmem>>, vector<2x16x32xf32>,
    %c0_87 = arith.constant 0 : index
    %c0_88 = arith.constant 0 : index
    %c0_89 = arith.constant 0 : index
    %112 = vector.load %arg31[%c0_87, %c0_88, %c0_89] : memref<2x20x32xf32, #tpu.memory_space<vmem>>, vector<2x16x32xf32>
    %113 = vector.shape_cast %112 : vector<2x16x32xf32> to vector<32x32xf32>
    %114 = vector.extract_strided_slice %96 {offsets = [0, 0], sizes = [32, 64], strides = [1, 1]} : vector<96x64xf32> to vector<32x64xf32>
    %cst_90 = arith.constant dense<0.000000e+00> : vector<32x64xf32>
    %115 = tpu.matmul %113, %114, %cst_90 {dimension_numbers = #tpu.dot_dimension_numbers<[1], [0], [0], [1], [0, 0, 1, 1], [], []>} : vector<32x32xf32>, vector<32x64xf32>, vector<32x64xf32> -> vector<32x64xf32>
    %116 = vector.broadcast %97 : vector<1x64xf32> to vector<32x64xf32>
    %117 = arith.addf %116, %115 : vector<32x64xf32>
    %c0_91 = arith.constant 0 : index
    %c2_92 = arith.constant 2 : index
    %c0_93 = arith.constant 0 : index
    %118 = vector.load %arg31[%c0_91, %c2_92, %c0_93] : memref<2x20x32xf32, #tpu.memory_space<vmem>>, vector<2x16x32xf32>
    %119 = vector.shape_cast %118 : vector<2x16x32xf32> to vector<32x32xf32>
    %120 = vector.extract_strided_slice %96 {offsets = [32, 0], sizes = [32, 64], strides = [1, 1]} : vector<96x64xf32> to vector<32x64xf32>
    %cst_94 = arith.constant dense<0.000000e+00> : vector<32x64xf32>
    %121 = tpu.matmul %119, %120, %cst_94 {dimension_numbers = #tpu.dot_dimension_numbers<[1], [0], [0], [1], [0, 0, 1, 1], [], []>} : vector<32x32xf32>, vector<32x64xf32>, vector<32x64xf32> -> vector<32x64xf32>
    %122 = arith.addf %117, %121 : vector<32x64xf32>
    %c0_95 = arith.constant 0 : index
    %c4 = arith.constant 4 : index
    %c0_96 = arith.constant 0 : index
    %123 = vector.load %arg31[%c0_95, %c4, %c0_96] : memref<2x20x32xf32, #tpu.memory_space<vmem>>, vector<2x16x32xf32>
    %124 = vector.shape_cast %123 : vector<2x16x32xf32> to vector<32x32xf32>
    %125 = vector.extract_strided_slice %96 {offsets = [64, 0], sizes = [32, 64], strides = [1, 1]} : vector<96x64xf32> to vector<32x64xf32>
    %cst_97 = arith.constant dense<0.000000e+00> : vector<32x64xf32>
    %126 = tpu.matmul %124, %125, %cst_97 {dimension_numbers = #tpu.dot_dimension_numbers<[1], [0], [0], [1], [0, 0, 1, 1], [], []>} : vector<32x32xf32>, vector<32x64xf32>, vector<32x64xf32> -> vector<32x64xf32>
    %127 = arith.addf %122, %126 : vector<32x64xf32>
    %128 = vector.shape_cast %127 : vector<32x64xf32> to vector<2x16x64xf32>
    %cst_98 = arith.constant dense<0.000000e+00> : vector<32x64xf32>
    %129 = tpu.matmul %3, %98, %cst_98 {dimension_numbers = #tpu.dot_dimension_numbers<[1], [0], [0], [1], [0, 0, 1, 1], [], []>} : vector<32x32xf32>, vector<32x64xf32>, vector<32x64xf32> -> vector<32x64xf32>
    %130 = vector.broadcast %99 : vector<1x64xf32> to vector<32x64xf32>
    %131 = arith.addf %129, %130 : vector<32x64xf32>
    %132 = vector.shape_cast %131 : vector<32x64xf32> to vector<2x16x64xf32>
    %133 = arith.addf %128, %132 : vector<2x16x64xf32>
    %134 = vector.extract_strided_slice %133 {offsets = [0, 0, 0], sizes = [2, 16, 32], strides = [1, 1, 1]} : vector<2x16x64xf32> to vector<2x16x32xf32>
    %135 = vector.extract_strided_slice %133 {offsets = [0, 0, 32], sizes = [2, 16, 32], strides = [1, 1, 1]} : vector<2x16x64xf32> to vector<2x16x32xf32>
    %136 = math.tanh %134 : vector<2x16x32xf32>
    %137 = arith.negf %135 : vector<2x16x32xf32>
    %138 = math.exp %137 : vector<2x16x32xf32>
    %cst_99 = arith.constant 1.000000e+00 : f32
    %139 = vector.broadcast %cst_99 : f32 to vector<2x16x32xf32>
    %140 = arith.addf %139, %138 : vector<2x16x32xf32>
    %141 = arith.divf %139, %140 : vector<2x16x32xf32>
    %142 = arith.mulf %136, %141 : vector<2x16x32xf32>
    %143 = vector.shape_cast %142 : vector<2x16x32xf32> to vector<32x32xf32>
    %cst_100 = arith.constant dense<0.000000e+00> : vector<32x64xf32>
    %144 = tpu.matmul %143, %100, %cst_100 {dimension_numbers = #tpu.dot_dimension_numbers<[1], [0], [0], [1], [0, 0, 1, 1], [], []>} : vector<32x32xf32>, vector<32x64xf32>, vector<32x64xf32> -> vector<32x64xf32>
    %145 = vector.broadcast %101 : vector<1x64xf32> to vector<32x64xf32>
    %146 = arith.addf %144, %145 : vector<32x64xf32>
    %147 = vector.extract_strided_slice %146 {offsets = [0, 32], sizes = [32, 32], strides = [1, 1]} : vector<32x64xf32> to vector<32x32xf32>
    %148 = arith.addf %93, %147 : vector<32x32xf32>
    %cst_101 = arith.constant 1.41421354 : f32
    %149 = vector.broadcast %cst_101 : f32 to vector<32x32xf32>
    %150 = arith.divf %148, %149 : vector<32x32xf32>
    %c0_102 = arith.constant 0 : index
    %c0_103 = arith.constant 0 : index
    %151 = vector.load %arg25[%c0_102, %c0_103] : memref<32x32xf32, #tpu.memory_space<vmem>>, vector<32x32xf32>
    %c0_104 = arith.constant 0 : index
    %c0_105 = arith.constant 0 : index
    %152 = vector.load %arg26[%c0_104, %c0_105] : memref<1x32xf32, #tpu.memory_space<vmem>>, vector<1x32xf32>
    %cst_106 = arith.constant dense<0.000000e+00> : vector<32x32xf32>
    %153 = tpu.matmul %150, %151, %cst_106 {dimension_numbers = #tpu.dot_dimension_numbers<[1], [0], [0], [1], [0, 0, 1, 1], [], []>} : vector<32x32xf32>, vector<32x32xf32>, vector<32x32xf32> -> vector<32x32xf32>
    %154 = vector.broadcast %152 : vector<1x32xf32> to vector<32x32xf32>
    %155 = arith.addf %153, %154 : vector<32x32xf32>
    %cst_107 = arith.constant 0.000000e+00 : f32
    %156 = vector.broadcast %cst_107 : f32 to vector<32x32xf32>
    %157 = arith.maximumf %155, %156 : vector<32x32xf32>
    %c0_108 = arith.constant 0 : index
    %c0_109 = arith.constant 0 : index
    %158 = vector.load %arg27[%c0_108, %c0_109] : memref<32x16xf32, #tpu.memory_space<vmem>>, vector<32x16xf32>
    %c0_110 = arith.constant 0 : index
    %c0_111 = arith.constant 0 : index
    %159 = vector.load %arg28[%c0_110, %c0_111] : memref<1x16xf32, #tpu.memory_space<vmem>>, vector<1x16xf32>
    %cst_112 = arith.constant dense<0.000000e+00> : vector<32x16xf32>
    %160 = tpu.matmul %157, %158, %cst_112 {dimension_numbers = #tpu.dot_dimension_numbers<[1], [0], [0], [1], [0, 0, 1, 1], [], []>} : vector<32x32xf32>, vector<32x16xf32>, vector<32x16xf32> -> vector<32x16xf32>
    %161 = vector.broadcast %159 : vector<1x16xf32> to vector<32x16xf32>
    %162 = arith.addf %160, %161 : vector<32x16xf32>
    %c0_113 = arith.constant 0 : index
    %c0_114 = arith.constant 0 : index
    %163 = vector.load %arg29[%c0_113, %c0_114] : memref<32x16xf32, #tpu.memory_space<vmem>>, vector<32x16xf32>
    tpu.vector_store %arg29[%c0_113, %c0_114], %162 {strides = array<i32>} : memref<32x16xf32, #tpu.memory_space<vmem>>, vector<32x16xf32>,
    return
  }
}

</mosaic_0001>

<bundles_post_ra>
// kernel: custom-call.2
= control target key start
LH: loop header
LB: loop body
LE: loop exit
PB: predicated region body
PF: predicated region fallthrough
CT: control target
= control target key end

     0   :  { %s6_s0 = inlined_call_operand.vmem [shape: u32[2,8], index: 0, kind: output, shape index: {}]  }

// kernel: ne.2
= control target key start
LH: loop header
LB: loop body
LE: loop exit
PB: predicated region body
PF: predicated region fallthrough
CT: control target
= control target key end

     0   :  { %v15_v2 = vmov 0   ;;  %s40_s0 = inlined_call_operand.vmem [shape: f32[2,8], index: 0, kind: input, shape index: {}, may-alias: {0,1}]   ;;  %s41_s1 = inlined_call_operand.vmem [shape: f32[2,8], index: 1, kind: input, shape index: {}, may-alias: {0,1}]   ;;  %s42_s2 = inlined_call_operand.vmem [shape: pred[2,8], index: 2, kind: output, shape index: {}]  }
   0x1   :  { %v3_v0 = vld [vmem:[%s40_s0] sm:$0x3] }
   0x2   :  { %v4_v1 = vld [vmem:[%s41_s1] sm:$0x3] }
   0x3   :  { %vm7_vm0 = vcmp.ne.f32.partialorder %v3_v0, %v4_v1 }
   0x4   :  { %v8_v3 = vsel %vm7_vm0, 1, %v15_v2 }
   0x5   :  { %v10_v4 = vpack.c.b16 %v15_v2, %v8_v3 }
   0x7   :  { %v11_v5 = vpack.c.b8 %v15_v2, %v10_v4 }
   0x9   :  { %13 = vst [vmem:[%s42_s2] sm:$0x1] %v11_v5 }

// kernel: squeeze.16
= control target key start
LH: loop header
LB: loop body
LE: loop exit
PB: predicated region body
PF: predicated region fallthrough
CT: control target
= control target key end

     0   :  { %vm7_vm0 = vcmask 64512   ;;  %s39_s0 = inlined_call_operand.vmem [shape: f32[16], index: 0, kind: input, shape index: {}]   ;;  %s40_s1 = inlined_call_operand.vmem [shape: f32[2,8], index: 1, kind: output, shape index: {}]  }
   0x1   :  { %v4_v0 = vld [vmem:[%s39_s0] sm:$0x1]  ;;  %s22_s0 = smov 120  }
   0x2   :  { %5 = vst [vmem:[#allocation1] sm:$0x1] %v4_v0 }
   0x9   :  { %v9_v1 = vld [vmem:[#allocation1] sm:$0x1]  }
   0xa   :  { %v6_v2 = vld [vmem:[#allocation1] sm:$0x1]   ;;  %10 = vrot.lane.b32.xlu0 %v9_v1, %s22_s0 }
   0xb   :  { %8 = vst.msk [vmem:[#allocation0] sm:$0x1] %vm7_vm0, %v6_v2  }
  0x7c   :  { %v11_v3 = vpop.permute.xlu0 %10  }
  0x7d   :  { %14 = vst.msk [vmem:[#allocation0 + $0x1] sm:$0x1] %vm7_vm0, %v11_v3  }
  0x84   :  { %v18_v4 = vld [vmem:[#allocation0] sm:$0x3] }
  0x85   :  { %20 = vst [vmem:[%s40_s1] sm:$0x3] %v18_v4 }

// kernel: fastspeech2_forward.4
= control target key start
LH: loop header
LB: loop body
LE: loop exit
PB: predicated region body
PF: predicated region fallthrough
CT: control target
= control target key end

     0   :  { %vm67_vm0 = vcmask 130048   ;;  %vm256_vm9 = vcmask 261120   ;;  %vm457_vm10 = vcmask 257024   ;;  %s3913_s25 = smov 112   ;;  %s4581_s2 = inlined_call_operand.vmem [shape: f32[16,32], index: 2, kind: input, shape index: {}]   ;;  %s4582_s0 = inlined_call_operand.vmem [shape: f32[2,16,16], index: 0, kind: input, shape index: {}]   ;;  %s4583_s4 = inlined_call_operand.vmem [shape: f32[32,32], index: 4, kind: input, shape index: {}]   ;;  %s4584_s3 = inlined_call_operand.vmem [shape: f32[1,32], index: 3, kind: input, shape index: {}]   ;;  %s4585_s6 = inlined_call_operand.vmem [shape: f32[160,64], index: 6, kind: input, shape index: {}]   ;;  %s4586_s5 = inlined_call_operand.vmem [shape: f32[1,32], index: 5, kind: input, shape index: {}]   ;;  %s4587_s7 = inlined_call_operand.vmem [shape: f32[1,64], index: 7, kind: input, shape index: {}]   ;;  %s4588_s8 = inlined_call_operand.vmem [shape: f32[160,64], index: 8, kind: input, shape index: {}]   ;;  %s4589_s1 = inlined_call_operand.vmem [shape: f32[2,16], index: 1, kind: input, shape index: {}]   ;;  %s4590_s9 = inlined_call_operand.vmem [shape: f32[1,64], index: 9, kind: input, shape index: {}]   ;;  %s4591_s10 = inlined_call_operand.vmem [shape: f32[32,96], index: 10, kind: input, shape index: {}]   ;;  %s4592_s11 = inlined_call_operand.vmem [shape: f32[1,96], index: 11, kind: input, shape index: {}]   ;;  %s4593_s12 = inlined_call_operand.vmem [shape: f32[32,32], index: 12, kind: input, shape index: {}]   ;;  %s4594_s14 = inlined_call_operand.vmem [shape: f32[32,32], index: 14, kind: input, shape index: {}]   ;;  %s4595_s13 = inlined_call_operand.vmem [shape: f32[1,32], index: 13, kind: input, shape index: {}]   ;;  %s4596_s15 = inlined_call_operand.vmem [shape: f32[1,32], index: 15, kind: input, shape index: {}]   ;;  %s4597_s16 = inlined_call_operand.vmem [shape: f32[2,32], index: 16, kind: output, shape index: {}]  }
   0x1   :  { %4599 = sst [smem:[#allocation3_spill]] %s4581_s2  ;;  %v54_v2 = vld [vmem:[%s4582_s0] sm:$0xff]  ;;  %v55_v4 = vld [vmem:[%s4582_s0 + $0x8] sm:$0xff]  ;;  %v56_v5 = vld [vmem:[%s4582_s0 + $0x10] sm:$0xff] }
   0x2   :  { %s4600_s23 = sld [smem:[#allocation3_spill]]  ;;  %3277 = vmatprep.mubr.msk.f32.mxu0 %vm67_vm0, %v54_v2  ;;  %v57_v6 = vld [vmem:[%s4582_s0 + $0x18] sm:$0xff]  ;;  %v245_v7 = vld [vmem:[%s4583_s4] sm:$0xff]  ;;  %v246_v8 = vld [vmem:[%s4583_s4 + $0x8] sm:$0xff] }
   0x3   :  { %v3545_v9 = vpack.c.bf16 %v246_v8, %v245_v7  ;;  %v247_v10 = vld [vmem:[%s4583_s4 + $0x10] sm:$0xff]  ;;  %v248_v11 = vld [vmem:[%s4583_s4 + $0x18] sm:$0xff]  ;;  %v3014_v13 = vld [vmem:[%s4584_s3] ss:$0 sm:$0xff]  ;;  %s3914_s4 = smov 48  }
   0x4   :  { %v3549_v12 = vpack.c.bf16 %v248_v11, %v247_v10 }
   0x5   :  { %3546 = vmatprep.subr.bf16.mxu1 %v3545_v9 }
   0x6   :  { %3548 = vmatpush3.bf16.msra.mxu1 %v3545_v9 }
   0x7   :  { %3550 = vmatprep.subr.bf16.mxu1 %v3549_v12 }
   0x8   :  { %v58_v0 = vld [vmem:[%s4600_s23] sm:$0xff]  ;;  %v59_v1 = vld [vmem:[%s4600_s23 + $0x8] sm:$0xff]  ;;  %s3909_s23 = smov 96  }
   0x9   :  { %v3541_v3 = vpack.c.bf16 %v59_v1, %v58_v0 }
   0xa   :  { %3552 = vmatpush3.bf16.msra.mxu1 %v3549_v12 }
   0xb   :  { %3542 = vmatprep.subr.bf16.mxu0 %v3541_v3 }
   0xc   :  { %3544 = vmatpush3.bf16.msra.mxu0 %v3541_v3 }
   0xf   :  { %3278 = vmatmul.mubr.msk.f32.vlgmr.msra.gmra.mrb[0].mxu0 %vm67_vm0, %v55_v4 }
  0x10   :  { %3280 = vmatprep.mubr.msk.f32.mxu0 %vm67_vm0, %v56_v5 }
  0x13   :  { %3281 = vmatmul.mubr.msk.f32.gmra.mrb[2].mxu0 %vm67_vm0, %v57_v6 }
  0xe2   :  { %v3279_v14 = vpop.f32.mrb[0].mxu0 }
  0xe3   :  { %v4037_v15 = vadd.f32 %v3279_v14, %v3014_v13  ;;  %v146_v16 = vpop.f32.mrb[1].mxu0 }
  0xe4   :  { %v4039_v17 = vadd.f32 %v3014_v13, %v146_v16 }
  0xe5   :  { %v178_v18 = vand.u32 2147483647, %v4037_v15  ;;  %v166_v51 = vmax.f32 %v4037_v15, 0.0  ;;  %vm170_vm1 = vcmp.ne.f32.partialorder %v4037_v15, %v4037_v15 }
  0xe6   :  { %v177_v19 = vand.u32 2147483647, %v4039_v17  ;;  %v3282_v20 = vpop.f32.mrb[2].mxu0  ;;  %v165_v61 = vmax.f32 %v4039_v17, 0.0  ;;  %vm169_vm4 = vcmp.ne.f32.partialorder %v4039_v17, %v4039_v17 }
  0xe7   :  { %v182_v21 = vsub.f32 0.0, %v178_v18  ;;  %v4043_v22 = vadd.f32 %v3282_v20, %v3014_v13  ;;  %v156_v23 = vpop.f32.mrb[3].mxu0 }
  0xe8   :  { %v181_v24 = vsub.f32 0.0, %v177_v19  ;;  %v4045_v25 = vadd.f32 %v3014_v13, %v156_v23 }
  0xe9   :  { %v187_v26 = vmul.f32 1.442695, %v182_v21  ;;  %v180_v27 = vand.u32 2147483647, %v4043_v22  ;;  %v168_v2 = vmax.f32 %v4043_v22, 0.0  ;;  %vm172_vm7 = vcmp.ne.f32.partialorder %v4043_v22, %v4043_v22 }
  0xea   :  { %v185_v28 = vmul.f32 1.442695, %v181_v24  ;;  %v179_v29 = vand.u32 2147483647, %v4045_v25  ;;  %v167_v7 = vmax.f32 %v4045_v25, 0.0  ;;  %vm171_vm8 = vcmp.ne.f32.partialorder %v4045_v25, %v4045_v25 }
  0xeb   :  { %3792 = vpow2.f32 %v187_v26  ;;  %v184_v30 = vsub.f32 0.0, %v180_v27 }
  0xec   :  { %3794 = vpow2.f32 %v185_v28  ;;  %v183_v31 = vsub.f32 0.0, %v179_v29 }
  0xed   :  { %v191_v32 = vmul.f32 1.442695, %v184_v30  ;;  %v3908_v30 = vmov 0.0  }
  0xee   :  { %v189_v33 = vmul.f32 1.442695, %v183_v31  ;;  %456 = vst.msk [vmem:[#allocation2 + $0x8] sm:$0xff] %vm256_vm9, %v3908_v30  ;;  %455 = vst.msk [vmem:[#allocation2] sm:$0xff] %vm256_vm9, %v3908_v30  ;;  %v437_v31 = vld [vmem:[%s4585_s6 + $0x18] sm:$0xff] }
  0xef   :  { %3796 = vpow2.f32 %v191_v32  ;;  %458 = vst.msk [vmem:[#allocation2 + $0x10] sm:$0xf] %vm457_vm10, %v3908_v30  ;;  %461 = vst.msk [vmem:[#allocation2 + $0x28] sm:$0xf] %vm457_vm10, %v3908_v30 }
  0xf0   :  { %3798 = vpow2.f32 %v189_v33  ;;  %459 = vst.msk [vmem:[#allocation2 + $0x18] sm:$0xff] %vm256_vm9, %v3908_v30  ;;  %460 = vst.msk [vmem:[#allocation2 + $0x20] sm:$0xff] %vm256_vm9, %v3908_v30  ;;  %v438_v33 = vld [vmem:[%s4585_s6 + $0x20] sm:$0xff] }
  0xf5   :  { %v3793_v34 = vpop.eup %3792 }
  0xf6   :  { %v3795_v35 = vpop.eup %3794  ;;  %v202_v36 = vadd.f32 1.0, %v3793_v34  ;;  %v205_v41 = vmul.f32 -0.5, %v3793_v34  ;;  %v208_v45 = vand.u32 2147483647, %v3793_v34 }
  0xf7   :  { %v193_v37 = vadd.f32 1.0, %v3795_v35  ;;  %v196_v43 = vmul.f32 -0.5, %v3795_v35  ;;  %v199_v49 = vand.u32 2147483647, %v3795_v35 }
  0xf8   :  { %3800 = vlog2.f32 %v202_v36  ;;  %v206_v44 = vadd.f32 1.0, %v205_v41  ;;  %vm209_vm2 = vcmp.lt.f32.partialorder %v208_v45, 0.0004427343  ;;  %v3019_v36 = vld [vmem:[%s4586_s5] ss:$0 sm:$0xff] }
  0xf9   :  { %v3797_v38 = vpop.eup %3796  ;;  %3802 = vlog2.f32 %v193_v37  ;;  %v197_v47 = vadd.f32 1.0, %v196_v43  ;;  %vm200_vm3 = vcmp.lt.f32.partialorder %v199_v49, 0.0004427343 }
  0xfa   :  { %v3799_v39 = vpop.eup %3798  ;;  %v220_v40 = vadd.f32 1.0, %v3797_v38  ;;  %v223_v46 = vmul.f32 -0.5, %v3797_v38  ;;  %v207_v54 = vmul.f32 %v3793_v34, %v206_v44  ;;  %v226_v58 = vand.u32 2147483647, %v3797_v38  ;;  %v439_v34 = vld [vmem:[%s4585_s6 + $0x28] sm:$0xff] }
  0xfb   :  { %v211_v42 = vadd.f32 1.0, %v3799_v39  ;;  %v214_v48 = vmul.f32 -0.5, %v3799_v39  ;;  %v198_v57 = vmul.f32 %v3795_v35, %v197_v47  ;;  %v217_v62 = vand.u32 2147483647, %v3799_v39 }
  0xfc   :  { %3804 = vlog2.f32 %v220_v40  ;;  %v224_v55 = vadd.f32 1.0, %v223_v46  ;;  %vm227_vm5 = vcmp.lt.f32.partialorder %v226_v58, 0.0004427343  ;;  %v4106_v35 = vpack.c.bf16 %v439_v34, %v438_v33 }
  0xfd   :  { %3806 = vlog2.f32 %v211_v42  ;;  %v215_v59 = vadd.f32 1.0, %v214_v48  ;;  %vm218_vm6 = vcmp.lt.f32.partialorder %v217_v62, 0.0004427343 }
  0xfe   :  { %v225_v6 = vmul.f32 %v3797_v38, %v224_v55 }
  0xff   :  { %v216_v10 = vmul.f32 %v3799_v39, %v215_v59 }
 0x102   :  { %v3801_v50 = vpop.eup %3800 }
 0x103   :  { %v3803_v52 = vpop.eup %3802  ;;  %v204_v53 = vmul.f32 0.6931472, %v3801_v50 }
 0x104   :  { %v195_v56 = vmul.f32 0.6931472, %v3803_v52 }
 0x105   :  { %v210_v60 = vsel %vm209_vm2, %v207_v54, %v204_v53 }
 0x106   :  { %v3805_v63 = vpop.eup %3804  ;;  %v230_v0 = vadd.f32 %v210_v60, %v166_v51  ;;  %v201_v1 = vsel %vm200_vm3, %v198_v57, %v195_v56 }
 0x107   :  { %v3807_v3 = vpop.eup %3806  ;;  %v229_v4 = vadd.f32 %v201_v1, %v165_v61  ;;  %v222_v5 = vmul.f32 0.6931472, %v3805_v63 }
 0x108   :  { %v234_v8 = vsel %vm170_vm1, %v4037_v15, %v230_v0  ;;  %v213_v9 = vmul.f32 0.6931472, %v3807_v3 }
 0x109   :  { %3808 = vtanh.f32 %v234_v8  ;;  %v228_v11 = vsel %vm227_vm5, %v225_v6, %v222_v5  ;;  %v233_v12 = vsel %vm169_vm4, %v4039_v17, %v229_v4  ;;  %vm4445_vm4 = vmpackc.low %vm67_vm0, %vm67_vm0  ;;  %vm2989_vm5 = vcmask 123904  }
 0x10a   :  { %v232_v13 = vadd.f32 %v228_v11, %v168_v2  ;;  %v219_v14 = vsel %vm218_vm6, %v216_v10, %v213_v9  ;;  %3810 = vtanh.f32 %v233_v12  ;;  %vm3008_vm6 = vcmask 254976  }
 0x10b   :  { %v231_v16 = vadd.f32 %v219_v14, %v167_v7 }
 0x10c   :  { %v236_v18 = vsel %vm172_vm7, %v4043_v22, %v232_v13 }
 0x10d   :  { %3812 = vtanh.f32 %v236_v18  ;;  %v235_v19 = vsel %vm171_vm8, %v4045_v25, %v231_v16 }
 0x10e   :  { %3814 = vtanh.f32 %v235_v19 }
 0x113   :  { %v3809_v20 = vpop.eup %3808 }
 0x114   :  { %v3811_v21 = vpop.eup %3810  ;;  %v242_v24 = vmul.f32 %v3809_v20, %v4037_v15  ;;  %v434_v15 = vld [vmem:[%s4585_s6] sm:$0xff] }
 0x115   :  { %v241_v23 = vmul.f32 %v3811_v21, %v4039_v17  ;;  %v435_v17 = vld [vmem:[%s4585_s6 + $0x8] sm:$0xff] }
 0x117   :  { %v3813_v26 = vpop.eup %3812  ;;  %3291 = vmatprep.mubr.msk.f32.mxu1 %vm256_vm9, %v241_v23 }
 0x118   :  { %v3815_v27 = vpop.eup %3814  ;;  %3292 = vmatmul.mubr.msk.f32.vlgmr.msra.gmra.mrb[0].mxu1 %vm256_vm9, %v242_v24  ;;  %v244_v29 = vmul.f32 %v3813_v26, %v4043_v22  ;;  %v3553_v22 = vpack.c.bf16 %v435_v17, %v434_v15 }
 0x119   :  { %v243_v28 = vmul.f32 %v3815_v27, %v4045_v25  ;;  %v436_v25 = vld [vmem:[%s4585_s6 + $0x10] sm:$0xff] }
 0x11a   :  { %3554 = vmatprep.subr.bf16.mxu0 %v3553_v22  ;;  %v3557_v32 = vpack.c.bf16 %v437_v31, %v436_v25 }
 0x11b   :  { %3294 = vmatprep.mubr.msk.f32.mxu1 %vm256_vm9, %v243_v28  ;;  %3556 = vmatpush3.bf16.msra.mxu0 %v3553_v22 }
 0x11c   :  { %3295 = vmatmul.mubr.msk.f32.gmra.mrb[2].mxu1 %vm256_vm9, %v244_v29  ;;  %3558 = vmatprep.subr.bf16.mxu0 %v3557_v32 }
 0x11f   :  { %3560 = vmatpush3.bf16.msra.mxu0 %v3557_v32 }
 0x120   :  { %3562 = vmatprep.subr.bf16.mxu0 %v4106_v35 }
 0x1eb   :  { %v3293_v37 = vpop.f32.mrb[0].mxu1 }
 0x1ec   :  { %v4112_v38 = vadd.f32 %v3293_v37, %v3019_v36  ;;  %v335_v39 = vpop.f32.mrb[1].mxu1 }
 0x1ed   :  { %v4114_v40 = vadd.f32 %v3019_v36, %v335_v39 }
 0x1ee   :  { %v367_v41 = vand.u32 2147483647, %v4112_v38  ;;  %v355_v10 = vmax.f32 %v4112_v38, 0.0  ;;  %vm359_vm11 = vcmp.ne.f32.partialorder %v4112_v38, %v4112_v38 }
 0x1ef   :  { %v366_v42 = vand.u32 2147483647, %v4114_v40  ;;  %v3296_v43 = vpop.f32.mrb[2].mxu1  ;;  %v354_v23 = vmax.f32 %v4114_v40, 0.0  ;;  %vm358_vm14 = vcmp.ne.f32.partialorder %v4114_v40, %v4114_v40 }
 0x1f0   :  { %v371_v44 = vsub.f32 0.0, %v367_v41  ;;  %v4118_v45 = vadd.f32 %v3296_v43, %v3019_v36  ;;  %v345_v46 = vpop.f32.mrb[3].mxu1 }
 0x1f1   :  { %v370_v47 = vsub.f32 0.0, %v366_v42  ;;  %v4120_v48 = vadd.f32 %v3019_v36, %v345_v46 }
 0x1f2   :  { %v376_v49 = vmul.f32 1.442695, %v371_v44  ;;  %v369_v50 = vand.u32 2147483647, %v4118_v45  ;;  %v357_v29 = vmax.f32 %v4118_v45, 0.0  ;;  %vm361_vm2 = vcmp.ne.f32.partialorder %v4118_v45, %v4118_v45 }
 0x1f3   :  { %v374_v51 = vmul.f32 1.442695, %v370_v47  ;;  %v368_v52 = vand.u32 2147483647, %v4120_v48  ;;  %v356_v31 = vmax.f32 %v4120_v48, 0.0  ;;  %vm360_vm3 = vcmp.ne.f32.partialorder %v4120_v48, %v4120_v48 }
 0x1f4   :  { %3816 = vpow2.f32 %v376_v49  ;;  %v373_v53 = vsub.f32 0.0, %v369_v50 }
 0x1f5   :  { %3818 = vpow2.f32 %v374_v51  ;;  %v372_v54 = vsub.f32 0.0, %v368_v52 }
 0x1f6   :  { %v380_v55 = vmul.f32 1.442695, %v373_v53 }
 0x1f7   :  { %v378_v56 = vmul.f32 1.442695, %v372_v54 }
 0x1f8   :  { %3820 = vpow2.f32 %v380_v55 }
 0x1f9   :  { %3822 = vpow2.f32 %v378_v56 }
 0x1fe   :  { %v3817_v57 = vpop.eup %3816 }
 0x1ff   :  { %v3819_v58 = vpop.eup %3818  ;;  %v391_v59 = vadd.f32 1.0, %v3817_v57  ;;  %v394_v0 = vmul.f32 -0.5, %v3817_v57  ;;  %v397_v4 = vand.u32 2147483647, %v3817_v57 }
 0x200   :  { %v382_v60 = vadd.f32 1.0, %v3819_v58  ;;  %v385_v2 = vmul.f32 -0.5, %v3819_v58  ;;  %v388_v8 = vand.u32 2147483647, %v3819_v58 }
 0x201   :  { %3824 = vlog2.f32 %v391_v59  ;;  %v395_v3 = vadd.f32 1.0, %v394_v0  ;;  %vm398_vm12 = vcmp.lt.f32.partialorder %v397_v4, 0.0004427343 }
 0x202   :  { %v3821_v61 = vpop.eup %3820  ;;  %3826 = vlog2.f32 %v382_v60  ;;  %v386_v6 = vadd.f32 1.0, %v385_v2  ;;  %vm389_vm13 = vcmp.lt.f32.partialorder %v388_v8, 0.0004427343  ;;  %v444_v2 = vld [vmem:[%s4585_s6 + $0x50] sm:$0xff] }
 0x203   :  { %v3823_v62 = vpop.eup %3822  ;;  %v409_v63 = vadd.f32 1.0, %v3821_v61  ;;  %v412_v5 = vmul.f32 -0.5, %v3821_v61  ;;  %v396_v13 = vmul.f32 %v3817_v57, %v395_v3  ;;  %v415_v19 = vand.u32 2147483647, %v3821_v61  ;;  %v445_v3 = vld [vmem:[%s4585_s6 + $0x58] sm:$0xff] }
 0x204   :  { %v400_v1 = vadd.f32 1.0, %v3823_v62  ;;  %v403_v7 = vmul.f32 -0.5, %v3823_v62  ;;  %v387_v18 = vmul.f32 %v3819_v58, %v386_v6  ;;  %v406_v24 = vand.u32 2147483647, %v3823_v62 }
 0x205   :  { %3828 = vlog2.f32 %v409_v63  ;;  %v413_v14 = vadd.f32 1.0, %v412_v5  ;;  %vm416_vm15 = vcmp.lt.f32.partialorder %v415_v19, 0.0004427343 }
 0x206   :  { %3830 = vlog2.f32 %v400_v1  ;;  %v404_v20 = vadd.f32 1.0, %v403_v7  ;;  %vm407_vm1 = vcmp.lt.f32.partialorder %v406_v24, 0.0004427343  ;;  %v451_v24 = vld [vmem:[%s4585_s6 + $0x88] sm:$0xff] }
 0x207   :  { %v414_v25 = vmul.f32 %v3821_v61, %v413_v14  ;;  %v3573_v14 = vpack.c.bf16 %v445_v3, %v444_v2 }
 0x208   :  { %v405_v34 = vmul.f32 %v3823_v62, %v404_v20  ;;  %v449_v20 = vld [vmem:[%s4585_s6 + $0x78] sm:$0xff] }
 0x20b   :  { %v3825_v9 = vpop.eup %3824 }
 0x20c   :  { %v3827_v11 = vpop.eup %3826  ;;  %v393_v12 = vmul.f32 0.6931472, %v3825_v9 }
 0x20d   :  { %v384_v16 = vmul.f32 0.6931472, %v3827_v11 }
 0x20e   :  { %v399_v21 = vsel %vm398_vm12, %v396_v13, %v393_v12 }
 0x20f   :  { %v3829_v26 = vpop.eup %3828  ;;  %v419_v27 = vadd.f32 %v399_v21, %v355_v10  ;;  %v390_v28 = vsel %vm389_vm13, %v387_v18, %v384_v16  ;;  %v446_v16 = vld [vmem:[%s4585_s6 + $0x60] sm:$0xff]  ;;  %v447_v18 = vld [vmem:[%s4585_s6 + $0x68] sm:$0xff] }
 0x210   :  { %v3831_v15 = vpop.eup %3830  ;;  %v418_v17 = vadd.f32 %v390_v28, %v354_v23  ;;  %v411_v22 = vmul.f32 0.6931472, %v3829_v26  ;;  %v3577_v19 = vpack.c.bf16 %v447_v18, %v446_v16  ;;  %v450_v23 = vld [vmem:[%s4585_s6 + $0x80] sm:$0xff]  ;;  %v453_v28 = vld [vmem:[%s4585_s6 + $0x98] sm:$0xff]  ;;  %v1054_v18 = vld [vmem:[%s4588_s8 + $0x48] sm:$0xff] }
 0x211   :  { %v423_v32 = vsel %vm359_vm11, %v4112_v38, %v419_v27  ;;  %v402_v33 = vmul.f32 0.6931472, %v3831_v15  ;;  %v3585_v26 = vpack.c.bf16 %v451_v24, %v450_v23  ;;  %v452_v27 = vld [vmem:[%s4585_s6 + $0x90] sm:$0xff]  ;;  %v3028_v15 = vld [vmem:[%s4587_s7] ss:$0 sm:$0xff] }
 0x212   :  { %3832 = vtanh.f32 %v423_v32  ;;  %v422_v36 = vsel %vm358_vm14, %v4114_v40, %v418_v17  ;;  %v417_v37 = vsel %vm416_vm15, %v414_v25, %v411_v22 }
 0x213   :  { %3834 = vtanh.f32 %v422_v36  ;;  %v421_v39 = vadd.f32 %v417_v37, %v357_v29  ;;  %v408_v41 = vsel %vm407_vm1, %v405_v34, %v402_v33  ;;  %v3589_v29 = vpack.c.bf16 %v453_v28, %v452_v27  ;;  %v1057_v27 = vld [vmem:[%s4588_s8 + $0x60] sm:$0xff]  ;;  %v1058_v28 = vld [vmem:[%s4588_s8 + $0x68] sm:$0xff] }
 0x214   :  { %v420_v42 = vadd.f32 %v408_v41, %v356_v31 }
 0x215   :  { %v425_v43 = vsel %vm361_vm2, %v4118_v45, %v421_v39 }
 0x216   :  { %3836 = vtanh.f32 %v425_v43  ;;  %v424_v44 = vsel %vm360_vm3, %v4120_v48, %v420_v42 }
 0x217   :  { %3838 = vtanh.f32 %v424_v44 }
 0x21c   :  { %v3833_v46 = vpop.eup %3832 }
 0x21d   :  { %v3835_v47 = vpop.eup %3834  ;;  %v4144_v49 = vmul.f32 %v3833_v46, %v4112_v38  ;;  %v440_v38 = vld [vmem:[%s4585_s6 + $0x30] sm:$0xff] }
 0x21e   :  { %v4147_v50 = vmul.f32 %v3835_v47, %v4114_v40  ;;  %v441_v40 = vld [vmem:[%s4585_s6 + $0x38] sm:$0xff] }
 0x21f   :  { %463 = vst.msk [vmem:[#allocation2 + $0xa] sm:$0xff] %vm256_vm9, %v4144_v49  ;;  %v3565_v58 = vpack.c.bf16 %v441_v40, %v440_v38 }
 0x220   :  { %v3837_v51 = vpop.eup %3836  ;;  %462 = vst.msk [vmem:[#allocation2 + $0x2] sm:$0xff] %vm256_vm9, %v4147_v50 }
 0x221   :  { %v3839_v52 = vpop.eup %3838  ;;  %v4154_v53 = vmul.f32 %v3837_v51, %v4118_v45  ;;  %v442_v45 = vld [vmem:[%s4585_s6 + $0x40] sm:$0xff] }
 0x222   :  { %v4157_v54 = vmul.f32 %v3839_v52, %v4120_v48  ;;  %v443_v48 = vld [vmem:[%s4585_s6 + $0x48] sm:$0xff] }
 0x223   :  { %465 = vst.msk [vmem:[#allocation2 + $0x22] sm:$0xff] %vm256_vm9, %v4154_v53  ;;  %v3569_v7 = vpack.c.bf16 %v443_v48, %v442_v45  ;;  %v1045_v45 = vld [vmem:[%s4588_s8] sm:$0xff]  ;;  %v1046_v48 = vld [vmem:[%s4588_s8 + $0x8] sm:$0xff] }
 0x224   :  { %464 = vst.msk [vmem:[#allocation2 + $0x1a] sm:$0xff] %vm256_vm9, %v4157_v54 }
 0x226   :  { %v683_v55 = vld [vmem:[#allocation2 + $0xa] sm:$0xff] }
 0x227   :  { %v466_v56 = vld [vmem:[#allocation2] sm:$0xff]  ;;  %v467_v57 = vld [vmem:[#allocation2 + $0x8] sm:$0xff] }
 0x228   :  { %v4175_v59 = vld [vmem:[#allocation2 + $0xb] sm:$0xff]  ;;  %3305 = vmatprep.mubr.msk.f32.mxu0 %vm256_vm9, %v466_v56  ;;  %v577_v60 = vld [vmem:[#allocation2 + $0x1] sm:$0xff] }
 0x229   :  { %v578_v61 = vld [vmem:[#allocation2 + $0x9] sm:$0xff]  ;;  %3306 = vmatmul.mubr.msk.f32.vlgmr.msra.gmra.mrb[4].mxu0 %vm256_vm9, %v467_v57  ;;  %v1048_v57 = vld [vmem:[%s4588_s8 + $0x18] sm:$0xff] }
 0x22a   :  { %v4178_v62 = vld [vmem:[#allocation2 + $0xc] sm:$0xff]  ;;  %v682_v63 = vld [vmem:[#allocation2 + $0x2] sm:$0xff]  ;;  %3564 = vmatpush3.bf16.msra.mxu0 %v4106_v35 }
 0x22b   :  { %v787_v0 = vld [vmem:[#allocation2 + $0x3] sm:$0xff]  ;;  %1068 = vst.msk [vmem:[#allocation2 + $0x10] sm:$0xf] %vm457_vm10, %v3908_v30  ;;  %v468_v5 = vld [vmem:[#allocation2 + $0x18] sm:$0xff]  ;;  %3566 = vmatprep.subr.bf16.mxu0 %v3565_v58  ;;  %v1047_v56 = vld [vmem:[%s4588_s8 + $0x10] sm:$0xff] }
 0x22c   :  { %v892_v1 = vld [vmem:[#allocation2 + $0x4] sm:$0xff]  ;;  %3308 = vmatprep.mubr.msk.f32.mxu0 %vm256_vm9, %v468_v5  ;;  %v579_v8 = vld [vmem:[#allocation2 + $0x19] sm:$0xff] }
 0x22d   :  { %v685_v4 = vld [vmem:[#allocation2 + $0x22] sm:$0xff]  ;;  %1066 = vst.msk [vmem:[#allocation2] sm:$0xff] %vm256_vm9, %v3908_v30  ;;  %1067 = vst.msk [vmem:[#allocation2 + $0x8] sm:$0xff] %vm256_vm9, %v3908_v30  ;;  %v684_v11 = vld [vmem:[#allocation2 + $0x1a] sm:$0xff] }
 0x22e   :  { %v469_v6 = vld [vmem:[#allocation2 + $0x20] sm:$0xff]  ;;  %3568 = vmatpush3.bf16.msra.mxu0 %v3565_v58 }
 0x22f   :  { %v790_v35 = vld [vmem:[#allocation2 + $0x23] sm:$0xff]  ;;  %3309 = vmatmul.mubr.msk.f32.gmra.mrb[6].mxu0 %vm256_vm9, %v469_v6  ;;  %v789_v12 = vld [vmem:[#allocation2 + $0x1b] sm:$0xff]  ;;  %3570 = vmatprep.subr.bf16.mxu0 %v3569_v7 }
 0x230   :  { %v580_v9 = vld [vmem:[#allocation2 + $0x21] sm:$0xff]  ;;  %3319 = vmatprep.mubr.msk.f32.mxu0 %vm256_vm9, %v577_v60 }
 0x231   :  { %v895_v10 = vld [vmem:[#allocation2 + $0x24] sm:$0xff]  ;;  %v894_v13 = vld [vmem:[#allocation2 + $0x1c] sm:$0xff] }
 0x232   :  { %1071 = vst.msk [vmem:[#allocation2 + $0x28] sm:$0xf] %vm457_vm10, %v3908_v30 }
 0x233   :  { %1069 = vst.msk [vmem:[#allocation2 + $0x18] sm:$0xff] %vm256_vm9, %v3908_v30  ;;  %1070 = vst.msk [vmem:[#allocation2 + $0x20] sm:$0xff] %vm256_vm9, %v3908_v30  ;;  %3320 = vmatmul.mubr.msk.f32.vlgmr.msra.gmra.mrb[4].mxu0 %vm256_vm9, %v578_v61  ;;  %v448_v30 = vld [vmem:[%s4585_s6 + $0x70] sm:$0xff]  ;;  %v1049_v61 = vld [vmem:[%s4588_s8 + $0x20] sm:$0xff] }
 0x234   :  { %3322 = vmatprep.mubr.msk.f32.mxu0 %vm256_vm9, %v579_v8  ;;  %3572 = vmatpush3.bf16.msra.mxu0 %v3569_v7  ;;  %v3581_v21 = vpack.c.bf16 %v449_v20, %v448_v30  ;;  %v1055_v20 = vld [vmem:[%s4588_s8 + $0x50] sm:$0xff] }
 0x235   :  { %3574 = vmatprep.subr.bf16.mxu0 %v3573_v14 }
 0x237   :  { %3323 = vmatmul.mubr.msk.f32.gmra.mrb[6].mxu0 %vm256_vm9, %v580_v9 }
 0x238   :  { %3576 = vmatpush3.bf16.msra.mxu0 %v3573_v14  ;;  %3333 = vmatprep.mubr.msk.f32.mxu0 %vm256_vm9, %v682_v63 }
 0x239   :  { %3578 = vmatprep.subr.bf16.mxu0 %v3577_v19 }
 0x23b   :  { %3334 = vmatmul.mubr.msk.f32.vlgmr.msra.gmra.mrb[4].mxu0 %vm256_vm9, %v683_v55  ;;  %v3593_v55 = vpack.c.bf16 %v1046_v48, %v1045_v45 }
 0x23c   :  { %3336 = vmatprep.mubr.msk.f32.mxu0 %vm256_vm9, %v684_v11  ;;  %3580 = vmatpush3.bf16.msra.mxu0 %v3577_v19 }
 0x23d   :  { %3582 = vmatprep.subr.bf16.mxu0 %v3581_v21  ;;  %3594 = vmatprep.subr.bf16.mxu1 %v3593_v55 }
 0x23e   :  { %3596 = vmatpush3.bf16.msra.mxu1 %v3593_v55  ;;  %v1655_v55 = vlaneseq }
 0x23f   :  { %3337 = vmatmul.mubr.msk.f32.gmra.mrb[6].mxu0 %vm256_vm9, %v685_v4 }
 0x240   :  { %3584 = vmatpush3.bf16.msra.mxu0 %v3581_v21  ;;  %3347 = vmatprep.mubr.msk.f32.mxu0 %vm256_vm9, %v787_v0  ;;  %v1056_v21 = vld [vmem:[%s4588_s8 + $0x58] sm:$0xff] }
 0x241   :  { %3586 = vmatprep.subr.bf16.mxu0 %v3585_v26  ;;  %v3613_v24 = vpack.c.bf16 %v1056_v21, %v1055_v20  ;;  %v1684_v20 = vld [vmem:[%s4591_s10 + $0x18] sm:$0xff] }
 0x243   :  { %3348 = vmatmul.mubr.msk.f32.vlgmr.msra.gmra.mrb[4].mxu0 %vm256_vm9, %v4175_v59  ;;  %v3597_v59 = vpack.c.bf16 %v1048_v57, %v1047_v56  ;;  %v4351_v56 = vshrl.u32 %v1655_v55, 7  ;;  %v4356_v57 = vld [vmem:[%s4589_s1] sm:$0x3] }
 0x244   :  { %3350 = vmatprep.mubr.msk.f32.mxu0 %vm256_vm9, %v789_v12  ;;  %3588 = vmatpush3.bf16.msra.mxu0 %v3585_v26 }
 0x245   :  { %3590 = vmatprep.subr.bf16.mxu0 %v3589_v29  ;;  %3598 = vmatprep.subr.bf16.mxu1 %v3597_v59 }
 0x246   :  { %3600 = vmatpush3.bf16.msra.mxu1 %v3597_v59 }
 0x247   :  { %3351 = vmatmul.mubr.msk.f32.gmra.mrb[6].mxu0 %vm256_vm9, %v790_v35 }
 0x248   :  { %3592 = vmatpush3.bf16.msra.mxu0 %v3589_v29  ;;  %3361 = vmatprep.mubr.msk.f32.mxu0 %vm256_vm9, %v892_v1 }
 0x24b   :  { %3362 = vmatmul.mubr.msk.f32.vlgmr.msra.gmra.mrb[4].mxu0 %vm256_vm9, %v4178_v62  ;;  %v1050_v62 = vld [vmem:[%s4588_s8 + $0x28] sm:$0xff] }
 0x24c   :  { %3364 = vmatprep.mubr.msk.f32.mxu0 %vm256_vm9, %v894_v13  ;;  %v3601_v0 = vpack.c.bf16 %v1050_v62, %v1049_v61 }
 0x24e   :  { %3602 = vmatprep.subr.bf16.mxu1 %v3601_v0 }
 0x24f   :  { %3365 = vmatmul.mubr.msk.f32.gmra.mrb[6].mxu0 %vm256_vm9, %v895_v10 }
 0x31e   :  { %v3363_v17 = vpop.f32.mrb[4].mxu0 }
 0x31f   :  { %v3697_v22 = vadd.f32 %v3363_v17, %v3028_v15  ;;  %v974_v25 = vpop.f32.mrb[5].mxu0 }
 0x320   :  { %v3698_v31 = vadd.f32 %v3028_v15, %v974_v25  ;;  %v1060_v25 = vld [vmem:[%s4588_s8 + $0x78] sm:$0xff] }
 0x321   :  { %v3046_v32 = vmul.f32 -1.442695, %v3697_v22 }
 0x322   :  { %v3045_v33 = vmul.f32 -1.442695, %v3698_v31  ;;  %v3366_v34 = vpop.f32.mrb[6].mxu0 }
 0x323   :  { %3840 = vpow2.f32 %v3046_v32  ;;  %v3699_v36 = vadd.f32 %v3366_v34, %v3028_v15  ;;  %v984_v37 = vpop.f32.mrb[7].mxu0  ;;  %v1061_v34 = vld [vmem:[%s4588_s8 + $0x80] sm:$0xff] }
 0x324   :  { %3842 = vpow2.f32 %v3045_v33  ;;  %v3700_v39 = vadd.f32 %v3028_v15, %v984_v37  ;;  %v3617_v15 = vpack.c.bf16 %v1058_v28, %v1057_v27  ;;  %v1668_v27 = vsub.s32 1, %v4351_v56 }
 0x325   :  { %v3048_v41 = vmul.f32 -1.442695, %v3699_v36 }
 0x326   :  { %v3047_v42 = vmul.f32 -1.442695, %v3700_v39 }
 0x327   :  { %3844 = vpow2.f32 %v3048_v41 }
 0x328   :  { %3846 = vpow2.f32 %v3047_v42  ;;  %v1063_v42 = vld [vmem:[%s4588_s8 + $0x90] sm:$0xff] }
 0x32d   :  { %v3841_v43 = vpop.eup %3840 }
 0x32e   :  { %v3843_v44 = vpop.eup %3842  ;;  %v1010_v47 = vadd.f32 1.0, %v3841_v43  ;;  %v1064_v43 = vld [vmem:[%s4588_s8 + $0x98] sm:$0xff] }
 0x32f   :  { %v1009_v46 = vadd.f32 1.0, %v3843_v44 }
 0x331   :  { %v3845_v51 = vpop.eup %3844  ;;  %3848 = vrcp.f32 %v1009_v46  ;;  %v3629_v46 = vpack.c.bf16 %v1064_v43, %v1063_v42 }
 0x332   :  { %v3847_v52 = vpop.eup %3846  ;;  %3850 = vrcp.f32 %v1010_v47  ;;  %v1012_v40 = vadd.f32 1.0, %v3845_v51 }
 0x333   :  { %v1011_v38 = vadd.f32 1.0, %v3847_v52 }
 0x335   :  { %3852 = vrcp.f32 %v1011_v38 }
 0x336   :  { %3854 = vrcp.f32 %v1012_v40 }
 0x33b   :  { %v3849_v58 = vpop.eup %3848 }
 0x33c   :  { %1025 = vrot.lane.b32.xlu0 %v3849_v58, %s3909_s23  ;;  %v3851_v60 = vpop.eup %3850  ;;  %v4359_v58 = vsub.s32 0, %v4351_v56 }
 0x33e   :  { %v1658_v59 = vrot.slane %v4356_v57, %v4359_v58 }
 0x33f   :  { %v3853_v63 = vpop.eup %3852 }
 0x340   :  { %1027 = vrot.lane.b32.xlu0 %v3851_v60, %s3909_s23  ;;  %1029 = vrot.lane.b32.xlu1 %v3853_v63, %s3909_s23  ;;  %v3855_v1 = vpop.eup %3854  ;;  %v3053_v60 = vld [vmem:[%s4590_s9] ss:$0 sm:$0xff] }
 0x344   :  { %1031 = vrot.lane.b32.xlu1 %v3855_v1, %s3909_s23 }
 0x348   :  { %1660 = vbcast.lane.b32.xlu1 %v1658_v59, 256 }
 0x3ae   :  { %v1026_v2 = vpop.permute.xlu0 %1025 }
 0x3af   :  { %v1037_v3 = vmul.f32 %v3698_v31, %v1026_v2 }
 0x3b1   :  { %v4270_v4 = vadd.f32 %v1037_v3, %v4147_v50 }
 0x3b2   :  { %v1028_v5 = vpop.permute.xlu0 %1027  ;;  %v1030_v6 = vpop.permute.xlu1 %1029 }
 0x3b3   :  { %1072 = vst.msk [vmem:[#allocation2 + $0x2] sm:$0xff] %vm256_vm9, %v4270_v4  ;;  %v1038_v7 = vmul.f32 %v3697_v22, %v1028_v5  ;;  %v1039_v35 = vmul.f32 %v3700_v39, %v1030_v6  ;;  %v1059_v22 = vld [vmem:[%s4588_s8 + $0x70] sm:$0xff] }
 0x3b4   :  { %v3621_v32 = vpack.c.bf16 %v1060_v25, %v1059_v22 }
 0x3b5   :  { %v4275_v8 = vadd.f32 %v1038_v7, %v4144_v49  ;;  %v4278_v9 = vadd.f32 %v1039_v35, %v4157_v54  ;;  %v1051_v49 = vld [vmem:[%s4588_s8 + $0x30] sm:$0xff]  ;;  %v1052_v54 = vld [vmem:[%s4588_s8 + $0x38] sm:$0xff] }
 0x3b6   :  { %v1032_v10 = vpop.permute.xlu1 %1031  ;;  %v3605_v13 = vpack.c.bf16 %v1052_v54, %v1051_v49  ;;  %v1681_v54 = vld [vmem:[%s4591_s10] sm:$0xff] }
 0x3b7   :  { %1073 = vst.msk [vmem:[#allocation2 + $0xa] sm:$0xff] %vm256_vm9, %v4275_v8  ;;  %1074 = vst.msk [vmem:[#allocation2 + $0x1a] sm:$0xff] %vm256_vm9, %v4278_v9  ;;  %v1040_v50 = vmul.f32 %v3699_v36, %v1032_v10  ;;  %v1062_v36 = vld [vmem:[%s4588_s8 + $0x88] sm:$0xff] }
 0x3b8   :  { %v3625_v39 = vpack.c.bf16 %v1062_v36, %v1061_v34 }
 0x3b9   :  { %v4285_v11 = vadd.f32 %v1040_v50, %v4154_v53  ;;  %v1053_v53 = vld [vmem:[%s4588_s8 + $0x40] sm:$0xff] }
 0x3ba   :  { %v1076_v12 = vld [vmem:[#allocation2] sm:$0xff]  ;;  %v3609_v19 = vpack.c.bf16 %v1054_v18, %v1053_v53 }
 0x3bb   :  { %1075 = vst.msk [vmem:[#allocation2 + $0x22] sm:$0xff] %vm256_vm9, %v4285_v11  ;;  %3375 = vmatprep.mubr.msk.f32.mxu1 %vm256_vm9, %v1076_v12  ;;  %v1187_v23 = vld [vmem:[#allocation2 + $0x1] sm:$0xff] }
 0x3bc   :  { %v1292_v31 = vld [vmem:[#allocation2 + $0x2] sm:$0xff] }
 0x3be   :  { %v1077_v14 = vld [vmem:[#allocation2 + $0x8] sm:$0xff]  ;;  %v1078_v16 = vld [vmem:[#allocation2 + $0x18] sm:$0xff] }
 0x3bf   :  { %3376 = vmatmul.mubr.msk.f32.vlgmr.msra.gmra.mrb[4].mxu1 %vm256_vm9, %v1077_v14  ;;  %v1188_v26 = vld [vmem:[#allocation2 + $0x9] sm:$0xff]  ;;  %v1189_v29 = vld [vmem:[#allocation2 + $0x19] sm:$0xff] }
 0x3c0   :  { %3378 = vmatprep.mubr.msk.f32.mxu1 %vm256_vm9, %v1078_v16  ;;  %3604 = vmatpush3.bf16.msra.mxu1 %v3601_v0  ;;  %v1293_v33 = vld [vmem:[#allocation2 + $0xa] sm:$0xff]  ;;  %v1294_v37 = vld [vmem:[#allocation2 + $0x1a] sm:$0xff] }
 0x3c1   :  { %3606 = vmatprep.subr.bf16.mxu1 %v3605_v13  ;;  %v1397_v44 = vld [vmem:[#allocation2 + $0x3] sm:$0xff]  ;;  %v1398_v47 = vld [vmem:[#allocation2 + $0xb] sm:$0xff] }
 0x3c2   :  { %v1079_v30 = vld [vmem:[#allocation2 + $0x20] sm:$0xff]  ;;  %v1503_v40 = vld [vmem:[#allocation2 + $0xc] sm:$0xff] }
 0x3c3   :  { %3379 = vmatmul.mubr.msk.f32.gmra.mrb[6].mxu1 %vm256_vm9, %v1079_v30  ;;  %v1190_v17 = vld [vmem:[#allocation2 + $0x21] sm:$0xff]  ;;  %v1683_v30 = vld [vmem:[%s4591_s10 + $0x10] sm:$0xff] }
 0x3c4   :  { %3608 = vmatpush3.bf16.msra.mxu1 %v3605_v13  ;;  %3389 = vmatprep.mubr.msk.f32.mxu1 %vm256_vm9, %v1187_v23  ;;  %v1295_v41 = vld [vmem:[#allocation2 + $0x22] sm:$0xff]  ;;  %v3637_v21 = vpack.c.bf16 %v1684_v20, %v1683_v30 }
 0x3c5   :  { %3610 = vmatprep.subr.bf16.mxu1 %v3609_v19  ;;  %v1399_v51 = vld [vmem:[#allocation2 + $0x1b] sm:$0xff]  ;;  %v1400_v52 = vld [vmem:[#allocation2 + $0x23] sm:$0xff] }
 0x3c6   :  { %v1502_v38 = vld [vmem:[#allocation2 + $0x4] sm:$0xff]  ;;  %v1504_v45 = vld [vmem:[#allocation2 + $0x1c] sm:$0xff] }
 0x3c7   :  { %3390 = vmatmul.mubr.msk.f32.vlgmr.msra.gmra.mrb[4].mxu1 %vm256_vm9, %v1188_v26  ;;  %v1505_v48 = vld [vmem:[#allocation2 + $0x24] sm:$0xff] }
 0x3c8   :  { %3392 = vmatprep.mubr.msk.f32.mxu1 %vm256_vm9, %v1189_v29  ;;  %3612 = vmatpush3.bf16.msra.mxu1 %v3609_v19  ;;  %v1682_v13 = vld [vmem:[%s4591_s10 + $0x8] sm:$0xff]  ;;  %v1669_v29 = vrot.slane %v4356_v57, %v1668_v27 }
 0x3c9   :  { %3614 = vmatprep.subr.bf16.mxu1 %v3613_v24  ;;  %v3633_v14 = vpack.c.bf16 %v1682_v13, %v1681_v54 }
 0x3cb   :  { %3393 = vmatmul.mubr.msk.f32.gmra.mrb[6].mxu1 %vm256_vm9, %v1190_v17  ;;  %3634 = vmatprep.subr.bf16.mxu0 %v3633_v14  ;;  %v4384_v17 = vpop.permute.xlu1 %1660 }
 0x3cc   :  { %3616 = vmatpush3.bf16.msra.mxu1 %v3613_v24  ;;  %3403 = vmatprep.mubr.msk.f32.mxu1 %vm256_vm9, %v1292_v31 }
 0x3cd   :  { %3618 = vmatprep.subr.bf16.mxu1 %v3617_v15  ;;  %3636 = vmatpush3.bf16.msra.mxu0 %v3633_v14 }
 0x3ce   :  { %3638 = vmatprep.subr.bf16.mxu0 %v3637_v21 }
 0x3cf   :  { %3404 = vmatmul.mubr.msk.f32.vlgmr.msra.gmra.mrb[4].mxu1 %vm256_vm9, %v1293_v33 }
 0x3d0   :  { %3406 = vmatprep.mubr.msk.f32.mxu1 %vm256_vm9, %v1294_v37  ;;  %3620 = vmatpush3.bf16.msra.mxu1 %v3617_v15 }
 0x3d1   :  { %3622 = vmatprep.subr.bf16.mxu1 %v3621_v32  ;;  %3640 = vmatpush3.bf16.msra.mxu0 %v3637_v21 }
 0x3d3   :  { %3407 = vmatmul.mubr.msk.f32.gmra.mrb[6].mxu1 %vm256_vm9, %v1295_v41 }
 0x3d4   :  { %3624 = vmatpush3.bf16.msra.mxu1 %v3621_v32  ;;  %3417 = vmatprep.mubr.msk.f32.mxu1 %vm256_vm9, %v1397_v44 }
 0x3d5   :  { %3626 = vmatprep.subr.bf16.mxu1 %v3625_v39 }
 0x3d7   :  { %3418 = vmatmul.mubr.msk.f32.vlgmr.msra.gmra.mrb[4].mxu1 %vm256_vm9, %v1398_v47 }
 0x3d8   :  { %3420 = vmatprep.mubr.msk.f32.mxu1 %vm256_vm9, %v1399_v51  ;;  %3628 = vmatpush3.bf16.msra.mxu1 %v3625_v39 }
 0x3d9   :  { %3630 = vmatprep.subr.bf16.mxu1 %v3629_v46 }
 0x3db   :  { %3421 = vmatmul.mubr.msk.f32.gmra.mrb[6].mxu1 %vm256_vm9, %v1400_v52 }
 0x3dc   :  { %3632 = vmatpush3.bf16.msra.mxu1 %v3629_v46  ;;  %3431 = vmatprep.mubr.msk.f32.mxu1 %vm256_vm9, %v1502_v38 }
 0x3df   :  { %3432 = vmatmul.mubr.msk.f32.vlgmr.msra.gmra.mrb[4].mxu1 %vm256_vm9, %v1503_v40 }
 0x3e0   :  { %3434 = vmatprep.mubr.msk.f32.mxu1 %vm256_vm9, %v1504_v45 }
 0x3e3   :  { %3435 = vmatmul.mubr.msk.f32.gmra.mrb[6].mxu1 %vm256_vm9, %v1505_v48 }
 0x4b2   :  { %v3433_v61 = vpop.f32.mrb[4].mxu1 }
 0x4b3   :  { %v3701_v62 = vadd.f32 %v3433_v61, %v3053_v60  ;;  %v1584_v63 = vpop.f32.mrb[5].mxu1 }
 0x4b4   :  { %v3702_v0 = vadd.f32 %v3053_v60, %v1584_v63 }
 0x4b5   :  { %v3071_v1 = vmul.f32 -1.442695, %v3701_v62 }
 0x4b6   :  { %v3070_v2 = vmul.f32 -1.442695, %v3702_v0  ;;  %v3436_v3 = vpop.f32.mrb[6].mxu1 }
 0x4b7   :  { %3856 = vpow2.f32 %v3071_v1  ;;  %v3703_v5 = vadd.f32 %v3436_v3, %v3053_v60  ;;  %v1594_v6 = vpop.f32.mrb[7].mxu1 }
 0x4b8   :  { %3858 = vpow2.f32 %v3070_v2  ;;  %v3704_v7 = vadd.f32 %v3053_v60, %v1594_v6 }
 0x4b9   :  { %v3073_v35 = vmul.f32 -1.442695, %v3703_v5 }
 0x4ba   :  { %v3072_v10 = vmul.f32 -1.442695, %v3704_v7 }
 0x4bb   :  { %3860 = vpow2.f32 %v3073_v35 }
 0x4bc   :  { %3862 = vpow2.f32 %v3072_v10  ;;  %v3910_v10 = vmov 1966171168  }
 0x4c1   :  { %v3857_v50 = vpop.eup %3856 }
 0x4c2   :  { %v3859_v12 = vpop.eup %3858  ;;  %v1620_v49 = vadd.f32 1.0, %v3857_v50  ;;  %v1796_v50 = vunpack.c.l.s4 %v3910_v10 }
 0x4c3   :  { %v1619_v53 = vadd.f32 1.0, %v3859_v12 }
 0x4c4   :  { %3864 = vrcp.f32 %v1620_v49  ;;  %v1797_v12 = vunpack.c.0.s8 %v1796_v50 }
 0x4c5   :  { %v3861_v16 = vpop.eup %3860  ;;  %3866 = vrcp.f32 %v1619_v53 }
 0x4c6   :  { %v3863_v18 = vpop.eup %3862  ;;  %v1622_v19 = vadd.f32 1.0, %v3861_v16  ;;  %v1800_v49 = vsub.s32 %v1797_v12, %v4351_v56 }
 0x4c7   :  { %v1621_v23 = vadd.f32 1.0, %v3863_v18 }
 0x4c8   :  { %3868 = vrcp.f32 %v1622_v19  ;;  %v1801_v54 = vrot.slane %v4356_v57, %v1800_v49 }
 0x4c9   :  { %3870 = vrcp.f32 %v1621_v23 }
 0x4ca   :  { %v1809_v13 = vrot.slane %v1801_v54, %v1800_v49  ;;  %v1802_v14 = vcombine.high %v1801_v54, %v1801_v54 }
 0x4cc   :  { %v3079_v53 = vadd.f32 -1.0, %v1809_v13  ;;  %v1816_v18 = vrot.slane %v1802_v14, %v1800_v49 }
 0x4ce   :  { %v3865_v24 = vpop.eup %3864  ;;  %v1821_v16 = vmul.f32 1e+09, %v3079_v53  ;;  %v3080_v20 = vadd.f32 -1.0, %v1816_v18 }
 0x4cf   :  { %v3867_v26 = vpop.eup %3866  ;;  %1637 = vrot.lane.b32.xlu1 %v3865_v24, %s3909_s23 }
 0x4d0   :  { %1635 = vrot.lane.b32.xlu0 %v3867_v26, %s3909_s23  ;;  %v4464_v19 = vrot.slane %v1821_v16, %v4359_v58  ;;  %v1822_v56 = vmul.f32 1e+09, %v3080_v20 }
 0x4d2   :  { %v3869_v28 = vpop.eup %3868 }
 0x4d3   :  { %1664 = vbcast.lane.b32.xlu1 %v1658_v59, 264  ;;  %v3871_v15 = vpop.eup %3870 }
 0x4d4   :  { %1641 = vrot.lane.b32.xlu0 %v3869_v28, %s3909_s23 }
 0x4d7   :  { %1675 = vbcast.lane.b32.xlu1 %v1669_v29, 264 }
 0x4d8   :  { %1639 = vrot.lane.b32.xlu0 %v3871_v15, %s3909_s23 }
 0x4dc   :  { %1671 = vbcast.lane.b32.xlu0 %v1669_v29, 256 }
 0x541   :  { %v1638_v22 = vpop.permute.xlu1 %1637 }
 0x542   :  { %v1648_v25 = vmul.f32 %v3701_v62, %v1638_v22  ;;  %v1636_v31 = vpop.permute.xlu0 %1635  ;;  %v4471_v22 = vrot.slane %v1822_v56, %v4359_v58 }
 0x543   :  { %v1647_v32 = vmul.f32 %v3702_v0, %v1636_v31 }
 0x544   :  { %v1652_v33 = vadd.f32 %v1648_v25, %v4275_v8 }
 0x545   :  { %v1651_v34 = vadd.f32 %v1647_v32, %v4270_v4  ;;  %v4388_v36 = vpop.permute.xlu1 %1664 }
 0x546   :  { %v1642_v37 = vpop.permute.xlu0 %1641  ;;  %v4394_v41 = vmul.f32 %v4388_v36, %v1652_v33 }
 0x547   :  { %v4391_v39 = vmul.f32 %v4384_v17, %v1651_v34  ;;  %v1650_v42 = vmul.f32 %v3703_v5, %v1642_v37 }
 0x549   :  { %3445 = vmatprep.mubr.msk.f32.mxu0 %vm256_vm9, %v4391_v39  ;;  %v1654_v4 = vadd.f32 %v1650_v42, %v4285_v11  ;;  %v4402_v46 = vpop.permute.xlu1 %1675 }
 0x54a   :  { %v1640_v43 = vpop.permute.xlu0 %1639  ;;  %3446 = vmatmul.mubr.msk.f32.vlgmr.msra.gmra.mrb[8].mxu0 %vm256_vm9, %v4394_v41 }
 0x54b   :  { %v1649_v8 = vmul.f32 %v3704_v7, %v1640_v43  ;;  %v4410_v52 = vmul.f32 %v4402_v46, %v1654_v4 }
 0x54d   :  { %v1653_v44 = vadd.f32 %v1649_v8, %v4278_v9  ;;  %v3074_v9 = vld [vmem:[%s4592_s11] ss:$0 sm:$0xff]  ;;  %s3911_s11 = smov 64  }
 0x54e   :  { %v4404_v47 = vpop.permute.xlu0 %1671 }
 0x54f   :  { %v4407_v51 = vmul.f32 %v4404_v47, %v1653_v44 }
 0x551   :  { %3448 = vmatprep.mubr.msk.f32.mxu0 %vm256_vm9, %v4407_v51 }
 0x552   :  { %3449 = vmatmul.mubr.msk.f32.gmra.mrb[10].mxu0 %vm256_vm9, %v4410_v52 }
 0x61d   :  { %v3447_v11 = vpop.f32.mrb[8].mxu0 }
 0x61e   :  { %v4419_v38 = vadd.f32 %v3447_v11, %v3074_v9  ;;  %v1775_v40 = vpop.f32.mrb[9].mxu0 }
 0x61f   :  { %v4421_v45 = vadd.f32 %v3074_v9, %v1775_v40 }
 0x621   :  { %3455 = vmatprep.mubr.msk.f32.mxu1 %vm67_vm0, %v4421_v45  ;;  %v4427_v48 = vpack.i.bf16 %v4419_v38, %v4421_v45 }
 0x623   :  { %3753 = vrot.lane.b32.xlu0 %v4427_v48, %s3909_s23 }
 0x625   :  { %v3450_v55 = vpop.f32.mrb[10].mxu0 }
 0x626   :  { %v4431_v59 = vadd.f32 %v3450_v55, %v3074_v9  ;;  %v1785_v60 = vpop.f32.mrb[11].mxu0 }
 0x627   :  { %v4433_v61 = vadd.f32 %v3074_v9, %v1785_v60 }
 0x629   :  { %3462 = vmatprep.mubr.msk.f32.mxu0 %vm67_vm0, %v4433_v61  ;;  %v4439_v62 = vpack.i.bf16 %v4431_v59, %v4433_v61 }
 0x62b   :  { %3758 = vrot.lane.b32.xlu1 %v4439_v62, %s3909_s23  ;;  %s3912_s23 = smov 80  }
 0x695   :  { %v3754_v63 = vpop.permute.xlu0 %3753 }
 0x696   :  { %v3756_v0 = vunpack.i.h.bf16 %v3754_v63  ;;  %v3755_v1 = vunpack.i.l.bf16 %v3754_v63 }
 0x698   :  { %v3641_v3 = vpack.c.bf16 %v3756_v0, %v3755_v1 }
 0x69a   :  { %3643 = vmatprep.subr.msk.bf16.mxu1 %vm4445_vm4, %v3641_v3 }
 0x69b   :  { %3646 = vmatpush3.bf16.xpose.msk.msra.mxu1 %vm4445_vm4, %v3641_v3 }
 0x69d   :  { %v3759_v5 = vpop.permute.xlu1 %3758 }
 0x69e   :  { %v3761_v6 = vunpack.i.h.bf16 %v3759_v5  ;;  %v3760_v7 = vunpack.i.l.bf16 %v3759_v5 }
 0x6a0   :  { %v3647_v35 = vpack.c.bf16 %v3761_v6, %v3760_v7 }
 0x6a2   :  { %3456 = vmatmul.mubr.msk.f32.vlgmr.msra.gmra.mrb[8].mxu1 %vm67_vm0, %v4419_v38  ;;  %3649 = vmatprep.subr.msk.bf16.mxu0 %vm4445_vm4, %v3647_v35 }
 0x6a3   :  { %3652 = vmatpush3.bf16.xpose.msk.msra.mxu0 %vm4445_vm4, %v3647_v35 }
 0x6aa   :  { %3463 = vmatmul.mubr.msk.f32.vlgmr.msra.gmra.mrb[12].mxu0 %vm67_vm0, %v4431_v59 }
 0x775   :  { %v3457_v30 = vpop.f32.mrb[8].mxu1 }
 0x776   :  { %v2002_v21 = vmul.f32 0.25, %v3457_v30  ;;  %v1903_v23 = vpop.f32.mrb[9].mxu1 }
 0x777   :  { %v2001_v24 = vmul.f32 0.25, %v1903_v23 }
 0x778   :  { %v2018_v26 = vadd.f32 %v4464_v19, %v2002_v21 }
 0x779   :  { %v2017_v27 = vadd.f32 %v4464_v19, %v2001_v24 }
 0x77a   :  { %v2024_v28 = vsel %vm67_vm0, %v2018_v26, -inf }
 0x77b   :  { %2025 = vmax.xlane.f32.xlu1 %v2024_v28  ;;  %v2021_v29 = vsel %vm67_vm0, %v2017_v27, -inf }
 0x77c   :  { %2022 = vmax.xlane.f32.xlu0 %v2021_v29 }
 0x77d   :  { %v3464_v15 = vpop.f32.mrb[12].mxu0 }
 0x77e   :  { %v1992_v25 = vpop.f32.mrb[13].mxu0  ;;  %v2004_v31 = vmul.f32 0.25, %v3464_v15 }
 0x77f   :  { %v2003_v32 = vmul.f32 0.25, %v1992_v25 }
 0x780   :  { %v2020_v37 = vadd.f32 %v4471_v22, %v2004_v31 }
 0x781   :  { %v2019_v33 = vadd.f32 %v4471_v22, %v2003_v32 }
 0x782   :  { %v2030_v42 = vsel %vm67_vm0, %v2020_v37, -inf }
 0x783   :  { %v2027_v34 = vsel %vm67_vm0, %v2019_v33, -inf }
 0x784   :  { %2028 = vmax.xlane.f32.xlu0 %v2027_v34 }
 0x788   :  { %2031 = vmax.xlane.f32.xlu0 %v2030_v42 }
 0x808   :  { %v2026_v43 = vpop.xlane.xlu1 %2025 }
 0x809   :  { %v2034_v8 = vsub.f32 %v2018_v26, %v2026_v43  ;;  %v2023_v4 = vpop.xlane.xlu0 %2022 }
 0x80a   :  { %v2033_v44 = vsub.f32 %v2017_v27, %v2023_v4 }
 0x80b   :  { %v2039_v9 = vmul.f32 1.442695, %v2034_v8 }
 0x80c   :  { %v2037_v58 = vmul.f32 1.442695, %v2033_v44 }
 0x80d   :  { %3872 = vpow2.f32 %v2039_v9 }
 0x80e   :  { %3874 = vpow2.f32 %v2037_v58 }
 0x811   :  { %v2029_v11 = vpop.xlane.xlu0 %2028 }
 0x812   :  { %v2035_v40 = vsub.f32 %v2019_v33, %v2029_v11 }
 0x814   :  { %v2041_v55 = vmul.f32 1.442695, %v2035_v40 }
 0x815   :  { %v2032_v60 = vpop.xlane.xlu0 %2031 }
 0x816   :  { %3876 = vpow2.f32 %v2041_v55  ;;  %v2036_v63 = vsub.f32 %v2020_v37, %v2032_v60 }
 0x817   :  { %v3873_v0 = vpop.eup %3872 }
 0x818   :  { %v3875_v1 = vpop.eup %3874  ;;  %v2043_v3 = vmul.f32 1.442695, %v2036_v63  ;;  %v2048_v5 = vsel %vm67_vm0, %v3873_v0, 0.0 }
 0x819   :  { %2049 = vadd.xlane.f32.xlu0 %v2048_v5  ;;  %v2045_v6 = vsel %vm67_vm0, %v3875_v1, 0.0 }
 0x81a   :  { %3878 = vpow2.f32 %v2043_v3  ;;  %2046 = vadd.xlane.f32.xlu1 %v2045_v6 }
 0x820   :  { %v3877_v7 = vpop.eup %3876 }
 0x821   :  { %v2051_v35 = vsel %vm67_vm0, %v3877_v7, 0.0 }
 0x822   :  { %2052 = vadd.xlane.f32.xlu1 %v2051_v35 }
 0x824   :  { %v3879_v10 = vpop.eup %3878 }
 0x825   :  { %v2054_v50 = vsel %vm67_vm0, %v3879_v10, 0.0 }
 0x826   :  { %2055 = vadd.xlane.f32.xlu0 %v2054_v50 }
 0x833   :  { %3763 = vrot.lane.b32.xlu1 %v4427_v48, %s3911_s11 }
 0x837   :  { %3773 = vrot.lane.b32.xlu1 %v4427_v48, %s3912_s23 }
 0x83b   :  { %3778 = vrot.lane.b32.xlu1 %v4439_v62, %s3912_s23 }
 0x83c   :  { %3768 = vrot.lane.b32.xlu0 %v4439_v62, %s3911_s11 }
 0x83f   :  { %2348 = vrot.lane.b32.xlu1 %v4419_v38, %s3913_s25  ;;  %v1686_v38 = vld [vmem:[%s4593_s12] sm:$0xff] }
 0x840   :  { %2346 = vrot.lane.b32.xlu0 %v4421_v45, %s3913_s25  ;;  %v1687_v45 = vld [vmem:[%s4593_s12 + $0x8] sm:$0xff] }
 0x841   :  { %v3661_v30 = vpack.c.bf16 %v1687_v45, %v1686_v38 }
 0x843   :  { %2439 = vrot.lane.b32.xlu1 %v4431_v59, %s3913_s25 }
 0x844   :  { %2437 = vrot.lane.b32.xlu0 %v4433_v61, %s3913_s25 }
 0x8a6   :  { %v2050_v49 = vpop.xlane.xlu0 %2049 }
 0x8a7   :  { %v2047_v12 = vpop.xlane.xlu1 %2046 }
 0x8a8   :  { %3880 = vrcp.f32 %v2047_v12 }
 0x8a9   :  { %3882 = vrcp.f32 %v2050_v49 }
 0x8af   :  { %v2053_v54 = vpop.xlane.xlu1 %2052 }
 0x8b0   :  { %3884 = vrcp.f32 %v2053_v54 }
 0x8b2   :  { %v3881_v13 = vpop.eup %3880 }
 0x8b3   :  { %v3764_v53 = vpop.permute.xlu1 %3763  ;;  %v2056_v14 = vpop.xlane.xlu0 %2055  ;;  %v2058_v16 = vmul.f32 %v3881_v13, %v3875_v1 }
 0x8b4   :  { %v3766_v59 = vunpack.i.h.bf16 %v3764_v53  ;;  %v3765_v61 = vunpack.i.l.bf16 %v3764_v53  ;;  %3886 = vrcp.f32 %v2056_v14  ;;  %v3883_v20 = vpop.eup %3882 }
 0x8b5   :  { %3469 = vmatprep.mubr.msk.f32.mxu1 %vm67_vm0, %v2058_v16  ;;  %v2060_v29 = vmul.f32 %v3883_v20, %v3873_v0 }
 0x8b6   :  { %v3653_v18 = vpack.c.bf16 %v3766_v59, %v3765_v61 }
 0x8b7   :  { %v3774_v21 = vpop.permute.xlu1 %3773  ;;  %v3769_v23 = vpop.permute.xlu0 %3768 }
 0x8b8   :  { %v3776_v24 = vunpack.i.h.bf16 %v3774_v21  ;;  %v3775_v26 = vunpack.i.l.bf16 %v3774_v21  ;;  %v3771_v27 = vunpack.i.h.bf16 %v3769_v23  ;;  %v3770_v56 = vunpack.i.l.bf16 %v3769_v23  ;;  %3654 = vmatprep.subr.bf16.mxu1 %v3653_v18 }
 0x8b9   :  { %3656 = vmatpush3.bf16.msra.mxu1 %v3653_v18 }
 0x8ba   :  { %v3885_v28 = vpop.eup %3884  ;;  %v3657_v15 = vpack.c.bf16 %v3771_v27, %v3770_v56  ;;  %3662 = vmatprep.subr.bf16.mxu1 %v3661_v30  ;;  %v3665_v32 = vpack.c.bf16 %v3776_v24, %v3775_v26 }
 0x8bb   :  { %v3779_v25 = vpop.permute.xlu1 %3778  ;;  %v2062_v31 = vmul.f32 %v3885_v28, %v3877_v7  ;;  %v2347_v8 = vpop.permute.xlu0 %2346 }
 0x8bc   :  { %v3781_v33 = vunpack.i.h.bf16 %v3779_v25  ;;  %v3780_v34 = vunpack.i.l.bf16 %v3779_v25  ;;  %3470 = vmatmul.mubr.msk.f32.vlgmr.msra.gmra.mrb[10].mxu1 %vm67_vm0, %v2060_v29  ;;  %3658 = vmatprep.subr.bf16.mxu0 %v3657_v15 }
 0x8bd   :  { %3660 = vmatpush3.bf16.msra.mxu0 %v3657_v15  ;;  %3476 = vmatprep.mubr.msk.f32.mxu0 %vm67_vm0, %v2062_v31 }
 0x8be   :  { %v3887_v37 = vpop.eup %3886  ;;  %v3671_v42 = vpack.c.bf16 %v3781_v33, %v3780_v34  ;;  %3667 = vmatprep.subr.msk.bf16.mxu0 %vm4445_vm4, %v3665_v32  ;;  %3664 = vmatpush3.bf16.msra.mxu1 %v3661_v30 }
 0x8bf   :  { %v2064_v43 = vmul.f32 %v3887_v37, %v3879_v10  ;;  %v2349_v4 = vpop.permute.xlu1 %2348  ;;  %v2438_v40 = vpop.permute.xlu0 %2437 }
 0x8c0   :  { %3673 = vmatprep.subr.msk.bf16.mxu1 %vm4445_vm4, %v3671_v42 }
 0x8c1   :  { %3477 = vmatmul.mubr.msk.f32.vlgmr.msra.gmra.mrb[14].mxu0 %vm67_vm0, %v2064_v43 }
 0x8c2   :  { %3493 = vmatprep.mubr.msk.f32.mxu0 %vm67_vm0, %v2347_v8 }
 0x8c3   :  { %v2440_v55 = vpop.permute.xlu1 %2439 }
 0x8c6   :  { %3670 = vmatpush3.bf16.xpose.msk.msra.mxu0 %vm4445_vm4, %v3665_v32 }
 0x8cd   :  { %3494 = vmatmul.mubr.msk.f32.vlgmr.msra.gmra.mrb[16].mxu0 %vm67_vm0, %v2349_v4 }
 0x98f   :  { %v3471_v44 = vpop.f32.mrb[10].mxu1 }
 0x990   :  { %v2143_v9 = vpop.f32.mrb[11].mxu1 }
 0x991   :  { %3483 = vmatprep.mubr.msk.f32.mxu1 %vm67_vm0, %v2143_v9  ;;  %v1688_v9 = vld [vmem:[%s4593_s12 + $0x10] sm:$0xff] }
 0x992   :  { %3484 = vmatmul.mubr.msk.f32.vlgmr.msra.gmra.mrb[12].mxu1 %vm67_vm0, %v3471_v44 }
 0x993   :  { %3676 = vmatpush3.bf16.xpose.msk.msra.mxu1 %vm4445_vm4, %v3671_v42 }
 0x994   :  { %v3478_v58 = vpop.f32.mrb[14].mxu0 }
 0x995   :  { %v2230_v11 = vpop.f32.mrb[15].mxu0 }
 0x996   :  { %3486 = vmatprep.mubr.msk.f32.mxu1 %vm67_vm0, %v2230_v11 }
 0x997   :  { %3487 = vmatmul.mubr.msk.f32.gmra.mrb[14].mxu1 %vm67_vm0, %v3478_v58 }
 0x998   :  { %3500 = vmatprep.mubr.msk.f32.mxu1 %vm67_vm0, %v2438_v40 }
 0x99b   :  { %3501 = vmatmul.mubr.msk.f32.vlgmr.msra.gmra.mrb[16].mxu1 %vm67_vm0, %v2440_v55 }
 0x9a0   :  { %v3495_v60 = vpop.f32.mrb[16].mxu0 }
 0x9a1   :  { %v2529_v63 = vmul.f32 0.25, %v3495_v60  ;;  %v2428_v0 = vpop.f32.mrb[17].mxu0 }
 0x9a2   :  { %v2528_v1 = vmul.f32 0.25, %v2428_v0 }
 0x9a3   :  { %v2533_v3 = vadd.f32 %v2529_v63, %v4464_v19 }
 0x9a4   :  { %v2532_v2 = vadd.f32 %v2528_v1, %v4464_v19 }
 0x9a5   :  { %v2539_v5 = vsel %vm67_vm0, %v2533_v3, -inf }
 0x9a6   :  { %2540 = vmax.xlane.f32.xlu1 %v2539_v5  ;;  %v2536_v6 = vsel %vm67_vm0, %v2532_v2, -inf }
 0x9a7   :  { %2537 = vmax.xlane.f32.xlu0 %v2536_v6 }
 0xa33   :  { %v2541_v49 = vpop.xlane.xlu1 %2540 }
 0xa34   :  { %v2538_v7 = vpop.xlane.xlu0 %2537  ;;  %v2549_v54 = vsub.f32 %v2533_v3, %v2541_v49  ;;  %v2859_v3 = vld [vmem:[%s4594_s14] sm:$0xff] }
 0xa35   :  { %v2548_v35 = vsub.f32 %v2532_v2, %v2538_v7  ;;  %v2860_v2 = vld [vmem:[%s4594_s14 + $0x8] sm:$0xff] }
 0xa36   :  { %v2554_v13 = vmul.f32 1.442695, %v2549_v54  ;;  %v3689_v5 = vpack.c.bf16 %v2860_v2, %v2859_v3  ;;  %v2990_v54 = vsel %vm2989_vm5, %v4356_v57, 0.0 }
 0xa37   :  { %v2552_v10 = vmul.f32 1.442695, %v2548_v35 }
 0xa39   :  { %3888 = vpow2.f32 %v2552_v10 }
 0xa3a   :  { %3890 = vpow2.f32 %v2554_v13  ;;  %v3097_v13 = vld [vmem:[%s4595_s13] ss:$0 sm:$0xff] }
 0xa43   :  { %v3889_v50 = vpop.eup %3888 }
 0xa44   :  { %v2560_v12 = vsel %vm67_vm0, %v3889_v50, 0.0  ;;  %v3891_v18 = vpop.eup %3890 }
 0xa45   :  { %2561 = vadd.xlane.f32.xlu1 %v2560_v12  ;;  %v2563_v30 = vsel %vm67_vm0, %v3891_v18, 0.0  ;;  %v2862_v12 = vld [vmem:[%s4594_s14 + $0x18] sm:$0xff] }
 0xa6e   :  { %v3502_v53 = vpop.f32.mrb[16].mxu1 }
 0xa6f   :  { %v2519_v19 = vpop.f32.mrb[17].mxu1  ;;  %v2531_v14 = vmul.f32 0.25, %v3502_v53 }
 0xa70   :  { %v2530_v16 = vmul.f32 0.25, %v2519_v19 }
 0xa71   :  { %v2535_v59 = vadd.f32 %v2531_v14, %v4471_v22 }
 0xa72   :  { %v2534_v38 = vadd.f32 %v2530_v16, %v4471_v22 }
 0xa73   :  { %v2545_v61 = vsel %vm67_vm0, %v2535_v59, -inf }
 0xa74   :  { %v2542_v45 = vsel %vm67_vm0, %v2534_v38, -inf }
 0xa75   :  { %2543 = vmax.xlane.f32.xlu0 %v2542_v45 }
 0xa79   :  { %2546 = vmax.xlane.f32.xlu0 %v2545_v61 }
 0xa7d   :  { %2564 = vadd.xlane.f32.xlu0 %v2563_v30 }
 0xad2   :  { %v2562_v20 = vpop.xlane.xlu1 %2561 }
 0xad3   :  { %3892 = vrcp.f32 %v2562_v20 }
 0xadd   :  { %v3893_v21 = vpop.eup %3892 }
 0xade   :  { %v2573_v23 = vmul.f32 %v3893_v21, %v3889_v50  ;;  %v2861_v50 = vld [vmem:[%s4594_s14 + $0x10] sm:$0xff] }
 0xadf   :  { %v3693_v49 = vpack.c.bf16 %v2862_v12, %v2861_v50 }
 0xae0   :  { %3507 = vmatprep.mubr.msk.f32.mxu0 %vm67_vm0, %v2573_v23 }
 0xb02   :  { %v2544_v24 = vpop.xlane.xlu0 %2543 }
 0xb03   :  { %v2550_v26 = vsub.f32 %v2534_v38, %v2544_v24 }
 0xb05   :  { %v2556_v27 = vmul.f32 1.442695, %v2550_v26 }
 0xb06   :  { %v2547_v56 = vpop.xlane.xlu0 %2546 }
 0xb07   :  { %3894 = vpow2.f32 %v2556_v27  ;;  %v2551_v22 = vsub.f32 %v2535_v59, %v2547_v56 }
 0xb09   :  { %v2558_v28 = vmul.f32 1.442695, %v2551_v22 }
 0xb0a   :  { %v2565_v32 = vpop.xlane.xlu0 %2564 }
 0xb0b   :  { %3896 = vpow2.f32 %v2558_v28 }
 0xb0c   :  { %3898 = vrcp.f32 %v2565_v32 }
 0xb11   :  { %v3895_v29 = vpop.eup %3894 }
 0xb12   :  { %v2566_v15 = vsel %vm67_vm0, %v3895_v29, 0.0 }
 0xb13   :  { %2567 = vadd.xlane.f32.xlu1 %v2566_v15 }
 0xb15   :  { %v3897_v25 = vpop.eup %3896 }
 0xb16   :  { %v2569_v31 = vsel %vm67_vm0, %v3897_v25, 0.0  ;;  %v3899_v4 = vpop.eup %3898 }
 0xb17   :  { %2570 = vadd.xlane.f32.xlu0 %v2569_v31  ;;  %v2575_v40 = vmul.f32 %v3899_v4, %v3891_v18 }
 0xb24   :  { %3783 = vrot.lane.b32.xlu1 %v4427_v48, %s3914_s4  ;;  %v1689_v48 = vld [vmem:[%s4593_s12 + $0x18] sm:$0xff] }
 0xb25   :  { %v3685_v60 = vpack.c.bf16 %v1689_v48, %v1688_v9 }
 0xb2d   :  { %3788 = vrot.lane.b32.xlu0 %v4439_v62, %s3914_s4 }
 0xb48   :  { %2991 = vadd.xlane.f32.xlu1 %v2990_v54 }
 0xba0   :  { %v2568_v33 = vpop.xlane.xlu1 %2567 }
 0xba1   :  { %3900 = vrcp.f32 %v2568_v33 }
 0xba4   :  { %v3784_v34 = vpop.permute.xlu1 %3783  ;;  %v2571_v37 = vpop.xlane.xlu0 %2570 }
 0xba5   :  { %v3786_v42 = vunpack.i.h.bf16 %v3784_v34  ;;  %v3785_v43 = vunpack.i.l.bf16 %v3784_v34  ;;  %3902 = vrcp.f32 %v2571_v37 }
 0xba7   :  { %v3677_v8 = vpack.c.bf16 %v3786_v42, %v3785_v43 }
 0xba8   :  { %v3789_v44 = vpop.permute.xlu0 %3788 }
 0xba9   :  { %v3791_v62 = vunpack.i.h.bf16 %v3789_v44  ;;  %v3790_v58 = vunpack.i.l.bf16 %v3789_v44  ;;  %3678 = vmatprep.subr.bf16.mxu0 %v3677_v8 }
 0xbaa   :  { %3680 = vmatpush3.bf16.msra.mxu0 %v3677_v8 }
 0xbab   :  { %v3901_v11 = vpop.eup %3900  ;;  %v3681_v55 = vpack.c.bf16 %v3791_v62, %v3790_v58  ;;  %3690 = vmatprep.subr.bf16.mxu0 %v3689_v5 }
 0xbac   :  { %v2577_v63 = vmul.f32 %v3901_v11, %v3895_v29 }
 0xbad   :  { %3508 = vmatmul.mubr.msk.f32.vlgmr.msra.gmra.mrb[18].mxu0 %vm67_vm0, %v2575_v40  ;;  %3682 = vmatprep.subr.bf16.mxu1 %v3681_v55 }
 0xbae   :  { %3684 = vmatpush3.bf16.msra.mxu1 %v3681_v55  ;;  %3514 = vmatprep.mubr.msk.f32.mxu1 %vm67_vm0, %v2577_v63 }
 0xbaf   :  { %v3903_v0 = vpop.eup %3902  ;;  %3686 = vmatprep.subr.bf16.mxu1 %v3685_v60  ;;  %3692 = vmatpush3.bf16.msra.mxu0 %v3689_v5 }
 0xbb0   :  { %v2579_v1 = vmul.f32 %v3903_v0, %v3897_v25  ;;  %3694 = vmatprep.subr.bf16.mxu0 %v3693_v49 }
 0xbb2   :  { %3515 = vmatmul.mubr.msk.f32.vlgmr.msra.gmra.mrb[18].mxu1 %vm67_vm0, %v2579_v1 }
 0xbb3   :  { %3688 = vmatpush3.bf16.msra.mxu1 %v3685_v60  ;;  %3696 = vmatpush3.bf16.msra.mxu0 %v3693_v49 }
 0xbd5   :  { %v2992_v56 = vpop.xlane.xlu1 %2991 }
 0xbd6   :  { %v2993_v31 = vmax.f32 %v2992_v56, 1.0 }
 0xbd8   :  { %v2995_v37 = vrot.slane %v2993_v31, 1 }
 0xbda   :  { %3904 = vrcp.f32 %v2995_v37 }
 0xbdb   :  { %3906 = vrcp.f32 %v2993_v31 }
 0xbe4   :  { %v3905_v11 = vpop.eup %3904 }
 0xbe5   :  { %v3907_v55 = vpop.eup %3906 }
 0xc80   :  { %v3509_v6 = vpop.f32.mrb[18].mxu0 }
 0xc81   :  { %v2658_v7 = vpop.f32.mrb[19].mxu0 }
 0xc82   :  { %3521 = vmatprep.mubr.msk.f32.mxu1 %vm67_vm0, %v2658_v7 }
 0xc83   :  { %3522 = vmatmul.mubr.msk.f32.vlgmr.msra.gmra.mrb[12].mxu1 %vm67_vm0, %v3509_v6 }
 0xc85   :  { %v3516_v35 = vpop.f32.mrb[18].mxu1 }
 0xc86   :  { %v2745_v10 = vpop.f32.mrb[19].mxu1 }
 0xc87   :  { %3524 = vmatprep.mubr.msk.f32.mxu1 %vm67_vm0, %v2745_v10 }
 0xc88   :  { %3525 = vmatmul.mubr.msk.f32.gmra.mrb[14].mxu1 %vm67_vm0, %v3516_v35  ;;  %vm3005_vm0 = vcmask 1041409  }
 0xd56   :  { %v3523_v53 = vpop.f32.mrb[12].mxu1 }
 0xd57   :  { %v3705_v19 = vadd.f32 %v3523_v53, %v3097_v13  ;;  %v2832_v14 = vpop.f32.mrb[13].mxu1 }
 0xd58   :  { %v3706_v16 = vadd.f32 %v3097_v13, %v2832_v14 }
 0xd59   :  { %v2856_v45 = vadd.f32 %v3705_v19, %v4394_v41 }
 0xd5a   :  { %v2855_v38 = vadd.f32 %v3706_v16, %v4391_v39  ;;  %v3114_v39 = vld [vmem:[%s4596_s15] ss:$0 sm:$0xff] }
 0xd5b   :  { %v3526_v59 = vpop.f32.mrb[14].mxu1 }
 0xd5c   :  { %v3707_v61 = vadd.f32 %v3526_v59, %v3097_v13  ;;  %v2842_v18 = vpop.f32.mrb[15].mxu1  ;;  %3535 = vmatprep.mubr.msk.f32.mxu0 %vm256_vm9, %v2855_v38 }
 0xd5d   :  { %v3708_v30 = vadd.f32 %v3097_v13, %v2842_v18  ;;  %3536 = vmatmul.mubr.msk.f32.vlgmr.msra.gmra.mrb[20].mxu0 %vm256_vm9, %v2856_v45 }
 0xd5e   :  { %v2858_v20 = vadd.f32 %v3707_v61, %v4410_v52 }
 0xd5f   :  { %v2857_v57 = vadd.f32 %v3708_v30, %v4407_v51 }
 0xd61   :  { %3538 = vmatprep.mubr.msk.f32.mxu0 %vm256_vm9, %v2857_v57 }
 0xd62   :  { %3539 = vmatmul.mubr.msk.f32.gmra.mrb[22].mxu0 %vm256_vm9, %v2858_v20 }
 0xe30   :  { %v3537_v41 = vpop.f32.mrb[20].mxu0 }
 0xe31   :  { %v2954_v21 = vadd.f32 %v3537_v41, %v3114_v39  ;;  %v2948_v23 = vpop.f32.mrb[21].mxu0 }
 0xe32   :  { %v2949_v24 = vadd.f32 %v3114_v39, %v2948_v23 }
 0xe33   :  { %v2968_v26 = vmul.f32 %v2954_v21, %v4388_v36 }
 0xe34   :  { %v2967_v27 = vmul.f32 %v2949_v24, %v4384_v17 }
 0xe35   :  { %v2972_v51 = vsel %vm256_vm9, %v2968_v26, 0.0  ;;  %v3540_v52 = vpop.f32.mrb[22].mxu0 }
 0xe36   :  { %v2971_v22 = vsel %vm256_vm9, %v2967_v27, 0.0  ;;  %v2964_v28 = vadd.f32 %v3540_v52, %v3114_v39  ;;  %v2958_v29 = vpop.f32.mrb[23].mxu0 }
 0xe37   :  { %v2973_v15 = vadd.f32 %v2972_v51, %v2971_v22  ;;  %v2959_v25 = vadd.f32 %v3114_v39, %v2958_v29 }
 0xe38   :  { %v2970_v32 = vmul.f32 %v2964_v28, %v4402_v46 }
 0xe39   :  { %v2974_v33 = vrot.slane %v2973_v15, 4  ;;  %v2969_v34 = vmul.f32 %v2959_v25, %v4404_v47 }
 0xe3a   :  { %v2981_v36 = vsel %vm256_vm9, %v2970_v32, 0.0 }
 0xe3b   :  { %v2975_v17 = vadd.f32 %v2974_v33, %v2973_v15  ;;  %v2980_v42 = vsel %vm256_vm9, %v2969_v34, 0.0 }
 0xe3c   :  { %v2982_v43 = vadd.f32 %v2981_v36, %v2980_v42 }
 0xe3d   :  { %v2976_v8 = vrot.slane %v2975_v17, 2 }
 0xe3e   :  { %v2983_v4 = vrot.slane %v2982_v43, 4 }
 0xe3f   :  { %v2977_v44 = vadd.f32 %v2976_v8, %v2975_v17 }
 0xe40   :  { %v2984_v9 = vadd.f32 %v2983_v4, %v2982_v43 }
 0xe41   :  { %v2978_v62 = vrot.slane %v2977_v44, 1 }
 0xe42   :  { %v2985_v48 = vrot.slane %v2984_v9, 2 }
 0xe43   :  { %v2979_v40 = vadd.f32 %v2978_v62, %v2977_v44 }
 0xe44   :  { %v2986_v58 = vadd.f32 %v2985_v48, %v2984_v9 }
 0xe45   :  { %v2999_v63 = vmul.f32 %v3907_v55, %v2979_v40 }
 0xe46   :  { %v2987_v46 = vrot.slane %v2986_v58, 1 }
 0xe48   :  { %v2988_v47 = vadd.f32 %v2987_v46, %v2986_v58 }
 0xe4a   :  { %v3001_v60 = vmul.f32 %v3905_v11, %v2988_v47 }
 0xe4c   :  { %v3004_v0 = vrot.slane %v3001_v60, 7 }
 0xe4e   :  { %v3006_v1 = vsel %vm3005_vm0, %v3004_v0, %v2999_v63 }
 0xe4f   :  { %3009 = vst.msk [vmem:[%s4597_s16] sm:$0x3] %vm3008_vm6, %v3006_v1 }

// kernel: fastspeech2_forward.5
= control target key start
LH: loop header
LB: loop body
LE: loop exit
PB: predicated region body
PF: predicated region fallthrough
CT: control target
= control target key end

     0   :  { %vm168_vm0 = vcmask 261120   ;;  %v4693_v8 = vmov 0.0   ;;  %vm4694_vm1 = vmmov 0   ;;  %vm282_vm2 = vcmask 130048   ;;  %s4697_s28 = smov 64   ;;  %s5574_s3 = inlined_call_operand.vmem [shape: f32[32,96], index: 3, kind: input, shape index: {}]   ;;  %s5575_s0 = inlined_call_operand.vmem [shape: f32[2,8,32], index: 0, kind: input, shape index: {}]   ;;  %s5576_s4 = inlined_call_operand.vmem [shape: f32[1,96], index: 4, kind: input, shape index: {}]   ;;  %s5577_s2 = inlined_call_operand.vmem [shape: f32[2,8], index: 2, kind: input, shape index: {}]   ;;  %s5578_s5 = inlined_call_operand.vmem [shape: f32[32,32], index: 5, kind: input, shape index: {}]   ;;  %s5579_s7 = inlined_call_operand.vmem [shape: f32[32,64], index: 7, kind: input, shape index: {}]   ;;  %s5580_s1 = inlined_call_operand.vmem [shape: f32[2,32], index: 1, kind: input, shape index: {}]   ;;  %s5581_s6 = inlined_call_operand.vmem [shape: f32[1,32], index: 6, kind: input, shape index: {}]   ;;  %s5582_s8 = inlined_call_operand.vmem [shape: f32[1,64], index: 8, kind: input, shape index: {}]   ;;  %s5583_s9 = inlined_call_operand.vmem [shape: f32[96,64], index: 9, kind: input, shape index: {}]   ;;  %s5584_s11 = inlined_call_operand.vmem [shape: f32[192,32], index: 11, kind: input, shape index: {}]   ;;  %s5585_s13 = inlined_call_operand.vmem [shape: f32[32,64], index: 13, kind: input, shape index: {}]   ;;  %s5586_s10 = inlined_call_operand.vmem [shape: f32[1,64], index: 10, kind: input, shape index: {}]   ;;  %s5587_s12 = inlined_call_operand.vmem [shape: f32[1,32], index: 12, kind: input, shape index: {}]   ;;  %s5588_s14 = inlined_call_operand.vmem [shape: f32[1,64], index: 14, kind: input, shape index: {}]   ;;  %s5589_s15 = inlined_call_operand.vmem [shape: f32[32,96], index: 15, kind: input, shape index: {}]   ;;  %s5590_s16 = inlined_call_operand.vmem [shape: f32[1,96], index: 16, kind: input, shape index: {}]   ;;  %s5591_s17 = inlined_call_operand.vmem [shape: f32[32,32], index: 17, kind: input, shape index: {}]   ;;  %s5592_s19 = inlined_call_operand.vmem [shape: f32[32,64], index: 19, kind: input, shape index: {}]   ;;  %s5593_s18 = inlined_call_operand.vmem [shape: f32[1,32], index: 18, kind: input, shape index: {}]   ;;  %s5594_s20 = inlined_call_operand.vmem [shape: f32[1,64], index: 20, kind: input, shape index: {}]   ;;  %s5595_s21 = inlined_call_operand.vmem [shape: f32[96,64], index: 21, kind: input, shape index: {}]   ;;  %s5596_s23 = inlined_call_operand.vmem [shape: f32[192,32], index: 23, kind: input, shape index: {}]   ;;  %s5597_s25 = inlined_call_operand.vmem [shape: f32[32,64], index: 25, kind: input, shape index: {}]   ;;  %s5598_s22 = inlined_call_operand.vmem [shape: f32[1,64], index: 22, kind: input, shape index: {}]   ;;  %s5599_s24 = inlined_call_operand.vmem [shape: f32[1,32], index: 24, kind: input, shape index: {}]   ;;  %s5600_s26 = inlined_call_operand.vmem [shape: f32[1,64], index: 26, kind: input, shape index: {}]   ;;  %s5601_s27 = inlined_call_operand.vmem [shape: f32[2,8,32], index: 27, kind: output, shape index: {}]  }
   0x1   :  { %5616 = sst [smem:[#allocation4_spill]] %s5574_s3  ;;  %4060 = vmatprep.subr.mxu1 %v4693_v8  ;;  %1284 = vst.msk [vmem:[#allocation2] sm:$0xff] %vm168_vm0, %v4693_v8  ;;  %1287 = vst.msk [vmem:[#allocation2 + $0x10] sm:$0xff] %vm168_vm0, %v4693_v8  ;;  %4062 = vmatprep.mubr.msk.f32.mxu1 %vm4694_vm1, %v4693_v8  ;;  %v90_v16 = vlaneseq  ;;  %v4696_v17 = vmov 1966171168   ;;  %vm450_vm3 = vcmask 64512  }
   0x2   :  { %5617 = sst [smem:[#allocation5_spill]] %s5575_s0  ;;  %v252_v18 = vunpack.c.l.s4 %v4696_v17  ;;  %s5612_s0 = smov 112   ;;  %vm1285_vm4 = vcmask 254976   ;;  %vm1554_vm5 = vcmask 523264   ;;  %vm1556_vm6 = vcmask 517120  }
   0x3   :  { %5618 = sst [smem:[#allocation6_spill]] %s5576_s4  ;;  %v4901_v19 = vshrl.u32 %v90_v16, 7  ;;  %s5610_s4 = smov 48   ;;  %1286 = vst.msk [vmem:[#allocation2 + $0x8] sm:$0x3] %vm1285_vm4, %v4693_v8 }
   0x4   :  { %5619 = sst [smem:[#allocation7_spill]] %s5577_s2  ;;  %s5629_s2 = sld [smem:[#allocation5_spill]]  ;;  %v253_v20 = vunpack.c.0.s8 %v252_v18  ;;  %1288 = vst.msk [vmem:[#allocation2 + $0x18] sm:$0x3] %vm1285_vm4, %v4693_v8 }
   0x5   :  { %5620 = sst [smem:[#allocation8_spill]] %s5578_s5  ;;  %s5630_s5 = sld [smem:[#allocation6_spill]]  ;;  %v4916_v28 = vsub.s32 0, %v4901_v19  ;;  %1558 = vst.msk [vmem:[#allocation3 + $0x10] sm:$0xff] %vm1554_vm5, %v4693_v8  ;;  %1555 = vst.msk [vmem:[#allocation3] sm:$0xff] %vm1554_vm5, %v4693_v8 }
   0x6   :  { %5621 = sst [smem:[#allocation9_spill]] %s5579_s7  ;;  %v4904_v21 = vsub.s32 %v253_v20, %v4901_v19  ;;  %s5631_s7 = sld [smem:[#allocation7_spill]]  ;;  %1559 = vst.msk [vmem:[#allocation3 + $0x18] sm:$0x3] %vm1556_vm6, %v4693_v8  ;;  %1557 = vst.msk [vmem:[#allocation3 + $0x8] sm:$0x3] %vm1556_vm6, %v4693_v8 }
   0x7   :  { %5622 = sst [smem:[#allocation10_spill]] %s5580_s1  ;;  %s5633_s1 = sld [smem:[#allocation9_spill]] }
   0x8   :  { %5623 = sst [smem:[#allocation11_spill]] %s5581_s6  ;;  %s5634_s29 = sld [smem:[#allocation10_spill]] }
   0x9   :  { %5624 = sst [smem:[#allocation12_spill]] %s5582_s8  ;;  %s5635_s3 = sld [smem:[#allocation11_spill]] }
   0xa   :  { %5625 = sst [smem:[#allocation13_spill]] %s5583_s9  ;;  %s5628_s8 = sld [smem:[#allocation4_spill]]  ;;  %v4857_v5 = vld [vmem:[%s5629_s2] sm:$0xff]  ;;  %v4864_v7 = vld [vmem:[%s5629_s2 + $0x8] sm:$0xff] }
   0xb   :  { %5626 = sst [smem:[#allocation14_spill]] %s5584_s11  ;;  %4057 = vmatprep.mubr.msk.f32.mxu0 %vm168_vm0, %v4857_v5  ;;  %v3795_v9 = vld [vmem:[%s5630_s5] ss:$0 sm:$0xff]  ;;  %s5614_s11 = smov 80  }
   0xc   :  { %5627 = sst [smem:[#allocation15_spill]] %s5585_s13  ;;  %v4909_v22 = vld [vmem:[%s5631_s7] sm:$0x3]  ;;  %s5632_s2 = sld [smem:[#allocation8_spill]] }
   0xd   :  { %v257_v23 = vrot.slane %v4909_v22, %v4904_v21  ;;  %s5636_s5 = sld [smem:[#allocation12_spill]]  ;;  %s5637_s7 = sld [smem:[#allocation13_spill]] }
   0xf   :  { %v265_v24 = vrot.slane %v257_v23, %v4904_v21  ;;  %v258_v25 = vcombine.high %v257_v23, %v257_v23 }
  0x10   :  { %v104_v0 = vld [vmem:[%s5628_s8] sm:$0xff]  ;;  %v105_v1 = vld [vmem:[%s5628_s8 + $0x8] sm:$0xff]  ;;  %v106_v2 = vld [vmem:[%s5628_s8 + $0x10] sm:$0xff] }
  0x11   :  { %v4403_v3 = vpack.c.bf16 %v105_v1, %v104_v0  ;;  %v107_v4 = vld [vmem:[%s5628_s8 + $0x18] sm:$0xff]  ;;  %s4695_s8 = smov 96   ;;  %v3798_v26 = vadd.f32 -1.0, %v265_v24  ;;  %v272_v27 = vrot.slane %v258_v25, %v4904_v21 }
  0x12   :  { %v4407_v6 = vpack.c.bf16 %v107_v4, %v106_v2  ;;  %v109_v55 = vld [vmem:[%s5632_s2] sm:$0xff]  ;;  %v110_v56 = vld [vmem:[%s5632_s2 + $0x8] sm:$0xff] }
  0x13   :  { %4404 = vmatprep.subr.bf16.mxu0 %v4403_v3  ;;  %v277_v29 = vmul.f32 1e+09, %v3798_v26  ;;  %v3799_v30 = vadd.f32 -1.0, %v272_v27  ;;  %v4411_v57 = vpack.c.bf16 %v110_v56, %v109_v55  ;;  %v116_v55 = vld [vmem:[%s5633_s1 + $0x10] sm:$0xff]  ;;  %v117_v56 = vld [vmem:[%s5633_s1 + $0x18] sm:$0xff] }
  0x14   :  { %4406 = vmatpush3.bf16.msra.mxu0 %v4403_v3 }
  0x15   :  { %4408 = vmatprep.subr.bf16.mxu0 %v4407_v6  ;;  %v4919_v31 = vrot.slane %v277_v29, %v4916_v28  ;;  %v278_v32 = vmul.f32 1e+09, %v3799_v30 }
  0x17   :  { %v4923_v37 = vrot.slane %v278_v32, %v4916_v28 }
  0x18   :  { %4410 = vmatpush3.bf16.msra.mxu0 %v4407_v6 }
  0x19   :  { %4070 = vmatprep.subr.mxu0 %v4693_v8 }
  0x1b   :  { %4058 = vmatmul.mubr.msk.f32.vlgmr.msra.gmra.mrb[0].mxu0 %vm168_vm0, %v4864_v7 }
  0x1c   :  { %4072 = vmatprep.mubr.msk.f32.mxu0 %vm4694_vm1, %v4693_v8 }
  0xee   :  { %v4059_v10 = vpop.f32.mrb[0].mxu0 }
  0xef   :  { %v241_v11 = vpop.f32.mrb[1].mxu0  ;;  %v4885_v13 = vadd.f32 %v4059_v10, %v3795_v9 }
  0xf0   :  { %v4881_v12 = vadd.f32 %v3795_v9, %v241_v11 }
  0xf2   :  { %280 = vrot.lane.b32.xlu0 %v4881_v12, %s4695_s8 }
  0xf6   :  { %358 = vrot.lane.b32.xlu0 %v4885_v13, %s4695_s8 }
 0x164   :  { %v281_v14 = vpop.permute.xlu0 %280 }
 0x165   :  { %4061 = vmatpush3.xpose.msk.msra.mxu1 %vm282_vm2, %v281_v14 }
 0x166   :  { %4065 = vmatprep.subr.mxu1 %v4693_v8 }
 0x168   :  { %4063 = vmatmul.mubr.msk.f32.vlgmr.msra.gmra.mrb[0].mxu1 %vm282_vm2, %v4881_v12  ;;  %v359_v15 = vpop.permute.xlu0 %358 }
 0x169   :  { %4066 = vmatpush3.xpose.msk.msra.mxu1 %vm282_vm2, %v359_v15  ;;  %4067 = vmatprep.mubr.msk.f32.mxu1 %vm4694_vm1, %v4693_v8 }
 0x16a   :  { %4075 = vmatprep.subr.mxu1 %v4693_v8 }
 0x16c   :  { %4068 = vmatmul.mubr.msk.f32.vlgmr.msra.gmra.mrb[2].mxu1 %vm282_vm2, %v4885_v13 }
 0x16d   :  { %4077 = vmatprep.mubr.msk.f32.mxu1 %vm4694_vm1, %v4693_v8 }
 0x23b   :  { %v353_v33 = vpop.f32.mrb[0].mxu1 }
 0x23c   :  { %v434_v34 = vmul.f32 0.25, %v353_v33  ;;  %v4064_v35 = vpop.f32.mrb[1].mxu1 }
 0x23e   :  { %v448_v36 = vadd.f32 %v4919_v31, %v434_v34 }
 0x23f   :  { %v430_v38 = vpop.f32.mrb[2].mxu1 }
 0x240   :  { %v435_v39 = vmul.f32 0.25, %v430_v38  ;;  %v4069_v40 = vpop.f32.mrb[3].mxu1  ;;  %v451_v41 = vsel %vm450_vm3, %v448_v36, -inf }
 0x241   :  { %452 = vmax.xlane.f32.xlu1 %v451_v41 }
 0x242   :  { %v449_v42 = vadd.f32 %v4923_v37, %v435_v39 }
 0x244   :  { %v454_v43 = vsel %vm450_vm3, %v449_v42, -inf }
 0x245   :  { %455 = vmax.xlane.f32.xlu1 %v454_v43 }
 0x256   :  { %473 = vrot.lane.b32.xlu1 %v4881_v12, %s4697_s28 }
 0x2ce   :  { %v453_v44 = vpop.xlane.xlu1 %452 }
 0x2cf   :  { %v457_v45 = vsub.f32 %v448_v36, %v453_v44 }
 0x2d1   :  { %v459_v46 = vmul.f32 1.442695, %v457_v45 }
 0x2d2   :  { %v456_v47 = vpop.xlane.xlu1 %455 }
 0x2d3   :  { %4644 = vpow2.f32 %v459_v46  ;;  %v458_v48 = vsub.f32 %v449_v42, %v456_v47  ;;  %v111_v47 = vld [vmem:[%s5632_s2 + $0x10] sm:$0xff] }
 0x2d5   :  { %v461_v49 = vmul.f32 1.442695, %v458_v48 }
 0x2d6   :  { %v474_v50 = vpop.permute.xlu1 %473 }
 0x2d7   :  { %4646 = vpow2.f32 %v461_v49  ;;  %4071 = vmatpush3.msra.mxu0 %v474_v50  ;;  %v4701_v49 = vmov 0.0|0.0  }
 0x2d8   :  { %4412 = vmatprep.subr.bf16.mxu0 %v4411_v57 }
 0x2dd   :  { %v4645_v51 = vpop.eup %4644 }
 0x2de   :  { %v463_v52 = vsel %vm450_vm3, %v4645_v51, 0.0 }
 0x2df   :  { %464 = vadd.xlane.f32.xlu0 %v463_v52  ;;  %v114_v52 = vld [vmem:[%s5633_s1] sm:$0xff] }
 0x2e1   :  { %v4647_v53 = vpop.eup %4646 }
 0x2e2   :  { %v466_v54 = vsel %vm450_vm3, %v4647_v53, 0.0 }
 0x2e3   :  { %467 = vadd.xlane.f32.xlu1 %v466_v54 }
 0x2f4   :  { %549 = vrot.lane.b32.xlu1 %v4885_v13, %s4697_s28 }
 0x2f5   :  { %714 = vrot.lane.b32.xlu0 %v4881_v12, %s5612_s0 }
 0x2f8   :  { %716 = vrot.lane.b32.xlu1 %v4881_v12, %s5614_s11 }
 0x2fc   :  { %794 = vrot.lane.b32.xlu1 %v4885_v13, %s5614_s11 }
 0x300   :  { %792 = vrot.lane.b32.xlu1 %v4885_v13, %s5612_s0 }
 0x36c   :  { %v465_v58 = vpop.xlane.xlu0 %464 }
 0x36d   :  { %4648 = vrcp.f32 %v465_v58 }
 0x370   :  { %v468_v59 = vpop.xlane.xlu1 %467  ;;  %v715_v2 = vpop.permute.xlu0 %714 }
 0x371   :  { %4650 = vrcp.f32 %v468_v59  ;;  %v4423_v59 = vpack.c.bf16 %v117_v56, %v116_v55 }
 0x374   :  { %v550_v60 = vpop.permute.xlu1 %549 }
 0x375   :  { %4076 = vmatpush3.msra.mxu1 %v550_v60  ;;  %v5007_v60 = vld [vmem:[%s5634_s29] sm:$0x3] }
 0x376   :  { %4087 = vmatprep.subr.mxu1 %v4693_v8 }
 0x377   :  { %v4649_v61 = vpop.eup %4648 }
 0x378   :  { %v470_v62 = vmul.f32 %v4649_v61, %v4645_v51  ;;  %v717_v1 = vpop.permute.xlu1 %716  ;;  %v3808_v61 = vld [vmem:[%s5635_s3] ss:$0 sm:$0xff]  ;;  %s5639_s3 = sld [smem:[#allocation15_spill]] }
 0x37a   :  { %4073 = vmatmul.mubr.msk.f32.vlgmr.msra.gmra.mrb[2].mxu0 %vm450_vm3, %v470_v62 }
 0x37b   :  { %v4651_v63 = vpop.eup %4650  ;;  %4414 = vmatpush3.bf16.msra.mxu0 %v4411_v57 }
 0x37c   :  { %v472_v0 = vmul.f32 %v4651_v63, %v4647_v53  ;;  %4092 = vmatprep.subr.mxu0 %v4693_v8  ;;  %v795_v6 = vpop.permute.xlu1 %794  ;;  %v115_v53 = vld [vmem:[%s5633_s1 + $0x8] sm:$0xff]  ;;  %s5641_s1 = smov 112  }
 0x37d   :  { %v4420_v54 = vpack.c.bf16 %v115_v53, %v114_v52 }
 0x37e   :  { %4078 = vmatmul.mubr.msk.f32.vlgmr.msra.gmra.mrb[4].mxu1 %vm450_vm3, %v472_v0 }
 0x37f   :  { %4088 = vmatpush3.xpose.msk.msra.mxu1 %vm282_vm2, %v717_v1  ;;  %4089 = vmatprep.mubr.msk.f32.mxu1 %vm4694_vm1, %v4693_v8 }
 0x380   :  { %4097 = vmatprep.subr.mxu1 %v4693_v8  ;;  %v793_v11 = vpop.permute.xlu1 %792 }
 0x382   :  { %4090 = vmatmul.mubr.msk.f32.vlgmr.msra.gmra.mrb[6].mxu1 %vm282_vm2, %v715_v2 }
 0x383   :  { %4099 = vmatprep.mubr.msk.f32.mxu1 %vm4694_vm1, %v4693_v8 }
 0x44d   :  { %v545_v3 = vpop.f32.mrb[2].mxu0 }
 0x44e   :  { %v4074_v4 = vpop.f32.mrb[3].mxu0  ;;  %4084 = vmatprep.mubr.msk.f32.mxu0 %vm282_vm2, %v545_v3 }
 0x451   :  { %v621_v9 = vpop.f32.mrb[4].mxu1 }
 0x452   :  { %v4079_v10 = vpop.f32.mrb[5].mxu1  ;;  %4085 = vmatmul.mubr.msk.f32.vlgmr.msra.gmra.mrb[4].mxu0 %vm282_vm2, %v621_v9  ;;  %v3817_v9 = vld [vmem:[%s5636_s5] ss:$0 sm:$0xff] }
 0x453   :  { %4093 = vmatpush3.xpose.msk.msra.mxu0 %vm282_vm2, %v795_v6  ;;  %4094 = vmatprep.mubr.msk.f32.mxu0 %vm4694_vm1, %v4693_v8 }
 0x454   :  { %4102 = vmatprep.subr.mxu0 %v4693_v8 }
 0x455   :  { %v788_v14 = vpop.f32.mrb[6].mxu1 }
 0x456   :  { %v870_v15 = vmul.f32 0.25, %v788_v14  ;;  %v4091_v16 = vpop.f32.mrb[7].mxu1  ;;  %4095 = vmatmul.mubr.msk.f32.vlgmr.msra.gmra.mrb[6].mxu0 %vm282_vm2, %v793_v11 }
 0x457   :  { %4104 = vmatprep.mubr.msk.f32.mxu0 %vm4694_vm1, %v4693_v8 }
 0x458   :  { %v872_v17 = vadd.f32 %v870_v15, %v4919_v31 }
 0x45a   :  { %v874_v18 = vsel %vm450_vm3, %v872_v17, -inf }
 0x45b   :  { %875 = vmax.xlane.f32.xlu1 %v874_v18 }
 0x4e8   :  { %v876_v20 = vpop.xlane.xlu1 %875 }
 0x4e9   :  { %v880_v23 = vsub.f32 %v872_v17, %v876_v20 }
 0x4eb   :  { %v882_v24 = vmul.f32 1.442695, %v880_v23 }
 0x4ed   :  { %4652 = vpow2.f32 %v882_v24 }
 0x4f7   :  { %v4653_v25 = vpop.eup %4652 }
 0x4f8   :  { %v886_v26 = vsel %vm450_vm3, %v4653_v25, 0.0 }
 0x4f9   :  { %887 = vadd.xlane.f32.xlu1 %v886_v26 }
 0x529   :  { %v866_v27 = vpop.f32.mrb[6].mxu0 }
 0x52a   :  { %v871_v29 = vmul.f32 0.25, %v866_v27  ;;  %v4096_v30 = vpop.f32.mrb[7].mxu0 }
 0x52c   :  { %v873_v32 = vadd.f32 %v871_v29, %v4923_v37 }
 0x52e   :  { %v877_v33 = vsel %vm450_vm3, %v873_v32, -inf }
 0x52f   :  { %878 = vmax.xlane.f32.xlu0 %v877_v33 }
 0x545   :  { %972 = vrot.lane.b32.xlu0 %v4885_v13, %s5610_s4 }
 0x586   :  { %v888_v41 = vpop.xlane.xlu1 %887 }
 0x5bc   :  { %v879_v34 = vpop.xlane.xlu0 %878 }
 0x5bd   :  { %v881_v35 = vsub.f32 %v873_v32, %v879_v34  ;;  %v99_v32 = vsub.s32 1, %v4901_v19  ;;  %v119_v19 = vld [vmem:[%s5637_s7] sm:$0xff] }
 0x5bf   :  { %v884_v36 = vmul.f32 1.442695, %v881_v35  ;;  %v100_v34 = vrot.slane %v4909_v22, %v99_v32 }
 0x5c0   :  { %v973_v38 = vpop.permute.xlu0 %972 }
 0x5c1   :  { %4654 = vpow2.f32 %v884_v36  ;;  %4103 = vmatpush3.msra.mxu0 %v973_v38 }
 0x5c2   :  { %4656 = vrcp.f32 %v888_v41 }
 0x5cb   :  { %v4655_v39 = vpop.eup %4654 }
 0x5cc   :  { %v889_v40 = vsel %vm450_vm3, %v4655_v39, 0.0  ;;  %v4657_v43 = vpop.eup %4656 }
 0x5cd   :  { %890 = vadd.xlane.f32.xlu1 %v889_v40  ;;  %v893_v44 = vmul.f32 %v4657_v43, %v4653_v25  ;;  %v122_v40 = vld [vmem:[%s5637_s7 + $0x18] sm:$0xff]  ;;  %v124_v43 = vld [vmem:[%s5637_s7 + $0x28] sm:$0xff] }
 0x5de   :  { %896 = vrot.lane.b32.xlu1 %v4881_v12, %s5610_s4  ;;  %v112_v12 = vld [vmem:[%s5632_s2 + $0x18] sm:$0xff]  ;;  %s5638_s4 = sld [smem:[#allocation14_spill]] }
 0x5df   :  { %v4415_v48 = vpack.c.bf16 %v112_v12, %v111_v47 }
 0x5e1   :  { %4416 = vmatprep.subr.bf16.mxu0 %v4415_v48 }
 0x65a   :  { %v891_v42 = vpop.xlane.xlu1 %890 }
 0x65b   :  { %4658 = vrcp.f32 %v891_v42  ;;  %v123_v42 = vld [vmem:[%s5637_s7 + $0x20] sm:$0xff] }
 0x65e   :  { %v897_v13 = vpop.permute.xlu1 %896 }
 0x65f   :  { %4098 = vmatpush3.msra.mxu1 %v897_v13  ;;  %v132_v13 = vld [vmem:[%s5638_s4] sm:$0xff] }
 0x660   :  { %4100 = vmatmul.mubr.msk.f32.vlgmr.msra.gmra.mrb[8].mxu1 %vm450_vm3, %v893_v44  ;;  %v4433_v44 = vpack.c.bf16 %v124_v43, %v123_v42  ;;  %v160_v42 = vld [vmem:[%s5639_s3 + $0x18] sm:$0xff] }
 0x665   :  { %v4659_v45 = vpop.eup %4658 }
 0x666   :  { %v895_v46 = vmul.f32 %v4659_v45, %v4655_v39  ;;  %v121_v39 = vld [vmem:[%s5637_s7 + $0x10] sm:$0xff]  ;;  %v133_v45 = vld [vmem:[%s5638_s4 + $0x8] sm:$0xff] }
 0x667   :  { %v4429_v41 = vpack.c.bf16 %v122_v40, %v121_v39  ;;  %v158_v39 = vld [vmem:[%s5639_s3 + $0x8] sm:$0xff]  ;;  %v159_v40 = vld [vmem:[%s5639_s3 + $0x10] sm:$0xff] }
 0x668   :  { %4105 = vmatmul.mubr.msk.f32.vlgmr.msra.gmra.mrb[8].mxu0 %vm450_vm3, %v895_v46  ;;  %v4449_v46 = vpack.c.bf16 %v133_v45, %v132_v13  ;;  %v4501_v43 = vpack.c.bf16 %v160_v42, %v159_v40 }
 0x669   :  { %4418 = vmatpush3.bf16.msra.mxu0 %v4415_v48 }
 0x66a   :  { %4419 = vmatprep.subr.bf16.mxu0 %v4701_v49  ;;  %4450 = vmatprep.subr.bf16.mxu1 %v4449_v46 }
 0x66b   :  { %4452 = vmatpush3.bf16.msra.mxu1 %v4449_v46 }
 0x733   :  { %v968_v50 = vpop.f32.mrb[8].mxu1 }
 0x734   :  { %v4101_v51 = vpop.f32.mrb[9].mxu1  ;;  %4111 = vmatprep.mubr.msk.f32.mxu0 %vm282_vm2, %v968_v50 }
 0x73b   :  { %v1044_v57 = vpop.f32.mrb[8].mxu0 }
 0x73c   :  { %v4106_v58 = vpop.f32.mrb[9].mxu0  ;;  %4112 = vmatmul.mubr.msk.f32.vlgmr.msra.gmra.mrb[4].mxu0 %vm282_vm2, %v1044_v57 }
 0x73d   :  { %4421 = vmatpush3.bf16.msra.mxu0 %v4420_v54  ;;  %4122 = vmatprep.mubr.msk.f32.mxu0 %vm4694_vm1, %v4693_v8 }
 0x73e   :  { %4422 = vmatprep.subr.bf16.mxu0 %v4701_v49 }
 0x741   :  { %4424 = vmatpush3.bf16.msra.mxu0 %v4423_v59 }
 0x744   :  { %4123 = vmatmul.mubr.msk.f32.vlgmr.msra.gmra.mrb[10].mxu0 %vm168_vm0, %v5007_v60 }
 0x80f   :  { %v4113_v62 = vpop.f32.mrb[4].mxu0 }
 0x810   :  { %v4603_v63 = vadd.f32 %v4113_v62, %v3808_v61  ;;  %v1120_v0 = vpop.f32.mrb[5].mxu0 }
 0x811   :  { %v4604_v1 = vadd.f32 %v3808_v61, %v1120_v0 }
 0x812   :  { %v1132_v2 = vadd.f32 %v4603_v63, %v4864_v7 }
 0x813   :  { %v1131_v3 = vadd.f32 %v4604_v1, %v4857_v5  ;;  %v93_v5 = vrot.slane %v4909_v22, %v4916_v28  ;;  %v120_v22 = vld [vmem:[%s5637_s7 + $0x8] sm:$0xff] }
 0x814   :  { %v1238_v4 = vsel %vm168_vm0, %v1132_v2, 0.0  ;;  %v4425_v38 = vpack.c.bf16 %v120_v22, %v119_v19  ;;  %v141_v19 = vld [vmem:[%s5638_s4 + $0x48] sm:$0xff] }
 0x815   :  { %1239 = vadd.xlane.f32.xlu0 %v1238_v4  ;;  %v1235_v6 = vsel %vm168_vm0, %v1131_v3, 0.0  ;;  %v125_v4 = vld [vmem:[%s5637_s7 + $0x30] sm:$0xff] }
 0x816   :  { %1236 = vadd.xlane.f32.xlu1 %v1235_v6  ;;  %4426 = vmatprep.subr.bf16.mxu0 %v4425_v38  ;;  %v126_v6 = vld [vmem:[%s5637_s7 + $0x38] sm:$0xff] }
 0x817   :  { %v1208_v10 = vpop.f32.mrb[10].mxu0  ;;  %4428 = vmatpush3.bf16.msra.mxu0 %v4425_v38  ;;  %v157_v38 = vld [vmem:[%s5639_s3] sm:$0xff] }
 0x818   :  { %v1209_v11 = vadd.f32 %v3817_v9, %v1208_v10  ;;  %v4124_v14 = vpop.f32.mrb[11].mxu0  ;;  %4430 = vmatprep.subr.bf16.mxu0 %v4429_v41 }
 0x81a   :  { %v1219_v15 = vrot.slane %v1209_v11, %v4904_v21 }
 0x81b   :  { %4432 = vmatpush3.bf16.msra.mxu0 %v4429_v41  ;;  %v4498_v41 = vpack.c.bf16 %v158_v39, %v157_v38 }
 0x81c   :  { %v1227_v16 = vrot.slane %v1219_v15, %v4904_v21  ;;  %v1220_v33 = vcombine.high %v1219_v15, %v1219_v15  ;;  %4434 = vmatprep.subr.bf16.mxu0 %v4433_v44 }
 0x81e   :  { %v1265_v7 = vrot.slane %v1227_v16, %v4916_v28  ;;  %v1234_v35 = vrot.slane %v1220_v33, %v4904_v21  ;;  %v4437_v16 = vpack.c.bf16 %v126_v6, %v125_v4  ;;  %v138_v33 = vld [vmem:[%s5638_s4 + $0x30] sm:$0xff]  ;;  %v147_v4 = vld [vmem:[%s5638_s4 + $0x78] sm:$0xff] }
 0x820   :  { %v1269_v36 = vrot.slane %v1234_v35, %v4916_v28 }
 0x827   :  { %1274 = vrot.lane.b32.xlu1 %v1265_v7, %s4695_s8 }
 0x82b   :  { %95 = vbcast.lane.b32.xlu1 %v93_v5, 256  ;;  %v127_v5 = vld [vmem:[%s5637_s7 + $0x40] sm:$0xff] }
 0x8a2   :  { %v1240_v17 = vpop.xlane.xlu0 %1239 }
 0x8a3   :  { %v1243_v18 = vmul.f32 0.03125, %v1240_v17  ;;  %v1237_v20 = vpop.xlane.xlu1 %1236  ;;  %v128_v17 = vld [vmem:[%s5637_s7 + $0x48] sm:$0xff] }
 0x8a4   :  { %v1242_v23 = vmul.f32 0.03125, %v1237_v20  ;;  %v129_v20 = vld [vmem:[%s5637_s7 + $0x50] sm:$0xff] }
 0x8a5   :  { %v1245_v24 = vsub.f32 %v1132_v2, %v1243_v18  ;;  %v4441_v18 = vpack.c.bf16 %v128_v17, %v127_v5  ;;  %v153_v5 = vld [vmem:[%s5638_s4 + $0xa8] sm:$0xff] }
 0x8a6   :  { %v1244_v25 = vsub.f32 %v1131_v3, %v1242_v23  ;;  %v130_v23 = vld [vmem:[%s5637_s7 + $0x58] sm:$0xff] }
 0x8a7   :  { %v1247_v26 = vmul.f32 %v1245_v24, %v1245_v24  ;;  %v1275_v47 = vpop.permute.xlu1 %1274 }
 0x8a8   :  { %v1246_v27 = vmul.f32 %v1244_v25, %v1244_v25 }
 0x8a9   :  { %v1251_v29 = vsel %vm168_vm0, %v1247_v26, 0.0  ;;  %v135_v26 = vld [vmem:[%s5638_s4 + $0x18] sm:$0xff] }
 0x8aa   :  { %1252 = vadd.xlane.f32.xlu0 %v1251_v29  ;;  %v1248_v30 = vsel %vm168_vm0, %v1246_v27, 0.0  ;;  %v136_v29 = vld [vmem:[%s5638_s4 + $0x20] sm:$0xff] }
 0x8ab   :  { %1249 = vadd.xlane.f32.xlu1 %v1248_v30  ;;  %v5062_v12 = vpop.permute.xlu1 %95  ;;  %v137_v30 = vld [vmem:[%s5638_s4 + $0x28] sm:$0xff] }
 0x8ac   :  { %v4457_v32 = vpack.c.bf16 %v137_v30, %v136_v29 }
 0x8bc   :  { %102 = vbcast.lane.b32.xlu1 %v100_v34, 256  ;;  %v139_v34 = vld [vmem:[%s5638_s4 + $0x38] sm:$0xff] }
 0x8bd   :  { %v4461_v35 = vpack.c.bf16 %v139_v34, %v138_v33 }
 0x8c0   :  { %1276 = vrot.lane.b32.xlu0 %v1269_v36, %s4695_s8 }
 0x937   :  { %v1253_v48 = vpop.xlane.xlu0 %1252 }
 0x938   :  { %v1255_v50 = vmul.f32 0.03125, %v1253_v48  ;;  %v1250_v51 = vpop.xlane.xlu1 %1249 }
 0x939   :  { %v1254_v52 = vmul.f32 0.03125, %v1250_v51  ;;  %v142_v51 = vld [vmem:[%s5638_s4 + $0x50] sm:$0xff] }
 0x93a   :  { %v1257_v53 = vadd.f32 1e-05, %v1255_v50 }
 0x93b   :  { %v1256_v54 = vadd.f32 1e-05, %v1254_v52  ;;  %v1277_v62 = vpop.permute.xlu0 %1276  ;;  %v143_v52 = vld [vmem:[%s5638_s4 + $0x58] sm:$0xff] }
 0x93c   :  { %4660 = vrsqrt.f32 %v1257_v53  ;;  %v5064_v63 = vpop.permute.xlu1 %102 }
 0x93d   :  { %4662 = vrsqrt.f32 %v1256_v54 }
 0x946   :  { %v4661_v55 = vpop.eup %4660 }
 0x947   :  { %v4663_v56 = vpop.eup %4662  ;;  %v1261_v57 = vmul.f32 %v4661_v55, %v1245_v24  ;;  %v4445_v24 = vpack.c.bf16 %v130_v23, %v129_v20  ;;  %v155_v20 = vld [vmem:[%s5638_s4 + $0xb8] sm:$0xff] }
 0x948   :  { %v1260_v58 = vmul.f32 %v4663_v56, %v1244_v25  ;;  %v134_v25 = vld [vmem:[%s5638_s4 + $0x10] sm:$0xff] }
 0x949   :  { %v1273_v59 = vmul.f32 %v1269_v36, %v1261_v57  ;;  %v4453_v27 = vpack.c.bf16 %v135_v26, %v134_v25  ;;  %v140_v36 = vld [vmem:[%s5638_s4 + $0x40] sm:$0xff] }
 0x94a   :  { %v1272_v61 = vmul.f32 %v1265_v7, %v1260_v58  ;;  %v4465_v22 = vpack.c.bf16 %v141_v19, %v140_v36  ;;  %v4469_v58 = vpack.c.bf16 %v143_v52, %v142_v51  ;;  %v3833_v36 = vld [vmem:[%s5588_s14] ss:$0 sm:$0xff] }
 0x94b   :  { %v1281_v0 = vadd.f32 %v1277_v62, %v1273_v59  ;;  %4454 = vmatprep.subr.bf16.mxu1 %v4453_v27  ;;  %v145_v62 = vld [vmem:[%s5638_s4 + $0x68] sm:$0xff]  ;;  %v1972_v52 = vld [vmem:[%s5589_s15] sm:$0xff] }
 0x94c   :  { %v1280_v1 = vadd.f32 %v1275_v47, %v1272_v61  ;;  %4456 = vmatpush3.bf16.msra.mxu1 %v4453_v27  ;;  %v144_v61 = vld [vmem:[%s5638_s4 + $0x60] sm:$0xff] }
 0x94d   :  { %v5067_v2 = vmul.f32 %v1281_v0, %v5064_v63  ;;  %4458 = vmatprep.subr.bf16.mxu1 %v4457_v32  ;;  %v4473_v0 = vpack.c.bf16 %v145_v62, %v144_v61 }
 0x94e   :  { %v5070_v3 = vmul.f32 %v1280_v1, %v5062_v12  ;;  %v146_v1 = vld [vmem:[%s5638_s4 + $0x70] sm:$0xff] }
 0x94f   :  { %1290 = vst.msk [vmem:[#allocation2 + $0x11] sm:$0xff] %vm168_vm0, %v5067_v2  ;;  %v4477_v6 = vpack.c.bf16 %v147_v4, %v146_v1 }
 0x950   :  { %1289 = vst.msk [vmem:[#allocation2 + $0x1] sm:$0xff] %vm168_vm0, %v5070_v3  ;;  %4460 = vmatpush3.bf16.msra.mxu1 %v4457_v32 }
 0x951   :  { %4462 = vmatprep.subr.bf16.mxu1 %v4461_v35 }
 0x954   :  { %4464 = vmatpush3.bf16.msra.mxu1 %v4461_v35 }
 0x955   :  { %4466 = vmatprep.subr.bf16.mxu1 %v4465_v22 }
 0x956   :  { %v1292_v9 = vld [vmem:[#allocation2 + $0x10] sm:$0xff] }
 0x957   :  { %v1383_v10 = vld [vmem:[#allocation2 + $0x11] sm:$0xff]  ;;  %v1291_v14 = vld [vmem:[#allocation2] sm:$0xff] }
 0x958   :  { %v1468_v11 = vld [vmem:[#allocation2 + $0x12] sm:$0xff]  ;;  %v1382_v15 = vld [vmem:[#allocation2 + $0x1] sm:$0xff]  ;;  %4133 = vmatprep.mubr.msk.f32.mxu0 %vm168_vm0, %v1291_v14 }
 0x959   :  { %v1467_v7 = vld [vmem:[#allocation2 + $0x2] sm:$0xff]  ;;  %3106 = vst.msk [vmem:[#allocation2 + $0x10] sm:$0xff] %vm168_vm0, %v4693_v8  ;;  %4134 = vmatmul.mubr.msk.f32.vlgmr.msra.gmra.mrb[12].mxu0 %vm168_vm0, %v1292_v9  ;;  %v150_v14 = vld [vmem:[%s5638_s4 + $0x90] sm:$0xff] }
 0x95a   :  { %3107 = vst.msk [vmem:[#allocation2 + $0x18] sm:$0x3] %vm1285_vm4, %v4693_v8  ;;  %3105 = vst.msk [vmem:[#allocation2 + $0x8] sm:$0x3] %vm1285_vm4, %v4693_v8  ;;  %4436 = vmatpush3.bf16.msra.mxu0 %v4433_v44  ;;  %4144 = vmatprep.mubr.msk.f32.mxu0 %vm168_vm0, %v1382_v15  ;;  %v3821_v44 = vld [vmem:[%s5586_s10] ss:$0 sm:$0xff] }
 0x95b   :  { %3104 = vst.msk [vmem:[#allocation2] sm:$0xff] %vm168_vm0, %v4693_v8  ;;  %4438 = vmatprep.subr.bf16.mxu0 %v4437_v16  ;;  %v148_v9 = vld [vmem:[%s5638_s4 + $0x80] sm:$0xff]  ;;  %v151_v15 = vld [vmem:[%s5638_s4 + $0x98] sm:$0xff] }
 0x95e   :  { %4440 = vmatpush3.bf16.msra.mxu0 %v4437_v16  ;;  %v4485_v16 = vpack.c.bf16 %v151_v15, %v150_v14 }
 0x95f   :  { %4442 = vmatprep.subr.bf16.mxu0 %v4441_v18 }
 0x961   :  { %4145 = vmatmul.mubr.msk.f32.vlgmr.msra.gmra.mrb[12].mxu0 %vm168_vm0, %v1383_v10  ;;  %v149_v10 = vld [vmem:[%s5638_s4 + $0x88] sm:$0xff] }
 0x962   :  { %4444 = vmatpush3.bf16.msra.mxu0 %v4441_v18  ;;  %4155 = vmatprep.mubr.msk.f32.mxu0 %vm168_vm0, %v1467_v7  ;;  %v152_v7 = vld [vmem:[%s5638_s4 + $0xa0] sm:$0xff]  ;;  %v154_v18 = vld [vmem:[%s5638_s4 + $0xb0] sm:$0xff] }
 0x963   :  { %4446 = vmatprep.subr.bf16.mxu0 %v4445_v24  ;;  %v4489_v17 = vpack.c.bf16 %v153_v5, %v152_v7  ;;  %v4493_v23 = vpack.c.bf16 %v155_v20, %v154_v18  ;;  %v3835_v20 = vld [vmem:[%s5590_s16] ss:$0 sm:$0xff]  ;;  %s5640_s16 = smov 80  }
 0x966   :  { %4448 = vmatpush3.bf16.msra.mxu0 %v4445_v24  ;;  %v3828_v24 = vld [vmem:[%s5587_s12] ss:$0 sm:$0xff] }
 0x967   :  { %4497 = vmatprep.subr.bf16.mxu0 %v4701_v49 }
 0x969   :  { %4156 = vmatmul.mubr.msk.f32.vlgmr.msra.gmra.mrb[12].mxu0 %vm168_vm0, %v1468_v11  ;;  %v4481_v11 = vpack.c.bf16 %v149_v10, %v148_v9 }
 0x96a   :  { %4223 = vmatprep.mubr.msk.f32.mxu0 %vm4694_vm1, %v4693_v8  ;;  %4499 = vmatpush3.bf16.msra.mxu0 %v4498_v41 }
 0x96b   :  { %4500 = vmatprep.subr.bf16.mxu0 %v4701_v49 }
 0x96e   :  { %4502 = vmatpush3.bf16.msra.mxu0 %v4501_v43 }
 0x971   :  { %4224 = vmatmul.mubr.msk.f32.vlgmr.msra.gmra.mrb[14].mxu0 %vm168_vm0, %v5007_v60 }
 0xa3c   :  { %v4157_v13 = vpop.f32.mrb[12].mxu0 }
 0xa3d   :  { %v4605_v45 = vadd.f32 %v4157_v13, %v3821_v44  ;;  %v1541_v46 = vpop.f32.mrb[13].mxu0 }
 0xa3e   :  { %v4606_v47 = vadd.f32 %v3821_v44, %v1541_v46 }
 0xa3f   :  { %v1553_v48 = vmax.f32 %v4605_v45, 0.0 }
 0xa40   :  { %v1552_v50 = vmax.f32 %v4606_v47, 0.0 }
 0xa41   :  { %1561 = vst.msk [vmem:[#allocation3 + $0x11] sm:$0xff] %vm1554_vm5, %v1553_v48 }
 0xa42   :  { %1560 = vst.msk [vmem:[#allocation3 + $0x1] sm:$0xff] %vm1554_vm5, %v1552_v50 }
 0xa44   :  { %v1897_v35 = vpop.f32.mrb[14].mxu0 }
 0xa45   :  { %v4225_v19 = vpop.f32.mrb[15].mxu0 }
 0xa48   :  { %v1563_v53 = vld [vmem:[#allocation3 + $0x10] sm:$0xff] }
 0xa49   :  { %v1654_v54 = vld [vmem:[#allocation3 + $0x11] sm:$0xff]  ;;  %v1562_v56 = vld [vmem:[#allocation3] sm:$0xff] }
 0xa4a   :  { %v1739_v55 = vld [vmem:[#allocation3 + $0x12] sm:$0xff]  ;;  %v1653_v57 = vld [vmem:[#allocation3 + $0x1] sm:$0xff]  ;;  %4174 = vmatprep.mubr.msk.f32.mxu1 %vm1554_vm5, %v1562_v56 }
 0xa4b   :  { %v1738_v59 = vld [vmem:[#allocation3 + $0x2] sm:$0xff]  ;;  %3375 = vst.msk [vmem:[#allocation3 + $0x10] sm:$0xff] %vm1554_vm5, %v4693_v8  ;;  %4175 = vmatmul.mubr.msk.f32.vlgmr.msra.gmra.mrb[10].mxu1 %vm1554_vm5, %v1563_v53  ;;  %v1975_v56 = vld [vmem:[%s5589_s15 + $0x18] sm:$0xff] }
 0xa4c   :  { %3376 = vst.msk [vmem:[#allocation3 + $0x18] sm:$0x3] %vm1556_vm6, %v4693_v8  ;;  %3374 = vst.msk [vmem:[#allocation3 + $0x8] sm:$0x3] %vm1556_vm6, %v4693_v8  ;;  %4468 = vmatpush3.bf16.msra.mxu1 %v4465_v22  ;;  %4193 = vmatprep.mubr.msk.f32.mxu1 %vm1554_vm5, %v1653_v57  ;;  %v1898_v22 = vadd.f32 %v3833_v36, %v1897_v35  ;;  %v1973_v53 = vld [vmem:[%s5589_s15 + $0x8] sm:$0xff] }
 0xa4d   :  { %3373 = vst.msk [vmem:[#allocation3] sm:$0xff] %vm1554_vm5, %v4693_v8  ;;  %4470 = vmatprep.subr.bf16.mxu1 %v4469_v58 }
 0xa4e   :  { %v1908_v38 = vrot.slane %v1898_v22, %v4904_v21 }
 0xa50   :  { %4472 = vmatpush3.bf16.msra.mxu1 %v4469_v58  ;;  %v1916_v39 = vrot.slane %v1908_v38, %v4904_v21  ;;  %v1909_v48 = vcombine.high %v1908_v38, %v1908_v38 }
 0xa51   :  { %4474 = vmatprep.subr.bf16.mxu1 %v4473_v0 }
 0xa52   :  { %v1923_v50 = vrot.slane %v1909_v48, %v4904_v21  ;;  %v1977_v48 = vld [vmem:[%s5591_s17] sm:$0xff] }
 0xa54   :  { %4476 = vmatpush3.bf16.msra.mxu1 %v4473_v0  ;;  %v1957_v51 = vrot.slane %v1923_v50, %v4916_v28  ;;  %v1978_v50 = vld [vmem:[%s5591_s17 + $0x8] sm:$0xff] }
 0xa55   :  { %4478 = vmatprep.subr.bf16.mxu1 %v4477_v6 }
 0xa58   :  { %4480 = vmatpush3.bf16.msra.mxu1 %v4477_v6 }
 0xa59   :  { %4482 = vmatprep.subr.bf16.mxu1 %v4481_v11 }
 0xa5b   :  { %4194 = vmatmul.mubr.msk.f32.vlgmr.msra.gmra.mrb[10].mxu1 %vm1554_vm5, %v1654_v54  ;;  %v4503_v54 = vpack.c.bf16 %v1973_v53, %v1972_v52 }
 0xa5c   :  { %4484 = vmatpush3.bf16.msra.mxu1 %v4481_v11  ;;  %4212 = vmatprep.mubr.msk.f32.mxu1 %vm1554_vm5, %v1738_v59 }
 0xa5d   :  { %4486 = vmatprep.subr.bf16.mxu1 %v4485_v16  ;;  %4504 = vmatprep.subr.bf16.mxu0 %v4503_v54 }
 0xa5e   :  { %4506 = vmatpush3.bf16.msra.mxu0 %v4503_v54 }
 0xa60   :  { %4488 = vmatpush3.bf16.msra.mxu1 %v4485_v16 }
 0xa61   :  { %4490 = vmatprep.subr.bf16.mxu1 %v4489_v17 }
 0xa64   :  { %4492 = vmatpush3.bf16.msra.mxu1 %v4489_v17 }
 0xa65   :  { %4494 = vmatprep.subr.bf16.mxu1 %v4493_v23 }
 0xa68   :  { %4496 = vmatpush3.bf16.msra.mxu1 %v4493_v23 }
 0xa69   :  { %4252 = vmatprep.subr.mxu1 %v4693_v8 }
 0xa6b   :  { %4213 = vmatmul.mubr.msk.f32.vlgmr.msra.gmra.mrb[10].mxu1 %vm1554_vm5, %v1739_v55  ;;  %v1974_v55 = vld [vmem:[%s5589_s15 + $0x10] sm:$0xff] }
 0xa6c   :  { %4254 = vmatprep.mubr.msk.f32.mxu1 %vm4694_vm1, %v4693_v8  ;;  %v4507_v57 = vpack.c.bf16 %v1975_v56, %v1974_v55 }
 0xa6e   :  { %4508 = vmatprep.subr.bf16.mxu0 %v4507_v57 }
 0xa6f   :  { %4510 = vmatpush3.bf16.msra.mxu0 %v4507_v57 }
 0xa70   :  { %4237 = vmatprep.subr.mxu0 %v4693_v8 }
 0xb3e   :  { %v4214_v25 = vpop.f32.mrb[10].mxu1 }
 0xb3f   :  { %v4607_v26 = vadd.f32 %v4214_v25, %v3828_v24  ;;  %v1812_v27 = vpop.f32.mrb[11].mxu1 }
 0xb40   :  { %v4608_v29 = vadd.f32 %v3828_v24, %v1812_v27 }
 0xb41   :  { %v1824_v30 = vadd.f32 %v4607_v26, %v5067_v2  ;;  %v1953_v2 = vrot.slane %v1916_v39, %v4916_v28 }
 0xb42   :  { %v1823_v32 = vadd.f32 %v4608_v29, %v5070_v3 }
 0xb43   :  { %v1927_v33 = vsel %vm168_vm0, %v1824_v30, 0.0 }
 0xb44   :  { %1928 = vadd.xlane.f32.xlu1 %v1927_v33  ;;  %v1924_v34 = vsel %vm168_vm0, %v1823_v32, 0.0 }
 0xb45   :  { %1925 = vadd.xlane.f32.xlu0 %v1924_v34 }
 0xb55   :  { %1962 = vrot.lane.b32.xlu1 %v1953_v2, %s4695_s8 }
 0xbd1   :  { %v1929_v3 = vpop.xlane.xlu1 %1928 }
 0xbd2   :  { %v1931_v40 = vmul.f32 0.03125, %v1929_v3  ;;  %v1926_v41 = vpop.xlane.xlu0 %1925 }
 0xbd3   :  { %v1930_v42 = vmul.f32 0.03125, %v1926_v41 }
 0xbd4   :  { %v1933_v43 = vsub.f32 %v1824_v30, %v1931_v40 }
 0xbd5   :  { %v1932_v44 = vsub.f32 %v1823_v32, %v1930_v42  ;;  %v1963_v9 = vpop.permute.xlu1 %1962 }
 0xbd6   :  { %v1935_v46 = vmul.f32 %v1933_v43, %v1933_v43 }
 0xbd7   :  { %v1934_v13 = vmul.f32 %v1932_v44, %v1932_v44 }
 0xbd8   :  { %v1939_v47 = vsel %vm168_vm0, %v1935_v46, 0.0 }
 0xbd9   :  { %v1936_v45 = vsel %vm168_vm0, %v1934_v13, 0.0 }
 0xbda   :  { %1937 = vadd.xlane.f32.xlu0 %v1936_v45 }
 0xbde   :  { %1940 = vadd.xlane.f32.xlu0 %v1939_v47 }
 0xbf4   :  { %1964 = vrot.lane.b32.xlu0 %v1957_v51, %s4695_s8 }
 0xc67   :  { %v1938_v58 = vpop.xlane.xlu0 %1937 }
 0xc68   :  { %v1942_v59 = vmul.f32 0.03125, %v1938_v58 }
 0xc6a   :  { %v1944_v61 = vadd.f32 1e-05, %v1942_v59 }
 0xc6b   :  { %v1941_v62 = vpop.xlane.xlu0 %1940 }
 0xc6c   :  { %4664 = vrsqrt.f32 %v1944_v61  ;;  %v1943_v0 = vmul.f32 0.03125, %v1941_v62 }
 0xc6e   :  { %v1945_v1 = vadd.f32 1e-05, %v1943_v0 }
 0xc6f   :  { %v1965_v16 = vpop.permute.xlu0 %1964 }
 0xc70   :  { %4666 = vrsqrt.f32 %v1945_v1 }
 0xc76   :  { %v4665_v4 = vpop.eup %4664 }
 0xc77   :  { %v1948_v6 = vmul.f32 %v4665_v4, %v1932_v44 }
 0xc79   :  { %v1960_v10 = vmul.f32 %v1953_v2, %v1948_v6 }
 0xc7a   :  { %v4667_v11 = vpop.eup %4666 }
 0xc7b   :  { %v1968_v14 = vadd.f32 %v1963_v9, %v1960_v10  ;;  %v1949_v15 = vmul.f32 %v4667_v11, %v1933_v43 }
 0xc7d   :  { %v5255_v7 = vmul.f32 %v1968_v14, %v5062_v12  ;;  %v1961_v5 = vmul.f32 %v1957_v51, %v1949_v15  ;;  %v4511_v51 = vpack.c.bf16 %v1978_v50, %v1977_v48  ;;  %v1985_v48 = vld [vmem:[%s5592_s19 + $0x18] sm:$0xff] }
 0xc7f   :  { %v1969_v17 = vadd.f32 %v1965_v16, %v1961_v5  ;;  %4234 = vmatprep.mubr.msk.f32.mxu0 %vm168_vm0, %v5255_v7 }
 0xc81   :  { %v5260_v18 = vmul.f32 %v1969_v17, %v5064_v63 }
 0xc83   :  { %4235 = vmatmul.mubr.msk.f32.vlgmr.msra.gmra.mrb[16].mxu0 %vm168_vm0, %v5260_v18 }
 0xc84   :  { %4239 = vmatprep.mubr.msk.f32.mxu0 %vm4694_vm1, %v4693_v8 }
 0xd56   :  { %v4236_v23 = vpop.f32.mrb[16].mxu0 }
 0xd57   :  { %v2108_v24 = vpop.f32.mrb[17].mxu0  ;;  %v5273_v26 = vadd.f32 %v4236_v23, %v3835_v20 }
 0xd58   :  { %v5269_v25 = vadd.f32 %v3835_v20, %v2108_v24 }
 0xd5a   :  { %2118 = vrot.lane.b32.xlu1 %v5269_v25, %s4695_s8 }
 0xd5e   :  { %2195 = vrot.lane.b32.xlu1 %v5273_v26, %s4695_s8 }
 0xdcc   :  { %v2119_v27 = vpop.permute.xlu1 %2118 }
 0xdcd   :  { %4238 = vmatpush3.xpose.msk.msra.mxu0 %vm282_vm2, %v2119_v27 }
 0xdce   :  { %4242 = vmatprep.subr.mxu0 %v4693_v8 }
 0xdd0   :  { %4240 = vmatmul.mubr.msk.f32.vlgmr.msra.gmra.mrb[18].mxu0 %vm282_vm2, %v5269_v25  ;;  %v2196_v29 = vpop.permute.xlu1 %2195 }
 0xdd1   :  { %4243 = vmatpush3.xpose.msk.msra.mxu0 %vm282_vm2, %v2196_v29  ;;  %4244 = vmatprep.mubr.msk.f32.mxu0 %vm4694_vm1, %v4693_v8 }
 0xdd2   :  { %4247 = vmatprep.subr.mxu0 %v4693_v8 }
 0xdd4   :  { %4245 = vmatmul.mubr.msk.f32.vlgmr.msra.gmra.mrb[20].mxu0 %vm282_vm2, %v5273_v26 }
 0xdd5   :  { %4249 = vmatprep.mubr.msk.f32.mxu0 %vm4694_vm1, %v4693_v8 }
 0xea3   :  { %v2190_v30 = vpop.f32.mrb[18].mxu0 }
 0xea4   :  { %v2271_v32 = vmul.f32 0.25, %v2190_v30  ;;  %v4241_v33 = vpop.f32.mrb[19].mxu0 }
 0xea6   :  { %v2273_v34 = vadd.f32 %v2271_v32, %v4919_v31 }
 0xea7   :  { %v2267_v35 = vpop.f32.mrb[20].mxu0 }
 0xea8   :  { %v2272_v36 = vmul.f32 0.25, %v2267_v35  ;;  %v4246_v19 = vpop.f32.mrb[21].mxu0  ;;  %v2275_v22 = vsel %vm450_vm3, %v2273_v34, -inf }
 0xea9   :  { %2276 = vmax.xlane.f32.xlu0 %v2275_v22 }
 0xeaa   :  { %v2274_v38 = vadd.f32 %v2272_v36, %v4923_v37 }
 0xeac   :  { %v2278_v39 = vsel %vm450_vm3, %v2274_v38, -inf }
 0xead   :  { %2279 = vmax.xlane.f32.xlu1 %v2278_v39  ;;  %v1979_v39 = vld [vmem:[%s5591_s17 + $0x10] sm:$0xff] }
 0xebe   :  { %2297 = vrot.lane.b32.xlu1 %v5269_v25, %s4697_s28 }
 0xec2   :  { %2540 = vrot.lane.b32.xlu1 %v5269_v25, %s5640_s16 }
 0xec6   :  { %2618 = vrot.lane.b32.xlu1 %v5273_v26, %s5640_s16 }
 0xeca   :  { %2616 = vrot.lane.b32.xlu1 %v5273_v26, %s5641_s1 }
 0xf36   :  { %v2277_v2 = vpop.xlane.xlu0 %2276 }
 0xf37   :  { %v2281_v3 = vsub.f32 %v2273_v34, %v2277_v2  ;;  %v1980_v2 = vld [vmem:[%s5591_s17 + $0x18] sm:$0xff] }
 0xf39   :  { %v2283_v40 = vmul.f32 1.442695, %v2281_v3 }
 0xf3a   :  { %v2280_v41 = vpop.xlane.xlu1 %2279 }
 0xf3b   :  { %4668 = vpow2.f32 %v2283_v40  ;;  %v2282_v42 = vsub.f32 %v2274_v38, %v2280_v41  ;;  %v4515_v40 = vpack.c.bf16 %v1980_v2, %v1979_v39 }
 0xf3d   :  { %v2285_v43 = vmul.f32 1.442695, %v2282_v42 }
 0xf3e   :  { %v2298_v44 = vpop.permute.xlu1 %2297 }
 0xf3f   :  { %4670 = vpow2.f32 %v2285_v43  ;;  %4248 = vmatpush3.msra.mxu0 %v2298_v44 }
 0xf40   :  { %4512 = vmatprep.subr.bf16.mxu0 %v4511_v51 }
 0xf42   :  { %v2541_v59 = vpop.permute.xlu1 %2540 }
 0xf45   :  { %v4669_v13 = vpop.eup %4668 }
 0xf46   :  { %v2287_v45 = vsel %vm450_vm3, %v4669_v13, 0.0  ;;  %v2619_v1 = vpop.permute.xlu1 %2618 }
 0xf47   :  { %2288 = vadd.xlane.f32.xlu0 %v2287_v45  ;;  %v1983_v45 = vld [vmem:[%s5592_s19 + $0x8] sm:$0xff] }
 0xf49   :  { %v4671_v46 = vpop.eup %4670 }
 0xf4a   :  { %v2290_v47 = vsel %vm450_vm3, %v4671_v46, 0.0  ;;  %v2617_v9 = vpop.permute.xlu1 %2616 }
 0xf4b   :  { %2291 = vadd.xlane.f32.xlu0 %v2290_v47 }
 0xf61   :  { %2373 = vrot.lane.b32.xlu0 %v5273_v26, %s4697_s28  ;;  %s5642_s28 = smov 48  }
 0xf65   :  { %2538 = vrot.lane.b32.xlu0 %v5269_v25, %s5641_s1 }
 0xfd4   :  { %v2289_v52 = vpop.xlane.xlu0 %2288 }
 0xfd5   :  { %4672 = vrcp.f32 %v2289_v52 }
 0xfd8   :  { %v2292_v53 = vpop.xlane.xlu0 %2291 }
 0xfd9   :  { %4674 = vrcp.f32 %v2292_v53  ;;  %v3846_v53 = vld [vmem:[%s5593_s18] ss:$0 sm:$0xff] }
 0xfdc   :  { %v2374_v54 = vpop.permute.xlu0 %2373 }
 0xfdd   :  { %4253 = vmatpush3.msra.mxu1 %v2374_v54 }
 0xfde   :  { %4264 = vmatprep.subr.mxu1 %v4693_v8 }
 0xfdf   :  { %v4673_v55 = vpop.eup %4672 }
 0xfe0   :  { %v2294_v56 = vmul.f32 %v4673_v55, %v4669_v13  ;;  %v2539_v61 = vpop.permute.xlu0 %2538  ;;  %v1982_v13 = vld [vmem:[%s5592_s19] sm:$0xff] }
 0xfe1   :  { %v4520_v47 = vpack.c.bf16 %v1983_v45, %v1982_v13 }
 0xfe2   :  { %4250 = vmatmul.mubr.msk.f32.vlgmr.msra.gmra.mrb[22].mxu0 %vm450_vm3, %v2294_v56 }
 0xfe3   :  { %v4675_v57 = vpop.eup %4674  ;;  %4514 = vmatpush3.bf16.msra.mxu0 %v4511_v51 }
 0xfe4   :  { %v2296_v58 = vmul.f32 %v4675_v57, %v4671_v46  ;;  %4269 = vmatprep.subr.mxu0 %v4693_v8  ;;  %v1984_v46 = vld [vmem:[%s5592_s19 + $0x10] sm:$0xff] }
 0xfe5   :  { %v4523_v50 = vpack.c.bf16 %v1985_v48, %v1984_v46 }
 0xfe6   :  { %4255 = vmatmul.mubr.msk.f32.vlgmr.msra.gmra.mrb[12].mxu1 %vm450_vm3, %v2296_v58 }
 0xfe7   :  { %4265 = vmatpush3.xpose.msk.msra.mxu1 %vm282_vm2, %v2541_v59  ;;  %4266 = vmatprep.mubr.msk.f32.mxu1 %vm4694_vm1, %v4693_v8 }
 0xfe8   :  { %4274 = vmatprep.subr.mxu1 %v4693_v8 }
 0xfea   :  { %4267 = vmatmul.mubr.msk.f32.vlgmr.msra.gmra.mrb[14].mxu1 %vm282_vm2, %v2539_v61 }
 0xfeb   :  { %4276 = vmatprep.mubr.msk.f32.mxu1 %vm4694_vm1, %v4693_v8 }
0x10b5   :  { %v2369_v62 = vpop.f32.mrb[22].mxu0 }
0x10b6   :  { %v4251_v0 = vpop.f32.mrb[23].mxu0  ;;  %4261 = vmatprep.mubr.msk.f32.mxu0 %vm282_vm2, %v2369_v62 }
0x10b9   :  { %v2445_v4 = vpop.f32.mrb[12].mxu1 }
0x10ba   :  { %v4256_v6 = vpop.f32.mrb[13].mxu1  ;;  %4262 = vmatmul.mubr.msk.f32.vlgmr.msra.gmra.mrb[24].mxu0 %vm282_vm2, %v2445_v4 }
0x10bb   :  { %4270 = vmatpush3.xpose.msk.msra.mxu0 %vm282_vm2, %v2619_v1  ;;  %4271 = vmatprep.mubr.msk.f32.mxu0 %vm4694_vm1, %v4693_v8 }
0x10bc   :  { %4279 = vmatprep.subr.mxu0 %v4693_v8 }
0x10bd   :  { %v2612_v10 = vpop.f32.mrb[14].mxu1 }
0x10be   :  { %v2694_v11 = vmul.f32 0.25, %v2612_v10  ;;  %v4268_v14 = vpop.f32.mrb[15].mxu1  ;;  %4272 = vmatmul.mubr.msk.f32.vlgmr.msra.gmra.mrb[26].mxu0 %vm282_vm2, %v2617_v9 }
0x10bf   :  { %4281 = vmatprep.mubr.msk.f32.mxu0 %vm4694_vm1, %v4693_v8 }
0x10c0   :  { %v2696_v15 = vadd.f32 %v2694_v11, %v4919_v31 }
0x10c2   :  { %v2698_v16 = vsel %vm450_vm3, %v2696_v15, -inf }
0x10c3   :  { %2699 = vmax.xlane.f32.xlu0 %v2698_v16 }
0x1150   :  { %v2700_v5 = vpop.xlane.xlu0 %2699 }
0x1151   :  { %v2704_v17 = vsub.f32 %v2696_v15, %v2700_v5 }
0x1153   :  { %v2706_v20 = vmul.f32 1.442695, %v2704_v17 }
0x1155   :  { %4676 = vpow2.f32 %v2706_v20 }
0x115f   :  { %v4677_v23 = vpop.eup %4676 }
0x1160   :  { %v2710_v24 = vsel %vm450_vm3, %v4677_v23, 0.0 }
0x1161   :  { %2711 = vadd.xlane.f32.xlu0 %v2710_v24 }
0x1191   :  { %v2690_v27 = vpop.f32.mrb[26].mxu0 }
0x1192   :  { %v2695_v29 = vmul.f32 0.25, %v2690_v27  ;;  %v4273_v30 = vpop.f32.mrb[27].mxu0 }
0x1193   :  { %v1987_v30 = vld [vmem:[%s5595_s21] sm:$0xff] }
0x1194   :  { %v2697_v32 = vadd.f32 %v2695_v29, %v4923_v37 }
0x1196   :  { %v2701_v33 = vsel %vm450_vm3, %v2697_v32, -inf }
0x1197   :  { %2702 = vmax.xlane.f32.xlu1 %v2701_v33 }
0x11a8   :  { %2720 = vrot.lane.b32.xlu1 %v5269_v25, %s5642_s28 }
0x11ee   :  { %v2712_v31 = vpop.xlane.xlu0 %2711 }
0x11ef   :  { %4678 = vrcp.f32 %v2712_v31  ;;  %v1989_v31 = vld [vmem:[%s5595_s21 + $0x10] sm:$0xff] }
0x11f9   :  { %v4679_v35 = vpop.eup %4678 }
0x11fa   :  { %v2717_v22 = vmul.f32 %v4679_v35, %v4677_v23 }
0x1224   :  { %v2703_v34 = vpop.xlane.xlu1 %2702 }
0x1225   :  { %v2705_v36 = vsub.f32 %v2697_v32, %v2703_v34  ;;  %v1988_v32 = vld [vmem:[%s5595_s21 + $0x8] sm:$0xff]  ;;  %v1990_v34 = vld [vmem:[%s5595_s21 + $0x18] sm:$0xff] }
0x1226   :  { %v4525_v33 = vpack.c.bf16 %v1988_v32, %v1987_v30  ;;  %v4529_v35 = vpack.c.bf16 %v1990_v34, %v1989_v31  ;;  %v2027_v30 = vld [vmem:[%s5597_s25 + $0x10] sm:$0xff]  ;;  %v4692_v34 = vld [vmem:[%s5634_s29] sm:$0x3] }
0x1227   :  { %v2708_v19 = vmul.f32 1.442695, %v2705_v36  ;;  %v1991_v36 = vld [vmem:[%s5595_s21 + $0x20] sm:$0xff] }
0x1228   :  { %v2721_v38 = vpop.permute.xlu1 %2720 }
0x1229   :  { %4680 = vpow2.f32 %v2708_v19  ;;  %4275 = vmatpush3.msra.mxu1 %v2721_v38  ;;  %v1992_v19 = vld [vmem:[%s5595_s21 + $0x28] sm:$0xff]  ;;  %v2000_v38 = vld [vmem:[%s5596_s23] sm:$0xff] }
0x122a   :  { %4277 = vmatmul.mubr.msk.f32.vlgmr.msra.gmra.mrb[16].mxu1 %vm450_vm3, %v2717_v22  ;;  %4519 = vmatprep.subr.bf16.mxu1 %v4701_v49  ;;  %v4533_v22 = vpack.c.bf16 %v1992_v19, %v1991_v36 }
0x122b   :  { %4299 = vmatprep.mubr.msk.f32.mxu1 %vm4694_vm1, %v4693_v8  ;;  %4521 = vmatpush3.bf16.msra.mxu1 %v4520_v47 }
0x122c   :  { %4522 = vmatprep.subr.bf16.mxu1 %v4701_v49 }
0x122f   :  { %4524 = vmatpush3.bf16.msra.mxu1 %v4523_v50 }
0x1232   :  { %4300 = vmatmul.mubr.msk.f32.vlgmr.msra.gmra.mrb[18].mxu1 %vm168_vm0, %v5007_v60 }
0x1233   :  { %v4681_v37 = vpop.eup %4680 }
0x1234   :  { %v2713_v25 = vsel %vm450_vm3, %v4681_v37, 0.0 }
0x1235   :  { %2714 = vadd.xlane.f32.xlu0 %v2713_v25 }
0x124b   :  { %2796 = vrot.lane.b32.xlu0 %v5273_v26, %s5642_s28 }
0x12c2   :  { %v2715_v3 = vpop.xlane.xlu0 %2714 }
0x12c3   :  { %4682 = vrcp.f32 %v2715_v3 }
0x12c6   :  { %v2797_v41 = vpop.permute.xlu0 %2796 }
0x12c7   :  { %4280 = vmatpush3.msra.mxu0 %v2797_v41 }
0x12c8   :  { %4516 = vmatprep.subr.bf16.mxu0 %v4515_v40 }
0x12cd   :  { %v4683_v42 = vpop.eup %4682 }
0x12ce   :  { %v2719_v43 = vmul.f32 %v4683_v42, %v4681_v37  ;;  %v2001_v37 = vld [vmem:[%s5596_s23 + $0x8] sm:$0xff] }
0x12cf   :  { %v4549_v25 = vpack.c.bf16 %v2001_v37, %v2000_v38 }
0x12d0   :  { %4282 = vmatmul.mubr.msk.f32.vlgmr.msra.gmra.mrb[28].mxu0 %vm450_vm3, %v2719_v43 }
0x12d1   :  { %4518 = vmatpush3.bf16.msra.mxu0 %v4515_v40  ;;  %4550 = vmatprep.subr.bf16.mxu1 %v4549_v25 }
0x12d2   :  { %4526 = vmatprep.subr.bf16.mxu0 %v4525_v33  ;;  %4552 = vmatpush3.bf16.msra.mxu1 %v4549_v25 }
0x12fd   :  { %v2792_v26 = vpop.f32.mrb[16].mxu1 }
0x12fe   :  { %v4278_v44 = vpop.f32.mrb[17].mxu1  ;;  %4288 = vmatprep.mubr.msk.f32.mxu0 %vm282_vm2, %v2792_v26 }
0x1305   :  { %v3029_v62 = vpop.f32.mrb[18].mxu1 }
0x1306   :  { %v4301_v0 = vpop.f32.mrb[19].mxu1 }
0x1307   :  { %v1997_v0 = vld [vmem:[%s5595_s21 + $0x50] sm:$0xff] }
0x13a3   :  { %v2868_v51 = vpop.f32.mrb[28].mxu0 }
0x13a4   :  { %v4283_v52 = vpop.f32.mrb[29].mxu0  ;;  %4289 = vmatmul.mubr.msk.f32.vlgmr.msra.gmra.mrb[24].mxu0 %vm282_vm2, %v2868_v51 }
0x13a5   :  { %4528 = vmatpush3.bf16.msra.mxu0 %v4525_v33  ;;  %v2028_v33 = vld [vmem:[%s5597_s25 + $0x18] sm:$0xff] }
0x13a6   :  { %4530 = vmatprep.subr.bf16.mxu0 %v4529_v35  ;;  %v4601_v31 = vpack.c.bf16 %v2028_v33, %v2027_v30 }
0x13a9   :  { %4532 = vmatpush3.bf16.msra.mxu0 %v4529_v35  ;;  %v3859_v35 = vld [vmem:[%s5598_s22] ss:$0 sm:$0xff] }
0x13aa   :  { %4534 = vmatprep.subr.bf16.mxu0 %v4533_v22 }
0x1477   :  { %v4290_v54 = vpop.f32.mrb[24].mxu0 }
0x1478   :  { %v4609_v55 = vadd.f32 %v4290_v54, %v3846_v53  ;;  %v2944_v56 = vpop.f32.mrb[25].mxu0  ;;  %v1993_v54 = vld [vmem:[%s5595_s21 + $0x30] sm:$0xff] }
0x1479   :  { %v4610_v57 = vadd.f32 %v3846_v53, %v2944_v56 }
0x147a   :  { %v2956_v58 = vadd.f32 %v4609_v55, %v5260_v18  ;;  %v1994_v55 = vld [vmem:[%s5595_s21 + $0x38] sm:$0xff] }
0x147b   :  { %v2955_v59 = vadd.f32 %v4610_v57, %v5255_v7  ;;  %v3855_v7 = vld [vmem:[%s5594_s20] ss:$0 sm:$0xff]  ;;  %v4537_v57 = vpack.c.bf16 %v1994_v55, %v1993_v54 }
0x147c   :  { %v3059_v61 = vsel %vm168_vm0, %v2956_v58, 0.0  ;;  %v3030_v5 = vadd.f32 %v3855_v7, %v3029_v62  ;;  %v2005_v7 = vld [vmem:[%s5596_s23 + $0x28] sm:$0xff] }
0x147d   :  { %3060 = vadd.xlane.f32.xlu0 %v3059_v61  ;;  %v3056_v60 = vsel %vm168_vm0, %v2955_v59, 0.0  ;;  %v1996_v61 = vld [vmem:[%s5595_s21 + $0x48] sm:$0xff] }
0x147e   :  { %3057 = vadd.xlane.f32.xlu1 %v3056_v60  ;;  %v3040_v17 = vrot.slane %v3030_v5, %v4904_v21  ;;  %v2007_v5 = vld [vmem:[%s5596_s23 + $0x38] sm:$0xff] }
0x1480   :  { %v3041_v20 = vcombine.high %v3040_v17, %v3040_v17  ;;  %v3048_v23 = vrot.slane %v3040_v17, %v4904_v21 }
0x1482   :  { %v3055_v24 = vrot.slane %v3041_v20, %v4904_v21  ;;  %v3085_v27 = vrot.slane %v3048_v23, %v4916_v28  ;;  %v2008_v20 = vld [vmem:[%s5596_s23 + $0x40] sm:$0xff]  ;;  %v2009_v23 = vld [vmem:[%s5596_s23 + $0x48] sm:$0xff] }
0x1484   :  { %v3089_v29 = vrot.slane %v3055_v24, %v4916_v28  ;;  %v4565_v24 = vpack.c.bf16 %v2009_v23, %v2008_v20 }
0x150a   :  { %v3061_v1 = vpop.xlane.xlu0 %3060 }
0x150b   :  { %v3063_v4 = vmul.f32 0.03125, %v3061_v1  ;;  %v3058_v6 = vpop.xlane.xlu1 %3057  ;;  %v1998_v1 = vld [vmem:[%s5595_s21 + $0x58] sm:$0xff] }
0x150c   :  { %v3062_v9 = vmul.f32 0.03125, %v3058_v6 }
0x150d   :  { %v3065_v10 = vsub.f32 %v2956_v58, %v3063_v4  ;;  %v4545_v4 = vpack.c.bf16 %v1998_v1, %v1997_v0  ;;  %v3866_v1 = vld [vmem:[%s5599_s24] ss:$0 sm:$0xff] }
0x150e   :  { %v3064_v11 = vsub.f32 %v2955_v59, %v3062_v9  ;;  %v1995_v59 = vld [vmem:[%s5595_s21 + $0x40] sm:$0xff] }
0x150f   :  { %v3067_v14 = vmul.f32 %v3065_v10, %v3065_v10  ;;  %v4541_v62 = vpack.c.bf16 %v1996_v61, %v1995_v59  ;;  %v2022_v61 = vld [vmem:[%s5596_s23 + $0xb0] sm:$0xff] }
0x1510   :  { %v3066_v15 = vmul.f32 %v3064_v11, %v3064_v11 }
0x1511   :  { %v3071_v18 = vsel %vm168_vm0, %v3067_v14, 0.0  ;;  %v2003_v14 = vld [vmem:[%s5596_s23 + $0x18] sm:$0xff] }
0x1512   :  { %3072 = vadd.xlane.f32.xlu0 %v3071_v18  ;;  %v3068_v16 = vsel %vm168_vm0, %v3066_v15, 0.0  ;;  %v2004_v18 = vld [vmem:[%s5596_s23 + $0x20] sm:$0xff] }
0x1513   :  { %3069 = vadd.xlane.f32.xlu1 %v3068_v16  ;;  %v2006_v16 = vld [vmem:[%s5596_s23 + $0x30] sm:$0xff] }
0x1514   :  { %v4561_v17 = vpack.c.bf16 %v2007_v5, %v2006_v16 }
0x1524   :  { %3094 = vrot.lane.b32.xlu1 %v3085_v27, %s4695_s8 }
0x1528   :  { %3096 = vrot.lane.b32.xlu0 %v3089_v29, %s4695_s8 }
0x159f   :  { %v3073_v39 = vpop.xlane.xlu0 %3072 }
0x15a0   :  { %v3075_v2 = vmul.f32 0.03125, %v3073_v39  ;;  %v3070_v3 = vpop.xlane.xlu1 %3069  ;;  %v2011_v39 = vld [vmem:[%s5596_s23 + $0x58] sm:$0xff] }
0x15a1   :  { %v3074_v40 = vmul.f32 0.03125, %v3070_v3 }
0x15a2   :  { %v3077_v41 = vadd.f32 1e-05, %v3075_v2 }
0x15a3   :  { %v3076_v42 = vadd.f32 1e-05, %v3074_v40  ;;  %v3097_v13 = vpop.permute.xlu0 %3096 }
0x15a4   :  { %4684 = vrsqrt.f32 %v3077_v41  ;;  %v3095_v47 = vpop.permute.xlu1 %3094  ;;  %v2012_v41 = vld [vmem:[%s5596_s23 + $0x60] sm:$0xff] }
0x15a5   :  { %4686 = vrsqrt.f32 %v3076_v42  ;;  %v2013_v42 = vld [vmem:[%s5596_s23 + $0x68] sm:$0xff] }
0x15ae   :  { %v4685_v43 = vpop.eup %4684 }
0x15af   :  { %v4687_v26 = vpop.eup %4686  ;;  %v3081_v44 = vmul.f32 %v4685_v43, %v3065_v10 }
0x15b0   :  { %v3080_v45 = vmul.f32 %v4687_v26, %v3064_v11  ;;  %v2002_v11 = vld [vmem:[%s5596_s23 + $0x10] sm:$0xff]  ;;  %v4573_v26 = vpack.c.bf16 %v2013_v42, %v2012_v41 }
0x15b1   :  { %v3093_v46 = vmul.f32 %v3089_v29, %v3081_v44  ;;  %v4553_v15 = vpack.c.bf16 %v2003_v14, %v2002_v11  ;;  %v2026_v29 = vld [vmem:[%s5597_s25 + $0x8] sm:$0xff]  ;;  %v2014_v44 = vld [vmem:[%s5596_s23 + $0x70] sm:$0xff] }
0x15b2   :  { %v3092_v48 = vmul.f32 %v3085_v27, %v3080_v45  ;;  %v2025_v27 = vld [vmem:[%s5597_s25] sm:$0xff] }
0x15b3   :  { %v3101_v50 = vadd.f32 %v3097_v13, %v3093_v46  ;;  %4554 = vmatprep.subr.bf16.mxu1 %v4553_v15  ;;  %v4598_v32 = vpack.c.bf16 %v2026_v29, %v2025_v27  ;;  %v2015_v13 = vld [vmem:[%s5596_s23 + $0x78] sm:$0xff]  ;;  %v2016_v46 = vld [vmem:[%s5596_s23 + $0x80] sm:$0xff] }
0x15b4   :  { %v3100_v51 = vadd.f32 %v3095_v47, %v3092_v48  ;;  %4556 = vmatpush3.bf16.msra.mxu1 %v4553_v15  ;;  %v4577_v45 = vpack.c.bf16 %v2015_v13, %v2014_v44  ;;  %v2017_v47 = vld [vmem:[%s5596_s23 + $0x88] sm:$0xff] }
0x15b5   :  { %v5415_v52 = vmul.f32 %v3101_v50, %v5064_v63  ;;  %v4581_v48 = vpack.c.bf16 %v2017_v47, %v2016_v46  ;;  %v2018_v50 = vld [vmem:[%s5596_s23 + $0x90] sm:$0xff] }
0x15b6   :  { %v5418_v53 = vmul.f32 %v3100_v51, %v5062_v12  ;;  %v2019_v51 = vld [vmem:[%s5596_s23 + $0x98] sm:$0xff] }
0x15b7   :  { %3109 = vst.msk [vmem:[#allocation2 + $0x11] sm:$0xff] %vm168_vm0, %v5415_v52  ;;  %v4585_v54 = vpack.c.bf16 %v2019_v51, %v2018_v50 }
0x15b8   :  { %3108 = vst.msk [vmem:[#allocation2 + $0x1] sm:$0xff] %vm168_vm0, %v5418_v53 }
0x15be   :  { %v3111_v58 = vld [vmem:[#allocation2 + $0x10] sm:$0xff] }
0x15bf   :  { %v3110_v56 = vld [vmem:[#allocation2] sm:$0xff]  ;;  %v3202_v6 = vld [vmem:[#allocation2 + $0x11] sm:$0xff] }
0x15c0   :  { %4310 = vmatprep.mubr.msk.f32.mxu0 %vm168_vm0, %v3110_v56  ;;  %v3201_v60 = vld [vmem:[#allocation2 + $0x1] sm:$0xff]  ;;  %v3287_v10 = vld [vmem:[#allocation2 + $0x12] sm:$0xff] }
0x15c1   :  { %4311 = vmatmul.mubr.msk.f32.vlgmr.msra.gmra.mrb[30].mxu0 %vm168_vm0, %v3111_v58  ;;  %v3286_v9 = vld [vmem:[#allocation2 + $0x2] sm:$0xff] }
0x15c2   :  { %4536 = vmatpush3.bf16.msra.mxu0 %v4533_v22  ;;  %4321 = vmatprep.mubr.msk.f32.mxu0 %vm168_vm0, %v3201_v60  ;;  %v2020_v56 = vld [vmem:[%s5596_s23 + $0xa0] sm:$0xff]  ;;  %v2023_v60 = vld [vmem:[%s5596_s23 + $0xb8] sm:$0xff] }
0x15c3   :  { %4538 = vmatprep.subr.bf16.mxu0 %v4537_v57 }
0x15c6   :  { %4540 = vmatpush3.bf16.msra.mxu0 %v4537_v57  ;;  %v2021_v57 = vld [vmem:[%s5596_s23 + $0xa8] sm:$0xff] }
0x15c7   :  { %4542 = vmatprep.subr.bf16.mxu0 %v4541_v62  ;;  %v4589_v59 = vpack.c.bf16 %v2021_v57, %v2020_v56 }
0x15c9   :  { %4322 = vmatmul.mubr.msk.f32.vlgmr.msra.gmra.mrb[30].mxu0 %vm168_vm0, %v3202_v6 }
0x15ca   :  { %4544 = vmatpush3.bf16.msra.mxu0 %v4541_v62  ;;  %4332 = vmatprep.mubr.msk.f32.mxu0 %vm168_vm0, %v3286_v9  ;;  %v4593_v62 = vpack.c.bf16 %v2023_v60, %v2022_v61 }
0x15cb   :  { %4546 = vmatprep.subr.bf16.mxu0 %v4545_v4 }
0x15ce   :  { %4548 = vmatpush3.bf16.msra.mxu0 %v4545_v4 }
0x15cf   :  { %4597 = vmatprep.subr.bf16.mxu0 %v4701_v49 }
0x15d1   :  { %4333 = vmatmul.mubr.msk.f32.vlgmr.msra.gmra.mrb[30].mxu0 %vm168_vm0, %v3287_v10 }
0x15d2   :  { %4400 = vmatprep.mubr.msk.f32.mxu0 %vm4694_vm1, %v4693_v8  ;;  %v4557_v8 = vpack.c.bf16 %v2005_v7, %v2004_v18  ;;  %4599 = vmatpush3.bf16.msra.mxu0 %v4598_v32 }
0x15d3   :  { %4600 = vmatprep.subr.bf16.mxu0 %v4701_v49  ;;  %v2010_v49 = vld [vmem:[%s5596_s23 + $0x50] sm:$0xff] }
0x15d4   :  { %4558 = vmatprep.subr.bf16.mxu1 %v4557_v8  ;;  %v4569_v3 = vpack.c.bf16 %v2011_v39, %v2010_v49 }
0x15d5   :  { %4560 = vmatpush3.bf16.msra.mxu1 %v4557_v8 }
0x15d6   :  { %4562 = vmatprep.subr.bf16.mxu1 %v4561_v17  ;;  %4602 = vmatpush3.bf16.msra.mxu0 %v4601_v31 }
0x15d9   :  { %4564 = vmatpush3.bf16.msra.mxu1 %v4561_v17  ;;  %4401 = vmatmul.mubr.msk.f32.vlgmr.msra.gmra.mrb[32].mxu0 %vm168_vm0, %v4692_v34 }
0x15da   :  { %4566 = vmatprep.subr.bf16.mxu1 %v4565_v24 }
0x16a4   :  { %v4334_v36 = vpop.f32.mrb[30].mxu0 }
0x16a5   :  { %v4611_v19 = vadd.f32 %v4334_v36, %v3859_v35  ;;  %v3360_v22 = vpop.f32.mrb[31].mxu0 }
0x16a6   :  { %v4612_v38 = vadd.f32 %v3859_v35, %v3360_v22 }
0x16a7   :  { %v3372_v37 = vmax.f32 %v4611_v19, 0.0 }
0x16a8   :  { %v3371_v25 = vmax.f32 %v4612_v38, 0.0 }
0x16a9   :  { %3378 = vst.msk [vmem:[#allocation3 + $0x11] sm:$0xff] %vm1554_vm5, %v3372_v37 }
0x16aa   :  { %3377 = vst.msk [vmem:[#allocation3 + $0x1] sm:$0xff] %vm1554_vm5, %v3371_v25 }
0x16ac   :  { %v3714_v7 = vpop.f32.mrb[32].mxu0 }
0x16ad   :  { %v4402_v8 = vpop.f32.mrb[33].mxu0 }
0x16b0   :  { %v3380_v40 = vld [vmem:[#allocation3 + $0x10] sm:$0xff] }
0x16b1   :  { %v3379_v2 = vld [vmem:[#allocation3] sm:$0xff]  ;;  %v3471_v55 = vld [vmem:[#allocation3 + $0x11] sm:$0xff] }
0x16b2   :  { %4351 = vmatprep.mubr.msk.f32.mxu1 %vm1554_vm5, %v3379_v2  ;;  %v3470_v43 = vld [vmem:[#allocation3 + $0x1] sm:$0xff]  ;;  %v3556_v0 = vld [vmem:[#allocation3 + $0x12] sm:$0xff] }
0x16b3   :  { %4352 = vmatmul.mubr.msk.f32.vlgmr.msra.gmra.mrb[20].mxu1 %vm1554_vm5, %v3380_v40  ;;  %v3555_v58 = vld [vmem:[#allocation3 + $0x2] sm:$0xff] }
0x16b4   :  { %4568 = vmatpush3.bf16.msra.mxu1 %v4565_v24  ;;  %4370 = vmatprep.mubr.msk.f32.mxu1 %vm1554_vm5, %v3470_v43 }
0x16b5   :  { %4570 = vmatprep.subr.bf16.mxu1 %v4569_v3 }
0x16b8   :  { %4572 = vmatpush3.bf16.msra.mxu1 %v4569_v3 }
0x16b9   :  { %4574 = vmatprep.subr.bf16.mxu1 %v4573_v26 }
0x16bc   :  { %4576 = vmatpush3.bf16.msra.mxu1 %v4573_v26 }
0x16bd   :  { %4578 = vmatprep.subr.bf16.mxu1 %v4577_v45 }
0x16c0   :  { %4580 = vmatpush3.bf16.msra.mxu1 %v4577_v45 }
0x16c1   :  { %4582 = vmatprep.subr.bf16.mxu1 %v4581_v48 }
0x16c3   :  { %4371 = vmatmul.mubr.msk.f32.vlgmr.msra.gmra.mrb[20].mxu1 %vm1554_vm5, %v3471_v55 }
0x16c4   :  { %4584 = vmatpush3.bf16.msra.mxu1 %v4581_v48  ;;  %4389 = vmatprep.mubr.msk.f32.mxu1 %vm1554_vm5, %v3555_v58 }
0x16c5   :  { %4586 = vmatprep.subr.bf16.mxu1 %v4585_v54 }
0x16c8   :  { %4588 = vmatpush3.bf16.msra.mxu1 %v4585_v54 }
0x16c9   :  { %4590 = vmatprep.subr.bf16.mxu1 %v4589_v59 }
0x16cc   :  { %4592 = vmatpush3.bf16.msra.mxu1 %v4589_v59 }
0x16cd   :  { %4594 = vmatprep.subr.bf16.mxu1 %v4593_v62 }
0x16d0   :  { %4596 = vmatpush3.bf16.msra.mxu1 %v4593_v62 }
0x16d3   :  { %4390 = vmatmul.mubr.msk.f32.vlgmr.msra.gmra.mrb[20].mxu1 %vm1554_vm5, %v3556_v0 }
0x17a6   :  { %v4391_v4 = vpop.f32.mrb[20].mxu1 }
0x17a7   :  { %v4613_v6 = vadd.f32 %v4391_v4, %v3866_v1  ;;  %v3629_v9 = vpop.f32.mrb[21].mxu1 }
0x17a8   :  { %v4614_v10 = vadd.f32 %v3866_v1, %v3629_v9 }
0x17a9   :  { %v3641_v11 = vadd.f32 %v4613_v6, %v5415_v52 }
0x17aa   :  { %v3640_v14 = vadd.f32 %v4614_v10, %v5418_v53  ;;  %v3871_v53 = vld [vmem:[%s5600_s26] ss:$0 sm:$0xff] }
0x17ab   :  { %v3744_v15 = vsel %vm168_vm0, %v3641_v11, 0.0  ;;  %v3715_v32 = vadd.f32 %v3871_v53, %v3714_v7 }
0x17ac   :  { %3745 = vadd.xlane.f32.xlu0 %v3744_v15  ;;  %v3741_v18 = vsel %vm168_vm0, %v3640_v14, 0.0 }
0x17ad   :  { %3742 = vadd.xlane.f32.xlu1 %v3741_v18  ;;  %v3725_v33 = vrot.slane %v3715_v32, %v4904_v21 }
0x17af   :  { %v3726_v31 = vcombine.high %v3725_v33, %v3725_v33  ;;  %v3733_v34 = vrot.slane %v3725_v33, %v4904_v21 }
0x17b1   :  { %v3740_v35 = vrot.slane %v3726_v31, %v4904_v21  ;;  %v3770_v36 = vrot.slane %v3733_v34, %v4916_v28 }
0x17b3   :  { %v3774_v19 = vrot.slane %v3740_v35, %v4916_v28 }
0x1839   :  { %v3746_v16 = vpop.xlane.xlu0 %3745 }
0x183a   :  { %v3748_v5 = vmul.f32 0.03125, %v3746_v16  ;;  %v3743_v17 = vpop.xlane.xlu1 %3742 }
0x183b   :  { %v3747_v20 = vmul.f32 0.03125, %v3743_v17 }
0x183c   :  { %v3750_v23 = vsub.f32 %v3641_v11, %v3748_v5 }
0x183d   :  { %v3749_v24 = vsub.f32 %v3640_v14, %v3747_v20 }
0x183e   :  { %v3752_v27 = vmul.f32 %v3750_v23, %v3750_v23 }
0x183f   :  { %v3751_v29 = vmul.f32 %v3749_v24, %v3749_v24 }
0x1840   :  { %v3756_v52 = vsel %vm168_vm0, %v3752_v27, 0.0 }
0x1841   :  { %3757 = vadd.xlane.f32.xlu0 %v3756_v52  ;;  %v3753_v30 = vsel %vm168_vm0, %v3751_v29, 0.0 }
0x1842   :  { %3754 = vadd.xlane.f32.xlu1 %v3753_v30 }
0x1853   :  { %3779 = vrot.lane.b32.xlu1 %v3770_v36, %s4695_s8 }
0x1857   :  { %3781 = vrot.lane.b32.xlu0 %v3774_v19, %s4695_s8 }
0x18ce   :  { %v3758_v22 = vpop.xlane.xlu0 %3757 }
0x18cf   :  { %v3760_v38 = vmul.f32 0.03125, %v3758_v22  ;;  %v3755_v37 = vpop.xlane.xlu1 %3754 }
0x18d0   :  { %v3759_v25 = vmul.f32 0.03125, %v3755_v37 }
0x18d1   :  { %v3762_v49 = vadd.f32 1e-05, %v3760_v38 }
0x18d2   :  { %v3761_v39 = vadd.f32 1e-05, %v3759_v25  ;;  %v3782_v21 = vpop.permute.xlu0 %3781 }
0x18d3   :  { %4688 = vrsqrt.f32 %v3762_v49  ;;  %v3780_v26 = vpop.permute.xlu1 %3779 }
0x18d4   :  { %4690 = vrsqrt.f32 %v3761_v39 }
0x18dd   :  { %v4689_v2 = vpop.eup %4688 }
0x18de   :  { %v4691_v3 = vpop.eup %4690  ;;  %v3766_v40 = vmul.f32 %v4689_v2, %v3750_v23 }
0x18df   :  { %v3765_v41 = vmul.f32 %v4691_v3, %v3749_v24 }
0x18e0   :  { %v3778_v42 = vmul.f32 %v3774_v19, %v3766_v40 }
0x18e1   :  { %v3777_v43 = vmul.f32 %v3770_v36, %v3765_v41 }
0x18e2   :  { %v3786_v28 = vadd.f32 %v3782_v21, %v3778_v42 }
0x18e3   :  { %v3785_v44 = vadd.f32 %v3780_v26, %v3777_v43 }
0x18e4   :  { %v3788_v13 = vmul.f32 %v3786_v28, %v5064_v63 }
0x18e5   :  { %v3787_v45 = vmul.f32 %v3785_v44, %v5062_v12 }
0x18e6   :  { %3790 = vst.msk [vmem:[%s5601_s27 + $0x8] sm:$0xff] %vm168_vm0, %v3788_v13 }
0x18e7   :  { %3789 = vst.msk [vmem:[%s5601_s27] sm:$0xff] %vm168_vm0, %v3787_v45 }

// kernel: fastspeech2_forward.6
= control target key start
LH: loop header
LB: loop body
LE: loop exit
PB: predicated region body
PF: predicated region fallthrough
CT: control target
= control target key end

     0   :  { %vm194_vm0 = vcmask 261120   ;;  %vm196_vm1 = vcmask 254976   ;;  %s3156_s3 = smov 4   ;;  %v3157_v0 = vmov 0.0   ;;  %s3158_s10 = smov 2   ;;  %vm908_vm2 = vcmask 7168   ;;  %s3587_s0 = inlined_call_operand.smem [shape: u32[38], index: -1, kind: input, shape index: {}] }
   0x1   :  { %s3202_s6 = sld [smem:[%s3587_s0 + %s3156_s3]]   ;;  %195 = vst.msk [vmem:[#allocation2] sm:$0xff] %vm194_vm0, %v3157_v0  ;;  %198 = vst.msk [vmem:[#allocation2 + $0x10] sm:$0xff] %vm194_vm0, %v3157_v0  ;;  %s3159_s14 = smov 3  }
   0x2   :  { %s1_s9 = sld [smem:[%s3587_s0]]   ;;  %197 = vst.msk [vmem:[#allocation2 + $0x8] sm:$0x3] %vm196_vm1, %v3157_v0  ;;  %199 = vst.msk [vmem:[#allocation2 + $0x18] sm:$0x3] %vm196_vm1, %v3157_v0  ;;  %s3160_s18 = smov 34  }
   0x3   :  { %508 = vst.msk [vmem:[#allocation3] sm:$0xff] %vm194_vm0, %v3157_v0  ;;  %510 = vst.msk [vmem:[#allocation3 + $0x10] sm:$0xff] %vm194_vm0, %v3157_v0  ;;  %s2434_s13 = sld [smem:[%s3587_s0 + %s3158_s10]]   ;;  %s3161_s22 = smov 5  }
   0x4   :  { %509 = vst.msk [vmem:[#allocation3 + $0x8] sm:$0x3] %vm196_vm1, %v3157_v0  ;;  %511 = vst.msk [vmem:[#allocation3 + $0x18] sm:$0x3] %vm196_vm1, %v3157_v0  ;;  %s2435_s17 = sld [smem:[%s3587_s0 + %s3159_s14]]   ;;  %s3162_s26 = smov 8  }
   0x5   :  { %s2466_s21 = sld [smem:[%s3587_s0 + %s3160_s18]]   ;;  %s3163_s30 = smov 6  }
   0x6   :  { %s2437_s25 = sld [smem:[%s3587_s0 + %s3161_s22]]   ;;  %s3164_s4 = smov 7  }
   0x7   :  { %v159_v1 = vld [vmem:[%s3202_s6] sm:$0xff]  ;;  %v160_v2 = vld [vmem:[%s3202_s6 + $0x8] sm:$0xff]  ;;  %v161_v3 = vld [vmem:[%s3202_s6 + $0x10] sm:$0xff]  ;;  %s3280_s29 = sld [smem:[%s3587_s0 + %s3162_s26]]   ;;  %s3165_s8 = smov 14  }
   0x8   :  { %v2890_v4 = vpack.c.bf16 %v160_v2, %v159_v1  ;;  %v162_v5 = vld [vmem:[%s3202_s6 + $0x18] sm:$0xff]  ;;  %v155_v6 = vld [vmem:[%s1_s9] sm:$0xff]  ;;  %v156_v11 = vld [vmem:[%s1_s9 + $0x8] sm:$0xff]  ;;  %s2438_s3 = sld [smem:[%s3587_s0 + %s3163_s30]]   ;;  %s3166_s12 = smov 9  }
   0x9   :  { %v1659_v7 = vld [vmem:[%s2434_s13] sm:$0xff]  ;;  %v2894_v8 = vpack.c.bf16 %v162_v5, %v161_v3  ;;  %200 = vst.msk [vmem:[#allocation2 + $0x1] sm:$0xff] %vm194_vm0, %v155_v6  ;;  %v1660_v12 = vld [vmem:[%s2434_s13 + $0x8] sm:$0xff]  ;;  %201 = vst.msk [vmem:[#allocation2 + $0x11] sm:$0xff] %vm194_vm0, %v156_v11  ;;  %s2439_s7 = sld [smem:[%s3587_s0 + %s3164_s4]]   ;;  %s3167_s16 = smov 15  }
   0xa   :  { %v3237_v9 = vadd.f32 %v1659_v7, %v155_v6  ;;  %v2411_v10 = vld [vmem:[%s2435_s17] sm:$0xff]  ;;  %2891 = vmatprep.subr.bf16.mxu0 %v2890_v4  ;;  %v3240_v13 = vadd.f32 %v1660_v12, %v156_v11  ;;  %v2412_v14 = vld [vmem:[%s2435_s17 + $0x8] sm:$0xff]  ;;  %v165_v20 = vld [vmem:[%s3202_s6 + $0x30] sm:$0xff]  ;;  %s3332_s11 = sld [smem:[%s3587_s0 + %s3165_s8]]   ;;  %s3168_s20 = smov 12  }
   0xb   :  { %v163_v15 = vld [vmem:[%s3202_s6 + $0x20] sm:$0xff]  ;;  %v164_v16 = vld [vmem:[%s3202_s6 + $0x28] sm:$0xff]  ;;  %2893 = vmatpush3.bf16.msra.mxu0 %v2890_v4  ;;  %v166_v21 = vld [vmem:[%s3202_s6 + $0x38] sm:$0xff]  ;;  %s2441_s15 = sld [smem:[%s3587_s0 + %s3166_s12]]   ;;  %s3169_s24 = smov 18  }
   0xc   :  { %v2413_v17 = vadd.f32 %v2411_v10, %v3237_v9  ;;  %2895 = vmatprep.subr.bf16.mxu0 %v2894_v8  ;;  %v2414_v18 = vadd.f32 %v2412_v14, %v3240_v13  ;;  %v2898_v19 = vpack.c.bf16 %v164_v16, %v163_v15  ;;  %v167_v22 = vld [vmem:[%s3202_s6 + $0x40] sm:$0xff]  ;;  %v168_v23 = vld [vmem:[%s3202_s6 + $0x48] sm:$0xff]  ;;  %v2902_v25 = vpack.c.bf16 %v166_v21, %v165_v20  ;;  %v169_v32 = vld [vmem:[%s3202_s6 + $0x50] sm:$0xff]  ;;  %s2447_s19 = sld [smem:[%s3587_s0 + %s3167_s16]]   ;;  %s3170_s28 = smov 13  }
   0xd   :  { %v2906_v31 = vpack.c.bf16 %v168_v23, %v167_v22  ;;  %v170_v33 = vld [vmem:[%s3202_s6 + $0x58] sm:$0xff]  ;;  %v2472_v35 = vld [vmem:[%s2437_s25] ss:$0 sm:$0xff]  ;;  %v175_v55 = vld [vmem:[%s3280_s29 + $0x8] sm:$0xff]  ;;  %s2444_s23 = sld [smem:[%s3587_s0 + %s3168_s20]]   ;;  %s3171_s2 = smov 10  }
   0xe   :  { %2415 = vst.msk [vmem:[%s2466_s21] sm:$0xff] %vm194_vm0, %v2413_v17  ;;  %2416 = vst.msk [vmem:[%s2466_s21 + $0x8] sm:$0xff] %vm194_vm0, %v2414_v18  ;;  %v2910_v34 = vpack.c.bf16 %v170_v33, %v169_v32  ;;  %v174_v54 = vld [vmem:[%s3280_s29] sm:$0xff]  ;;  %v176_v57 = vld [vmem:[%s3280_s29 + $0x10] sm:$0xff]  ;;  %s3397_s27 = sld [smem:[%s3587_s0 + %s3169_s24]]   ;;  %s3172_s6 = smov 11  }
   0xf   :  { %2897 = vmatpush3.bf16.msra.mxu0 %v2894_v8  ;;  %v2914_v56 = vpack.c.bf16 %v175_v55, %v174_v54  ;;  %v177_v58 = vld [vmem:[%s3280_s29 + $0x18] sm:$0xff]  ;;  %v178_v60 = vld [vmem:[%s3280_s29 + $0x20] sm:$0xff]  ;;  %v179_v61 = vld [vmem:[%s3280_s29 + $0x28] sm:$0xff]  ;;  %s2445_s1 = sld [smem:[%s3587_s0 + %s3170_s28]]   ;;  %s3173_s10 = smov 16  }
  0x10   :  { %v202_v24 = vld [vmem:[#allocation2] sm:$0xff]  ;;  %2899 = vmatprep.subr.bf16.mxu0 %v2898_v19  ;;  %v203_v28 = vld [vmem:[#allocation2 + $0x10] sm:$0xff]  ;;  %v2918_v59 = vpack.c.bf16 %v177_v58, %v176_v57  ;;  %v2922_v62 = vpack.c.bf16 %v179_v61, %v178_v60  ;;  %v181_v23 = vld [vmem:[%s3280_s29 + $0x38] sm:$0xff]  ;;  %s2442_s5 = sld [smem:[%s3587_s0 + %s3171_s2]]   ;;  %s3174_s14 = smov 17  }
  0x11   :  { %v293_v26 = vld [vmem:[#allocation2 + $0x1] sm:$0xff]  ;;  %2667 = vmatprep.mubr.msk.f32.mxu0 %vm194_vm0, %v202_v24  ;;  %v294_v29 = vld [vmem:[#allocation2 + $0x11] sm:$0xff]  ;;  %2915 = vmatprep.subr.bf16.mxu1 %v2914_v56  ;;  %v2478_v15 = vld [vmem:[%s2439_s7] ss:$0 sm:$0xff]  ;;  %s2443_s9 = sld [smem:[%s3587_s0 + %s3172_s6]]   ;;  %s3175_s18 = smov 24  }
  0x12   :  { %v378_v27 = vld [vmem:[#allocation2 + $0x2] sm:$0xff]  ;;  %v379_v30 = vld [vmem:[#allocation2 + $0x12] sm:$0xff]  ;;  %2668 = vmatmul.mubr.msk.f32.vlgmr.msra.gmra.mrb[0].mxu0 %vm194_vm0, %v203_v28  ;;  %2917 = vmatpush3.bf16.msra.mxu1 %v2914_v56  ;;  %v2481_v55 = vld [vmem:[%s2441_s15] ss:$0 sm:$0xff]  ;;  %s2448_s13 = sld [smem:[%s3587_s0 + %s3173_s10]]   ;;  %s3176_s22 = smov 1  }
  0x13   :  { %946 = vst.msk [vmem:[#allocation2] sm:$0xff] %vm194_vm0, %v3157_v0  ;;  %948 = vst.msk [vmem:[#allocation2 + $0x10] sm:$0xff] %vm194_vm0, %v3157_v0  ;;  %2901 = vmatpush3.bf16.msra.mxu0 %v2898_v19  ;;  %2678 = vmatprep.mubr.msk.f32.mxu0 %vm194_vm0, %v293_v26  ;;  %v180_v22 = vld [vmem:[%s3280_s29 + $0x30] sm:$0xff]  ;;  %v182_v28 = vld [vmem:[%s3280_s29 + $0x40] sm:$0xff]  ;;  %s2449_s17 = sld [smem:[%s3587_s0 + %s3174_s14]]   ;;  %s3177_s26 = smov 35  }
  0x14   :  { %947 = vst.msk [vmem:[#allocation2 + $0x8] sm:$0x3] %vm196_vm1, %v3157_v0  ;;  %949 = vst.msk [vmem:[#allocation2 + $0x18] sm:$0x3] %vm196_vm1, %v3157_v0  ;;  %2903 = vmatprep.subr.bf16.mxu0 %v2902_v25  ;;  %2919 = vmatprep.subr.bf16.mxu1 %v2918_v59  ;;  %s3438_s21 = sld [smem:[%s3587_s0 + %s3175_s18]]   ;;  %s3178_s30 = smov 19  }
  0x15   :  { %950 = vst.msk [vmem:[#allocation2 + $0x1] sm:$0xff] %vm194_vm0, %v155_v6  ;;  %951 = vst.msk [vmem:[#allocation2 + $0x11] sm:$0xff] %vm194_vm0, %v156_v11  ;;  %s2433_s25 = sld [smem:[%s3587_s0 + %s3176_s22]]   ;;  %s3179_s4 = smov 25  }
  0x16   :  { %2921 = vmatpush3.bf16.msra.mxu1 %v2918_v59  ;;  %s2457_s7 = sld [smem:[%s3587_s0 + %s3179_s4]]   ;;  %s3180_s8 = smov 22  }
  0x17   :  { %2905 = vmatpush3.bf16.msra.mxu0 %v2902_v25  ;;  %2923 = vmatprep.subr.bf16.mxu1 %v2922_v62  ;;  %s3181_s12 = smov 28   ;;  %s3182_s16 = smov 23  }
  0x18   :  { %2907 = vmatprep.subr.bf16.mxu0 %v2906_v31  ;;  %s3511_s15 = sld [smem:[%s3587_s0 + %s3181_s12]]   ;;  %s3183_s20 = smov 20  }
  0x19   :  { %s3184_s24 = smov 21   ;;  %s3185_s28 = smov 26  }
  0x1a   :  { %2679 = vmatmul.mubr.msk.f32.vlgmr.msra.gmra.mrb[0].mxu0 %vm194_vm0, %v294_v29  ;;  %v183_v29 = vld [vmem:[%s3280_s29 + $0x48] sm:$0xff]  ;;  %s3186_s2 = smov 27   ;;  %s3187_s6 = smov 36  }
  0x1b   :  { %2909 = vmatpush3.bf16.msra.mxu0 %v2906_v31  ;;  %2689 = vmatprep.mubr.msk.f32.mxu0 %vm194_vm0, %v378_v27  ;;  %v2926_v27 = vpack.c.bf16 %v181_v23, %v180_v22  ;;  %v2930_v33 = vpack.c.bf16 %v183_v29, %v182_v28  ;;  %s3188_s10 = smov 29   ;;  %s3189_s14 = smov 32  }
  0x1c   :  { %2911 = vmatprep.subr.bf16.mxu0 %v2910_v34  ;;  %v3288_v63 = vld [vmem:[#allocation2] sm:$0xff]  ;;  %v3290_v1 = vld [vmem:[#allocation2 + $0x10] sm:$0xff]  ;;  %s3190_s18 = smov 33   ;;  %s3191_s22 = smov 30  }
  0x1d   :  { %v3292_v2 = vld [vmem:[#allocation2 + $0x1] sm:$0xff]  ;;  %v3294_v3 = vld [vmem:[#allocation2 + $0x11] sm:$0xff] }
  0x1e   :  { %v3296_v4 = vld [vmem:[#allocation2 + $0x2] sm:$0xff]  ;;  %v3298_v5 = vld [vmem:[#allocation2 + $0x12] sm:$0xff] }
  0x1f   :  { %2913 = vmatpush3.bf16.msra.mxu0 %v2910_v34  ;;  %1698 = vst.msk [vmem:[#allocation2] sm:$0xff] %vm194_vm0, %v3157_v0  ;;  %1700 = vst.msk [vmem:[#allocation2 + $0x10] sm:$0xff] %vm194_vm0, %v3157_v0  ;;  %v184_v34 = vld [vmem:[%s3280_s29 + $0x50] sm:$0xff] }
  0x20   :  { %1699 = vst.msk [vmem:[#allocation2 + $0x8] sm:$0x3] %vm196_vm1, %v3157_v0  ;;  %1701 = vst.msk [vmem:[#allocation2 + $0x18] sm:$0x3] %vm196_vm1, %v3157_v0 }
  0x21   :  { %1702 = vst.msk [vmem:[#allocation2 + $0x1] sm:$0xff] %vm194_vm0, %v3237_v9  ;;  %1703 = vst.msk [vmem:[#allocation2 + $0x11] sm:$0xff] %vm194_vm0, %v3240_v13  ;;  %v2477_v13 = vld [vmem:[%s2438_s3] ss:$0 sm:$0xff]  ;;  %s2451_s3 = sld [smem:[%s3587_s0 + %s3178_s30]]   ;;  %s3193_s30 = smov 37  }
  0x22   :  { %2690 = vmatmul.mubr.msk.f32.vlgmr.msra.gmra.mrb[0].mxu0 %vm194_vm0, %v379_v30 }
  0xf5   :  { %v2691_v36 = vpop.f32.mrb[0].mxu0 }
  0xf6   :  { %v452_v37 = vpop.f32.mrb[1].mxu0  ;;  %v3058_v38 = vadd.f32 %v2691_v36, %v2472_v35 }
  0xf7   :  { %v3059_v39 = vadd.f32 %v2472_v35, %v452_v37  ;;  %v185_v35 = vld [vmem:[%s3280_s29 + $0x58] sm:$0xff]  ;;  %v911_v37 = vld [vmem:[%s3332_s11] sm:$0xff]  ;;  %s2467_s29 = sld [smem:[%s3587_s0 + %s3177_s26]]   ;;  %s3192_s26 = smov 31  }
  0xf8   :  { %v464_v41 = vmax.f32 %v3058_v38, 0.0  ;;  %v2934_v36 = vpack.c.bf16 %v185_v35, %v184_v34  ;;  %v912_v38 = vld [vmem:[%s3332_s11 + $0x8] sm:$0xff]  ;;  %v192_v34 = vld [vmem:[%s2444_s23 + $0x18] sm:$0xff] }
  0xf9   :  { %v463_v40 = vmax.f32 %v3059_v39, 0.0  ;;  %v2946_v39 = vpack.c.bf16 %v912_v38, %v911_v37  ;;  %v927_v37 = vld [vmem:[%s3397_s27 + $0x8] sm:$0xff] }
  0xfa   :  { %v468_v43 = vsel %vm194_vm0, %v464_v41, 0.0 }
  0xfb   :  { %v465_v42 = vsel %vm194_vm0, %v463_v40, 0.0 }
  0xfc   :  { %466 = vadd.xlane.f32.xlu0 %v465_v42 }
 0x100   :  { %469 = vadd.xlane.f32.xlu0 %v468_v43  ;;  %v915_v43 = vld [vmem:[%s3332_s11 + $0x20] sm:$0xff] }
 0x189   :  { %v467_v44 = vpop.xlane.xlu0 %466 }
 0x18a   :  { %v472_v45 = vmul.f32 0.03125, %v467_v44  ;;  %v916_v44 = vld [vmem:[%s3332_s11 + $0x28] sm:$0xff] }
 0x18c   :  { %v474_v46 = vsub.f32 %v463_v40, %v472_v45  ;;  %v913_v40 = vld [vmem:[%s3332_s11 + $0x10] sm:$0xff]  ;;  %v2954_v45 = vpack.c.bf16 %v916_v44, %v915_v43 }
 0x18d   :  { %v470_v47 = vpop.xlane.xlu0 %469 }
 0x18e   :  { %v473_v48 = vmul.f32 0.03125, %v470_v47  ;;  %v476_v49 = vmul.f32 %v474_v46, %v474_v46  ;;  %v918_v47 = vld [vmem:[%s3332_s11 + $0x38] sm:$0xff] }
 0x190   :  { %v475_v50 = vsub.f32 %v464_v41, %v473_v48  ;;  %v478_v51 = vsel %vm194_vm0, %v476_v49, 0.0  ;;  %v914_v41 = vld [vmem:[%s3332_s11 + $0x18] sm:$0xff]  ;;  %v919_v49 = vld [vmem:[%s3332_s11 + $0x40] sm:$0xff] }
 0x191   :  { %479 = vadd.xlane.f32.xlu1 %v478_v51  ;;  %v2950_v42 = vpack.c.bf16 %v914_v41, %v913_v40 }
 0x192   :  { %v477_v52 = vmul.f32 %v475_v50, %v475_v50 }
 0x194   :  { %v481_v53 = vsel %vm194_vm0, %v477_v52, 0.0  ;;  %v921_v52 = vld [vmem:[%s3332_s11 + $0x50] sm:$0xff] }
 0x195   :  { %482 = vadd.xlane.f32.xlu1 %v481_v53  ;;  %v922_v53 = vld [vmem:[%s3332_s11 + $0x58] sm:$0xff] }
 0x196   :  { %v2966_v54 = vpack.c.bf16 %v922_v53, %v921_v52 }
 0x21e   :  { %v480_v6 = vpop.xlane.xlu1 %479 }
 0x21f   :  { %v484_v7 = vmul.f32 0.03125, %v480_v6 }
 0x221   :  { %v486_v8 = vadd.f32 1e-05, %v484_v7 }
 0x222   :  { %v483_v10 = vpop.xlane.xlu1 %482 }
 0x223   :  { %3132 = vrsqrt.f32 %v486_v8  ;;  %v485_v11 = vmul.f32 0.03125, %v483_v10 }
 0x225   :  { %v487_v12 = vadd.f32 1e-05, %v485_v11 }
 0x227   :  { %3134 = vrsqrt.f32 %v487_v12 }
 0x22d   :  { %v3133_v9 = vpop.eup %3132 }
 0x22e   :  { %v490_v14 = vmul.f32 %v3133_v9, %v474_v46  ;;  %v917_v46 = vld [vmem:[%s3332_s11 + $0x30] sm:$0xff] }
 0x22f   :  { %v2958_v48 = vpack.c.bf16 %v918_v47, %v917_v46  ;;  %v2486_v47 = vld [vmem:[%s2442_s5] ss:$0 sm:$0xff]  ;;  %s2459_s5 = sld [smem:[%s3587_s0 + %s3186_s2]]  }
 0x230   :  { %v498_v16 = vmul.f32 %v2477_v13, %v490_v14 }
 0x231   :  { %v3135_v17 = vpop.eup %3134 }
 0x232   :  { %v506_v18 = vadd.f32 %v2478_v15, %v498_v16  ;;  %v491_v19 = vmul.f32 %v3135_v17, %v475_v50  ;;  %v920_v50 = vld [vmem:[%s3332_s11 + $0x48] sm:$0xff]  ;;  %s2454_s11 = sld [smem:[%s3587_s0 + %s3180_s8]]  }
 0x233   :  { %v2962_v51 = vpack.c.bf16 %v920_v50, %v919_v49  ;;  %v2487_v49 = vld [vmem:[%s2443_s9] ss:$0 sm:$0xff]  ;;  %s2468_s9 = sld [smem:[%s3587_s0 + %s3187_s6]]  }
 0x234   :  { %512 = vst.msk [vmem:[#allocation3 + $0x1] sm:$0xff] %vm194_vm0, %v506_v18  ;;  %v499_v20 = vmul.f32 %v2477_v13, %v491_v19 }
 0x236   :  { %v507_v21 = vadd.f32 %v2478_v15, %v499_v20 }
 0x238   :  { %513 = vst.msk [vmem:[#allocation3 + $0x11] sm:$0xff] %vm194_vm0, %v507_v21 }
 0x23b   :  { %v514_v24 = vld [vmem:[#allocation3] sm:$0xff] }
 0x23c   :  { %v605_v25 = vld [vmem:[#allocation3 + $0x1] sm:$0xff]  ;;  %2700 = vmatprep.mubr.msk.f32.mxu1 %vm194_vm0, %v514_v24 }
 0x23d   :  { %v690_v26 = vld [vmem:[#allocation3 + $0x2] sm:$0xff] }
 0x23e   :  { %1257 = vst.msk [vmem:[#allocation3] sm:$0xff] %vm194_vm0, %v3157_v0 }
 0x23f   :  { %1258 = vst.msk [vmem:[#allocation3 + $0x8] sm:$0x3] %vm196_vm1, %v3157_v0  ;;  %v515_v30 = vld [vmem:[#allocation3 + $0x10] sm:$0xff] }
 0x240   :  { %v606_v31 = vld [vmem:[#allocation3 + $0x11] sm:$0xff]  ;;  %2701 = vmatmul.mubr.msk.f32.vlgmr.msra.gmra.mrb[0].mxu1 %vm194_vm0, %v515_v30  ;;  %v189_v30 = vld [vmem:[%s2444_s23] sm:$0xff] }
 0x241   :  { %v691_v32 = vld [vmem:[#allocation3 + $0x12] sm:$0xff]  ;;  %2925 = vmatpush3.bf16.msra.mxu1 %v2922_v62  ;;  %2711 = vmatprep.mubr.msk.f32.mxu1 %vm194_vm0, %v605_v25 }
 0x242   :  { %1259 = vst.msk [vmem:[#allocation3 + $0x10] sm:$0xff] %vm194_vm0, %v3157_v0  ;;  %2927 = vmatprep.subr.bf16.mxu1 %v2926_v27 }
 0x243   :  { %1260 = vst.msk [vmem:[#allocation3 + $0x18] sm:$0x3] %vm196_vm1, %v3157_v0 }
 0x245   :  { %2929 = vmatpush3.bf16.msra.mxu1 %v2926_v27 }
 0x246   :  { %2931 = vmatprep.subr.bf16.mxu1 %v2930_v33 }
 0x248   :  { %2712 = vmatmul.mubr.msk.f32.vlgmr.msra.gmra.mrb[0].mxu1 %vm194_vm0, %v606_v31  ;;  %v190_v31 = vld [vmem:[%s2444_s23 + $0x8] sm:$0xff] }
 0x249   :  { %2933 = vmatpush3.bf16.msra.mxu1 %v2930_v33  ;;  %2722 = vmatprep.mubr.msk.f32.mxu1 %vm194_vm0, %v690_v26  ;;  %v191_v33 = vld [vmem:[%s2444_s23 + $0x10] sm:$0xff]  ;;  %s2452_s23 = sld [smem:[%s3587_s0 + %s3183_s20]]  }
 0x24a   :  { %2935 = vmatprep.subr.bf16.mxu1 %v2934_v36  ;;  %v2942_v35 = vpack.c.bf16 %v192_v34, %v191_v33  ;;  %v1666_v33 = vld [vmem:[%s3438_s21 + $0x18] sm:$0xff] }
 0x24d   :  { %2937 = vmatpush3.bf16.msra.mxu1 %v2934_v36  ;;  %v926_v36 = vld [vmem:[%s3397_s27] sm:$0xff] }
 0x24e   :  { %2947 = vmatprep.subr.bf16.mxu1 %v2946_v39  ;;  %v2970_v38 = vpack.c.bf16 %v927_v37, %v926_v36  ;;  %v1667_v36 = vld [vmem:[%s3438_s21 + $0x20] sm:$0xff]  ;;  %v1668_v37 = vld [vmem:[%s3438_s21 + $0x28] sm:$0xff] }
 0x250   :  { %2723 = vmatmul.mubr.msk.f32.vlgmr.msra.gmra.mrb[0].mxu1 %vm194_vm0, %v691_v32  ;;  %v2938_v32 = vpack.c.bf16 %v190_v31, %v189_v30  ;;  %v1663_v30 = vld [vmem:[%s3438_s21] sm:$0xff]  ;;  %v1664_v31 = vld [vmem:[%s3438_s21 + $0x8] sm:$0xff] }
 0x251   :  { %2949 = vmatpush3.bf16.msra.mxu1 %v2946_v39  ;;  %2744 = vmatprep.mubr.msk.f32.mxu1 %vm194_vm0, %v3288_v63  ;;  %v81_v39 = vstv %s2445_s1  ;;  %s2458_s1 = sld [smem:[%s3587_s0 + %s3185_s28]]  }
 0x252   :  { %2951 = vmatprep.subr.bf16.mxu1 %v2950_v42  ;;  %2939 = vmatprep.subr.bf16.mxu0 %v2938_v32  ;;  %82 = vst [vmem:[#allocation4] sm:$0x1] %v81_v39  ;;  %v1669_v39 = vld [vmem:[%s3438_s21 + $0x30] sm:$0xff] }
 0x253   :  { %2941 = vmatpush3.bf16.msra.mxu0 %v2938_v32  ;;  %v1665_v32 = vld [vmem:[%s3438_s21 + $0x10] sm:$0xff] }
 0x254   :  { %2943 = vmatprep.subr.bf16.mxu0 %v2942_v35  ;;  %v3006_v34 = vpack.c.bf16 %v1666_v33, %v1665_v32 }
 0x255   :  { %2953 = vmatpush3.bf16.msra.mxu1 %v2950_v42 }
 0x256   :  { %2955 = vmatprep.subr.bf16.mxu1 %v2954_v45 }
 0x257   :  { %2945 = vmatpush3.bf16.msra.mxu0 %v2942_v35  ;;  %v1704_v35 = vld [vmem:[#allocation2] sm:$0xff] }
 0x258   :  { %2745 = vmatmul.mubr.msk.f32.vlgmr.msra.gmra.mrb[2].mxu1 %vm194_vm0, %v3290_v1  ;;  %v2493_v1 = vld [vmem:[%s2447_s19] ss:$0 sm:$0xff]  ;;  %2971 = vmatprep.subr.bf16.mxu0 %v2970_v38  ;;  %s2455_s19 = sld [smem:[%s3587_s0 + %s3182_s16]]  }
 0x259   :  { %2957 = vmatpush3.bf16.msra.mxu1 %v2954_v45  ;;  %2755 = vmatprep.mubr.msk.f32.mxu1 %vm194_vm0, %v3292_v2 }
 0x25a   :  { %2959 = vmatprep.subr.bf16.mxu1 %v2958_v48 }
 0x25d   :  { %2961 = vmatpush3.bf16.msra.mxu1 %v2958_v48 }
 0x25e   :  { %2963 = vmatprep.subr.bf16.mxu1 %v2962_v51 }
 0x260   :  { %2756 = vmatmul.mubr.msk.f32.vlgmr.msra.gmra.mrb[2].mxu1 %vm194_vm0, %v3294_v3 }
 0x261   :  { %2965 = vmatpush3.bf16.msra.mxu1 %v2962_v51  ;;  %2766 = vmatprep.mubr.msk.f32.mxu1 %vm194_vm0, %v3296_v4 }
 0x262   :  { %2967 = vmatprep.subr.bf16.mxu1 %v2966_v54 }
 0x265   :  { %2969 = vmatpush3.bf16.msra.mxu1 %v2966_v54  ;;  %v928_v54 = vld [vmem:[%s3397_s27 + $0x10] sm:$0xff] }
 0x268   :  { %2767 = vmatmul.mubr.msk.f32.vlgmr.msra.gmra.mrb[2].mxu1 %vm194_vm0, %v3298_v5 }
 0x323   :  { %v2724_v56 = vpop.f32.mrb[0].mxu1 }
 0x324   :  { %v764_v57 = vpop.f32.mrb[1].mxu1  ;;  %v3060_v58 = vadd.f32 %v2724_v56, %v2481_v55 }
 0x325   :  { %v3061_v59 = vadd.f32 %v2481_v55, %v764_v57  ;;  %v929_v55 = vld [vmem:[%s3397_s27 + $0x18] sm:$0xff] }
 0x326   :  { %v776_v61 = vmax.f32 %v3060_v58, 0.0 }
 0x327   :  { %v775_v60 = vmax.f32 %v3061_v59, 0.0  ;;  %v2974_v59 = vpack.c.bf16 %v929_v55, %v928_v54  ;;  %v3475_v54 = vld [vmem:[%s2433_s25 + $0x8] sm:$0xff] }
 0x328   :  { %v780_v63 = vsel %vm194_vm0, %v776_v61, 0.0 }
 0x329   :  { %v777_v62 = vsel %vm194_vm0, %v775_v60, 0.0 }
 0x32a   :  { %778 = vadd.xlane.f32.xlu0 %v777_v62  ;;  %v931_v62 = vld [vmem:[%s3397_s27 + $0x28] sm:$0xff] }
 0x32e   :  { %781 = vadd.xlane.f32.xlu0 %v780_v63 }
 0x33b   :  { %v2768_v2 = vpop.f32.mrb[2].mxu1 }
 0x33c   :  { %v1202_v3 = vpop.f32.mrb[3].mxu1  ;;  %v3062_v4 = vadd.f32 %v2768_v2, %v2493_v1 }
 0x33d   :  { %v3063_v5 = vadd.f32 %v2493_v1, %v1202_v3 }
 0x33e   :  { %v1214_v7 = vmax.f32 %v3062_v4, 0.0 }
 0x33f   :  { %v1213_v6 = vmax.f32 %v3063_v5, 0.0 }
 0x340   :  { %v1218_v10 = vsel %vm194_vm0, %v1214_v7, 0.0 }
 0x341   :  { %v1215_v8 = vsel %vm194_vm0, %v1213_v6, 0.0 }
 0x342   :  { %1216 = vadd.xlane.f32.xlu1 %v1215_v8  ;;  %v2499_v8 = vld [vmem:[%s2449_s17] ss:$0 sm:$0xff]  ;;  %s2464_s17 = sld [smem:[%s3587_s0 + %s3189_s14]]  }
 0x346   :  { %1219 = vadd.xlane.f32.xlu1 %v1218_v10 }
 0x3b7   :  { %v779_v11 = vpop.xlane.xlu0 %778 }
 0x3b8   :  { %v783_v12 = vmul.f32 0.03125, %v779_v11 }
 0x3ba   :  { %v785_v9 = vsub.f32 %v775_v60, %v783_v12 }
 0x3bb   :  { %v782_v13 = vpop.xlane.xlu0 %781 }
 0x3bc   :  { %v784_v14 = vmul.f32 0.03125, %v782_v13  ;;  %v787_v15 = vmul.f32 %v785_v9, %v785_v9 }
 0x3be   :  { %v786_v16 = vsub.f32 %v776_v61, %v784_v14  ;;  %v789_v17 = vsel %vm194_vm0, %v787_v15, 0.0  ;;  %v930_v61 = vld [vmem:[%s3397_s27 + $0x20] sm:$0xff]  ;;  %v932_v15 = vld [vmem:[%s3397_s27 + $0x30] sm:$0xff] }
 0x3bf   :  { %790 = vadd.xlane.f32.xlu0 %v789_v17  ;;  %v2978_v2 = vpack.c.bf16 %v931_v62, %v930_v61  ;;  %v2502_v62 = vld [vmem:[%s2451_s3] ss:$0 sm:$0xff]  ;;  %s2469_s3 = sld [smem:[%s3587_s0 + %s3193_s30]]  }
 0x3c0   :  { %v788_v18 = vmul.f32 %v786_v16, %v786_v16 }
 0x3c2   :  { %v792_v19 = vsel %vm194_vm0, %v788_v18, 0.0 }
 0x3c3   :  { %793 = vadd.xlane.f32.xlu0 %v792_v19 }
 0x3cf   :  { %v1217_v20 = vpop.xlane.xlu1 %1216 }
 0x3d0   :  { %v1221_v21 = vmul.f32 0.03125, %v1217_v20 }
 0x3d2   :  { %v3381_v22 = vsub.f32 %v1213_v6, %v1221_v21  ;;  %v2498_v6 = vld [vmem:[%s2448_s13] ss:$0 sm:$0xff]  ;;  %s2461_s13 = sld [smem:[%s3587_s0 + %s3188_s10]]  }
 0x3d3   :  { %v1220_v23 = vpop.xlane.xlu1 %1219  ;;  %v934_v21 = vld [vmem:[%s3397_s27 + $0x40] sm:$0xff] }
 0x3d4   :  { %v1222_v24 = vmul.f32 0.03125, %v1220_v23  ;;  %v1225_v25 = vmul.f32 %v3381_v22, %v3381_v22 }
 0x3d6   :  { %v3385_v26 = vsub.f32 %v1214_v7, %v1222_v24  ;;  %v1227_v27 = vsel %vm194_vm0, %v1225_v25, 0.0 }
 0x3d7   :  { %1228 = vadd.xlane.f32.xlu1 %v1227_v27  ;;  %v936_v27 = vld [vmem:[%s3397_s27 + $0x50] sm:$0xff] }
 0x3d8   :  { %v1226_v28 = vmul.f32 %v3385_v26, %v3385_v26 }
 0x3da   :  { %v1230_v29 = vsel %vm194_vm0, %v1226_v28, 0.0  ;;  %v937_v28 = vld [vmem:[%s3397_s27 + $0x58] sm:$0xff] }
 0x3db   :  { %1231 = vadd.xlane.f32.xlu1 %v1230_v29  ;;  %v2990_v29 = vpack.c.bf16 %v937_v28, %v936_v27 }
 0x44c   :  { %v791_v40 = vpop.xlane.xlu0 %790 }
 0x44d   :  { %v795_v41 = vmul.f32 0.03125, %v791_v40  ;;  %v1670_v40 = vld [vmem:[%s3438_s21 + $0x38] sm:$0xff] }
 0x44f   :  { %v797_v42 = vadd.f32 1e-05, %v795_v41  ;;  %v1705_v41 = vld [vmem:[#allocation2 + $0x10] sm:$0xff] }
 0x450   :  { %v794_v43 = vpop.xlane.xlu0 %793 }
 0x451   :  { %3136 = vrsqrt.f32 %v797_v42  ;;  %v796_v44 = vmul.f32 0.03125, %v794_v43  ;;  %v3014_v42 = vpack.c.bf16 %v1670_v40, %v1669_v39  ;;  %v1795_v43 = vld [vmem:[#allocation2 + $0x1] sm:$0xff]  ;;  %v943_v39 = vld [vmem:[%s2454_s11 + $0x10] sm:$0xff]  ;;  %v944_v40 = vld [vmem:[%s2454_s11 + $0x18] sm:$0xff] }
 0x453   :  { %v798_v45 = vadd.f32 1e-05, %v796_v44  ;;  %v1671_v44 = vld [vmem:[%s3438_s21 + $0x40] sm:$0xff] }
 0x455   :  { %3138 = vrsqrt.f32 %v798_v45  ;;  %v1672_v45 = vld [vmem:[%s3438_s21 + $0x48] sm:$0xff] }
 0x45b   :  { %v3137_v46 = vpop.eup %3136 }
 0x45c   :  { %v801_v48 = vmul.f32 %v3137_v46, %v785_v9  ;;  %v3018_v46 = vpack.c.bf16 %v1672_v45, %v1671_v44  ;;  %v83_v45 = vstv %s2455_s19 }
 0x45d   :  { %84 = vst [vmem:[#allocation5] sm:$0x1] %v83_v45 }
 0x45e   :  { %v809_v50 = vmul.f32 %v2486_v47, %v801_v48  ;;  %v1674_v48 = vld [vmem:[%s3438_s21 + $0x58] sm:$0xff] }
 0x45f   :  { %v3139_v51 = vpop.eup %3138 }
 0x460   :  { %v802_v52 = vmul.f32 %v3139_v51, %v786_v16  ;;  %v817_v53 = vadd.f32 %v2487_v49, %v809_v50  ;;  %v933_v16 = vld [vmem:[%s3397_s27 + $0x38] sm:$0xff]  ;;  %v1880_v51 = vld [vmem:[#allocation2 + $0x2] sm:$0xff] }
 0x461   :  { %v2982_v20 = vpack.c.bf16 %v933_v16, %v932_v15 }
 0x462   :  { %v810_v56 = vmul.f32 %v2486_v47, %v802_v52  ;;  %2733 = vmatprep.mubr.msk.f32.mxu0 %vm194_vm0, %v817_v53  ;;  %v1673_v47 = vld [vmem:[%s3438_s21 + $0x50] sm:$0xff]  ;;  %v2488_v53 = vld [vmem:[#allocation4] ss:$0 sm:$0xff]  ;;  %s2465_s21 = sld [smem:[%s3587_s0 + %s3190_s18]]  }
 0x463   :  { %v3022_v50 = vpack.c.bf16 %v1674_v48, %v1673_v47  ;;  %v1881_v52 = vld [vmem:[#allocation2 + $0x12] sm:$0xff] }
 0x464   :  { %v818_v57 = vadd.f32 %v2487_v49, %v810_v56  ;;  %v1229_v58 = vpop.xlane.xlu1 %1228  ;;  %v1796_v49 = vld [vmem:[#allocation2 + $0x11] sm:$0xff] }
 0x465   :  { %v1233_v60 = vmul.f32 0.03125, %v1229_v58 }
 0x466   :  { %2734 = vmatmul.mubr.msk.f32.vlgmr.msra.gmra.mrb[2].mxu0 %vm194_vm0, %v818_v57  ;;  %v3477_v57 = vld [vmem:[%s2433_s25] sm:$0xff]  ;;  %s2462_s25 = sld [smem:[%s3587_s0 + %s3191_s22]]  }
 0x467   :  { %v1235_v63 = vadd.f32 1e-05, %v1233_v60  ;;  %2973 = vmatpush3.bf16.msra.mxu0 %v2970_v38  ;;  %v3010_v38 = vpack.c.bf16 %v1668_v37, %v1667_v36  ;;  %v941_v36 = vld [vmem:[%s2454_s11] sm:$0xff]  ;;  %v942_v37 = vld [vmem:[%s2454_s11 + $0x8] sm:$0xff] }
 0x468   :  { %v1232_v1 = vpop.xlane.xlu1 %1231  ;;  %2975 = vmatprep.subr.bf16.mxu0 %v2974_v59 }
 0x469   :  { %3140 = vrsqrt.f32 %v1235_v63  ;;  %v1234_v3 = vmul.f32 0.03125, %v1232_v1 }
 0x46b   :  { %v1236_v4 = vadd.f32 1e-05, %v1234_v3  ;;  %2977 = vmatpush3.bf16.msra.mxu0 %v2974_v59 }
 0x46c   :  { %2979 = vmatprep.subr.bf16.mxu0 %v2978_v2 }
 0x46d   :  { %3142 = vrsqrt.f32 %v1236_v4 }
 0x473   :  { %v3141_v5 = vpop.eup %3140 }
 0x474   :  { %v1239_v7 = vmul.f32 %v3141_v5, %v3381_v22  ;;  %v935_v22 = vld [vmem:[%s3397_s27 + $0x48] sm:$0xff]  ;;  %s2453_s27 = sld [smem:[%s3587_s0 + %s3184_s24]]  }
 0x476   :  { %v1247_v10 = vmul.f32 %v2498_v6, %v1239_v7 }
 0x477   :  { %v3143_v11 = vpop.eup %3142 }
 0x478   :  { %v1255_v12 = vadd.f32 %v2499_v8, %v1247_v10  ;;  %v1240_v9 = vmul.f32 %v3143_v11, %v3385_v26  ;;  %v2986_v26 = vpack.c.bf16 %v935_v22, %v934_v21 }
 0x47a   :  { %1261 = vst.msk [vmem:[#allocation3 + $0x1] sm:$0xff] %vm194_vm0, %v1255_v12  ;;  %v1248_v13 = vmul.f32 %v2498_v6, %v1240_v9 }
 0x47c   :  { %v1256_v14 = vadd.f32 %v2499_v8, %v1248_v13  ;;  %v2514_v8 = vld [vmem:[%s2457_s7] ss:$0 sm:$0xff] }
 0x47e   :  { %1262 = vst.msk [vmem:[#allocation3 + $0x11] sm:$0xff] %vm194_vm0, %v1256_v14 }
 0x481   :  { %v1263_v17 = vld [vmem:[#allocation3] sm:$0xff] }
 0x482   :  { %v1354_v18 = vld [vmem:[#allocation3 + $0x1] sm:$0xff]  ;;  %2777 = vmatprep.mubr.msk.f32.mxu0 %vm194_vm0, %v1263_v17 }
 0x483   :  { %v1439_v19 = vld [vmem:[#allocation3 + $0x2] sm:$0xff] }
 0x484   :  { %2009 = vst.msk [vmem:[#allocation3] sm:$0xff] %vm194_vm0, %v3157_v0 }
 0x485   :  { %2010 = vst.msk [vmem:[#allocation3 + $0x8] sm:$0x3] %vm196_vm1, %v3157_v0  ;;  %v1264_v23 = vld [vmem:[#allocation3 + $0x10] sm:$0xff] }
 0x486   :  { %v1355_v24 = vld [vmem:[#allocation3 + $0x11] sm:$0xff]  ;;  %2778 = vmatmul.mubr.msk.f32.vlgmr.msra.gmra.mrb[4].mxu0 %vm194_vm0, %v1264_v23 }
 0x487   :  { %v1440_v25 = vld [vmem:[#allocation3 + $0x12] sm:$0xff]  ;;  %2981 = vmatpush3.bf16.msra.mxu0 %v2978_v2  ;;  %2788 = vmatprep.mubr.msk.f32.mxu0 %vm194_vm0, %v1354_v18 }
 0x488   :  { %2011 = vst.msk [vmem:[#allocation3 + $0x10] sm:$0xff] %vm194_vm0, %v3157_v0  ;;  %2983 = vmatprep.subr.bf16.mxu0 %v2982_v20 }
 0x489   :  { %2012 = vst.msk [vmem:[#allocation3 + $0x18] sm:$0x3] %vm196_vm1, %v3157_v0  ;;  %v3002_v0 = vpack.c.bf16 %v1664_v31, %v1663_v30 }
 0x48b   :  { %2985 = vmatpush3.bf16.msra.mxu0 %v2982_v20 }
 0x48c   :  { %2987 = vmatprep.subr.bf16.mxu0 %v2986_v26 }
 0x48e   :  { %2789 = vmatmul.mubr.msk.f32.vlgmr.msra.gmra.mrb[4].mxu0 %vm194_vm0, %v1355_v24 }
 0x48f   :  { %2989 = vmatpush3.bf16.msra.mxu0 %v2986_v26  ;;  %2799 = vmatprep.mubr.msk.f32.mxu0 %vm194_vm0, %v1439_v19 }
 0x490   :  { %2991 = vmatprep.subr.bf16.mxu0 %v2990_v29 }
 0x493   :  { %2993 = vmatpush3.bf16.msra.mxu0 %v2990_v29 }
 0x494   :  { %3003 = vmatprep.subr.bf16.mxu0 %v3002_v0 }
 0x496   :  { %2800 = vmatmul.mubr.msk.f32.vlgmr.msra.gmra.mrb[4].mxu0 %vm194_vm0, %v1440_v25 }
 0x497   :  { %3005 = vmatpush3.bf16.msra.mxu0 %v3002_v0  ;;  %2821 = vmatprep.mubr.msk.f32.mxu0 %vm194_vm0, %v1704_v35 }
 0x498   :  { %3007 = vmatprep.subr.bf16.mxu0 %v3006_v34 }
 0x49b   :  { %3009 = vmatpush3.bf16.msra.mxu0 %v3006_v34 }
 0x49c   :  { %3011 = vmatprep.subr.bf16.mxu0 %v3010_v38 }
 0x49e   :  { %2822 = vmatmul.mubr.msk.f32.vlgmr.msra.gmra.mrb[6].mxu0 %vm194_vm0, %v1705_v41  ;;  %v2998_v41 = vpack.c.bf16 %v944_v40, %v943_v39 }
 0x49f   :  { %3013 = vmatpush3.bf16.msra.mxu0 %v3010_v38  ;;  %2832 = vmatprep.mubr.msk.f32.mxu0 %vm194_vm0, %v1795_v43  ;;  %v2994_v38 = vpack.c.bf16 %v942_v37, %v941_v36  ;;  %v1679_v43 = vld [vmem:[%s3511_s15 + $0x8] sm:$0xff]  ;;  %v2509_v37 = vld [vmem:[#allocation5] ss:$0 sm:$0xff] }
 0x4a0   :  { %3015 = vmatprep.subr.bf16.mxu0 %v3014_v42 }
 0x4a1   :  { %2995 = vmatprep.subr.bf16.mxu1 %v2994_v38 }
 0x4a2   :  { %2997 = vmatpush3.bf16.msra.mxu1 %v2994_v38 }
 0x4a3   :  { %3017 = vmatpush3.bf16.msra.mxu0 %v3014_v42  ;;  %2999 = vmatprep.subr.bf16.mxu1 %v2998_v41  ;;  %v1678_v42 = vld [vmem:[%s3511_s15] sm:$0xff] }
 0x4a4   :  { %3019 = vmatprep.subr.bf16.mxu0 %v3018_v46  ;;  %v3026_v44 = vpack.c.bf16 %v1679_v43, %v1678_v42 }
 0x4a6   :  { %2833 = vmatmul.mubr.msk.f32.vlgmr.msra.gmra.mrb[6].mxu0 %vm194_vm0, %v1796_v49  ;;  %3001 = vmatpush3.bf16.msra.mxu1 %v2998_v41 }
 0x4a7   :  { %3021 = vmatpush3.bf16.msra.mxu0 %v3018_v46  ;;  %2843 = vmatprep.mubr.msk.f32.mxu0 %vm194_vm0, %v1880_v51 }
 0x4a8   :  { %3023 = vmatprep.subr.bf16.mxu0 %v3022_v50  ;;  %3027 = vmatprep.subr.bf16.mxu1 %v3026_v44 }
 0x4ab   :  { %3025 = vmatpush3.bf16.msra.mxu0 %v3022_v50 }
 0x4ae   :  { %2844 = vmatmul.mubr.msk.f32.vlgmr.msra.gmra.mrb[6].mxu0 %vm194_vm0, %v1881_v52 }
 0x539   :  { %v2735_v55 = vpop.f32.mrb[2].mxu0 }
 0x53a   :  { %v903_v56 = vadd.f32 %v2735_v55, %v2488_v53  ;;  %v897_v58 = vpop.f32.mrb[3].mxu0 }
 0x53b   :  { %v898_v59 = vadd.f32 %v2488_v53, %v897_v58  ;;  %v2507_v53 = vld [vmem:[%s2452_s23] ss:$0 sm:$0xff] }
 0x53c   :  { %v907_v60 = vmul.f32 %v903_v56, %v3475_v54  ;;  %v2508_v56 = vld [vmem:[%s2453_s27] ss:$0 sm:$0xff] }
 0x53d   :  { %v906_v61 = vmul.f32 %v898_v59, %v3477_v57 }
 0x53e   :  { %910 = vst.msk [vmem:[%s2467_s29 + $0x8] sm:$0xff] %vm908_vm2, %v907_v60 }
 0x53f   :  { %909 = vst.msk [vmem:[%s2467_s29] sm:$0xff] %vm908_vm2, %v906_v61  ;;  %s2463_s29 = sld [smem:[%s3587_s0 + %s3192_s26]]  }
 0x569   :  { %v2801_v63 = vpop.f32.mrb[4].mxu0 }
 0x56a   :  { %v1513_v1 = vpop.f32.mrb[5].mxu0  ;;  %v3064_v2 = vadd.f32 %v2801_v63, %v2502_v62  ;;  %v1681_v63 = vld [vmem:[%s3511_s15 + $0x18] sm:$0xff] }
 0x56b   :  { %v3065_v3 = vadd.f32 %v2502_v62, %v1513_v1  ;;  %v1680_v62 = vld [vmem:[%s3511_s15 + $0x10] sm:$0xff] }
 0x56c   :  { %v1525_v5 = vmax.f32 %v3064_v2, 0.0 }
 0x56d   :  { %v1524_v4 = vmax.f32 %v3065_v3, 0.0 }
 0x56e   :  { %v1529_v7 = vsel %vm194_vm0, %v1525_v5, 0.0 }
 0x56f   :  { %v1526_v6 = vsel %vm194_vm0, %v1524_v4, 0.0 }
 0x570   :  { %1527 = vadd.xlane.f32.xlu1 %v1526_v6  ;;  %v1682_v6 = vld [vmem:[%s3511_s15 + $0x20] sm:$0xff] }
 0x574   :  { %1530 = vadd.xlane.f32.xlu1 %v1529_v7  ;;  %v1683_v7 = vld [vmem:[%s3511_s15 + $0x28] sm:$0xff] }
 0x581   :  { %v2845_v10 = vpop.f32.mrb[6].mxu0 }
 0x582   :  { %v1954_v11 = vpop.f32.mrb[7].mxu0  ;;  %v3066_v12 = vadd.f32 %v2845_v10, %v2514_v8 }
 0x583   :  { %v3067_v9 = vadd.f32 %v2514_v8, %v1954_v11  ;;  %v3034_v11 = vpack.c.bf16 %v1683_v7, %v1682_v6  ;;  %v1696_v6 = vld [vmem:[%s2464_s17 + $0x18] sm:$0xff] }
 0x584   :  { %v1966_v14 = vmax.f32 %v3066_v12, 0.0 }
 0x585   :  { %v1965_v13 = vmax.f32 %v3067_v9, 0.0 }
 0x586   :  { %v1970_v16 = vsel %vm194_vm0, %v1966_v14, 0.0 }
 0x587   :  { %v1967_v15 = vsel %vm194_vm0, %v1965_v13, 0.0 }
 0x588   :  { %1968 = vadd.xlane.f32.xlu0 %v1967_v15 }
 0x58c   :  { %1971 = vadd.xlane.f32.xlu0 %v1970_v16  ;;  %v2520_v16 = vld [vmem:[%s2459_s5] ss:$0 sm:$0xff] }
 0x5fd   :  { %v1528_v17 = vpop.xlane.xlu1 %1527 }
 0x5fe   :  { %v1532_v18 = vmul.f32 0.03125, %v1528_v17 }
 0x600   :  { %v1534_v19 = vsub.f32 %v1524_v4, %v1532_v18  ;;  %v3030_v4 = vpack.c.bf16 %v1681_v63, %v1680_v62 }
 0x601   :  { %v1531_v20 = vpop.xlane.xlu1 %1530 }
 0x602   :  { %v1533_v21 = vmul.f32 0.03125, %v1531_v20  ;;  %v1536_v22 = vmul.f32 %v1534_v19, %v1534_v19 }
 0x604   :  { %v1535_v23 = vsub.f32 %v1525_v5, %v1533_v21  ;;  %v1538_v24 = vsel %vm194_vm0, %v1536_v22, 0.0 }
 0x605   :  { %1539 = vadd.xlane.f32.xlu1 %v1538_v24  ;;  %v1684_v24 = vld [vmem:[%s3511_s15 + $0x30] sm:$0xff] }
 0x606   :  { %v1537_v25 = vmul.f32 %v1535_v23, %v1535_v23 }
 0x608   :  { %v1541_v26 = vsel %vm194_vm0, %v1537_v25, 0.0  ;;  %v1685_v25 = vld [vmem:[%s3511_s15 + $0x38] sm:$0xff] }
 0x609   :  { %1542 = vadd.xlane.f32.xlu1 %v1541_v26  ;;  %v3038_v26 = vpack.c.bf16 %v1685_v25, %v1684_v24 }
 0x615   :  { %v1969_v27 = vpop.xlane.xlu0 %1968 }
 0x616   :  { %v1973_v28 = vmul.f32 0.03125, %v1969_v27 }
 0x618   :  { %v3495_v29 = vsub.f32 %v1965_v13, %v1973_v28  ;;  %v1686_v28 = vld [vmem:[%s3511_s15 + $0x40] sm:$0xff] }
 0x619   :  { %v1972_v30 = vpop.xlane.xlu0 %1971 }
 0x61a   :  { %v1974_v31 = vmul.f32 0.03125, %v1972_v30  ;;  %v1977_v0 = vmul.f32 %v3495_v29, %v3495_v29 }
 0x61c   :  { %v3499_v32 = vsub.f32 %v1966_v14, %v1974_v31  ;;  %v1979_v33 = vsel %vm194_vm0, %v1977_v0, 0.0  ;;  %v2519_v14 = vld [vmem:[%s2458_s1] ss:$0 sm:$0xff]  ;;  %v1688_v0 = vld [vmem:[%s3511_s15 + $0x50] sm:$0xff] }
 0x61d   :  { %1980 = vadd.xlane.f32.xlu0 %v1979_v33 }
 0x61e   :  { %v1978_v34 = vmul.f32 %v3499_v32, %v3499_v32 }
 0x620   :  { %v1982_v35 = vsel %vm194_vm0, %v1978_v34, 0.0 }
 0x621   :  { %1983 = vadd.xlane.f32.xlu0 %v1982_v35 }
 0x692   :  { %v1540_v46 = vpop.xlane.xlu1 %1539 }
 0x693   :  { %v1544_v47 = vmul.f32 0.03125, %v1540_v46 }
 0x695   :  { %v1546_v48 = vadd.f32 1e-05, %v1544_v47 }
 0x696   :  { %v1543_v49 = vpop.xlane.xlu1 %1542 }
 0x697   :  { %3144 = vrsqrt.f32 %v1546_v48  ;;  %v1545_v50 = vmul.f32 0.03125, %v1543_v49 }
 0x699   :  { %v1547_v51 = vadd.f32 1e-05, %v1545_v50 }
 0x69b   :  { %3146 = vrsqrt.f32 %v1547_v51 }
 0x6a1   :  { %v3145_v52 = vpop.eup %3144 }
 0x6a2   :  { %v1550_v55 = vmul.f32 %v3145_v52, %v1534_v19 }
 0x6a4   :  { %v1558_v58 = vmul.f32 %v2507_v53, %v1550_v55 }
 0x6a5   :  { %v3147_v59 = vpop.eup %3146 }
 0x6a6   :  { %v1551_v60 = vmul.f32 %v3147_v59, %v1535_v23  ;;  %v1566_v61 = vadd.f32 %v2508_v56, %v1558_v58 }
 0x6a8   :  { %v1559_v1 = vmul.f32 %v2507_v53, %v1551_v60  ;;  %2810 = vmatprep.mubr.msk.f32.mxu1 %vm194_vm0, %v1566_v61 }
 0x6aa   :  { %v1567_v2 = vadd.f32 %v2508_v56, %v1559_v1  ;;  %v1981_v3 = vpop.xlane.xlu0 %1980 }
 0x6ab   :  { %v1985_v5 = vmul.f32 0.03125, %v1981_v3  ;;  %v1694_v3 = vld [vmem:[%s2464_s17 + $0x8] sm:$0xff] }
 0x6ac   :  { %2811 = vmatmul.mubr.msk.f32.vlgmr.msra.gmra.mrb[4].mxu1 %vm194_vm0, %v1567_v2  ;;  %v1693_v2 = vld [vmem:[%s2464_s17] sm:$0xff] }
 0x6ad   :  { %v1987_v8 = vadd.f32 1e-05, %v1985_v5  ;;  %3029 = vmatpush3.bf16.msra.mxu1 %v3026_v44  ;;  %v2523_v44 = vld [vmem:[%s2461_s13] ss:$0 sm:$0xff]  ;;  %v1695_v5 = vld [vmem:[%s2464_s17 + $0x10] sm:$0xff] }
 0x6ae   :  { %v1984_v10 = vpop.xlane.xlu0 %1983  ;;  %3031 = vmatprep.subr.bf16.mxu1 %v3030_v4  ;;  %v3054_v7 = vpack.c.bf16 %v1696_v6, %v1695_v5 }
 0x6af   :  { %3148 = vrsqrt.f32 %v1987_v8  ;;  %v1986_v12 = vmul.f32 0.03125, %v1984_v10  ;;  %v85_v8 = vstv %s2465_s21 }
 0x6b0   :  { %86 = vst [vmem:[#allocation6] sm:$0x1] %v85_v8 }
 0x6b1   :  { %v1988_v9 = vadd.f32 1e-05, %v1986_v12  ;;  %3033 = vmatpush3.bf16.msra.mxu1 %v3030_v4  ;;  %v3050_v4 = vpack.c.bf16 %v1694_v3, %v1693_v2 }
 0x6b2   :  { %3035 = vmatprep.subr.bf16.mxu1 %v3034_v11 }
 0x6b3   :  { %3150 = vrsqrt.f32 %v1988_v9  ;;  %3051 = vmatprep.subr.bf16.mxu0 %v3050_v4 }
 0x6b4   :  { %3053 = vmatpush3.bf16.msra.mxu0 %v3050_v4 }
 0x6b5   :  { %3055 = vmatprep.subr.bf16.mxu0 %v3054_v7 }
 0x6b7   :  { %v2530_v25 = vld [vmem:[#allocation6] ss:$0 sm:$0xff] }
 0x6b8   :  { %3057 = vmatpush3.bf16.msra.mxu0 %v3054_v7 }
 0x6b9   :  { %v3149_v13 = vpop.eup %3148 }
 0x6ba   :  { %v1991_v15 = vmul.f32 %v3149_v13, %v3495_v29  ;;  %v1687_v29 = vld [vmem:[%s3511_s15 + $0x48] sm:$0xff] }
 0x6bb   :  { %v3042_v31 = vpack.c.bf16 %v1687_v29, %v1686_v28 }
 0x6bc   :  { %v1999_v17 = vmul.f32 %v2519_v14, %v1991_v15 }
 0x6bd   :  { %v3151_v18 = vpop.eup %3150 }
 0x6be   :  { %v2007_v19 = vadd.f32 %v2520_v16, %v1999_v17  ;;  %v1992_v20 = vmul.f32 %v3151_v18, %v3499_v32  ;;  %v1689_v32 = vld [vmem:[%s3511_s15 + $0x58] sm:$0xff] }
 0x6bf   :  { %v3046_v33 = vpack.c.bf16 %v1689_v32, %v1688_v0 }
 0x6c0   :  { %2013 = vst.msk [vmem:[#allocation3 + $0x1] sm:$0xff] %vm194_vm0, %v2007_v19  ;;  %v2000_v21 = vmul.f32 %v2519_v14, %v1992_v20  ;;  %v2529_v20 = vld [vmem:[%s2463_s29] ss:$0 sm:$0xff] }
 0x6c2   :  { %v2008_v22 = vadd.f32 %v2520_v16, %v2000_v21  ;;  %v2528_v16 = vld [vmem:[%s2462_s25] ss:$0 sm:$0xff] }
 0x6c4   :  { %2014 = vst.msk [vmem:[#allocation3 + $0x11] sm:$0xff] %vm194_vm0, %v2008_v22 }
 0x6c7   :  { %v2015_v23 = vld [vmem:[#allocation3] sm:$0xff] }
 0x6c8   :  { %2854 = vmatprep.mubr.msk.f32.mxu1 %vm194_vm0, %v2015_v23  ;;  %v2106_v30 = vld [vmem:[#allocation3 + $0x1] sm:$0xff] }
 0x6c9   :  { %v2191_v35 = vld [vmem:[#allocation3 + $0x2] sm:$0xff] }
 0x6cb   :  { %v2016_v27 = vld [vmem:[#allocation3 + $0x10] sm:$0xff] }
 0x6cc   :  { %2855 = vmatmul.mubr.msk.f32.vlgmr.msra.gmra.mrb[6].mxu1 %vm194_vm0, %v2016_v27  ;;  %v2107_v34 = vld [vmem:[#allocation3 + $0x11] sm:$0xff] }
 0x6cd   :  { %3037 = vmatpush3.bf16.msra.mxu1 %v3034_v11  ;;  %2865 = vmatprep.mubr.msk.f32.mxu1 %vm194_vm0, %v2106_v30  ;;  %v2192_v36 = vld [vmem:[#allocation3 + $0x12] sm:$0xff] }
 0x6ce   :  { %3039 = vmatprep.subr.bf16.mxu1 %v3038_v26 }
 0x6d1   :  { %3041 = vmatpush3.bf16.msra.mxu1 %v3038_v26 }
 0x6d2   :  { %3043 = vmatprep.subr.bf16.mxu1 %v3042_v31 }
 0x6d4   :  { %2866 = vmatmul.mubr.msk.f32.vlgmr.msra.gmra.mrb[6].mxu1 %vm194_vm0, %v2107_v34 }
 0x6d5   :  { %3045 = vmatpush3.bf16.msra.mxu1 %v3042_v31  ;;  %2876 = vmatprep.mubr.msk.f32.mxu1 %vm194_vm0, %v2191_v35 }
 0x6d6   :  { %3047 = vmatprep.subr.bf16.mxu1 %v3046_v33 }
 0x6d9   :  { %3049 = vmatpush3.bf16.msra.mxu1 %v3046_v33 }
 0x6dc   :  { %2877 = vmatmul.mubr.msk.f32.vlgmr.msra.gmra.mrb[6].mxu1 %vm194_vm0, %v2192_v36 }
 0x77f   :  { %v2812_v38 = vpop.f32.mrb[4].mxu1 }
 0x780   :  { %v1652_v39 = vadd.f32 %v2812_v38, %v2509_v37  ;;  %v1646_v40 = vpop.f32.mrb[5].mxu1 }
 0x781   :  { %v1647_v41 = vadd.f32 %v2509_v37, %v1646_v40 }
 0x782   :  { %v1656_v42 = vmul.f32 %v1652_v39, %v3475_v54 }
 0x783   :  { %v1655_v43 = vmul.f32 %v1647_v41, %v3477_v57 }
 0x784   :  { %1658 = vst.msk [vmem:[%s2468_s9 + $0x8] sm:$0xff] %vm908_vm2, %v1656_v42 }
 0x785   :  { %1657 = vst.msk [vmem:[%s2468_s9] sm:$0xff] %vm908_vm2, %v1655_v43 }
 0x7af   :  { %v2878_v45 = vpop.f32.mrb[6].mxu1 }
 0x7b0   :  { %v3068_v46 = vadd.f32 %v2878_v45, %v2523_v44  ;;  %v2265_v47 = vpop.f32.mrb[7].mxu1 }
 0x7b1   :  { %v3069_v48 = vadd.f32 %v2523_v44, %v2265_v47 }
 0x7b2   :  { %v2277_v49 = vmax.f32 %v3068_v46, 0.0 }
 0x7b3   :  { %v2276_v50 = vmax.f32 %v3069_v48, 0.0 }
 0x7b4   :  { %v2281_v51 = vsel %vm194_vm0, %v2277_v49, 0.0 }
 0x7b5   :  { %2282 = vadd.xlane.f32.xlu1 %v2281_v51  ;;  %v2278_v52 = vsel %vm194_vm0, %v2276_v50, 0.0 }
 0x7b6   :  { %2279 = vadd.xlane.f32.xlu0 %v2278_v52 }
 0x842   :  { %v2283_v53 = vpop.xlane.xlu1 %2282 }
 0x843   :  { %v2285_v55 = vmul.f32 0.03125, %v2283_v53  ;;  %v2280_v56 = vpop.xlane.xlu0 %2279 }
 0x844   :  { %v2284_v58 = vmul.f32 0.03125, %v2280_v56 }
 0x845   :  { %v2287_v59 = vsub.f32 %v2277_v49, %v2285_v55 }
 0x846   :  { %v2286_v60 = vsub.f32 %v2276_v50, %v2284_v58 }
 0x847   :  { %v2289_v61 = vmul.f32 %v2287_v59, %v2287_v59 }
 0x848   :  { %v2288_v62 = vmul.f32 %v2286_v60, %v2286_v60 }
 0x849   :  { %v2293_v63 = vsel %vm194_vm0, %v2289_v61, 0.0 }
 0x84a   :  { %2294 = vadd.xlane.f32.xlu1 %v2293_v63  ;;  %v2290_v1 = vsel %vm194_vm0, %v2288_v62, 0.0 }
 0x84b   :  { %2291 = vadd.xlane.f32.xlu0 %v2290_v1 }
 0x8d7   :  { %v2295_v10 = vpop.xlane.xlu1 %2294 }
 0x8d8   :  { %v2297_v11 = vmul.f32 0.03125, %v2295_v10  ;;  %v2292_v12 = vpop.xlane.xlu0 %2291 }
 0x8d9   :  { %v2296_v9 = vmul.f32 0.03125, %v2292_v12 }
 0x8da   :  { %v2299_v13 = vadd.f32 1e-05, %v2297_v11 }
 0x8db   :  { %v2298_v14 = vadd.f32 1e-05, %v2296_v9 }
 0x8dc   :  { %3152 = vrsqrt.f32 %v2299_v13 }
 0x8dd   :  { %3154 = vrsqrt.f32 %v2298_v14 }
 0x8e6   :  { %v3153_v15 = vpop.eup %3152 }
 0x8e7   :  { %v3155_v17 = vpop.eup %3154  ;;  %v2303_v18 = vmul.f32 %v3153_v15, %v2287_v59 }
 0x8e8   :  { %v2302_v19 = vmul.f32 %v3155_v17, %v2286_v60 }
 0x8e9   :  { %v2311_v21 = vmul.f32 %v2528_v16, %v2303_v18 }
 0x8ea   :  { %v2310_v22 = vmul.f32 %v2528_v16, %v2302_v19 }
 0x8eb   :  { %v2319_v24 = vadd.f32 %v2529_v20, %v2311_v21 }
 0x8ec   :  { %v2318_v23 = vadd.f32 %v2529_v20, %v2310_v22 }
 0x8ee   :  { %2887 = vmatprep.mubr.msk.f32.mxu0 %vm194_vm0, %v2318_v23 }
 0x8ef   :  { %2888 = vmatmul.mubr.msk.f32.vlgmr.msra.gmra.mrb[8].mxu0 %vm194_vm0, %v2319_v24 }
 0x9c2   :  { %v2889_v26 = vpop.f32.mrb[8].mxu0 }
 0x9c3   :  { %v2404_v27 = vadd.f32 %v2889_v26, %v2530_v25  ;;  %v2398_v28 = vpop.f32.mrb[9].mxu0 }
 0x9c4   :  { %v2399_v29 = vadd.f32 %v2530_v25, %v2398_v28 }
 0x9c5   :  { %v2408_v30 = vmul.f32 %v2404_v27, %v3475_v54 }
 0x9c6   :  { %v2407_v31 = vmul.f32 %v2399_v29, %v3477_v57 }
 0x9c7   :  { %2410 = vst.msk [vmem:[%s2469_s3 + $0x8] sm:$0xff] %vm908_vm2, %v2408_v30 }
 0x9c8   :  { %2409 = vst.msk [vmem:[%s2469_s3] sm:$0xff] %vm908_vm2, %v2407_v31 }

// kernel: fastspeech2_forward.7
= control target key start
LH: loop header
LB: loop body
LE: loop exit
PB: predicated region body
PF: predicated region fallthrough
CT: control target
= control target key end

     0   :  { %vm253_vm0 = vcmask 261120   ;;  %v2903_v0 = vmov 0.0|0.0   ;;  %s2904_s3 = smov 5   ;;  %vm2905_vm1 = vmmov 0   ;;  %v2906_v1 = vmov 0.0   ;;  %s2907_s10 = smov 3   ;;  %s3313_s0 = inlined_call_operand.smem [shape: u32[30], index: -1, kind: input, shape index: {}] }
   0x1   :  { %2635 = vmatprep.subr.bf16.mxu1 %v2903_v0  ;;  %s2148_s6 = sld [smem:[%s3313_s0 + %s2904_s3]]   ;;  %2403 = vmatprep.mubr.msk.f32.mxu1 %vm2905_vm1, %v2906_v1  ;;  %578 = vst.msk [vmem:[#allocation2] sm:$0xff] %vm253_vm0, %v2906_v1  ;;  %579 = vst.msk [vmem:[#allocation2 + $0x8] sm:$0xff] %vm253_vm0, %v2906_v1  ;;  %s2908_s14 = smov 1   ;;  %vm140_vm2 = vcmask 130048   ;;  %vm580_vm3 = vcmask 254976   ;;  %vm1324_vm4 = vcmask 257024  }
   0x2   :  { %582 = vst.msk [vmem:[#allocation2 + $0x18] sm:$0xff] %vm253_vm0, %v2906_v1  ;;  %583 = vst.msk [vmem:[#allocation2 + $0x20] sm:$0xff] %vm253_vm0, %v2906_v1  ;;  %s2967_s9 = sld [smem:[%s3313_s0]]   ;;  %s2909_s18 = smov 7  }
   0x3   :  { %1322 = vst.msk [vmem:[#allocation3] sm:$0xff] %vm253_vm0, %v2906_v1  ;;  %1323 = vst.msk [vmem:[#allocation3 + $0x8] sm:$0xff] %vm253_vm0, %v2906_v1  ;;  %s2146_s13 = sld [smem:[%s3313_s0 + %s2907_s10]]   ;;  %s2910_s22 = smov 6  }
   0x4   :  { %1326 = vst.msk [vmem:[#allocation3 + $0x18] sm:$0xff] %vm253_vm0, %v2906_v1  ;;  %1327 = vst.msk [vmem:[#allocation3 + $0x20] sm:$0xff] %vm253_vm0, %v2906_v1  ;;  %s2144_s17 = sld [smem:[%s3313_s0 + %s2908_s14]]   ;;  %s2911_s26 = smov 9  }
   0x5   :  { %s2988_s21 = sld [smem:[%s3313_s0 + %s2909_s18]]   ;;  %s2912_s30 = smov 8   ;;  %581 = vst.msk [vmem:[#allocation2 + $0x10] sm:$0x3] %vm580_vm3, %v2906_v1  ;;  %584 = vst.msk [vmem:[#allocation2 + $0x28] sm:$0x3] %vm580_vm3, %v2906_v1 }
   0x6   :  { %s2149_s25 = sld [smem:[%s3313_s0 + %s2910_s22]]   ;;  %s2913_s4 = smov 11   ;;  %1325 = vst.msk [vmem:[#allocation3 + $0x10] sm:$0xf] %vm1324_vm4, %v2906_v1  ;;  %1328 = vst.msk [vmem:[#allocation3 + $0x28] sm:$0xf] %vm1324_vm4, %v2906_v1 }
   0x7   :  { %v242_v2 = vld [vmem:[%s2148_s6] sm:$0xff]  ;;  %v243_v3 = vld [vmem:[%s2148_s6 + $0x8] sm:$0xff]  ;;  %v244_v4 = vld [vmem:[%s2148_s6 + $0x10] sm:$0xff]  ;;  %s2152_s29 = sld [smem:[%s3313_s0 + %s2911_s26]]   ;;  %s2914_s8 = smov 10  }
   0x8   :  { %v2636_v5 = vpack.c.bf16 %v243_v3, %v242_v2  ;;  %v245_v6 = vld [vmem:[%s2148_s6 + $0x18] sm:$0xff]  ;;  %v122_v7 = vld [vmem:[%s2967_s9] sm:$0xff]  ;;  %v123_v12 = vld [vmem:[%s2967_s9 + $0x8] sm:$0xff]  ;;  %s2151_s3 = sld [smem:[%s3313_s0 + %s2912_s30]]   ;;  %s2916_s12 = smov 4  }
   0x9   :  { %v131_v8 = vld [vmem:[%s2146_s13] sm:$0xff]  ;;  %v132_v9 = vld [vmem:[%s2146_s13 + $0x8] sm:$0xff]  ;;  %2389 = vmatprep.mubr.msk.f32.mxu0 %vm140_vm2, %v122_v7  ;;  %v2639_v10 = vpack.c.bf16 %v245_v6, %v244_v4  ;;  %v124_v35 = vld [vmem:[%s2967_s9 + $0x10] sm:$0xff]  ;;  %s3044_s7 = sld [smem:[%s3313_s0 + %s2913_s4]]   ;;  %s2917_s16 = smov 13  }
   0xa   :  { %2637 = vmatpush3.bf16.msra.mxu1 %v2636_v5  ;;  %v2631_v11 = vpack.c.bf16 %v132_v9, %v131_v8  ;;  %v130_v13 = vld [vmem:[%s2144_s17] sm:$0x3]  ;;  %v125_v36 = vld [vmem:[%s2967_s9 + $0x18] sm:$0xff]  ;;  %s2153_s11 = sld [smem:[%s3313_s0 + %s2914_s8]]   ;;  %s2918_s20 = smov 2  }
   0xb   :  { %2638 = vmatprep.subr.bf16.mxu1 %v2903_v0  ;;  %v334_v14 = vld [vmem:[%s2988_s21] sm:$0xff]  ;;  %v335_v15 = vld [vmem:[%s2988_s21 + $0x8] sm:$0xff]  ;;  %v336_v17 = vld [vmem:[%s2988_s21 + $0x10] sm:$0xff]  ;;  %s2147_s15 = sld [smem:[%s3313_s0 + %s2916_s12]]   ;;  %s2919_s24 = smov 15  }
   0xc   :  { %2632 = vmatprep.subr.bf16.mxu0 %v2631_v11  ;;  %v2642_v16 = vpack.c.bf16 %v335_v15, %v334_v14  ;;  %v337_v18 = vld [vmem:[%s2988_s21 + $0x18] sm:$0xff]  ;;  %v338_v20 = vld [vmem:[%s2988_s21 + $0x20] sm:$0xff]  ;;  %v339_v21 = vld [vmem:[%s2988_s21 + $0x28] sm:$0xff]  ;;  %v2915_v15 = vmov 1966171168   ;;  %s2156_s19 = sld [smem:[%s3313_s0 + %s2917_s16]]   ;;  %s2920_s28 = smov 12  }
   0xd   :  { %2634 = vmatpush3.bf16.msra.mxu0 %v2631_v11  ;;  %v2645_v19 = vpack.c.bf16 %v337_v18, %v336_v17  ;;  %v2648_v22 = vpack.c.bf16 %v339_v21, %v338_v20  ;;  %v340_v23 = vld [vmem:[%s2988_s21 + $0x30] sm:$0xff]  ;;  %v341_v24 = vld [vmem:[%s2988_s21 + $0x38] sm:$0xff]  ;;  %v342_v26 = vld [vmem:[%s2988_s21 + $0x40] sm:$0xff]  ;;  %v545_v17 = vlaneseq  ;;  %s2145_s23 = sld [smem:[%s3313_s0 + %s2918_s20]]   ;;  %s2921_s2 = smov 14  }
   0xe   :  { %2640 = vmatpush3.bf16.msra.mxu1 %v2639_v10  ;;  %2641 = vmatprep.subr.bf16.mxu0 %v2903_v0  ;;  %v2651_v25 = vpack.c.bf16 %v341_v24, %v340_v23  ;;  %v343_v27 = vld [vmem:[%s2988_s21 + $0x48] sm:$0xff]  ;;  %v344_v29 = vld [vmem:[%s2988_s21 + $0x50] sm:$0xff]  ;;  %v345_v30 = vld [vmem:[%s2988_s21 + $0x58] sm:$0xff]  ;;  %s3140_s27 = sld [smem:[%s3313_s0 + %s2919_s24]]   ;;  %s2922_s6 = smov 96  }
   0xf   :  { %2665 = vmatprep.subr.bf16.mxu1 %v2903_v0  ;;  %v2654_v28 = vpack.c.bf16 %v343_v27, %v342_v26  ;;  %v2657_v31 = vpack.c.bf16 %v345_v30, %v344_v29  ;;  %v346_v32 = vld [vmem:[%s2988_s21 + $0x60] sm:$0xff]  ;;  %v347_v33 = vld [vmem:[%s2988_s21 + $0x68] sm:$0xff]  ;;  %v348_v37 = vld [vmem:[%s2988_s21 + $0x70] sm:$0xff]  ;;  %s2155_s1 = sld [smem:[%s3313_s0 + %s2920_s28]]  }
  0x10   :  { %2390 = vmatmul.mubr.msk.f32.vlgmr.msra.gmra.mrb[0].mxu0 %vm140_vm2, %v123_v12  ;;  %v2660_v34 = vpack.c.bf16 %v347_v33, %v346_v32  ;;  %v349_v38 = vld [vmem:[%s2988_s21 + $0x78] sm:$0xff]  ;;  %v2178_v40 = vld [vmem:[%s2149_s25] ss:$0 sm:$0xff]  ;;  %v435_v54 = vld [vmem:[%s2152_s29 + $0x8] sm:$0xff]  ;;  %s2157_s5 = sld [smem:[%s3313_s0 + %s2921_s2]]   ;;  %s2935_s25 = smov 28  }
  0x11   :  { %2404 = vmatmul.mubr.msk.f32.vlgmr.msra.gmra.mrb[0].mxu1 %vm253_vm0, %v130_v13  ;;  %2643 = vmatpush3.bf16.msra.mxu0 %v2642_v16  ;;  %v2663_v39 = vpack.c.bf16 %v349_v38, %v348_v37  ;;  %v434_v53 = vld [vmem:[%s2152_s29] sm:$0xff]  ;;  %v436_v56 = vld [vmem:[%s2152_s29 + $0x10] sm:$0xff]  ;;  %v437_v57 = vld [vmem:[%s2152_s29 + $0x18] sm:$0xff]  ;;  %v543_v16 = vunpack.c.l.s4 %v2915_v15  ;;  %s2171_s28 = sld [smem:[%s3313_s0 + %s2935_s25]]   ;;  %s2936_s29 = smov 29  }
  0x12   :  { %2449 = vmatprep.mubr.msk.f32.mxu1 %vm2905_vm1, %v2906_v1  ;;  %2644 = vmatprep.subr.bf16.mxu0 %v2903_v0  ;;  %v2666_v55 = vpack.c.bf16 %v435_v54, %v434_v53  ;;  %v2669_v58 = vpack.c.bf16 %v437_v57, %v436_v56  ;;  %v2181_v59 = vld [vmem:[%s2151_s3] ss:$0 sm:$0xff]  ;;  %v440_v7 = vld [vmem:[%s3044_s7 + $0x8] sm:$0xff]  ;;  %v441_v9 = vld [vmem:[%s3044_s7 + $0x10] sm:$0xff]  ;;  %s2172_s2 = sld [smem:[%s3313_s0 + %s2936_s29]]  }
  0x13   :  { %2392 = vmatprep.mubr.msk.f32.mxu0 %vm140_vm2, %v124_v35  ;;  %v439_v6 = vld [vmem:[%s3044_s7] sm:$0xff]  ;;  %v442_v10 = vld [vmem:[%s3044_s7 + $0x18] sm:$0xff]  ;;  %v444_v13 = vld [vmem:[%s3044_s7 + $0x28] sm:$0xff]  ;;  %v544_v18 = vunpack.c.0.s8 %v543_v16 }
  0x14   :  { %2393 = vmatmul.mubr.msk.f32.gmra.mrb[2].mxu0 %vm140_vm2, %v125_v36  ;;  %2667 = vmatpush3.bf16.msra.mxu1 %v2666_v55  ;;  %v2671_v8 = vpack.c.bf16 %v440_v7, %v439_v6  ;;  %v2675_v11 = vpack.c.bf16 %v442_v10, %v441_v9  ;;  %v443_v12 = vld [vmem:[%s3044_s7 + $0x20] sm:$0xff]  ;;  %v449_v55 = vld [vmem:[%s3044_s7 + $0x50] sm:$0xff]  ;;  %v450_v56 = vld [vmem:[%s3044_s7 + $0x58] sm:$0xff] }
  0x15   :  { %2646 = vmatpush3.bf16.msra.mxu0 %v2645_v19  ;;  %2438 = vmatprep.mubr.msk.f32.mxu0 %vm2905_vm1, %v2906_v1  ;;  %v2679_v14 = vpack.c.bf16 %v444_v13, %v443_v12  ;;  %v546_v19 = vshrl.u32 %v545_v17, 7  ;;  %v2183_v20 = vld [vmem:[%s2153_s11] ss:$0 sm:$0xff]  ;;  %v3125_v12 = vld [vmem:[%s2145_s23 + $0x8] sm:$0xff]  ;;  %v3127_v13 = vld [vmem:[%s2145_s23 + $0x10] sm:$0xff]  ;;  %s2924_s11 = smov 19  }
  0x16   :  { %2647 = vmatprep.subr.bf16.mxu0 %v2903_v0  ;;  %2668 = vmatprep.subr.bf16.mxu1 %v2903_v0  ;;  %v3120_v10 = vld [vmem:[%s2145_s23] sm:$0xff]  ;;  %v458_v16 = vld [vmem:[%s3140_s27 + $0x8] sm:$0xff]  ;;  %s3172_s14 = sld [smem:[%s3313_s0 + %s2924_s11]]  }
  0x17   :  { %v3060_v21 = vsub.s32 %v544_v18, %v546_v19  ;;  %v3069_v29 = vsub.s32 0, %v546_v19  ;;  %v457_v15 = vld [vmem:[%s3140_s27] sm:$0xff] }
  0x18   :  { %2670 = vmatpush3.bf16.msra.mxu1 %v2669_v58  ;;  %v2691_v58 = vpack.c.bf16 %v450_v56, %v449_v55  ;;  %v2703_v17 = vpack.c.bf16 %v458_v16, %v457_v15  ;;  %v2189_v18 = vld [vmem:[%s2155_s1] ss:$0 sm:$0xff]  ;;  %s2929_s1 = smov 20  }
  0x19   :  { %2649 = vmatpush3.bf16.msra.mxu0 %v2648_v22  ;;  %2672 = vmatprep.subr.bf16.mxu1 %v2671_v8  ;;  %v2173_v22 = vld [vmem:[%s2147_s15] ss:$0 sm:$0xff]  ;;  %s2925_s15 = smov 16   ;;  %s2163_s4 = sld [smem:[%s3313_s0 + %s2929_s1]]  }
  0x1a   :  { %2650 = vmatprep.subr.bf16.mxu0 %v2903_v0  ;;  %v2198_v19 = vld [vmem:[%s2157_s5] ss:$0 sm:$0xff]  ;;  %s2159_s18 = sld [smem:[%s3313_s0 + %s2925_s15]]   ;;  %s2930_s5 = smov 22  }
  0x1b   :  { %s2165_s9 = sld [smem:[%s3313_s0 + %s2930_s5]]  }
  0x1d   :  { %2652 = vmatpush3.bf16.msra.mxu0 %v2651_v25 }
  0x1e   :  { %2653 = vmatprep.subr.bf16.mxu0 %v2903_v0 }
  0x21   :  { %2655 = vmatpush3.bf16.msra.mxu0 %v2654_v28 }
  0x22   :  { %2656 = vmatprep.subr.bf16.mxu0 %v2903_v0 }
  0x25   :  { %2658 = vmatpush3.bf16.msra.mxu0 %v2657_v31 }
  0x26   :  { %2659 = vmatprep.subr.bf16.mxu0 %v2903_v0 }
  0x29   :  { %2661 = vmatpush3.bf16.msra.mxu0 %v2660_v34 }
  0x2a   :  { %2662 = vmatprep.subr.bf16.mxu0 %v2903_v0 }
  0x2d   :  { %2664 = vmatpush3.bf16.msra.mxu0 %v2663_v39 }
  0x2e   :  { %2704 = vmatprep.subr.bf16.mxu0 %v2703_v17 }
  0xe3   :  { %v3022_v41 = vpop.f32.mrb[0].mxu0 }
  0xe4   :  { %v323_v42 = vpop.f32.mrb[0].mxu1  ;;  %v3024_v43 = vpop.f32.mrb[1].mxu0  ;;  %v3063_v26 = vadd.f32 %v3022_v41, %v2173_v22 }
  0xe5   :  { %v324_v44 = vadd.f32 %v2178_v40, %v323_v42  ;;  %v2405_v45 = vpop.f32.mrb[1].mxu1  ;;  %v3066_v27 = vadd.f32 %v2173_v22, %v3024_v43 }
  0xe6   :  { %v239_v34 = vmax.f32 %v3063_v26, 0.0  ;;  %v445_v45 = vld [vmem:[%s3044_s7 + $0x30] sm:$0xff] }
  0xe7   :  { %v2180_v46 = vmul.f32 -1.442695, %v324_v44  ;;  %v3026_v51 = vpop.f32.mrb[2].mxu0  ;;  %v238_v35 = vmax.f32 %v3066_v27, 0.0 }
  0xe8   :  { %v3028_v52 = vpop.f32.mrb[3].mxu0  ;;  %v3072_v30 = vadd.f32 %v3026_v51, %v2173_v22  ;;  %v448_v51 = vld [vmem:[%s3044_s7 + $0x48] sm:$0xff] }
  0xe9   :  { %2847 = vpow2.f32 %v2180_v46  ;;  %v3075_v31 = vadd.f32 %v2173_v22, %v3028_v52  ;;  %v446_v46 = vld [vmem:[%s3044_s7 + $0x38] sm:$0xff] }
  0xea   :  { %v241_v38 = vmax.f32 %v3072_v30, 0.0 }
  0xeb   :  { %v240_v39 = vmax.f32 %v3075_v31, 0.0 }
  0xf3   :  { %v2848_v47 = vpop.eup %2847 }
  0xf4   :  { %v330_v48 = vadd.f32 1.0, %v2848_v47 }
  0xf6   :  { %2849 = vrcp.f32 %v330_v48 }
 0x100   :  { %v2850_v49 = vpop.eup %2849 }
 0x101   :  { %v333_v50 = vmul.f32 %v2850_v49, %v324_v44  ;;  %v2683_v49 = vpack.c.bf16 %v446_v46, %v445_v45 }
 0x103   :  { %2439 = vmatmul.mubr.f32.vlgmr.msra.gmra.mrb[4].mxu0 %v333_v50  ;;  %v447_v50 = vld [vmem:[%s3044_s7 + $0x40] sm:$0xff]  ;;  %s2923_s7 = smov 17  }
 0x104   :  { %v2687_v53 = vpack.c.bf16 %v448_v51, %v447_v50  ;;  %2706 = vmatpush3.bf16.msra.mxu0 %v2703_v17  ;;  %s2160_s10 = sld [smem:[%s3313_s0 + %s2923_s7]]  }
 0x10a   :  { %v1184_v15 = vld [vmem:[%s2160_s10 + $0x18] sm:$0xff] }
 0x1d6   :  { %v423_v60 = vpop.f32.mrb[4].mxu0 }
 0x1d7   :  { %v424_v61 = vadd.f32 %v2181_v59, %v423_v60  ;;  %v2440_v62 = vpop.f32.mrb[5].mxu0  ;;  %v452_v60 = vld [vmem:[%s2156_s19] sm:$0xff] }
 0x1d9   :  { %v2182_v63 = vmul.f32 -1.442695, %v424_v61 }
 0x1db   :  { %2851 = vpow2.f32 %v2182_v63 }
 0x1e5   :  { %v2852_v2 = vpop.eup %2851 }
 0x1e6   :  { %v430_v3 = vadd.f32 1.0, %v2852_v2 }
 0x1e8   :  { %2853 = vrcp.f32 %v430_v3  ;;  %v454_v3 = vld [vmem:[%s2156_s19 + $0x10] sm:$0xff] }
 0x1f2   :  { %v2854_v4 = vpop.eup %2853 }
 0x1f3   :  { %v3037_v5 = vmul.f32 %v2854_v4, %v424_v61  ;;  %v453_v61 = vld [vmem:[%s2156_s19 + $0x8] sm:$0xff]  ;;  %v455_v4 = vld [vmem:[%s2156_s19 + $0x18] sm:$0xff]  ;;  %s2926_s19 = smov 18  }
 0x1f4   :  { %v2695_v63 = vpack.c.bf16 %v453_v61, %v452_v60  ;;  %v2699_v7 = vpack.c.bf16 %v455_v4, %v454_v3  ;;  %s2161_s22 = sld [smem:[%s3313_s0 + %s2926_s19]]  }
 0x1f5   :  { %2450 = vmatmul.mubr.msk.f32.vlgmr.msra.gmra.mrb[2].mxu1 %vm253_vm0, %v3037_v5 }
 0x1f6   :  { %2674 = vmatpush3.bf16.msra.mxu1 %v2671_v8 }
 0x1f7   :  { %2676 = vmatprep.subr.bf16.mxu1 %v2675_v11 }
 0x1fa   :  { %2678 = vmatpush3.bf16.msra.mxu1 %v2675_v11 }
 0x1fb   :  { %2680 = vmatprep.subr.bf16.mxu1 %v2679_v14 }
 0x2c8   :  { %v537_v23 = vpop.f32.mrb[2].mxu1 }
 0x2c9   :  { %v538_v24 = vadd.f32 %v2183_v20, %v537_v23  ;;  %v2451_v25 = vpop.f32.mrb[3].mxu1 }
 0x2cb   :  { %v548_v28 = vrot.slane %v538_v24, %v3060_v21  ;;  %v2779_v24 = vadd.f32 %v2198_v19, %v2189_v18 }
 0x2cd   :  { %v549_v32 = vcombine.high %v548_v28, %v548_v28  ;;  %v556_v33 = vrot.slane %v548_v28, %v3060_v21 }
 0x2cf   :  { %v563_v36 = vrot.slane %v549_v32, %v3060_v21  ;;  %v567_v37 = vrot.slane %v556_v33, %v3069_v29 }
 0x2d1   :  { %v571_v40 = vrot.slane %v563_v36, %v3069_v29  ;;  %v574_v41 = vadd.f32 %v567_v37, %v238_v35  ;;  %v575_v42 = vadd.f32 %v567_v37, %v239_v34 }
 0x2d3   :  { %v576_v43 = vadd.f32 %v571_v40, %v240_v39  ;;  %v577_v44 = vadd.f32 %v571_v40, %v241_v38  ;;  %585 = vst.msk [vmem:[#allocation2 + $0x1] sm:$0xff] %vm253_vm0, %v574_v41  ;;  %586 = vst.msk [vmem:[#allocation2 + $0x9] sm:$0xff] %vm253_vm0, %v575_v42 }
 0x2d5   :  { %587 = vst.msk [vmem:[#allocation2 + $0x19] sm:$0xff] %vm253_vm0, %v576_v43  ;;  %588 = vst.msk [vmem:[#allocation2 + $0x21] sm:$0xff] %vm253_vm0, %v577_v44 }
 0x2da   :  { %v589_v47 = vld [vmem:[#allocation2] sm:$0xff]  ;;  %v590_v48 = vld [vmem:[#allocation2 + $0x8] sm:$0xff] }
 0x2db   :  { %2460 = vmatprep.mubr.msk.f32.mxu1 %vm253_vm0, %v589_v47  ;;  %v700_v57 = vld [vmem:[#allocation2 + $0x1] sm:$0xff]  ;;  %v701_v59 = vld [vmem:[#allocation2 + $0x9] sm:$0xff] }
 0x2dc   :  { %2461 = vmatmul.mubr.msk.f32.vlgmr.msra.gmra.mrb[4].mxu1 %vm253_vm0, %v590_v48  ;;  %v591_v52 = vld [vmem:[#allocation2 + $0x18] sm:$0xff]  ;;  %v592_v54 = vld [vmem:[#allocation2 + $0x20] sm:$0xff]  ;;  %v806_v8 = vld [vmem:[#allocation2 + $0xa] sm:$0xff] }
 0x2dd   :  { %2682 = vmatpush3.bf16.msra.mxu1 %v2679_v14  ;;  %2463 = vmatprep.mubr.msk.f32.mxu1 %vm253_vm0, %v591_v52  ;;  %v702_v62 = vld [vmem:[#allocation2 + $0x19] sm:$0xff]  ;;  %v703_v2 = vld [vmem:[#allocation2 + $0x21] sm:$0xff]  ;;  %v459_v48 = vld [vmem:[%s3140_s27 + $0x10] sm:$0xff] }
 0x2de   :  { %2684 = vmatprep.subr.bf16.mxu1 %v2683_v49  ;;  %v805_v6 = vld [vmem:[#allocation2 + $0x2] sm:$0xff]  ;;  %v807_v9 = vld [vmem:[#allocation2 + $0x1a] sm:$0xff] }
 0x2df   :  { %v808_v11 = vld [vmem:[#allocation2 + $0x22] sm:$0xff]  ;;  %v3133_v14 = vld [vmem:[%s2145_s23 + $0x18] sm:$0xff]  ;;  %s2927_s23 = smov 21  }
 0x2e0   :  { %2464 = vmatmul.mubr.msk.f32.gmra.mrb[6].mxu1 %vm253_vm0, %v592_v54  ;;  %s2164_s26 = sld [smem:[%s3313_s0 + %s2927_s23]]  }
 0x2e1   :  { %2686 = vmatpush3.bf16.msra.mxu1 %v2683_v49  ;;  %2474 = vmatprep.mubr.msk.f32.mxu1 %vm253_vm0, %v700_v57  ;;  %v460_v49 = vld [vmem:[%s3140_s27 + $0x18] sm:$0xff]  ;;  %s2928_s27 = smov 23  }
 0x2e2   :  { %2688 = vmatprep.subr.bf16.mxu1 %v2687_v53  ;;  %v2707_v51 = vpack.c.bf16 %v460_v49, %v459_v48  ;;  %s3249_s30 = sld [smem:[%s3313_s0 + %s2928_s27]]  }
 0x2e4   :  { %2475 = vmatmul.mubr.msk.f32.vlgmr.msra.gmra.mrb[4].mxu1 %vm253_vm0, %v701_v59  ;;  %2708 = vmatprep.subr.bf16.mxu0 %v2707_v51 }
 0x2e5   :  { %2690 = vmatpush3.bf16.msra.mxu1 %v2687_v53  ;;  %2477 = vmatprep.mubr.msk.f32.mxu1 %vm253_vm0, %v702_v62 }
 0x2e6   :  { %2692 = vmatprep.subr.bf16.mxu1 %v2691_v58  ;;  %2710 = vmatpush3.bf16.msra.mxu0 %v2707_v51 }
 0x2e7   :  { %2711 = vmatprep.subr.bf16.mxu0 %v2903_v0 }
 0x2e8   :  { %2478 = vmatmul.mubr.msk.f32.gmra.mrb[6].mxu1 %vm253_vm0, %v703_v2  ;;  %v1182_v2 = vld [vmem:[%s2160_s10 + $0x8] sm:$0xff] }
 0x2e9   :  { %2694 = vmatpush3.bf16.msra.mxu1 %v2691_v58  ;;  %2488 = vmatprep.mubr.msk.f32.mxu1 %vm253_vm0, %v805_v6 }
 0x2ea   :  { %2696 = vmatprep.subr.bf16.mxu1 %v2695_v63 }
 0x2ec   :  { %2489 = vmatmul.mubr.msk.f32.vlgmr.msra.gmra.mrb[4].mxu1 %vm253_vm0, %v806_v8 }
 0x2ed   :  { %2698 = vmatpush3.bf16.msra.mxu1 %v2695_v63  ;;  %2491 = vmatprep.mubr.msk.f32.mxu1 %vm253_vm0, %v807_v9  ;;  %v1181_v63 = vld [vmem:[%s2160_s10] sm:$0xff] }
 0x2ee   :  { %2700 = vmatprep.subr.bf16.mxu1 %v2699_v7 }
 0x2f0   :  { %2492 = vmatmul.mubr.msk.f32.gmra.mrb[6].mxu1 %vm253_vm0, %v808_v11  ;;  %v1183_v11 = vld [vmem:[%s2160_s10 + $0x10] sm:$0xff]  ;;  %s2931_s10 = smov 25  }
 0x2f1   :  { %2702 = vmatpush3.bf16.msra.mxu1 %v2699_v7  ;;  %2502 = vmatprep.mubr.msk.f32.mxu1 %vm253_vm0, %v3120_v10  ;;  %v2712_v7 = vpack.c.bf16 %v1182_v2, %v1181_v63  ;;  %v1194_v63 = vld [vmem:[%s3172_s14 + $0x40] sm:$0xff]  ;;  %v1195_v2 = vld [vmem:[%s3172_s14 + $0x48] sm:$0xff]  ;;  %s2168_s13 = sld [smem:[%s3313_s0 + %s2931_s10]]  }
 0x2f4   :  { %2503 = vmatmul.mubr.msk.f32.vlgmr.msra.gmra.mrb[4].mxu1 %vm253_vm0, %v3125_v12 }
 0x2f5   :  { %2505 = vmatprep.mubr.msk.f32.mxu1 %vm253_vm0, %v3127_v13 }
 0x2f8   :  { %2506 = vmatmul.mubr.msk.f32.gmra.mrb[6].mxu1 %vm253_vm0, %v3133_v14 }
 0x3c7   :  { %v2504_v20 = vpop.f32.mrb[4].mxu1 }
 0x3c8   :  { %v2773_v22 = vadd.f32 %v2504_v20, %v2189_v18  ;;  %v994_v23 = vpop.f32.mrb[5].mxu1 }
 0x3c9   :  { %v2775_v25 = vadd.f32 %v2189_v18, %v994_v23  ;;  %v1188_v23 = vld [vmem:[%s3172_s14 + $0x10] sm:$0xff] }
 0x3ca   :  { %v2774_v28 = vadd.f32 %v2773_v22, %v2198_v19  ;;  %v1187_v22 = vld [vmem:[%s3172_s14 + $0x8] sm:$0xff] }
 0x3cb   :  { %v2776_v32 = vadd.f32 %v2775_v25, %v2198_v19  ;;  %v2507_v33 = vpop.f32.mrb[6].mxu1  ;;  %v2715_v19 = vpack.c.bf16 %v1184_v15, %v1183_v11 }
 0x3cc   :  { %v2204_v36 = vmul.f32 -1.442695, %v2774_v28  ;;  %v2778_v37 = vadd.f32 %v2779_v24, %v2507_v33  ;;  %v1004_v40 = vpop.f32.mrb[7].mxu1 }
 0x3cd   :  { %v2203_v41 = vmul.f32 -1.442695, %v2776_v32  ;;  %v2780_v42 = vadd.f32 %v2779_v24, %v1004_v40  ;;  %v1189_v24 = vld [vmem:[%s3172_s14 + $0x18] sm:$0xff] }
 0x3ce   :  { %2855 = vpow2.f32 %v2204_v36  ;;  %v2206_v43 = vmul.f32 -1.442695, %v2778_v37  ;;  %v2721_v25 = vpack.c.bf16 %v1189_v24, %v1188_v23 }
 0x3cf   :  { %2857 = vpow2.f32 %v2203_v41  ;;  %v2205_v44 = vmul.f32 -1.442695, %v2780_v42 }
 0x3d0   :  { %2859 = vpow2.f32 %v2206_v43 }
 0x3d1   :  { %2861 = vpow2.f32 %v2205_v44 }
 0x3d8   :  { %v2856_v45 = vpop.eup %2855 }
 0x3d9   :  { %v2858_v46 = vpop.eup %2857  ;;  %v1034_v50 = vadd.f32 1.0, %v2856_v45 }
 0x3da   :  { %v1033_v47 = vadd.f32 1.0, %v2858_v46  ;;  %v2860_v52 = vpop.eup %2859 }
 0x3db   :  { %v2862_v53 = vpop.eup %2861  ;;  %v1036_v55 = vadd.f32 1.0, %v2860_v52 }
 0x3dc   :  { %2863 = vrcp.f32 %v1033_v47  ;;  %v1035_v54 = vadd.f32 1.0, %v2862_v53 }
 0x3dd   :  { %2865 = vrcp.f32 %v1034_v50 }
 0x3de   :  { %2867 = vrcp.f32 %v1035_v54 }
 0x3df   :  { %2869 = vrcp.f32 %v1036_v55 }
 0x3e0   :  { %2871 = vtanh.f32 %v2776_v32  ;;  %v1191_v32 = vld [vmem:[%s3172_s14 + $0x28] sm:$0xff] }
 0x3e1   :  { %2873 = vtanh.f32 %v2774_v28  ;;  %v1190_v28 = vld [vmem:[%s3172_s14 + $0x20] sm:$0xff] }
 0x3e2   :  { %2875 = vtanh.f32 %v2780_v42  ;;  %v2725_v33 = vpack.c.bf16 %v1191_v32, %v1190_v28  ;;  %v2212_v42 = vld [vmem:[%s2161_s22] ss:$0 sm:$0xff]  ;;  %s2934_s22 = smov 26  }
 0x3e3   :  { %2877 = vtanh.f32 %v2778_v37  ;;  %v2207_v37 = vld [vmem:[%s2159_s18] ss:$0 sm:$0xff]  ;;  %s2933_s18 = smov 27   ;;  %s2169_s24 = sld [smem:[%s3313_s0 + %s2934_s22]]  }
 0x3e4   :  { %v1204_v32 = vld [vmem:[%s3249_s30] sm:$0xff]  ;;  %s3278_s21 = sld [smem:[%s3313_s0 + %s2933_s18]]  }
 0x3e6   :  { %v2864_v56 = vpop.eup %2863 }
 0x3e7   :  { %1049 = vrot.lane.b32.xlu0 %v2864_v56, %s2922_s6  ;;  %v2866_v57 = vpop.eup %2865 }
 0x3e8   :  { %v2868_v58 = vpop.eup %2867 }
 0x3e9   :  { %1053 = vrot.lane.b32.xlu1 %v2868_v58, %s2922_s6  ;;  %v2870_v59 = vpop.eup %2869 }
 0x3ea   :  { %v2872_v60 = vpop.eup %2871 }
 0x3eb   :  { %1051 = vrot.lane.b32.xlu0 %v2866_v57, %s2922_s6  ;;  %v2874_v3 = vpop.eup %2873 }
 0x3ec   :  { %v2876_v8 = vpop.eup %2875 }
 0x3ed   :  { %1055 = vrot.lane.b32.xlu1 %v2870_v59, %s2922_s6  ;;  %v2878_v17 = vpop.eup %2877 }
 0x459   :  { %v1050_v61 = vpop.permute.xlu0 %1049 }
 0x45a   :  { %v1061_v62 = vmul.f32 %v2872_v60, %v1050_v61  ;;  %v1193_v60 = vld [vmem:[%s3172_s14 + $0x38] sm:$0xff] }
 0x45b   :  { %v1054_v4 = vpop.permute.xlu1 %1053 }
 0x45c   :  { %2516 = vmatprep.mubr.msk.f32.mxu0 %vm253_vm0, %v1061_v62  ;;  %v1063_v16 = vmul.f32 %v2876_v8, %v1054_v4  ;;  %v2733_v4 = vpack.c.bf16 %v1195_v2, %v1194_v63  ;;  %v1197_v8 = vld [vmem:[%s3172_s14 + $0x58] sm:$0xff] }
 0x45d   :  { %v1052_v6 = vpop.permute.xlu0 %1051 }
 0x45e   :  { %v1062_v9 = vmul.f32 %v2874_v3, %v1052_v6 }
 0x45f   :  { %v1056_v18 = vpop.permute.xlu1 %1055 }
 0x460   :  { %2517 = vmatmul.mubr.msk.f32.vlgmr.msra.gmra.mrb[6].mxu0 %vm253_vm0, %v1062_v9  ;;  %v1064_v20 = vmul.f32 %v2878_v17, %v1056_v18  ;;  %v1200_v17 = vld [vmem:[%s2164_s26 + $0x8] sm:$0xff] }
 0x461   :  { %2713 = vmatpush3.bf16.msra.mxu0 %v2712_v7  ;;  %2519 = vmatprep.mubr.msk.f32.mxu0 %vm253_vm0, %v1063_v16  ;;  %v1196_v7 = vld [vmem:[%s3172_s14 + $0x50] sm:$0xff]  ;;  %v1199_v16 = vld [vmem:[%s2164_s26] sm:$0xff] }
 0x462   :  { %2714 = vmatprep.subr.bf16.mxu0 %v2903_v0  ;;  %v1186_v0 = vld [vmem:[%s3172_s14] sm:$0xff]  ;;  %v2737_v11 = vpack.c.bf16 %v1197_v8, %v1196_v7 }
 0x464   :  { %2520 = vmatmul.mubr.msk.f32.gmra.mrb[8].mxu0 %vm253_vm0, %v1064_v20 }
 0x465   :  { %2716 = vmatpush3.bf16.msra.mxu0 %v2715_v19  ;;  %2530 = vmatprep.mubr.msk.f32.mxu0 %vm2905_vm1, %v2906_v1  ;;  %v2741_v19 = vpack.c.bf16 %v1200_v17, %v1199_v16  ;;  %v1909_v16 = vld [vmem:[%s2168_s13 + $0x8] sm:$0xff]  ;;  %v1910_v17 = vld [vmem:[%s2168_s13 + $0x10] sm:$0xff] }
 0x468   :  { %2531 = vmatmul.mubr.msk.f32.vlgmr.msra.gmra.mrb[10].mxu0 %vm253_vm0, %v3037_v5  ;;  %v2717_v5 = vpack.c.bf16 %v1187_v22, %v1186_v0  ;;  %v1201_v0 = vld [vmem:[%s2164_s26 + $0x10] sm:$0xff]  ;;  %v1202_v22 = vld [vmem:[%s2164_s26 + $0x18] sm:$0xff] }
 0x469   :  { %v2745_v23 = vpack.c.bf16 %v1202_v22, %v1201_v0 }
 0x46a   :  { %2718 = vmatprep.subr.bf16.mxu1 %v2717_v5 }
 0x46b   :  { %2720 = vmatpush3.bf16.msra.mxu1 %v2717_v5 }
 0x46c   :  { %2722 = vmatprep.subr.bf16.mxu1 %v2721_v25 }
 0x46f   :  { %2724 = vmatpush3.bf16.msra.mxu1 %v2721_v25 }
 0x470   :  { %2726 = vmatprep.subr.bf16.mxu1 %v2725_v33 }
 0x533   :  { %v2518_v1 = vpop.f32.mrb[6].mxu0 }
 0x534   :  { %v1149_v36 = vpop.f32.mrb[7].mxu0  ;;  %v3188_v43 = vadd.f32 %v2518_v1, %v2207_v37 }
 0x535   :  { %v3190_v44 = vadd.f32 %v2207_v37, %v1149_v36 }
 0x536   :  { %v1169_v50 = vadd.f32 %v3188_v43, %v239_v34 }
 0x537   :  { %v2521_v40 = vpop.f32.mrb[8].mxu0  ;;  %v1168_v51 = vadd.f32 %v3190_v44, %v238_v35 }
 0x538   :  { %v1159_v41 = vpop.f32.mrb[9].mxu0  ;;  %v3192_v45 = vadd.f32 %v2521_v40, %v2207_v37  ;;  %v1174_v26 = vmul.f32 0.70710677, %v1169_v50 }
 0x539   :  { %v3194_v47 = vadd.f32 %v2207_v37, %v1159_v41  ;;  %v1173_v34 = vmul.f32 0.70710677, %v1168_v51 }
 0x53a   :  { %v1171_v53 = vadd.f32 %v3192_v45, %v241_v38 }
 0x53b   :  { %v1281_v46 = vpop.f32.mrb[10].mxu0  ;;  %v1170_v54 = vadd.f32 %v3194_v47, %v240_v39 }
 0x53c   :  { %v1282_v48 = vadd.f32 %v2212_v42, %v1281_v46  ;;  %v2532_v49 = vpop.f32.mrb[11].mxu0  ;;  %v1176_v57 = vmul.f32 0.70710677, %v1171_v53 }
 0x53d   :  { %v1175_v58 = vmul.f32 0.70710677, %v1170_v54 }
 0x53e   :  { %v1292_v52 = vrot.slane %v1282_v48, %v3060_v21 }
 0x540   :  { %v1293_v55 = vcombine.high %v1292_v52, %v1292_v52  ;;  %v1300_v56 = vrot.slane %v1292_v52, %v3060_v21 }
 0x542   :  { %v1307_v27 = vrot.slane %v1293_v55, %v3060_v21  ;;  %v1311_v35 = vrot.slane %v1300_v56, %v3069_v29  ;;  %v1192_v21 = vld [vmem:[%s3172_s14 + $0x30] sm:$0xff]  ;;  %s2932_s14 = smov 24  }
 0x543   :  { %s2167_s17 = sld [smem:[%s3313_s0 + %s2932_s14]]  }
 0x544   :  { %v1315_v30 = vrot.slane %v1307_v27, %v3069_v29  ;;  %v1318_v31 = vadd.f32 %v1311_v35, %v1173_v34  ;;  %v1319_v38 = vadd.f32 %v1311_v35, %v1174_v26  ;;  %v2729_v29 = vpack.c.bf16 %v1193_v60, %v1192_v21  ;;  %v1206_v34 = vld [vmem:[%s3249_s30 + $0x10] sm:$0xff]  ;;  %v1207_v27 = vld [vmem:[%s3249_s30 + $0x18] sm:$0xff] }
 0x546   :  { %v1320_v39 = vadd.f32 %v1315_v30, %v1175_v58  ;;  %v1321_v59 = vadd.f32 %v1315_v30, %v1176_v57  ;;  %1329 = vst.msk [vmem:[#allocation3 + $0x2] sm:$0xff] %vm253_vm0, %v1318_v31  ;;  %1330 = vst.msk [vmem:[#allocation3 + $0xa] sm:$0xff] %vm253_vm0, %v1319_v38  ;;  %v2753_v57 = vpack.c.bf16 %v1207_v27, %v1206_v34 }
 0x548   :  { %1331 = vst.msk [vmem:[#allocation3 + $0x1a] sm:$0xff] %vm253_vm0, %v1320_v39  ;;  %1332 = vst.msk [vmem:[#allocation3 + $0x22] sm:$0xff] %vm253_vm0, %v1321_v59 }
 0x549   :  { %v2236_v0 = vld [vmem:[%s2167_s17] ss:$0 sm:$0xff] }
 0x54d   :  { %v1333_v61 = vld [vmem:[#allocation3] sm:$0xff]  ;;  %v1334_v62 = vld [vmem:[#allocation3 + $0x8] sm:$0xff] }
 0x54e   :  { %2541 = vmatprep.mubr.msk.f32.mxu1 %vm253_vm0, %v1333_v61  ;;  %v1444_v9 = vld [vmem:[#allocation3 + $0x2] sm:$0xff]  ;;  %v1445_v15 = vld [vmem:[#allocation3 + $0xa] sm:$0xff] }
 0x54f   :  { %2542 = vmatmul.mubr.msk.f32.vlgmr.msra.gmra.mrb[8].mxu1 %vm253_vm0, %v1334_v62  ;;  %v1335_v3 = vld [vmem:[#allocation3 + $0x18] sm:$0xff]  ;;  %v1336_v6 = vld [vmem:[#allocation3 + $0x20] sm:$0xff]  ;;  %v1550_v24 = vld [vmem:[#allocation3 + $0xc] sm:$0xff] }
 0x550   :  { %2728 = vmatpush3.bf16.msra.mxu1 %v2725_v33  ;;  %2544 = vmatprep.mubr.msk.f32.mxu1 %vm253_vm0, %v1335_v3  ;;  %v1446_v18 = vld [vmem:[#allocation3 + $0x1a] sm:$0xff]  ;;  %v1447_v20 = vld [vmem:[#allocation3 + $0x22] sm:$0xff] }
 0x551   :  { %2730 = vmatprep.subr.bf16.mxu1 %v2729_v29  ;;  %v1549_v5 = vld [vmem:[#allocation3 + $0x4] sm:$0xff]  ;;  %v1551_v25 = vld [vmem:[#allocation3 + $0x1c] sm:$0xff] }
 0x552   :  { %v1552_v28 = vld [vmem:[#allocation3 + $0x24] sm:$0xff]  ;;  %v1205_v33 = vld [vmem:[%s3249_s30 + $0x8] sm:$0xff] }
 0x553   :  { %2545 = vmatmul.mubr.msk.f32.gmra.mrb[10].mxu1 %vm253_vm0, %v1336_v6 }
 0x554   :  { %2732 = vmatpush3.bf16.msra.mxu1 %v2729_v29  ;;  %2555 = vmatprep.mubr.msk.f32.mxu1 %vm253_vm0, %v1444_v9 }
 0x555   :  { %2734 = vmatprep.subr.bf16.mxu1 %v2733_v4 }
 0x557   :  { %2556 = vmatmul.mubr.msk.f32.vlgmr.msra.gmra.mrb[8].mxu1 %vm253_vm0, %v1445_v15  ;;  %v1908_v15 = vld [vmem:[%s2168_s13] sm:$0xff] }
 0x558   :  { %2736 = vmatpush3.bf16.msra.mxu1 %v2733_v4  ;;  %2558 = vmatprep.mubr.msk.f32.mxu1 %vm253_vm0, %v1446_v18  ;;  %v2757_v18 = vpack.c.bf16 %v1909_v16, %v1908_v15 }
 0x559   :  { %2738 = vmatprep.subr.bf16.mxu1 %v2737_v11 }
 0x55b   :  { %2559 = vmatmul.mubr.msk.f32.gmra.mrb[10].mxu1 %vm253_vm0, %v1447_v20 }
 0x55c   :  { %2740 = vmatpush3.bf16.msra.mxu1 %v2737_v11  ;;  %2569 = vmatprep.mubr.msk.f32.mxu1 %vm253_vm0, %v1549_v5 }
 0x55d   :  { %2742 = vmatprep.subr.bf16.mxu1 %v2741_v19 }
 0x55f   :  { %2570 = vmatmul.mubr.msk.f32.vlgmr.msra.gmra.mrb[8].mxu1 %vm253_vm0, %v1550_v24 }
 0x560   :  { %2744 = vmatpush3.bf16.msra.mxu1 %v2741_v19  ;;  %2572 = vmatprep.mubr.msk.f32.mxu1 %vm253_vm0, %v1551_v25  ;;  %v1911_v19 = vld [vmem:[%s2168_s13 + $0x18] sm:$0xff] }
 0x561   :  { %2746 = vmatprep.subr.bf16.mxu1 %v2745_v23  ;;  %v2761_v20 = vpack.c.bf16 %v1911_v19, %v1910_v17 }
 0x563   :  { %2573 = vmatmul.mubr.msk.f32.gmra.mrb[10].mxu1 %vm253_vm0, %v1552_v28 }
 0x564   :  { %2748 = vmatpush3.bf16.msra.mxu1 %v2745_v23  ;;  %2583 = vmatprep.mubr.msk.f32.mxu1 %vm253_vm0, %v3120_v10  ;;  %v2749_v10 = vpack.c.bf16 %v1205_v33, %v1204_v32 }
 0x566   :  { %2750 = vmatprep.subr.bf16.mxu0 %v2749_v10 }
 0x567   :  { %2584 = vmatmul.mubr.msk.f32.vlgmr.msra.gmra.mrb[8].mxu1 %vm253_vm0, %v3125_v12  ;;  %2752 = vmatpush3.bf16.msra.mxu0 %v2749_v10  ;;  %v2218_v12 = vld [vmem:[%s2163_s4] ss:$0 sm:$0xff] }
 0x568   :  { %2586 = vmatprep.mubr.msk.f32.mxu1 %vm253_vm0, %v3127_v13  ;;  %v2227_v13 = vld [vmem:[%s2165_s9] ss:$0 sm:$0xff]  ;;  %2754 = vmatprep.subr.bf16.mxu0 %v2753_v57 }
 0x569   :  { %v2787_v37 = vadd.f32 %v2227_v13, %v2218_v12 }
 0x56b   :  { %2587 = vmatmul.mubr.msk.f32.gmra.mrb[10].mxu1 %vm253_vm0, %v3133_v14  ;;  %2756 = vmatpush3.bf16.msra.mxu0 %v2753_v57 }
 0x56c   :  { %2758 = vmatprep.subr.bf16.mxu0 %v2757_v18 }
 0x63a   :  { %v2585_v14 = vpop.f32.mrb[8].mxu1 }
 0x63b   :  { %v2781_v1 = vadd.f32 %v2585_v14, %v2218_v12  ;;  %v1726_v36 = vpop.f32.mrb[9].mxu1 }
 0x63c   :  { %v2783_v40 = vadd.f32 %v2218_v12, %v1726_v36  ;;  %v2028_v36 = vld [vmem:[%s3278_s21] sm:$0xff] }
 0x63d   :  { %v2782_v41 = vadd.f32 %v2781_v1, %v2227_v13 }
 0x63e   :  { %v2784_v42 = vadd.f32 %v2783_v40, %v2227_v13  ;;  %v2588_v46 = vpop.f32.mrb[10].mxu1 }
 0x63f   :  { %v2233_v48 = vmul.f32 -1.442695, %v2782_v41  ;;  %v2786_v49 = vadd.f32 %v2787_v37, %v2588_v46  ;;  %v1736_v50 = vpop.f32.mrb[11].mxu1 }
 0x640   :  { %v2232_v51 = vmul.f32 -1.442695, %v2784_v42  ;;  %v2788_v52 = vadd.f32 %v2787_v37, %v1736_v50  ;;  %v2029_v37 = vld [vmem:[%s3278_s21 + $0x8] sm:$0xff] }
 0x641   :  { %2879 = vpow2.f32 %v2233_v48  ;;  %v2235_v53 = vmul.f32 -1.442695, %v2786_v49  ;;  %v2030_v48 = vld [vmem:[%s3278_s21 + $0x10] sm:$0xff] }
 0x642   :  { %2881 = vpow2.f32 %v2232_v51  ;;  %v2234_v54 = vmul.f32 -1.442695, %v2788_v52  ;;  %v2241_v51 = vld [vmem:[%s2169_s24] ss:$0 sm:$0xff] }
 0x643   :  { %2883 = vpow2.f32 %v2235_v53 }
 0x644   :  { %2885 = vpow2.f32 %v2234_v54 }
 0x64b   :  { %v2880_v55 = vpop.eup %2879 }
 0x64c   :  { %v2882_v56 = vpop.eup %2881  ;;  %v1766_v26 = vadd.f32 1.0, %v2880_v55 }
 0x64d   :  { %v1765_v35 = vadd.f32 1.0, %v2882_v56  ;;  %v2884_v58 = vpop.eup %2883 }
 0x64e   :  { %2887 = vrcp.f32 %v1766_v26  ;;  %v1768_v30 = vadd.f32 1.0, %v2884_v58  ;;  %v2886_v31 = vpop.eup %2885 }
 0x64f   :  { %2889 = vrcp.f32 %v1765_v35  ;;  %v1767_v38 = vadd.f32 1.0, %v2886_v31  ;;  %v2246_v31 = vld [vmem:[%s2171_s28] ss:$0 sm:$0xff] }
 0x650   :  { %2891 = vrcp.f32 %v1768_v30 }
 0x651   :  { %2893 = vrcp.f32 %v1767_v38 }
 0x652   :  { %2895 = vtanh.f32 %v2784_v42 }
 0x653   :  { %2897 = vtanh.f32 %v2782_v41 }
 0x654   :  { %2899 = vtanh.f32 %v2788_v52 }
 0x655   :  { %2901 = vtanh.f32 %v2786_v49  ;;  %v2031_v49 = vld [vmem:[%s3278_s21 + $0x18] sm:$0xff] }
 0x656   :  { %v2769_v50 = vpack.c.bf16 %v2031_v49, %v2030_v48 }
 0x658   :  { %v2888_v39 = vpop.eup %2887 }
 0x659   :  { %v2890_v59 = vpop.eup %2889  ;;  %1783 = vrot.lane.b32.xlu1 %v2888_v39, %s2922_s6 }
 0x65a   :  { %1781 = vrot.lane.b32.xlu0 %v2890_v59, %s2922_s6  ;;  %v2892_v21 = vpop.eup %2891 }
 0x65b   :  { %v2894_v60 = vpop.eup %2893 }
 0x65c   :  { %v2896_v62 = vpop.eup %2895 }
 0x65d   :  { %1787 = vrot.lane.b32.xlu1 %v2892_v21, %s2922_s6  ;;  %v2898_v63 = vpop.eup %2897 }
 0x65e   :  { %1785 = vrot.lane.b32.xlu0 %v2894_v60, %s2922_s6  ;;  %v2900_v6 = vpop.eup %2899 }
 0x65f   :  { %v2902_v8 = vpop.eup %2901 }
 0x6cb   :  { %v1784_v61 = vpop.permute.xlu1 %1783 }
 0x6cc   :  { %v1782_v29 = vpop.permute.xlu0 %1781  ;;  %v1794_v3 = vmul.f32 %v2898_v63, %v1784_v61 }
 0x6cd   :  { %v1793_v2 = vmul.f32 %v2896_v62, %v1782_v29 }
 0x6cf   :  { %2597 = vmatprep.mubr.msk.f32.mxu0 %vm253_vm0, %v1793_v2  ;;  %v1788_v4 = vpop.permute.xlu1 %1787 }
 0x6d0   :  { %2598 = vmatmul.mubr.msk.f32.vlgmr.msra.gmra.mrb[12].mxu0 %vm253_vm0, %v1794_v3  ;;  %v1786_v7 = vpop.permute.xlu0 %1785  ;;  %v1796_v11 = vmul.f32 %v2902_v8, %v1788_v4 }
 0x6d1   :  { %v1795_v9 = vmul.f32 %v2900_v6, %v1786_v7  ;;  %2760 = vmatpush3.bf16.msra.mxu0 %v2757_v18 }
 0x6d2   :  { %2762 = vmatprep.subr.bf16.mxu0 %v2761_v20 }
 0x6d3   :  { %2600 = vmatprep.mubr.msk.f32.mxu0 %vm253_vm0, %v1795_v9 }
 0x6d4   :  { %2601 = vmatmul.mubr.msk.f32.gmra.mrb[14].mxu0 %vm253_vm0, %v1796_v11 }
 0x6d5   :  { %2764 = vmatpush3.bf16.msra.mxu0 %v2761_v20 }
 0x7a3   :  { %v2599_v22 = vpop.f32.mrb[12].mxu0 }
 0x7a4   :  { %v1887_v5 = vadd.f32 %v2599_v22, %v2236_v0  ;;  %v1881_v23 = vpop.f32.mrb[13].mxu0 }
 0x7a5   :  { %v1882_v24 = vadd.f32 %v2236_v0, %v1881_v23 }
 0x7a6   :  { %v1901_v25 = vadd.f32 %v1887_v5, %v3188_v43  ;;  %v2765_v43 = vpack.c.bf16 %v2029_v37, %v2028_v36 }
 0x7a7   :  { %v1900_v28 = vadd.f32 %v1882_v24, %v3190_v44  ;;  %v2602_v32 = vpop.f32.mrb[14].mxu0 }
 0x7a8   :  { %v1905_v33 = vmul.f32 0.70710677, %v1901_v25  ;;  %v1897_v10 = vadd.f32 %v2602_v32, %v2236_v0  ;;  %v1891_v12 = vpop.f32.mrb[15].mxu0  ;;  %2766 = vmatprep.subr.bf16.mxu0 %v2765_v43 }
 0x7a9   :  { %v1904_v13 = vmul.f32 0.70710677, %v1900_v28  ;;  %v1892_v14 = vadd.f32 %v2236_v0, %v1891_v12 }
 0x7aa   :  { %v1903_v1 = vadd.f32 %v1897_v10, %v3192_v45  ;;  %1925 = vrot.lane.b32.xlu1 %v1905_v33, %s2922_s6 }
 0x7ab   :  { %v1902_v40 = vadd.f32 %v1892_v14, %v3194_v47  ;;  %1923 = vrot.lane.b32.xlu0 %v1904_v13, %s2922_s6 }
 0x7ac   :  { %v1907_v44 = vmul.f32 0.70710677, %v1903_v1 }
 0x7ad   :  { %v1906_v41 = vmul.f32 0.70710677, %v1902_v40 }
 0x7ae   :  { %1929 = vrot.lane.b32.xlu1 %v1907_v44, %s2922_s6 }
 0x7af   :  { %1927 = vrot.lane.b32.xlu0 %v1906_v41, %s2922_s6 }
 0x81c   :  { %v1926_v42 = vpop.permute.xlu1 %1925 }
 0x81d   :  { %v1924_v45 = vpop.permute.xlu0 %1923 }
 0x81e   :  { %2611 = vmatprep.mubr.msk.f32.mxu0 %vm253_vm0, %v1924_v45 }
 0x81f   :  { %2612 = vmatmul.mubr.msk.f32.vlgmr.msra.gmra.mrb[16].mxu0 %vm253_vm0, %v1926_v42 }
 0x820   :  { %2768 = vmatpush3.bf16.msra.mxu0 %v2765_v43  ;;  %v1930_v46 = vpop.permute.xlu1 %1929 }
 0x821   :  { %v1928_v47 = vpop.permute.xlu0 %1927  ;;  %2770 = vmatprep.subr.bf16.mxu0 %v2769_v50 }
 0x822   :  { %2614 = vmatprep.mubr.msk.f32.mxu0 %vm253_vm0, %v1928_v47 }
 0x823   :  { %2615 = vmatmul.mubr.msk.f32.gmra.mrb[18].mxu0 %vm253_vm0, %v1930_v46 }
 0x824   :  { %2772 = vmatpush3.bf16.msra.mxu0 %v2769_v50 }
 0x8f2   :  { %v2613_v52 = vpop.f32.mrb[16].mxu0 }
 0x8f3   :  { %v2011_v53 = vadd.f32 %v2613_v52, %v2241_v51  ;;  %v2005_v54 = vpop.f32.mrb[17].mxu0 }
 0x8f4   :  { %v2006_v55 = vadd.f32 %v2241_v51, %v2005_v54 }
 0x8f5   :  { %v2025_v34 = vmax.f32 %v2011_v53, 0.0 }
 0x8f6   :  { %v2024_v56 = vmax.f32 %v2006_v55, 0.0  ;;  %v2616_v26 = vpop.f32.mrb[18].mxu0 }
 0x8f7   :  { %v2021_v27 = vadd.f32 %v2616_v26, %v2241_v51  ;;  %v2015_v35 = vpop.f32.mrb[19].mxu0 }
 0x8f8   :  { %v2016_v57 = vadd.f32 %v2241_v51, %v2015_v35  ;;  %2625 = vmatprep.mubr.msk.f32.mxu0 %vm253_vm0, %v2024_v56 }
 0x8f9   :  { %2626 = vmatmul.mubr.msk.f32.vlgmr.msra.gmra.mrb[20].mxu0 %vm253_vm0, %v2025_v34  ;;  %v2027_v30 = vmax.f32 %v2021_v27, 0.0 }
 0x8fa   :  { %v2026_v58 = vmax.f32 %v2016_v57, 0.0 }
 0x8fc   :  { %2628 = vmatprep.mubr.msk.f32.mxu0 %vm253_vm0, %v2026_v58 }
 0x8fd   :  { %2629 = vmatmul.mubr.msk.f32.gmra.mrb[22].mxu0 %vm253_vm0, %v2027_v30 }
 0x9cc   :  { %v2627_v38 = vpop.f32.mrb[20].mxu0 }
 0x9cd   :  { %v2123_v39 = vadd.f32 %v2627_v38, %v2246_v31  ;;  %v2117_v59 = vpop.f32.mrb[21].mxu0 }
 0x9ce   :  { %v2118_v21 = vadd.f32 %v2246_v31, %v2117_v59 }
 0x9cf   :  { %2137 = vst.msk [vmem:[%s2172_s2 + $0x8] sm:$0xff] %vm140_vm2, %v2123_v39 }
 0x9d0   :  { %2136 = vst.msk [vmem:[%s2172_s2] sm:$0xff] %vm140_vm2, %v2118_v21  ;;  %v2630_v60 = vpop.f32.mrb[22].mxu0 }
 0x9d1   :  { %v2133_v61 = vadd.f32 %v2630_v60, %v2246_v31  ;;  %v2127_v62 = vpop.f32.mrb[23].mxu0 }
 0x9d2   :  { %v2128_v29 = vadd.f32 %v2246_v31, %v2127_v62 }
 0x9d3   :  { %2139 = vst.msk [vmem:[%s2172_s2 + $0x18] sm:$0xff] %vm140_vm2, %v2133_v61 }
 0x9d4   :  { %2138 = vst.msk [vmem:[%s2172_s2 + $0x10] sm:$0xff] %vm140_vm2, %v2128_v29 }

</bundles_post_ra>
